<compile_context>
chip_gen: v5e
topology: v5e:2x2
jax: 0.10.0
libtpu: 0.0.40
codegen_flags: <defaults>
</compile_context>

<pallas_src>
import jax
import jax.numpy as jnp
from jax.experimental import pallas as pl
from jax.experimental.pallas import tpu as pltpu


# ----------------------------- Pallas kernel ------------------------------ #
def _code2seq_attn_kernel(
    ft_ref,      # (R, 2E)     bf16  concat([from_sum, to_sum]) (R = TB*P)
    nodes_ref,   # (L, R, E)   bf16  path-node embeddings, time-major
    mask_ref,    # (TB, P)     f32   1.0 for real paths, 0.0 for padding
    wih_ref,     # (E, 4H)     bf16  LSTM input weights (x @ W layout, [i,f,o|g])
    whh_ref,     # (H, 4H)     bf16  LSTM hidden weights ([i,f,o|g])
    blstm_ref,   # (1, 4H)     f32   b_ih + b_hh ([i,f,o|g])
    wft_ref,     # (2E, C)     bf16  encoder projection, stacked [from; to] slice
    wpath_ref,   # (H, C)      bf16  encoder projection, "path" slice
    attn_ref,    # (1, C)      f32   attention scoring vector (row layout)
    wh_ref,      # (C, Hc)     bf16  classifier hidden weights
    bh_ref,      # (1, Hc)     f32
    wo_ref,      # (Hc, n_cls) bf16  classifier output weights
    bo_ref,      # (1, n_cls)  f32
    out_ref,     # (TB, n_cls) f32   logits for TB samples
    xw_ref,      # (L, R, 4H)  bf16  VMEM scratch: hoisted input projection + bias
):
    L, R, E = nodes_ref.shape
    H = whh_ref.shape[0]
    TB, P = mask_ref.shape
    C = wft_ref.shape[1]

    whh = whh_ref[...]

    # ---- Hoisted input projection + bias: one [L*R, E] @ [E, 4H] matmul ----- #
    nodes_flat = nodes_ref[...].reshape(L * R, E)
    xw = jnp.dot(nodes_flat, wih_ref[...], preferred_element_type=jnp.float32)
    xw_ref[...] = (xw + blstm_ref[...]).reshape(L, R, 4 * H).astype(xw_ref.dtype)

    # ---- LSTM recurrence (gate layout permuted to [i, f, o | g]) ------------ #
    def lstm_step(t, carry):
        h, c = carry
        gates = (
            xw_ref[t].astype(jnp.float32)                        # [R, 4H]
            + jnp.dot(h.astype(whh.dtype), whh,
                      preferred_element_type=jnp.float32)
        )
        sig = jax.nn.sigmoid(gates[:, : 3 * H])   # i, f, o (one 3H-wide EUP pass)
        g_g = jnp.tanh(gates[:, 3 * H:])          # g       (one H-wide  EUP pass)
        i_g = sig[:, 0:H]
        f_g = sig[:, H:2 * H]
        o_g = sig[:, 2 * H:3 * H]
        c_new = f_g * c + i_g * g_g
        h_new = o_g * jnp.tanh(c_new)
        return h_new, c_new

    h0 = jnp.zeros((R, H), jnp.float32)
    c0 = jnp.zeros((R, H), jnp.float32)
    h, _ = jax.lax.fori_loop(0, L, lstm_step, (h0, c0), unroll=True)

    # ---- Encoder projection (merged from|to matmul + path matmul) ----------- #
    enc = jnp.tanh(
        jnp.dot(ft_ref[...], wft_ref[...],
                preferred_element_type=jnp.float32)
        + jnp.dot(h.astype(wpath_ref.dtype), wpath_ref[...],
                  preferred_element_type=jnp.float32)
    )                                                            # [R, C] f32

    # ---- Attention over each sample's paths (masked == segment softmax) ---- #
    enc3 = enc.reshape(TB, P, C)
    mask = mask_ref[...]                                         # [TB, P]
    scores = jnp.sum(enc3 * attn_ref[...], axis=-1)              # VPU mul + lane reduce
    scores = jnp.where(mask > 0.0, scores, -1e30)
    scores = scores - jnp.max(scores, axis=1, keepdims=True)
    w = jnp.exp(scores) * mask
    denom = jnp.sum(w, axis=1, keepdims=True)
    w = w / jnp.maximum(denom, 1e-9)           # guard: zero-path segments -> ctx = 0
    ctx = jnp.sum(enc3 * w[:, :, None], axis=1)                  # [TB, C]

    # ---- Classifier MLP (bf16 operands, f32 accumulation) ------------------- #
    hid = jnp.maximum(
        jnp.dot(ctx.astype(wh_ref.dtype), wh_ref[...],
                preferred_element_type=jnp.float32)
        + bh_ref[...],
        0.0,
    )                                                            # [TB, Hc]
    logits = (
        jnp.dot(hid.astype(wo_ref.dtype), wo_ref[...],
                preferred_element_type=jnp.float32)
        + bo_ref[...]
    )                                                            # [TB, n_cls]
    out_ref[...] = logits.astype(out_ref.dtype)


# ------------------------------ Wrapper ------------------------------------ #
def _chip_config():
    """(num_tensorcores, vmem_limit_bytes) by TPU generation.

    v5e/v6e : 1 TC/chip, 128 MiB physical VMEM -> run the whole batch in one
              grid step and give the compiler a generous scoped-VMEM limit.
    v7x     : 2 TCs/chip but only 64 MiB VMEM per TC -> keep a >=2-way batch
              split ("parallel" megacore sharding) and a conservative limit.
    unknown : conservative (1 TC, 48 MiB)."""
    kind = ""
    try:
        kind = jax.devices()[0].device_kind.lower()
    except Exception:
        pass
    if "v7" in kind or "7x" in kind:
        return 2, 48 * 1024 * 1024
    if "v5" in kind or "v6" in kind:
        return 1, 96 * 1024 * 1024
    return 1, 48 * 1024 * 1024


def _choose_tb(B, P, L, E, H, num_tc, vmem_budget):
    """Samples per grid step. Multiple of 8 (sublane-aligned [TB,*] blocks).
    Single-TC chips: as large as the VMEM budget allows (ideally one step).
    Multi-TC (v7x): additionally cap at ~B/num_tc so each core gets a step."""
    cdiv = lambda a, b: -(-a // b)
    bp8 = cdiv(B, 8) * 8                       # minimal padded batch

    def footprint(tb):
        r = tb * P
        stream = r * 2 * E * 2                 # ft block (bf16)
        stream += L * r * E * 2                # nodes block (bf16)
        stream *= 2                            # double-buffered by BlockSpec
        scratch = L * r * 4 * H * 2            # bf16 xw scratch
        return stream + scratch

    tb = bp8
    while tb > 8 and footprint(tb) > (vmem_budget * 3) // 4:
        tb -= 8

    if num_tc > 1:                             # v7x: feed both TensorCores
        half = cdiv(cdiv(bp8, num_tc), 8) * 8
        tb = min(tb, max(half, 8))
    return max(tb, 8)


def code2seq_attn_forward(params, samples, paths_for_label):
    """Full forward. Embedding gathers / padding are JAX glue (fused by jit);
    LSTM, projection, attention and classifier run inside the Pallas kernel."""
    token_emb = params["token_emb"]
    node_emb = params["node_emb"]

    from_ids = samples["from_token"]      # [B, P, max_parts] int32
    to_ids = samples["to_token"]          # [B, P, max_parts] int32
    node_ids = samples["path_nodes"]      # [B, L, P]         int32

    B, P, _ = from_ids.shape
    L = node_ids.shape[1]
    E = token_emb.shape[1]
    H = params["w_hh"].shape[0]
    C = params["w_ft"].shape[1]
    Hc = params["w_h"].shape[1]
    n_cls = params["w_o"].shape[1]

    # Embedding sums over sub-tokens (padding rows of the tables are zero).
    from_sum = token_emb[from_ids].sum(axis=2)                        # [B,P,E]
    to_sum = token_emb[to_ids].sum(axis=2)                            # [B,P,E]
    ft = jnp.concatenate([from_sum, to_sum], axis=-1).astype(jnp.bfloat16)  # [B,P,2E]
    node_ids_tm = jnp.transpose(node_ids, (1, 0, 2))                  # [L,B,P]
    nodes_tm = node_emb[node_ids_tm].astype(jnp.bfloat16)             # [L,B,P,E]

    mask = (jnp.arange(P)[None, :] < paths_for_label[:, None]).astype(
        jnp.float32)                                                  # [B,P]

    # --- generation-aware batch tiling: TB samples per grid step -------------
    num_tc, vmem_limit = _chip_config()
    TB = _choose_tb(B, P, L, E, H, num_tc, vmem_limit)
    n_steps = -(-B // TB)
    Bp = n_steps * TB
    pad = Bp - B
    if pad:
        ft = jnp.pad(ft, ((0, pad), (0, 0), (0, 0)))
        nodes_tm = jnp.pad(nodes_tm, ((0, 0), (0, pad), (0, 0), (0, 0)))
        mask = jnp.pad(mask, ((0, pad), (0, 0)))   # padded samples: zero paths

    R = TB * P
    ft2d = ft.reshape(Bp * P, 2 * E)
    nodes3d = nodes_tm.reshape(L, Bp * P, E)

    kern = pl.pallas_call(
        _code2seq_attn_kernel,
        grid=(n_steps,),
        in_specs=[
            pl.BlockSpec((R, 2 * E), lambda b: (b, 0)),               # from|to
            pl.BlockSpec((L, R, E), lambda b: (0, b, 0)),             # nodes
            pl.BlockSpec((TB, P), lambda b: (b, 0)),                  # mask
            pl.BlockSpec((E, 4 * H), lambda b: (0, 0)),               # w_ih
            pl.BlockSpec((H, 4 * H), lambda b: (0, 0)),               # w_hh
            pl.BlockSpec((1, 4 * H), lambda b: (0, 0)),               # b_lstm
            pl.BlockSpec((2 * E, C), lambda b: (0, 0)),               # w_ft
            pl.BlockSpec((H, C), lambda b: (0, 0)),                   # w_path
            pl.BlockSpec((1, C), lambda b: (0, 0)),                   # attn
            pl.BlockSpec((C, Hc), lambda b: (0, 0)),                  # w_h
            pl.BlockSpec((1, Hc), lambda b: (0, 0)),                  # b_h
            pl.BlockSpec((Hc, n_cls), lambda b: (0, 0)),              # w_o
            pl.BlockSpec((1, n_cls), lambda b: (0, 0)),               # b_o
        ],
        out_specs=pl.BlockSpec((TB, n_cls), lambda b: (b, 0)),
        out_shape=jax.ShapeDtypeStruct((Bp, n_cls), jnp.float32),
        scratch_shapes=[pltpu.VMEM((L, R, 4 * H), jnp.bfloat16)],
        compiler_params=pltpu.CompilerParams(
            dimension_semantics=("parallel",),
            vmem_limit_bytes=vmem_limit,
        ),
    )

    out = kern(
        ft2d, nodes3d, mask,
        params["w_ih"], params["w_hh"], params["b_lstm"],
        params["w_ft"], params["w_path"], params["attn_row"],
        params["w_h"], params["b_h"], params["w_o"], params["b_o"],
    )
    return out[:B]                                                   # [B, n_cls]


# --------------------------- Parameter init -------------------------------- #
def _to_ifog(w4h):
    """Permute a [..., 4H] LSTM weight/bias from PyTorch gate order (i,f,g,o)
    to the kernel's (i,f,o,g) layout so sigmoid/tanh apply to contiguous lanes."""
    Hq = w4h.shape[-1] // 4
    return jnp.concatenate(
        [w4h[..., : 2 * Hq], w4h[..., 3 * Hq:], w4h[..., 2 * Hq: 3 * Hq]],
        axis=-1)


def init_params(key, *, n_tokens, n_nodes, E, H, C, Hc, n_cls,
                token_pad=0, node_pad=0):
    ks = jax.random.split(key, 12)
    s = 0.05
    bf16 = jnp.bfloat16

    token_emb = jax.random.normal(ks[0], (n_tokens, E), jnp.float32) * s
    token_emb = token_emb.at[token_pad].set(0.0)          # padding_idx
    node_emb = jax.random.normal(ks[1], (n_nodes, E), jnp.float32) * s
    node_emb = node_emb.at[node_pad].set(0.0)

    w_ih = jax.random.normal(ks[2], (4 * H, E), jnp.float32) * s     # torch layout
    w_hh = jax.random.normal(ks[3], (4 * H, H), jnp.float32) * s
    b_ih = jax.random.normal(ks[4], (4 * H,), jnp.float32) * s
    b_hh = jax.random.normal(ks[5], (4 * H,), jnp.float32) * s

    # Encoder Linear over concat([from, path_h, to]) -> split / regroup slices.
    w_lin = jax.random.normal(ks[6], (2 * E + H, C), jnp.float32) * s
    attn = jax.random.normal(ks[7], (C, 1), jnp.float32) * s
    w_h = jax.random.normal(ks[8], (C, Hc), jnp.float32) * s
    b_h = jax.random.normal(ks[9], (1, Hc), jnp.float32) * s
    w_o = jax.random.normal(ks[10], (Hc, n_cls), jnp.float32) * s
    b_o = jax.random.normal(ks[11], (1, n_cls), jnp.float32) * s

    w_ft = jnp.concatenate([w_lin[:E], w_lin[E + H:]], axis=0)       # [2E, C]

    return {
        "token_emb": token_emb,
        "node_emb": node_emb,
        "w_ih": _to_ifog(w_ih.T).astype(bf16),             # [E, 4H]  for x @ W
        "w_hh": _to_ifog(w_hh.T).astype(bf16),             # [H, 4H]
        "b_lstm": _to_ifog((b_ih + b_hh).reshape(1, 4 * H)),
        "w_ft": w_ft.astype(bf16),                         # [2E, C] (from|to)
        "w_path": w_lin[E:E + H].astype(bf16),             # [H, C]
        "attn_row": attn.T,                                # [1, C] (VPU scoring)
        "w_h": w_h.astype(bf16),
        "b_h": b_h,
        "w_o": w_o.astype(bf16),
        "b_o": b_o,
    }


# --------------------------------- main ------------------------------------ #
if __name__ == "__main__":
    B, P, L, MAX_PARTS = 16, 8, 8, 4
    E, H, C, Hc, N_CLS = 32, 32, 64, 64, 2
    N_TOKENS, N_NODES = 50, 30

    key = jax.random.PRNGKey(0)
    k_par, k_from, k_to, k_nodes, k_cnt = jax.random.split(key, 5)

    params = init_params(
        k_par, n_tokens=N_TOKENS, n_nodes=N_NODES,
        E=E, H=H, C=C, Hc=Hc, n_cls=N_CLS,
    )

    samples = {
        "from_token": jax.random.randint(k_from, (B, P, MAX_PARTS), 1, N_TOKENS),
        "to_token": jax.random.randint(k_to, (B, P, MAX_PARTS), 1, N_TOKENS),
        "path_nodes": jax.random.randint(k_nodes, (B, L, P), 1, N_NODES),
    }
    # Ragged segment sizes (1..P paths per label).
    paths_for_label = jax.random.randint(k_cnt, (B,), 1, P + 1).astype(jnp.int32)

    # jit so the embedding gathers / sums fuse into the same XLA program
    # as the pallas_call (avoids an extra HBM round-trip for glue ops).
    forward = jax.jit(code2seq_attn_forward)
    logits = forward(params, samples, paths_for_label)
    logits = jax.block_until_ready(logits)

    assert logits.shape == (B, N_CLS)
    assert bool(jnp.all(jnp.isfinite(logits)))
    print("KERNEL_OK")
</pallas_src>

<mosaic_0001>
module attributes {stable_mosaic.version = 11 : i64} {
  func.func @_code2seq_attn_kernel(%arg0: i32, %arg1: memref<128x64xbf16, #tpu.memory_space<vmem>>, %arg2: memref<8x128x32xbf16, #tpu.memory_space<vmem>>, %arg3: memref<16x8xf32, #tpu.memory_space<vmem>>, %arg4: memref<32x128xbf16, #tpu.memory_space<vmem>>, %arg5: memref<32x128xbf16, #tpu.memory_space<vmem>>, %arg6: memref<1x128xf32, #tpu.memory_space<vmem>>, %arg7: memref<64x64xbf16, #tpu.memory_space<vmem>>, %arg8: memref<32x64xbf16, #tpu.memory_space<vmem>>, %arg9: memref<1x64xf32, #tpu.memory_space<vmem>>, %arg10: memref<64x64xbf16, #tpu.memory_space<vmem>>, %arg11: memref<1x64xf32, #tpu.memory_space<vmem>>, %arg12: memref<64x2xbf16, #tpu.memory_space<vmem>>, %arg13: memref<1x2xf32, #tpu.memory_space<vmem>>, %arg14: memref<16x2xf32, #tpu.memory_space<vmem>>, %arg15: memref<8x128x128xbf16, #tpu.memory_space<vmem>>) attributes {dimension_semantics = [#tpu.dimension_semantics<parallel>], iteration_bounds = array<i64: 1>, scalar_prefetch = 0 : i64, scratch_operands = 1 : i64, tpu.core_type = #tpu.core_type<tc>, window_params = [{transform_indices = @transform_0, window_bounds = array<i64: 128, 64>}, {transform_indices = @transform_1, window_bounds = array<i64: 8, 128, 32>}, {transform_indices = @transform_2, window_bounds = array<i64: 16, 8>}, {pipeline_mode = #tpu.pipeline_mode<synchronous>, transform_indices = @transform_3, window_bounds = array<i64: 32, 128>}, {pipeline_mode = #tpu.pipeline_mode<synchronous>, transform_indices = @transform_4, window_bounds = array<i64: 32, 128>}, {pipeline_mode = #tpu.pipeline_mode<synchronous>, transform_indices = @transform_5, window_bounds = array<i64: 1, 128>}, {pipeline_mode = #tpu.pipeline_mode<synchronous>, transform_indices = @transform_6, window_bounds = array<i64: 64, 64>}, {pipeline_mode = #tpu.pipeline_mode<synchronous>, transform_indices = @transform_7, window_bounds = array<i64: 32, 64>}, {pipeline_mode = #tpu.pipeline_mode<synchronous>, transform_indices = @transform_8, window_bounds = array<i64: 1, 64>}, {pipeline_mode = #tpu.pipeline_mode<synchronous>, transform_indices = @transform_9, window_bounds = array<i64: 64, 64>}, {pipeline_mode = #tpu.pipeline_mode<synchronous>, transform_indices = @transform_10, window_bounds = array<i64: 1, 64>}, {pipeline_mode = #tpu.pipeline_mode<synchronous>, transform_indices = @transform_11, window_bounds = array<i64: 64, 2>}, {pipeline_mode = #tpu.pipeline_mode<synchronous>, transform_indices = @transform_12, window_bounds = array<i64: 1, 2>}, {transform_indices = @transform_13, window_bounds = array<i64: 16, 2>}]} {
    %c0 = arith.constant 0 : index
    %c0_0 = arith.constant 0 : index
    %0 = vector.load %arg5[%c0, %c0_0] : memref<32x128xbf16, #tpu.memory_space<vmem>>, vector<32x128xbf16>
    %c0_1 = arith.constant 0 : index
    %c0_2 = arith.constant 0 : index
    %c0_3 = arith.constant 0 : index
    %1 = vector.load %arg2[%c0_1, %c0_2, %c0_3] : memref<8x128x32xbf16, #tpu.memory_space<vmem>>, vector<8x128x32xbf16>
    %2 = vector.shape_cast %1 : vector<8x128x32xbf16> to vector<1024x32xbf16>
    %c0_4 = arith.constant 0 : index
    %c0_5 = arith.constant 0 : index
    %3 = vector.load %arg4[%c0_4, %c0_5] : memref<32x128xbf16, #tpu.memory_space<vmem>>, vector<32x128xbf16>
    %cst = arith.constant dense<0.000000e+00> : vector<1024x128xf32>
    %4 = tpu.matmul %2, %3, %cst {dimension_numbers = #tpu.dot_dimension_numbers<[1], [0], [0], [1], [0, 0, 1, 1], [], []>} : vector<1024x32xbf16>, vector<32x128xbf16>, vector<1024x128xf32> -> vector<1024x128xf32>
    %c0_6 = arith.constant 0 : index
    %c0_7 = arith.constant 0 : index
    %5 = vector.load %arg6[%c0_6, %c0_7] : memref<1x128xf32, #tpu.memory_space<vmem>>, vector<1x128xf32>
    %6 = vector.broadcast %5 : vector<1x128xf32> to vector<1024x128xf32>
    %7 = arith.addf %4, %6 : vector<1024x128xf32>
    %8 = vector.shape_cast %7 : vector<1024x128xf32> to vector<8x128x128xf32>
    %9 = arith.truncf %8 : vector<8x128x128xf32> to vector<8x128x128xbf16>
    %c0_8 = arith.constant 0 : index
    %c0_9 = arith.constant 0 : index
    %c0_10 = arith.constant 0 : index
    %10 = vector.load %arg15[%c0_8, %c0_9, %c0_10] : memref<8x128x128xbf16, #tpu.memory_space<vmem>>, vector<8x128x128xbf16>
    tpu.vector_store %arg15[%c0_8, %c0_9, %c0_10], %9 {strides = array<i32>} : memref<8x128x128xbf16, #tpu.memory_space<vmem>>, vector<8x128x128xbf16>,
    %cst_11 = arith.constant 0.000000e+00 : f32
    %11 = vector.broadcast %cst_11 : f32 to vector<128x32xf32>
    %cst_12 = arith.constant 0.000000e+00 : f32
    %12 = vector.broadcast %cst_12 : f32 to vector<128x32xf32>
    %c0_i32 = arith.constant 0 : i32
    %13 = arith.index_cast %c0_i32 : i32 to index
    %c0_13 = arith.constant 0 : index
    %c0_14 = arith.constant 0 : index
    %14 = vector.load %arg15[%13, %c0_13, %c0_14] : memref<8x128x128xbf16, #tpu.memory_space<vmem>>, vector<1x128x128xbf16>
    %15 = vector.shape_cast %14 : vector<1x128x128xbf16> to vector<128x128xbf16>
    %16 = arith.extf %15 : vector<128x128xbf16> to vector<128x128xf32>
    %17 = arith.truncf %11 : vector<128x32xf32> to vector<128x32xbf16>
    %cst_15 = arith.constant dense<0.000000e+00> : vector<128x128xf32>
    %18 = tpu.matmul %17, %0, %cst_15 {dimension_numbers = #tpu.dot_dimension_numbers<[1], [0], [0], [1], [0, 0, 1, 1], [], []>} : vector<128x32xbf16>, vector<32x128xbf16>, vector<128x128xf32> -> vector<128x128xf32>
    %19 = arith.addf %16, %18 : vector<128x128xf32>
    %20 = vector.extract_strided_slice %19 {offsets = [0, 0], sizes = [128, 96], strides = [1, 1]} : vector<128x128xf32> to vector<128x96xf32>
    %21 = arith.negf %20 : vector<128x96xf32>
    %22 = math.exp %21 : vector<128x96xf32>
    %cst_16 = arith.constant 1.000000e+00 : f32
    %23 = vector.broadcast %cst_16 : f32 to vector<128x96xf32>
    %24 = arith.addf %23, %22 : vector<128x96xf32>
    %25 = arith.divf %23, %24 : vector<128x96xf32>
    %26 = vector.extract_strided_slice %19 {offsets = [0, 96], sizes = [128, 32], strides = [1, 1]} : vector<128x128xf32> to vector<128x32xf32>
    %27 = math.tanh %26 : vector<128x32xf32>
    %28 = vector.extract_strided_slice %25 {offsets = [0, 0], sizes = [128, 32], strides = [1, 1]} : vector<128x96xf32> to vector<128x32xf32>
    %29 = vector.extract_strided_slice %25 {offsets = [0, 32], sizes = [128, 32], strides = [1, 1]} : vector<128x96xf32> to vector<128x32xf32>
    %30 = vector.extract_strided_slice %25 {offsets = [0, 64], sizes = [128, 32], strides = [1, 1]} : vector<128x96xf32> to vector<128x32xf32>
    %31 = arith.mulf %29, %12 : vector<128x32xf32>
    %32 = arith.mulf %28, %27 : vector<128x32xf32>
    %33 = arith.addf %31, %32 : vector<128x32xf32>
    %34 = math.tanh %33 : vector<128x32xf32>
    %35 = arith.mulf %30, %34 : vector<128x32xf32>
    %c1_i32 = arith.constant 1 : i32
    %36 = arith.index_cast %c1_i32 : i32 to index
    %c0_17 = arith.constant 0 : index
    %c0_18 = arith.constant 0 : index
    %37 = vector.load %arg15[%36, %c0_17, %c0_18] : memref<8x128x128xbf16, #tpu.memory_space<vmem>>, vector<1x128x128xbf16>
    %38 = vector.shape_cast %37 : vector<1x128x128xbf16> to vector<128x128xbf16>
    %39 = arith.extf %38 : vector<128x128xbf16> to vector<128x128xf32>
    %40 = arith.truncf %35 : vector<128x32xf32> to vector<128x32xbf16>
    %cst_19 = arith.constant dense<0.000000e+00> : vector<128x128xf32>
    %41 = tpu.matmul %40, %0, %cst_19 {dimension_numbers = #tpu.dot_dimension_numbers<[1], [0], [0], [1], [0, 0, 1, 1], [], []>} : vector<128x32xbf16>, vector<32x128xbf16>, vector<128x128xf32> -> vector<128x128xf32>
    %42 = arith.addf %39, %41 : vector<128x128xf32>
    %43 = vector.extract_strided_slice %42 {offsets = [0, 0], sizes = [128, 96], strides = [1, 1]} : vector<128x128xf32> to vector<128x96xf32>
    %44 = arith.negf %43 : vector<128x96xf32>
    %45 = math.exp %44 : vector<128x96xf32>
    %cst_20 = arith.constant 1.000000e+00 : f32
    %46 = vector.broadcast %cst_20 : f32 to vector<128x96xf32>
    %47 = arith.addf %46, %45 : vector<128x96xf32>
    %48 = arith.divf %46, %47 : vector<128x96xf32>
    %49 = vector.extract_strided_slice %42 {offsets = [0, 96], sizes = [128, 32], strides = [1, 1]} : vector<128x128xf32> to vector<128x32xf32>
    %50 = math.tanh %49 : vector<128x32xf32>
    %51 = vector.extract_strided_slice %48 {offsets = [0, 0], sizes = [128, 32], strides = [1, 1]} : vector<128x96xf32> to vector<128x32xf32>
    %52 = vector.extract_strided_slice %48 {offsets = [0, 32], sizes = [128, 32], strides = [1, 1]} : vector<128x96xf32> to vector<128x32xf32>
    %53 = vector.extract_strided_slice %48 {offsets = [0, 64], sizes = [128, 32], strides = [1, 1]} : vector<128x96xf32> to vector<128x32xf32>
    %54 = arith.mulf %52, %33 : vector<128x32xf32>
    %55 = arith.mulf %51, %50 : vector<128x32xf32>
    %56 = arith.addf %54, %55 : vector<128x32xf32>
    %57 = math.tanh %56 : vector<128x32xf32>
    %58 = arith.mulf %53, %57 : vector<128x32xf32>
    %c2_i32 = arith.constant 2 : i32
    %59 = arith.index_cast %c2_i32 : i32 to index
    %c0_21 = arith.constant 0 : index
    %c0_22 = arith.constant 0 : index
    %60 = vector.load %arg15[%59, %c0_21, %c0_22] : memref<8x128x128xbf16, #tpu.memory_space<vmem>>, vector<1x128x128xbf16>
    %61 = vector.shape_cast %60 : vector<1x128x128xbf16> to vector<128x128xbf16>
    %62 = arith.extf %61 : vector<128x128xbf16> to vector<128x128xf32>
    %63 = arith.truncf %58 : vector<128x32xf32> to vector<128x32xbf16>
    %cst_23 = arith.constant dense<0.000000e+00> : vector<128x128xf32>
    %64 = tpu.matmul %63, %0, %cst_23 {dimension_numbers = #tpu.dot_dimension_numbers<[1], [0], [0], [1], [0, 0, 1, 1], [], []>} : vector<128x32xbf16>, vector<32x128xbf16>, vector<128x128xf32> -> vector<128x128xf32>
    %65 = arith.addf %62, %64 : vector<128x128xf32>
    %66 = vector.extract_strided_slice %65 {offsets = [0, 0], sizes = [128, 96], strides = [1, 1]} : vector<128x128xf32> to vector<128x96xf32>
    %67 = arith.negf %66 : vector<128x96xf32>
    %68 = math.exp %67 : vector<128x96xf32>
    %cst_24 = arith.constant 1.000000e+00 : f32
    %69 = vector.broadcast %cst_24 : f32 to vector<128x96xf32>
    %70 = arith.addf %69, %68 : vector<128x96xf32>
    %71 = arith.divf %69, %70 : vector<128x96xf32>
    %72 = vector.extract_strided_slice %65 {offsets = [0, 96], sizes = [128, 32], strides = [1, 1]} : vector<128x128xf32> to vector<128x32xf32>
    %73 = math.tanh %72 : vector<128x32xf32>
    %74 = vector.extract_strided_slice %71 {offsets = [0, 0], sizes = [128, 32], strides = [1, 1]} : vector<128x96xf32> to vector<128x32xf32>
    %75 = vector.extract_strided_slice %71 {offsets = [0, 32], sizes = [128, 32], strides = [1, 1]} : vector<128x96xf32> to vector<128x32xf32>
    %76 = vector.extract_strided_slice %71 {offsets = [0, 64], sizes = [128, 32], strides = [1, 1]} : vector<128x96xf32> to vector<128x32xf32>
    %77 = arith.mulf %75, %56 : vector<128x32xf32>
    %78 = arith.mulf %74, %73 : vector<128x32xf32>
    %79 = arith.addf %77, %78 : vector<128x32xf32>
    %80 = math.tanh %79 : vector<128x32xf32>
    %81 = arith.mulf %76, %80 : vector<128x32xf32>
    %c3_i32 = arith.constant 3 : i32
    %82 = arith.index_cast %c3_i32 : i32 to index
    %c0_25 = arith.constant 0 : index
    %c0_26 = arith.constant 0 : index
    %83 = vector.load %arg15[%82, %c0_25, %c0_26] : memref<8x128x128xbf16, #tpu.memory_space<vmem>>, vector<1x128x128xbf16>
    %84 = vector.shape_cast %83 : vector<1x128x128xbf16> to vector<128x128xbf16>
    %85 = arith.extf %84 : vector<128x128xbf16> to vector<128x128xf32>
    %86 = arith.truncf %81 : vector<128x32xf32> to vector<128x32xbf16>
    %cst_27 = arith.constant dense<0.000000e+00> : vector<128x128xf32>
    %87 = tpu.matmul %86, %0, %cst_27 {dimension_numbers = #tpu.dot_dimension_numbers<[1], [0], [0], [1], [0, 0, 1, 1], [], []>} : vector<128x32xbf16>, vector<32x128xbf16>, vector<128x128xf32> -> vector<128x128xf32>
    %88 = arith.addf %85, %87 : vector<128x128xf32>
    %89 = vector.extract_strided_slice %88 {offsets = [0, 0], sizes = [128, 96], strides = [1, 1]} : vector<128x128xf32> to vector<128x96xf32>
    %90 = arith.negf %89 : vector<128x96xf32>
    %91 = math.exp %90 : vector<128x96xf32>
    %cst_28 = arith.constant 1.000000e+00 : f32
    %92 = vector.broadcast %cst_28 : f32 to vector<128x96xf32>
    %93 = arith.addf %92, %91 : vector<128x96xf32>
    %94 = arith.divf %92, %93 : vector<128x96xf32>
    %95 = vector.extract_strided_slice %88 {offsets = [0, 96], sizes = [128, 32], strides = [1, 1]} : vector<128x128xf32> to vector<128x32xf32>
    %96 = math.tanh %95 : vector<128x32xf32>
    %97 = vector.extract_strided_slice %94 {offsets = [0, 0], sizes = [128, 32], strides = [1, 1]} : vector<128x96xf32> to vector<128x32xf32>
    %98 = vector.extract_strided_slice %94 {offsets = [0, 32], sizes = [128, 32], strides = [1, 1]} : vector<128x96xf32> to vector<128x32xf32>
    %99 = vector.extract_strided_slice %94 {offsets = [0, 64], sizes = [128, 32], strides = [1, 1]} : vector<128x96xf32> to vector<128x32xf32>
    %100 = arith.mulf %98, %79 : vector<128x32xf32>
    %101 = arith.mulf %97, %96 : vector<128x32xf32>
    %102 = arith.addf %100, %101 : vector<128x32xf32>
    %103 = math.tanh %102 : vector<128x32xf32>
    %104 = arith.mulf %99, %103 : vector<128x32xf32>
    %c4_i32 = arith.constant 4 : i32
    %105 = arith.index_cast %c4_i32 : i32 to index
    %c0_29 = arith.constant 0 : index
    %c0_30 = arith.constant 0 : index
    %106 = vector.load %arg15[%105, %c0_29, %c0_30] : memref<8x128x128xbf16, #tpu.memory_space<vmem>>, vector<1x128x128xbf16>
    %107 = vector.shape_cast %106 : vector<1x128x128xbf16> to vector<128x128xbf16>
    %108 = arith.extf %107 : vector<128x128xbf16> to vector<128x128xf32>
    %109 = arith.truncf %104 : vector<128x32xf32> to vector<128x32xbf16>
    %cst_31 = arith.constant dense<0.000000e+00> : vector<128x128xf32>
    %110 = tpu.matmul %109, %0, %cst_31 {dimension_numbers = #tpu.dot_dimension_numbers<[1], [0], [0], [1], [0, 0, 1, 1], [], []>} : vector<128x32xbf16>, vector<32x128xbf16>, vector<128x128xf32> -> vector<128x128xf32>
    %111 = arith.addf %108, %110 : vector<128x128xf32>
    %112 = vector.extract_strided_slice %111 {offsets = [0, 0], sizes = [128, 96], strides = [1, 1]} : vector<128x128xf32> to vector<128x96xf32>
    %113 = arith.negf %112 : vector<128x96xf32>
    %114 = math.exp %113 : vector<128x96xf32>
    %cst_32 = arith.constant 1.000000e+00 : f32
    %115 = vector.broadcast %cst_32 : f32 to vector<128x96xf32>
    %116 = arith.addf %115, %114 : vector<128x96xf32>
    %117 = arith.divf %115, %116 : vector<128x96xf32>
    %118 = vector.extract_strided_slice %111 {offsets = [0, 96], sizes = [128, 32], strides = [1, 1]} : vector<128x128xf32> to vector<128x32xf32>
    %119 = math.tanh %118 : vector<128x32xf32>
    %120 = vector.extract_strided_slice %117 {offsets = [0, 0], sizes = [128, 32], strides = [1, 1]} : vector<128x96xf32> to vector<128x32xf32>
    %121 = vector.extract_strided_slice %117 {offsets = [0, 32], sizes = [128, 32], strides = [1, 1]} : vector<128x96xf32> to vector<128x32xf32>
    %122 = vector.extract_strided_slice %117 {offsets = [0, 64], sizes = [128, 32], strides = [1, 1]} : vector<128x96xf32> to vector<128x32xf32>
    %123 = arith.mulf %121, %102 : vector<128x32xf32>
    %124 = arith.mulf %120, %119 : vector<128x32xf32>
    %125 = arith.addf %123, %124 : vector<128x32xf32>
    %126 = math.tanh %125 : vector<128x32xf32>
    %127 = arith.mulf %122, %126 : vector<128x32xf32>
    %c5_i32 = arith.constant 5 : i32
    %128 = arith.index_cast %c5_i32 : i32 to index
    %c0_33 = arith.constant 0 : index
    %c0_34 = arith.constant 0 : index
    %129 = vector.load %arg15[%128, %c0_33, %c0_34] : memref<8x128x128xbf16, #tpu.memory_space<vmem>>, vector<1x128x128xbf16>
    %130 = vector.shape_cast %129 : vector<1x128x128xbf16> to vector<128x128xbf16>
    %131 = arith.extf %130 : vector<128x128xbf16> to vector<128x128xf32>
    %132 = arith.truncf %127 : vector<128x32xf32> to vector<128x32xbf16>
    %cst_35 = arith.constant dense<0.000000e+00> : vector<128x128xf32>
    %133 = tpu.matmul %132, %0, %cst_35 {dimension_numbers = #tpu.dot_dimension_numbers<[1], [0], [0], [1], [0, 0, 1, 1], [], []>} : vector<128x32xbf16>, vector<32x128xbf16>, vector<128x128xf32> -> vector<128x128xf32>
    %134 = arith.addf %131, %133 : vector<128x128xf32>
    %135 = vector.extract_strided_slice %134 {offsets = [0, 0], sizes = [128, 96], strides = [1, 1]} : vector<128x128xf32> to vector<128x96xf32>
    %136 = arith.negf %135 : vector<128x96xf32>
    %137 = math.exp %136 : vector<128x96xf32>
    %cst_36 = arith.constant 1.000000e+00 : f32
    %138 = vector.broadcast %cst_36 : f32 to vector<128x96xf32>
    %139 = arith.addf %138, %137 : vector<128x96xf32>
    %140 = arith.divf %138, %139 : vector<128x96xf32>
    %141 = vector.extract_strided_slice %134 {offsets = [0, 96], sizes = [128, 32], strides = [1, 1]} : vector<128x128xf32> to vector<128x32xf32>
    %142 = math.tanh %141 : vector<128x32xf32>
    %143 = vector.extract_strided_slice %140 {offsets = [0, 0], sizes = [128, 32], strides = [1, 1]} : vector<128x96xf32> to vector<128x32xf32>
    %144 = vector.extract_strided_slice %140 {offsets = [0, 32], sizes = [128, 32], strides = [1, 1]} : vector<128x96xf32> to vector<128x32xf32>
    %145 = vector.extract_strided_slice %140 {offsets = [0, 64], sizes = [128, 32], strides = [1, 1]} : vector<128x96xf32> to vector<128x32xf32>
    %146 = arith.mulf %144, %125 : vector<128x32xf32>
    %147 = arith.mulf %143, %142 : vector<128x32xf32>
    %148 = arith.addf %146, %147 : vector<128x32xf32>
    %149 = math.tanh %148 : vector<128x32xf32>
    %150 = arith.mulf %145, %149 : vector<128x32xf32>
    %c6_i32 = arith.constant 6 : i32
    %151 = arith.index_cast %c6_i32 : i32 to index
    %c0_37 = arith.constant 0 : index
    %c0_38 = arith.constant 0 : index
    %152 = vector.load %arg15[%151, %c0_37, %c0_38] : memref<8x128x128xbf16, #tpu.memory_space<vmem>>, vector<1x128x128xbf16>
    %153 = vector.shape_cast %152 : vector<1x128x128xbf16> to vector<128x128xbf16>
    %154 = arith.extf %153 : vector<128x128xbf16> to vector<128x128xf32>
    %155 = arith.truncf %150 : vector<128x32xf32> to vector<128x32xbf16>
    %cst_39 = arith.constant dense<0.000000e+00> : vector<128x128xf32>
    %156 = tpu.matmul %155, %0, %cst_39 {dimension_numbers = #tpu.dot_dimension_numbers<[1], [0], [0], [1], [0, 0, 1, 1], [], []>} : vector<128x32xbf16>, vector<32x128xbf16>, vector<128x128xf32> -> vector<128x128xf32>
    %157 = arith.addf %154, %156 : vector<128x128xf32>
    %158 = vector.extract_strided_slice %157 {offsets = [0, 0], sizes = [128, 96], strides = [1, 1]} : vector<128x128xf32> to vector<128x96xf32>
    %159 = arith.negf %158 : vector<128x96xf32>
    %160 = math.exp %159 : vector<128x96xf32>
    %cst_40 = arith.constant 1.000000e+00 : f32
    %161 = vector.broadcast %cst_40 : f32 to vector<128x96xf32>
    %162 = arith.addf %161, %160 : vector<128x96xf32>
    %163 = arith.divf %161, %162 : vector<128x96xf32>
    %164 = vector.extract_strided_slice %157 {offsets = [0, 96], sizes = [128, 32], strides = [1, 1]} : vector<128x128xf32> to vector<128x32xf32>
    %165 = math.tanh %164 : vector<128x32xf32>
    %166 = vector.extract_strided_slice %163 {offsets = [0, 0], sizes = [128, 32], strides = [1, 1]} : vector<128x96xf32> to vector<128x32xf32>
    %167 = vector.extract_strided_slice %163 {offsets = [0, 32], sizes = [128, 32], strides = [1, 1]} : vector<128x96xf32> to vector<128x32xf32>
    %168 = vector.extract_strided_slice %163 {offsets = [0, 64], sizes = [128, 32], strides = [1, 1]} : vector<128x96xf32> to vector<128x32xf32>
    %169 = arith.mulf %167, %148 : vector<128x32xf32>
    %170 = arith.mulf %166, %165 : vector<128x32xf32>
    %171 = arith.addf %169, %170 : vector<128x32xf32>
    %172 = math.tanh %171 : vector<128x32xf32>
    %173 = arith.mulf %168, %172 : vector<128x32xf32>
    %c7_i32 = arith.constant 7 : i32
    %174 = arith.index_cast %c7_i32 : i32 to index
    %c0_41 = arith.constant 0 : index
    %c0_42 = arith.constant 0 : index
    %175 = vector.load %arg15[%174, %c0_41, %c0_42] : memref<8x128x128xbf16, #tpu.memory_space<vmem>>, vector<1x128x128xbf16>
    %176 = vector.shape_cast %175 : vector<1x128x128xbf16> to vector<128x128xbf16>
    %177 = arith.extf %176 : vector<128x128xbf16> to vector<128x128xf32>
    %178 = arith.truncf %173 : vector<128x32xf32> to vector<128x32xbf16>
    %cst_43 = arith.constant dense<0.000000e+00> : vector<128x128xf32>
    %179 = tpu.matmul %178, %0, %cst_43 {dimension_numbers = #tpu.dot_dimension_numbers<[1], [0], [0], [1], [0, 0, 1, 1], [], []>} : vector<128x32xbf16>, vector<32x128xbf16>, vector<128x128xf32> -> vector<128x128xf32>
    %180 = arith.addf %177, %179 : vector<128x128xf32>
    %181 = vector.extract_strided_slice %180 {offsets = [0, 0], sizes = [128, 96], strides = [1, 1]} : vector<128x128xf32> to vector<128x96xf32>
    %182 = arith.negf %181 : vector<128x96xf32>
    %183 = math.exp %182 : vector<128x96xf32>
    %cst_44 = arith.constant 1.000000e+00 : f32
    %184 = vector.broadcast %cst_44 : f32 to vector<128x96xf32>
    %185 = arith.addf %184, %183 : vector<128x96xf32>
    %186 = arith.divf %184, %185 : vector<128x96xf32>
    %187 = vector.extract_strided_slice %180 {offsets = [0, 96], sizes = [128, 32], strides = [1, 1]} : vector<128x128xf32> to vector<128x32xf32>
    %188 = math.tanh %187 : vector<128x32xf32>
    %189 = vector.extract_strided_slice %186 {offsets = [0, 0], sizes = [128, 32], strides = [1, 1]} : vector<128x96xf32> to vector<128x32xf32>
    %190 = vector.extract_strided_slice %186 {offsets = [0, 32], sizes = [128, 32], strides = [1, 1]} : vector<128x96xf32> to vector<128x32xf32>
    %191 = vector.extract_strided_slice %186 {offsets = [0, 64], sizes = [128, 32], strides = [1, 1]} : vector<128x96xf32> to vector<128x32xf32>
    %192 = arith.mulf %190, %171 : vector<128x32xf32>
    %193 = arith.mulf %189, %188 : vector<128x32xf32>
    %194 = arith.addf %192, %193 : vector<128x32xf32>
    %195 = math.tanh %194 : vector<128x32xf32>
    %196 = arith.mulf %191, %195 : vector<128x32xf32>
    %c8_i32 = arith.constant 8 : i32
    %c0_45 = arith.constant 0 : index
    %c0_46 = arith.constant 0 : index
    %197 = vector.load %arg1[%c0_45, %c0_46] : memref<128x64xbf16, #tpu.memory_space<vmem>>, vector<128x64xbf16>
    %c0_47 = arith.constant 0 : index
    %c0_48 = arith.constant 0 : index
    %198 = vector.load %arg7[%c0_47, %c0_48] : memref<64x64xbf16, #tpu.memory_space<vmem>>, vector<64x64xbf16>
    %cst_49 = arith.constant dense<0.000000e+00> : vector<128x64xf32>
    %199 = tpu.matmul %197, %198, %cst_49 {dimension_numbers = #tpu.dot_dimension_numbers<[1], [0], [0], [1], [0, 0, 1, 1], [], []>} : vector<128x64xbf16>, vector<64x64xbf16>, vector<128x64xf32> -> vector<128x64xf32>
    %200 = arith.truncf %196 : vector<128x32xf32> to vector<128x32xbf16>
    %c0_50 = arith.constant 0 : index
    %c0_51 = arith.constant 0 : index
    %201 = vector.load %arg8[%c0_50, %c0_51] : memref<32x64xbf16, #tpu.memory_space<vmem>>, vector<32x64xbf16>
    %cst_52 = arith.constant dense<0.000000e+00> : vector<128x64xf32>
    %202 = tpu.matmul %200, %201, %cst_52 {dimension_numbers = #tpu.dot_dimension_numbers<[1], [0], [0], [1], [0, 0, 1, 1], [], []>} : vector<128x32xbf16>, vector<32x64xbf16>, vector<128x64xf32> -> vector<128x64xf32>
    %203 = arith.addf %199, %202 : vector<128x64xf32>
    %204 = math.tanh %203 : vector<128x64xf32>
    %205 = vector.shape_cast %204 : vector<128x64xf32> to vector<16x8x64xf32>
    %c0_53 = arith.constant 0 : index
    %c0_54 = arith.constant 0 : index
    %206 = vector.load %arg3[%c0_53, %c0_54] : memref<16x8xf32, #tpu.memory_space<vmem>>, vector<16x8xf32>
    %c0_55 = arith.constant 0 : index
    %c0_56 = arith.constant 0 : index
    %207 = vector.load %arg9[%c0_55, %c0_56] : memref<1x64xf32, #tpu.memory_space<vmem>>, vector<1x64xf32>
    %208 = vector.shape_cast %207 : vector<1x64xf32> to vector<1x1x64xf32>
    %209 = vector.broadcast %208 : vector<1x1x64xf32> to vector<16x8x64xf32>
    %210 = arith.mulf %205, %209 : vector<16x8x64xf32>
    %cst_57 = arith.constant dense<0.000000e+00> : vector<16x8xf32>
    %211 = vector.multi_reduction <add>, %210, %cst_57 [2] : vector<16x8x64xf32> to vector<16x8xf32>
    %cst_58 = arith.constant 0.000000e+00 : f32
    %212 = vector.broadcast %cst_58 : f32 to vector<16x8xf32>
    %213 = arith.cmpf ogt, %206, %212 : vector<16x8xf32>
    %cst_59 = arith.constant -1.000000e+30 : f32
    %214 = vector.broadcast %cst_59 : f32 to vector<16x8xf32>
    %215 = arith.select %213, %211, %214 : vector<16x8xi1>, vector<16x8xf32>
    %cst_60 = arith.constant dense<0xFF800000> : vector<16xf32>
    %216 = vector.multi_reduction <maximumf>, %215, %cst_60 [1] : vector<16x8xf32> to vector<16xf32>
    %217 = vector.shape_cast %216 : vector<16xf32> to vector<16x1xf32>
    %218 = vector.broadcast %217 : vector<16x1xf32> to vector<16x8xf32>
    %219 = arith.subf %215, %218 : vector<16x8xf32>
    %220 = math.exp %219 : vector<16x8xf32>
    %221 = arith.mulf %220, %206 : vector<16x8xf32>
    %cst_61 = arith.constant dense<0.000000e+00> : vector<16xf32>
    %222 = vector.multi_reduction <add>, %221, %cst_61 [1] : vector<16x8xf32> to vector<16xf32>
    %223 = vector.shape_cast %222 : vector<16xf32> to vector<16x1xf32>
    %cst_62 = arith.constant 9.99999971E-10 : f32
    %224 = vector.broadcast %cst_62 : f32 to vector<16x1xf32>
    %225 = arith.maximumf %223, %224 : vector<16x1xf32>
    %226 = vector.broadcast %225 : vector<16x1xf32> to vector<16x8xf32>
    %227 = arith.divf %221, %226 : vector<16x8xf32>
    %228 = vector.shape_cast %227 : vector<16x8xf32> to vector<16x8x1xf32>
    %229 = vector.broadcast %228 : vector<16x8x1xf32> to vector<16x8x64xf32>
    %230 = arith.mulf %205, %229 : vector<16x8x64xf32>
    %cst_63 = arith.constant dense<0.000000e+00> : vector<16x64xf32>
    %231 = vector.multi_reduction <add>, %230, %cst_63 [1] : vector<16x8x64xf32> to vector<16x64xf32>
    %232 = arith.truncf %231 : vector<16x64xf32> to vector<16x64xbf16>
    %c0_64 = arith.constant 0 : index
    %c0_65 = arith.constant 0 : index
    %233 = vector.load %arg10[%c0_64, %c0_65] : memref<64x64xbf16, #tpu.memory_space<vmem>>, vector<64x64xbf16>
    %cst_66 = arith.constant dense<0.000000e+00> : vector<16x64xf32>
    %234 = tpu.matmul %232, %233, %cst_66 {dimension_numbers = #tpu.dot_dimension_numbers<[1], [0], [0], [1], [0, 0, 1, 1], [], []>} : vector<16x64xbf16>, vector<64x64xbf16>, vector<16x64xf32> -> vector<16x64xf32>
    %c0_67 = arith.constant 0 : index
    %c0_68 = arith.constant 0 : index
    %235 = vector.load %arg11[%c0_67, %c0_68] : memref<1x64xf32, #tpu.memory_space<vmem>>, vector<1x64xf32>
    %236 = vector.broadcast %235 : vector<1x64xf32> to vector<16x64xf32>
    %237 = arith.addf %234, %236 : vector<16x64xf32>
    %cst_69 = arith.constant 0.000000e+00 : f32
    %238 = vector.broadcast %cst_69 : f32 to vector<16x64xf32>
    %239 = arith.maximumf %237, %238 : vector<16x64xf32>
    %240 = arith.truncf %239 : vector<16x64xf32> to vector<16x64xbf16>
    %c0_70 = arith.constant 0 : index
    %c0_71 = arith.constant 0 : index
    %241 = vector.load %arg12[%c0_70, %c0_71] : memref<64x2xbf16, #tpu.memory_space<vmem>>, vector<64x2xbf16>
    %cst_72 = arith.constant dense<0.000000e+00> : vector<16x2xf32>
    %242 = tpu.matmul %240, %241, %cst_72 {dimension_numbers = #tpu.dot_dimension_numbers<[1], [0], [0], [1], [0, 0, 1, 1], [], []>} : vector<16x64xbf16>, vector<64x2xbf16>, vector<16x2xf32> -> vector<16x2xf32>
    %c0_73 = arith.constant 0 : index
    %c0_74 = arith.constant 0 : index
    %243 = vector.load %arg13[%c0_73, %c0_74] : memref<1x2xf32, #tpu.memory_space<vmem>>, vector<1x2xf32>
    %244 = vector.broadcast %243 : vector<1x2xf32> to vector<16x2xf32>
    %245 = arith.addf %242, %244 : vector<16x2xf32>
    %c0_75 = arith.constant 0 : index
    %c0_76 = arith.constant 0 : index
    %246 = vector.load %arg14[%c0_75, %c0_76] : memref<16x2xf32, #tpu.memory_space<vmem>>, vector<16x2xf32>
    tpu.vector_store %arg14[%c0_75, %c0_76], %245 {strides = array<i32>} : memref<16x2xf32, #tpu.memory_space<vmem>>, vector<16x2xf32>,
    return
  }
  func.func @transform_0(%arg0: i32) -> (i32, i32) {
    %c0_i32 = arith.constant 0 : i32
    %c0_i32_0 = arith.constant 0 : i32
    return %arg0, %c0_i32 : i32, i32
  }
  func.func @transform_1(%arg0: i32) -> (i32, i32, i32) {
    %c0_i32 = arith.constant 0 : i32
    %c0_i32_0 = arith.constant 0 : i32
    %c0_i32_1 = arith.constant 0 : i32
    return %c0_i32, %arg0, %c0_i32_0 : i32, i32, i32
  }
  func.func @transform_2(%arg0: i32) -> (i32, i32) {
    %c0_i32 = arith.constant 0 : i32
    %c0_i32_0 = arith.constant 0 : i32
    return %arg0, %c0_i32 : i32, i32
  }
  func.func @transform_3(%arg0: i32) -> (i32, i32) {
    %c0_i32 = arith.constant 0 : i32
    %c0_i32_0 = arith.constant 0 : i32
    %c0_i32_1 = arith.constant 0 : i32
    return %c0_i32, %c0_i32_0 : i32, i32
  }
  func.func @transform_4(%arg0: i32) -> (i32, i32) {
    %c0_i32 = arith.constant 0 : i32
    %c0_i32_0 = arith.constant 0 : i32
    %c0_i32_1 = arith.constant 0 : i32
    return %c0_i32, %c0_i32_0 : i32, i32
  }
  func.func @transform_5(%arg0: i32) -> (i32, i32) {
    %c0_i32 = arith.constant 0 : i32
    %c0_i32_0 = arith.constant 0 : i32
    %c0_i32_1 = arith.constant 0 : i32
    return %c0_i32, %c0_i32_0 : i32, i32
  }
  func.func @transform_6(%arg0: i32) -> (i32, i32) {
    %c0_i32 = arith.constant 0 : i32
    %c0_i32_0 = arith.constant 0 : i32
    %c0_i32_1 = arith.constant 0 : i32
    return %c0_i32, %c0_i32_0 : i32, i32
  }
  func.func @transform_7(%arg0: i32) -> (i32, i32) {
    %c0_i32 = arith.constant 0 : i32
    %c0_i32_0 = arith.constant 0 : i32
    %c0_i32_1 = arith.constant 0 : i32
    return %c0_i32, %c0_i32_0 : i32, i32
  }
  func.func @transform_8(%arg0: i32) -> (i32, i32) {
    %c0_i32 = arith.constant 0 : i32
    %c0_i32_0 = arith.constant 0 : i32
    %c0_i32_1 = arith.constant 0 : i32
    return %c0_i32, %c0_i32_0 : i32, i32
  }
  func.func @transform_9(%arg0: i32) -> (i32, i32) {
    %c0_i32 = arith.constant 0 : i32
    %c0_i32_0 = arith.constant 0 : i32
    %c0_i32_1 = arith.constant 0 : i32
    return %c0_i32, %c0_i32_0 : i32, i32
  }
  func.func @transform_10(%arg0: i32) -> (i32, i32) {
    %c0_i32 = arith.constant 0 : i32
    %c0_i32_0 = arith.constant 0 : i32
    %c0_i32_1 = arith.constant 0 : i32
    return %c0_i32, %c0_i32_0 : i32, i32
  }
  func.func @transform_11(%arg0: i32) -> (i32, i32) {
    %c0_i32 = arith.constant 0 : i32
    %c0_i32_0 = arith.constant 0 : i32
    %c0_i32_1 = arith.constant 0 : i32
    return %c0_i32, %c0_i32_0 : i32, i32
  }
  func.func @transform_12(%arg0: i32) -> (i32, i32) {
    %c0_i32 = arith.constant 0 : i32
    %c0_i32_0 = arith.constant 0 : i32
    %c0_i32_1 = arith.constant 0 : i32
    return %c0_i32, %c0_i32_0 : i32, i32
  }
  func.func @transform_13(%arg0: i32) -> (i32, i32) {
    %c0_i32 = arith.constant 0 : i32
    %c0_i32_0 = arith.constant 0 : i32
    return %arg0, %c0_i32 : i32, i32
  }
}

</mosaic_0001>

<bundles_post_ra>
// kernel: code2seq_attn_forward.1
= control target key start
LH: loop header
LB: loop body
LE: loop exit
PB: predicated region body
PF: predicated region fallthrough
CT: control target
= control target key end

     0   :  { %vm517_vm0 = vcmask 261120   ;;  %v10623_v10 = vmov 0   ;;  %s10625_s21 = smov 64   ;;  %s14434_s3 = inlined_call_operand.vmem [shape: bf16[32,128], index: 3, kind: input, shape index: {}]   ;;  %s14435_s4 = inlined_call_operand.vmem [shape: bf16[32,128], index: 4, kind: input, shape index: {}]   ;;  %s14436_s5 = inlined_call_operand.vmem [shape: f32[1,128], index: 5, kind: input, shape index: {}]   ;;  %s14437_s1 = inlined_call_operand.vmem [shape: bf16[8,128,32], index: 1, kind: input, shape index: {}]   ;;  %s14438_s6 = inlined_call_operand.vmem [shape: bf16[64,64], index: 6, kind: input, shape index: {}]   ;;  %s14439_s7 = inlined_call_operand.vmem [shape: bf16[32,64], index: 7, kind: input, shape index: {}]   ;;  %s14440_s0 = inlined_call_operand.vmem [shape: bf16[128,64], index: 0, kind: input, shape index: {}]   ;;  %s14441_s8 = inlined_call_operand.vmem [shape: f32[1,64], index: 8, kind: input, shape index: {}]   ;;  %s14442_s2 = inlined_call_operand.vmem [shape: f32[16,8], index: 2, kind: input, shape index: {}]   ;;  %s14443_s9 = inlined_call_operand.vmem [shape: bf16[64,64], index: 9, kind: input, shape index: {}]   ;;  %s14444_s10 = inlined_call_operand.vmem [shape: f32[1,64], index: 10, kind: input, shape index: {}]   ;;  %s14445_s11 = inlined_call_operand.vmem [shape: bf16[64,2], index: 11, kind: input, shape index: {}]   ;;  %s14446_s12 = inlined_call_operand.vmem [shape: f32[1,2], index: 12, kind: input, shape index: {}]   ;;  %s14447_s13 = inlined_call_operand.vmem [shape: f32[16,2], index: 13, kind: output, shape index: {}]  }
   0x1   :  { %v8816_v0 = vld [vmem:[%s14434_s3 + $0x8] sm:$0xff]  ;;  %v8815_v1 = vld [vmem:[%s14434_s3] sm:$0xff]  ;;  %v8789_v6 = vld [vmem:[%s14437_s1 + $0x130] sm:$0xff]  ;;  %s10624_s3 = smov 32  }
   0x2   :  { %9534 = vmatpush.bf16.msra.mxu1 %v8816_v0  ;;  %716 = vmatpush.bf16.msra.mxu0 %v8816_v0  ;;  %v10705_v2 = vld [vmem:[%s14435_s4 + $0x8] sm:$0xff]  ;;  %v8751_v4 = vld [vmem:[%s14437_s1] sm:$0xff]  ;;  %v8790_v8 = vld [vmem:[%s14437_s1 + $0x138] sm:$0xff] }
   0x3   :  { %9535 = vmatpush.bf16.msra.mxu2 %v8816_v0  ;;  %9536 = vmatpush.bf16.msra.mxu3 %v8816_v0  ;;  %v8788_v3 = vld [vmem:[%s14437_s1 + $0x128] sm:$0xff]  ;;  %v10717_v5 = vld [vmem:[%s14435_s4] sm:$0xff]  ;;  %v8753_v9 = vld [vmem:[%s14437_s1 + $0x10] sm:$0xff] }
   0x4   :  { %v8752_v7 = vld [vmem:[%s14437_s1 + $0x8] sm:$0xff]  ;;  %v8754_v11 = vld [vmem:[%s14437_s1 + $0x18] sm:$0xff]  ;;  %v8755_v12 = vld [vmem:[%s14437_s1 + $0x20] sm:$0xff] }
   0x5   :  { %v8756_v18 = vld [vmem:[%s14437_s1 + $0x28] sm:$0xff]  ;;  %v10771_v22 = vld [vmem:[%s14436_s5] ss:$0 sm:$0xff]  ;;  %v8757_v53 = vld [vmem:[%s14437_s1 + $0x30] sm:$0xff] }
   0x6   :  { %9537 = vmatpush.bf16.msra.mxu1 %v8815_v1  ;;  %717 = vmatpush.bf16.msra.mxu0 %v8815_v1 }
   0x7   :  { %9538 = vmatpush.bf16.msra.mxu2 %v8815_v1  ;;  %9539 = vmatpush.bf16.msra.mxu3 %v8815_v1  ;;  %v8758_v1 = vld [vmem:[%s14437_s1 + $0x38] sm:$0xff] }
   0x9   :  { %8424 = vmatmul.msk.bf16.vlgmr.msra.gmra.mxu1 %vm517_vm0, %v8788_v3  ;;  %8387 = vmatmul.msk.bf16.vlgmr.msra.gmra.mxu0 %vm517_vm0, %v8751_v4 }
   0xa   :  { %1348 = vmatpush.bf16.msrb.mxu1 %v10705_v2 }
   0xb   :  { %2094 = vmatpush.bf16.msrb.mxu2 %v10705_v2  ;;  %2840 = vmatpush.bf16.msrb.mxu3 %v10705_v2 }
   0xe   :  { %1349 = vmatpush.bf16.msrb.mxu1 %v10717_v5 }
   0xf   :  { %2095 = vmatpush.bf16.msrb.mxu2 %v10717_v5  ;;  %2841 = vmatpush.bf16.msrb.mxu3 %v10717_v5 }
  0x12   :  { %3586 = vmatpush.bf16.msra.mxu1 %v10705_v2 }
  0x16   :  { %3587 = vmatpush.bf16.msra.mxu1 %v10717_v5 }
  0x19   :  { %8425 = vmatmul.msk.bf16.gmra.mxu1 %vm517_vm0, %v8789_v6  ;;  %8388 = vmatmul.msk.bf16.gmra.mxu0 %vm517_vm0, %v8752_v7 }
  0x29   :  { %8426 = vmatmul.msk.bf16.gmra.mxu1 %vm517_vm0, %v8790_v8  ;;  %8389 = vmatmul.msk.bf16.gmra.mxu0 %vm517_vm0, %v8753_v9 }
  0x39   :  { %1350 = vmatmul.bf16.vlgmr.msrb.gmra.mxu1 %v10623_v10  ;;  %8390 = vmatmul.msk.bf16.gmra.mxu0 %vm517_vm0, %v8754_v11 }
  0x3a   :  { %5824 = vmatpush.bf16.msrb.mxu1 %v10705_v2 }
  0x3e   :  { %5825 = vmatpush.bf16.msrb.mxu1 %v10717_v5 }
  0x49   :  { %1355 = vmatmul.bf16.gmra.mxu1 %v10623_v10  ;;  %8391 = vmatmul.msk.bf16.gmra.mxu0 %vm517_vm0, %v8755_v12 }
  0x59   :  { %1360 = vmatmul.bf16.gmra.mxu1 %v10623_v10  ;;  %8392 = vmatmul.msk.bf16.gmra.mxu0 %vm517_vm0, %v8756_v18 }
  0x69   :  { %1365 = vmatmul.bf16.gmra.mxu1 %v10623_v10  ;;  %8393 = vmatmul.msk.bf16.gmra.mxu0 %vm517_vm0, %v8757_v53 }
  0x79   :  { %1370 = vmatmul.bf16.gmra.mxu1 %v10623_v10  ;;  %8394 = vmatmul.msk.bf16.gmra.mxu0 %vm517_vm0, %v8758_v1 }
  0x86   :  { %v10754_v13 = vpop.f32.mrf.mxu1  ;;  %v719_v16 = vpop.f32.mrf.mxu0 }
  0x87   :  { %v720_v23 = vadd.f32 %v10771_v22, %v719_v16 }
  0x89   :  { %1375 = vmatmul.bf16.gmra.mxu1 %v10623_v10 }
  0x8e   :  { %v10756_v14 = vpop.f32.mrf.mxu1  ;;  %v721_v19 = vpop.f32.mrf.mxu0 }
  0x8f   :  { %v722_v24 = vadd.f32 %v10771_v22, %v721_v19 }
  0x91   :  { %v8842_v26 = vpack.c.bf16 %v722_v24, %v720_v23 }
  0x93   :  { %v9161_v28 = vunpack.c.l.bf16 %v8842_v26  ;;  %v9162_v34 = vunpack.c.h.bf16 %v8842_v26 }
  0x96   :  { %v10758_v15 = vpop.f32.mrf.mxu1  ;;  %v724_v21 = vpop.f32.mrf.mxu0 }
  0x97   :  { %v725_v32 = vadd.f32 %v10771_v22, %v724_v21 }
  0x99   :  { %1380 = vmatmul.bf16.gmra.mxu1 %v10623_v10 }
  0x9e   :  { %v10760_v17 = vpop.f32.mrf.mxu1  ;;  %v726_v27 = vpop.f32.mrf.mxu0 }
  0x9f   :  { %v727_v33 = vadd.f32 %v10771_v22, %v726_v27 }
  0xa1   :  { %v8847_v38 = vpack.c.bf16 %v727_v33, %v725_v32 }
  0xa3   :  { %v9165_v40 = vunpack.c.l.bf16 %v8847_v38  ;;  %v9166_v46 = vunpack.c.h.bf16 %v8847_v38 }
  0xa6   :  { %v10766_v20 = vpop.f32.mrf.mxu1  ;;  %v729_v31 = vpop.f32.mrf.mxu0 }
  0xa7   :  { %v730_v44 = vadd.f32 %v10771_v22, %v729_v31 }
  0xa9   :  { %1385 = vmatmul.bf16.gmra.mxu1 %v10623_v10 }
  0xae   :  { %v10775_v25 = vpop.f32.mrf.mxu1  ;;  %v731_v39 = vpop.f32.mrf.mxu0 }
  0xaf   :  { %v732_v45 = vadd.f32 %v10771_v22, %v731_v39 }
  0xb1   :  { %v8852_v51 = vpack.c.bf16 %v732_v45, %v730_v44 }
  0xb3   :  { %v9169_v52 = vunpack.c.l.bf16 %v8852_v51  ;;  %v9170_v59 = vunpack.c.h.bf16 %v8852_v51 }
  0xb6   :  { %v1351_v29 = vpop.f32.mrf.mxu1  ;;  %v734_v48 = vpop.f32.mrf.mxu0 }
  0xb7   :  { %v1391_v30 = vadd.f32 %v9161_v28, %v1351_v29  ;;  %v735_v58 = vadd.f32 %v10771_v22, %v734_v48 }
  0xb9   :  { %9550 = vtanh.f32 %v1391_v30  ;;  %v8459_v9 = vmul.f32 -1.442695, %v1391_v30 }
  0xbe   :  { %v1353_v35 = vpop.f32.mrf.mxu1  ;;  %v736_v57 = vpop.f32.mrf.mxu0 }
  0xbf   :  { %v9551_v36 = vpop.eup %9550  ;;  %v1392_v37 = vadd.f32 %v9162_v34, %v1353_v35  ;;  %v737_v60 = vadd.f32 %v10771_v22, %v736_v57 }
  0xc0   :  { %1759 = vrot.lane.b32.xlu0 %v9551_v36, %s10624_s3 }
  0xc1   :  { %9552 = vtanh.f32 %v1392_v37  ;;  %v10791_v0 = vpack.c.bf16 %v737_v60, %v735_v58  ;;  %v8460_v10 = vmul.f32 -1.442695, %v1392_v37 }
  0xc3   :  { %v9173_v3 = vunpack.c.l.bf16 %v10791_v0  ;;  %v9174_v53 = vunpack.c.h.bf16 %v10791_v0 }
  0xc6   :  { %v1356_v41 = vpop.f32.mrf.mxu1  ;;  %v739_v24 = vpop.f32.mrf.mxu0 }
  0xc7   :  { %v9553_v42 = vpop.eup %9552  ;;  %v1393_v43 = vadd.f32 %v9165_v40, %v1356_v41  ;;  %v740_v48 = vadd.f32 %v10771_v22, %v739_v24 }
  0xc8   :  { %1761 = vrot.lane.b32.xlu0 %v9553_v42, %s10624_s3 }
  0xc9   :  { %9554 = vtanh.f32 %v1393_v43  ;;  %v8461_v16 = vmul.f32 -1.442695, %v1393_v43 }
  0xce   :  { %v1358_v47 = vpop.f32.mrf.mxu1  ;;  %v741_v36 = vpop.f32.mrf.mxu0 }
  0xcf   :  { %v9555_v49 = vpop.eup %9554  ;;  %v1394_v50 = vadd.f32 %v9166_v46, %v1358_v47 }
  0xd0   :  { %1763 = vrot.lane.b32.xlu1 %v9555_v49, %s10624_s3  ;;  %v742_v49 = vadd.f32 %v10771_v22, %v741_v36 }
  0xd1   :  { %9556 = vtanh.f32 %v1394_v50  ;;  %v8462_v23 = vmul.f32 -1.442695, %v1394_v50 }
  0xd6   :  { %v1361_v54 = vpop.f32.mrf.mxu1 }
  0xd7   :  { %v9557_v55 = vpop.eup %9556  ;;  %v1395_v56 = vadd.f32 %v9169_v52, %v1361_v54 }
  0xd8   :  { %1765 = vrot.lane.b32.xlu1 %v9557_v55, %s10624_s3 }
  0xd9   :  { %9558 = vtanh.f32 %v1395_v56  ;;  %v8463_v30 = vmul.f32 -1.442695, %v1395_v56  ;;  %v744_v56 = vpop.f32.mrf.mxu0 }
  0xde   :  { %v1363_v61 = vpop.f32.mrf.mxu1 }
  0xdf   :  { %v9559_v62 = vpop.eup %9558  ;;  %v1396_v63 = vadd.f32 %v9170_v59, %v1363_v61  ;;  %v10835_v61 = vpack.c.bf16 %v742_v49, %v740_v48 }
  0xe0   :  { %1767 = vrot.lane.b32.xlu2 %v9559_v62, %s10624_s3 }
  0xe1   :  { %9560 = vtanh.f32 %v1396_v63  ;;  %v8464_v27 = vmul.f32 -1.442695, %v1396_v63  ;;  %v9178_v48 = vunpack.c.h.bf16 %v10835_v61 }
  0xe6   :  { %v1366_v4 = vpop.f32.mrf.mxu1 }
  0xe7   :  { %v9561_v6 = vpop.eup %9560  ;;  %v1397_v7 = vadd.f32 %v9173_v3, %v1366_v4 }
  0xe8   :  { %1769 = vrot.lane.b32.xlu2 %v9561_v6, %s10624_s3 }
  0xe9   :  { %9562 = vtanh.f32 %v1397_v7  ;;  %v8465_v33 = vmul.f32 -1.442695, %v1397_v7 }
  0xea   :  { %9564 = vpow2.f32 %v8459_v9 }
  0xeb   :  { %9566 = vpow2.f32 %v8460_v10  ;;  %v9177_v10 = vunpack.c.l.bf16 %v10835_v61 }
  0xee   :  { %v1368_v35 = vpop.f32.mrf.mxu1 }
  0xef   :  { %v9563_v8 = vpop.eup %9562  ;;  %v10841_v3 = vadd.f32 %v9174_v53, %v1368_v35 }
  0xf0   :  { %1771 = vrot.lane.b32.xlu2 %v9563_v8, %s10624_s3  ;;  %v9565_v11 = vpop.eup %9564 }
  0xf1   :  { %v1455_v12 = vadd.f32 1.0, %v9565_v11  ;;  %v9567_v18 = vpop.eup %9566 }
  0xf2   :  { %v10801_v19 = vadd.f32 1.0, %v9567_v18 }
  0xf3   :  { %9568 = vrcp.f32 %v1455_v12  ;;  %v1482_v45 = vand.u32 2147483648, %v1455_v12  ;;  %vm1476_vm2 = vweird.f32 %v1455_v12  ;;  %v1480_v47 = vand.u32 2147483647, %v1455_v12 }
  0xf4   :  { %9570 = vpow2.f32 %v8461_v16  ;;  %v1497_v7 = vand.u32 2147483648, %v10801_v19  ;;  %vm1491_vm6 = vweird.f32 %v10801_v19  ;;  %v1495_v9 = vand.u32 2147483647, %v10801_v19 }
  0xf5   :  { %9572 = vrcp.f32 %v10801_v19  ;;  %v1483_v58 = vor.u32 1.1754944e-38, %v1482_v45  ;;  %vm1481_vm4 = vcmp.eq.f32.partialorder %v1480_v47, 8.507059e+37 }
  0xf6   :  { %9574 = vpow2.f32 %v8462_v23  ;;  %v1371_v59 = vpop.f32.mrf.mxu1  ;;  %v1498_v18 = vor.u32 1.1754944e-38, %v1497_v7  ;;  %vm1496_vm8 = vcmp.eq.f32.partialorder %v1495_v9, 8.507059e+37 }
  0xf7   :  { %9576 = vpow2.f32 %v8464_v27  ;;  %v10865_v24 = vadd.f32 %v9177_v10, %v1371_v59 }
  0xf9   :  { %v9569_v21 = vpop.eup %9568 }
  0xfa   :  { %v9571_v26 = vpop.eup %9570  ;;  %v1472_v28 = vmul.f32 %v9569_v21, %v1455_v12  ;;  %vm1477_vm1 = vweird.f32 %v9569_v21 }
  0xfb   :  { %v10804_v29 = vadd.f32 1.0, %v9571_v26  ;;  %v10806_v32 = vpop.eup %9572  ;;  %vm10820_vm3 = vmor %vm1476_vm2, %vm1477_vm1 }
  0xfc   :  { %v1473_v31 = vsub.f32 1.0, %v1472_v28  ;;  %v9575_v34 = vpop.eup %9574  ;;  %v1487_v38 = vmul.f32 %v10806_v32, %v10801_v19  ;;  %vm1492_vm5 = vweird.f32 %v10806_v32  ;;  %v746_v19 = vpop.f32.mrf.mxu0 }
  0xfd   :  { %9578 = vrcp.f32 %v10804_v29  ;;  %v9577_v39 = vpop.eup %9576  ;;  %v10811_v40 = vadd.f32 1.0, %v9575_v34  ;;  %vm1493_vm7 = vmor %vm1491_vm6, %vm1492_vm5  ;;  %vm1506_vm10 = vweird.f32 %v10804_v29  ;;  %v1510_v34 = vand.u32 2147483647, %v10804_v29 }
  0xfe   :  { %9580 = vpow2.f32 %v8463_v30  ;;  %v1474_v37 = vmul.f32 %v9569_v21, %v1473_v31  ;;  %v10815_v42 = vadd.f32 1.0, %v9577_v39  ;;  %v1488_v44 = vsub.f32 1.0, %v1487_v38 }
  0xff   :  { %9582 = vpow2.f32 %v8465_v33  ;;  %v1512_v35 = vand.u32 2147483648, %v10804_v29  ;;  %v747_v39 = vadd.f32 %v10771_v22, %v746_v19  ;;  %vm1511_vm12 = vcmp.eq.f32.partialorder %v1510_v34, 8.507059e+37 }
 0x100   :  { %v1475_v43 = vadd.f32 %v9569_v21, %v1474_v37  ;;  %9584 = vrcp.f32 %v10811_v40  ;;  %v1489_v55 = vmul.f32 %v10806_v32, %v1488_v44  ;;  %v745_v37 = vadd.f32 %v10771_v22, %v744_v56 }
 0x101   :  { %9586 = vrcp.f32 %v10815_v42  ;;  %vm1521_vm13 = vweird.f32 %v10811_v40  ;;  %vm1551_vm15 = vweird.f32 %v10815_v42  ;;  %v1557_v56 = vand.u32 2147483648, %v10815_v42 }
 0x102   :  { %v1479_v54 = vsel %vm10820_vm3, %v9569_v21, %v1475_v43  ;;  %v1490_v6 = vadd.f32 %v10806_v32, %v1489_v55  ;;  %v10893_v50 = vpack.c.bf16 %v747_v39, %v745_v37  ;;  %v1527_v61 = vand.u32 2147483648, %v10811_v40 }
 0x103   :  { %v10813_v41 = vpop.eup %9578  ;;  %v10837_v63 = vsel %vm1481_vm4, %v1483_v58, %v1479_v54 }
 0x104   :  { %v9581_v46 = vpop.eup %9580  ;;  %v1502_v51 = vmul.f32 %v10813_v41, %v10804_v29  ;;  %v1494_v16 = vsel %vm1493_vm7, %v10806_v32, %v1490_v6  ;;  %vm1507_vm9 = vweird.f32 %v10813_v41  ;;  %v1373_v32 = vpop.f32.mrf.mxu1  ;;  %v1555_v6 = vand.u32 2147483647, %v10815_v42 }
 0x105   :  { %v9583_v52 = vpop.eup %9582  ;;  %v10831_v57 = vadd.f32 1.0, %v9581_v46  ;;  %v10867_v26 = vsel %vm1496_vm8, %v1498_v18, %v1494_v16  ;;  %vm1508_vm11 = vmor %vm1506_vm10, %vm1507_vm9  ;;  %v1513_v46 = vor.u32 1.1754944e-38, %v1512_v35  ;;  %v9181_v9 = vunpack.c.l.bf16 %v10893_v50 }
 0x106   :  { %v10833_v60 = vadd.f32 1.0, %v9583_v52  ;;  %v1503_v1 = vsub.f32 1.0, %v1502_v51  ;;  %v10839_v0 = vpop.eup %9584  ;;  %v1528_v18 = vor.u32 1.1754944e-38, %v1527_v61  ;;  %vm1556_vm4 = vcmp.eq.f32.partialorder %v1555_v6, 8.507059e+37 }
 0x107   :  { %9588 = vrcp.f32 %v10831_v57  ;;  %v10848_v8 = vpop.eup %9586  ;;  %v1517_v12 = vmul.f32 %v10839_v0, %v10811_v40  ;;  %vm1522_vm14 = vweird.f32 %v10839_v0  ;;  %vm1536_vm6 = vweird.f32 %v10831_v57 }
 0x108   :  { %9590 = vtanh.f32 %v10841_v3  ;;  %v1504_v11 = vmul.f32 %v10813_v41, %v1503_v1  ;;  %v1547_v21 = vmul.f32 %v10848_v8, %v10815_v42  ;;  %vm1552_vm1 = vweird.f32 %v10848_v8  ;;  %vm10914_vm2 = vmor %vm1521_vm13, %vm1522_vm14 }
 0x109   :  { %9592 = vrcp.f32 %v10833_v60  ;;  %v1518_v30 = vsub.f32 1.0, %v1517_v12  ;;  %v10906_v1 = vadd.f32 %v9178_v48, %v1373_v32  ;;  %vm10919_vm3 = vmor %vm1551_vm15, %vm1552_vm1  ;;  %vm1566_vm8 = vweird.f32 %v10833_v60 }
 0x10a   :  { %v1505_v28 = vadd.f32 %v10813_v41, %v1504_v11  ;;  %9594 = vtanh.f32 %v10865_v24  ;;  %v1548_v38 = vsub.f32 1.0, %v1547_v21  ;;  %v1558_v11 = vor.u32 1.1754944e-38, %v1557_v56 }
 0x10b   :  { %v1519_v45 = vmul.f32 %v10839_v0, %v1518_v30  ;;  %9596 = vtanh.f32 %v10906_v1  ;;  %v1540_v30 = vand.u32 2147483647, %v10831_v57  ;;  %v9182_v39 = vunpack.c.h.bf16 %v10893_v50 }
 0x10c   :  { %v1509_v44 = vsel %vm1508_vm11, %v10813_v41, %v1505_v28  ;;  %v1549_v49 = vmul.f32 %v10848_v8, %v1548_v38  ;;  %v1525_v41 = vand.u32 2147483647, %v10811_v40  ;;  %v1570_v38 = vand.u32 2147483647, %v10833_v60 }
 0x10d   :  { %v10863_v23 = vpop.eup %9588  ;;  %v10895_v51 = vsel %vm1511_vm12, %v1513_v46, %v1509_v44  ;;  %v1520_v55 = vadd.f32 %v10839_v0, %v1519_v45  ;;  %vm1541_vm12 = vcmp.eq.f32.partialorder %v1540_v30, 8.507059e+37 }
 0x10e   :  { %v9591_v31 = vpop.eup %9590  ;;  %v1532_v29 = vmul.f32 %v10863_v23, %v10831_v57  ;;  %vm1526_vm5 = vcmp.eq.f32.partialorder %v1525_v41, 8.507059e+37  ;;  %vm1537_vm7 = vweird.f32 %v10863_v23  ;;  %vm1571_vm13 = vcmp.eq.f32.partialorder %v1570_v38, 8.507059e+37 }
 0x10f   :  { %v10874_v36 = vpop.eup %9592  ;;  %v1524_v40 = vsel %vm10914_vm2, %v10839_v0, %v1520_v55  ;;  %vm10948_vm10 = vmor %vm1536_vm6, %vm1537_vm7 }
 0x110   :  { %v1562_v47 = vmul.f32 %v10874_v36, %v10833_v60  ;;  %v9595_v52 = vpop.eup %9594  ;;  %v1533_v53 = vsub.f32 1.0, %v1532_v29  ;;  %v10937_v28 = vsel %vm1526_vm5, %v1528_v18, %v1524_v40  ;;  %vm1567_vm9 = vweird.f32 %v10874_v36 }
 0x111   :  { %v9597_v35 = vpop.eup %9596  ;;  %vm10955_vm11 = vmor %vm1566_vm8, %vm1567_vm9  ;;  %v1727_v18 = vmul.f32 0.0, %v10837_v63 }
 0x112   :  { %v1563_v59 = vsub.f32 1.0, %v1562_v47  ;;  %v1534_v42 = vmul.f32 %v10863_v23, %v1533_v53 }
 0x114   :  { %v1564_v16 = vmul.f32 %v10874_v36, %v1563_v59  ;;  %v1535_v0 = vadd.f32 %v10863_v23, %v1534_v42  ;;  %v749_v59 = vpop.f32.mrf.mxu0 }
 0x116   :  { %v1565_v32 = vadd.f32 %v10874_v36, %v1564_v16  ;;  %v1539_v46 = vsel %vm10948_vm10, %v10863_v23, %v1535_v0 }
 0x118   :  { %v1569_v47 = vsel %vm10955_vm11, %v10874_v36, %v1565_v32  ;;  %v8466_v36 = vmul.f32 -1.442695, %v10841_v3 }
 0x11c   :  { %v751_v6 = vpop.f32.mrf.mxu0 }
 0x124   :  { %v754_v16 = vpop.f32.mrf.mxu0 }
 0x132   :  { %v1760_v62 = vpop.permute.xlu0 %1759 }
 0x133   :  { %v1807_v4 = vmul.f32 %v1760_v62, %v10837_v63  ;;  %v1376_v62 = vpop.f32.mrf.mxu1 }
 0x134   :  { %v1401_v19 = vadd.f32 %v9181_v9, %v1376_v62 }
 0x135   :  { %1839 = vrot.lane.b32.xlu0 %v1807_v4, %s10624_s3  ;;  %v1550_v4 = vadd.f32 %v10848_v8, %v1549_v49 }
 0x136   :  { %9598 = vtanh.f32 %v1401_v19  ;;  %v8469_v42 = vmul.f32 -1.442695, %v1401_v19 }
 0x137   :  { %v1554_v21 = vsel %vm10919_vm3, %v10848_v8, %v1550_v4 }
 0x13a   :  { %v1762_v27 = vpop.permute.xlu0 %1761  ;;  %v10879_v43 = vpop.permute.xlu2 %1767 }
 0x13b   :  { %v1808_v33 = vmul.f32 %v1762_v27, %v10867_v26  ;;  %v1542_v27 = vand.u32 2147483648, %v10831_v57  ;;  %v1378_v44 = vpop.f32.mrf.mxu1 }
 0x13c   :  { %v1402_v48 = vadd.f32 %v9182_v39, %v1378_v44  ;;  %v9599_v50 = vpop.eup %9598 }
 0x13d   :  { %1841 = vrot.lane.b32.xlu1 %v1808_v33, %s10624_s3  ;;  %1773 = vrot.lane.b32.xlu0 %v9591_v31, %s10624_s3  ;;  %v10943_v31 = vsel %vm1556_vm4, %v1558_v11, %v1554_v21  ;;  %v1572_v33 = vand.u32 2147483648, %v10833_v60  ;;  %v1543_v45 = vor.u32 1.1754944e-38, %v1542_v27  ;;  %v752_v11 = vadd.f32 %v10771_v22, %v751_v6 }
 0x13e   :  { %9600 = vtanh.f32 %v1402_v48 }
 0x13f   :  { %v1573_v60 = vor.u32 1.1754944e-38, %v1572_v33  ;;  %v10968_v41 = vsel %vm1541_vm12, %v1543_v45, %v1539_v46  ;;  %9602 = vpow2.f32 %v8466_v36 }
 0x141   :  { %v10972_v53 = vsel %vm1571_vm13, %v1573_v60, %v1569_v47 }
 0x142   :  { %v1764_v54 = vpop.permute.xlu1 %1763  ;;  %v1770_v12 = vpop.permute.xlu2 %1769 }
 0x143   :  { %v1809_v58 = vmul.f32 %v1764_v54, %v10895_v51  ;;  %v1812_v57 = vmul.f32 %v1770_v12, %v10943_v31  ;;  %v1381_v3 = vpop.f32.mrf.mxu1 }
 0x144   :  { %v9601_v23 = vpop.eup %9600 }
 0x145   :  { %1843 = vrot.lane.b32.xlu1 %v1809_v58, %s10624_s3  ;;  %1775 = vrot.lane.b32.xlu0 %v9595_v52, %s10624_s3  ;;  %v1811_v52 = vmul.f32 %v10879_v43, %v10968_v41  ;;  %v9603_v55 = vpop.eup %9602  ;;  %v8467_v43 = vmul.f32 -1.442695, %v10865_v24  ;;  %v8468_v58 = vmul.f32 -1.442695, %v10906_v1  ;;  %v8470_v24 = vmul.f32 -1.442695, %v1402_v48 }
 0x146   :  { %v1462_v56 = vadd.f32 1.0, %v9603_v55  ;;  %v750_v1 = vadd.f32 %v10771_v22, %v749_v59  ;;  %v1728_v48 = vmul.f32 0.0, %v10867_v26 }
 0x148   :  { %9604 = vrcp.f32 %v1462_v56  ;;  %v8872_v27 = vpack.c.bf16 %v752_v11, %v750_v1  ;;  %vm1581_vm14 = vweird.f32 %v1462_v56  ;;  %v1587_v32 = vand.u32 2147483648, %v1462_v56 }
 0x149   :  { %9606 = vpow2.f32 %v8467_v43 }
 0x14a   :  { %v1766_v8 = vpop.permute.xlu1 %1765  ;;  %v1772_v49 = vpop.permute.xlu2 %1771  ;;  %9608 = vpow2.f32 %v8468_v58  ;;  %v9186_v38 = vunpack.c.h.bf16 %v8872_v27  ;;  %v1588_v44 = vor.u32 1.1754944e-38, %v1587_v32  ;;  %v9185_v47 = vunpack.c.l.bf16 %v8872_v27  ;;  %v8792_v27 = vld [vmem:[%s14437_s1 + $0x148] sm:$0xff] }
 0x14b   :  { %v1810_v34 = vmul.f32 %v1766_v8, %v10937_v28  ;;  %v1813_v54 = vmul.f32 %v1772_v49, %v10972_v53  ;;  %v1383_v30 = vpop.f32.mrf.mxu1 }
 0x14c   :  { %v11013_v49 = vadd.f32 %v9186_v38, %v1383_v30  ;;  %v11023_v59 = vadd.f32 %v9185_v47, %v1381_v3  ;;  %v1730_v47 = vmul.f32 0.0, %v10937_v28 }
 0x14d   :  { %1845 = vrot.lane.b32.xlu2 %v1810_v34, %s10624_s3  ;;  %1777 = vrot.lane.b32.xlu1 %v9597_v35, %s10624_s3  ;;  %v1585_v35 = vand.u32 2147483647, %v1462_v56 }
 0x14e   :  { %1849 = vrot.lane.b32.xlu0 %v1812_v57, %s10624_s3  ;;  %v9605_v61 = vpop.eup %9604 }
 0x14f   :  { %v9607_v62 = vpop.eup %9606  ;;  %v1577_v9 = vmul.f32 %v9605_v61, %v1462_v56  ;;  %vm1582_vm15 = vweird.f32 %v9605_v61  ;;  %vm1586_vm2 = vcmp.eq.f32.partialorder %v1585_v35, 8.507059e+37 }
 0x150   :  { %v9609_v4 = vpop.eup %9608  ;;  %v10982_v7 = vadd.f32 1.0, %v9607_v62  ;;  %vm10997_vm1 = vmor %vm1581_vm14, %vm1582_vm15  ;;  %v755_v62 = vadd.f32 %v10771_v22, %v754_v16 }
 0x151   :  { %v10984_v10 = vadd.f32 1.0, %v9609_v4  ;;  %v1578_v40 = vsub.f32 1.0, %v1577_v9 }
 0x152   :  { %9610 = vrcp.f32 %v10982_v7  ;;  %vm1596_vm3 = vweird.f32 %v10982_v7  ;;  %v1602_v11 = vand.u32 2147483648, %v10982_v7 }
 0x153   :  { %9612 = vrcp.f32 %v10984_v10  ;;  %v1579_v12 = vmul.f32 %v9605_v61, %v1578_v40  ;;  %vm1611_vm5 = vweird.f32 %v10984_v10  ;;  %v1615_v32 = vand.u32 2147483647, %v10984_v10 }
 0x154   :  { %9614 = vpow2.f32 %v8469_v42  ;;  %v1729_v42 = vmul.f32 0.0, %v10895_v51  ;;  %v1603_v38 = vor.u32 1.1754944e-38, %v1602_v11 }
 0x155   :  { %1847 = vrot.lane.b32.xlu2 %v1811_v52, %s10624_s3  ;;  %1779 = vrot.lane.b32.xlu1 %v9599_v50, %s10624_s3  ;;  %9616 = vpow2.f32 %v8470_v24  ;;  %v1580_v34 = vadd.f32 %v9605_v61, %v1579_v12  ;;  %v1617_v12 = vand.u32 2147483648, %v10984_v10  ;;  %vm1616_vm10 = vcmp.eq.f32.partialorder %v1615_v32, 8.507059e+37 }
 0x156   :  { %1851 = vrot.lane.b32.xlu0 %v1813_v54, %s10624_s3  ;;  %v756_v54 = vpop.f32.mrf.mxu0 }
 0x157   :  { %v1584_v46 = vsel %vm10997_vm1, %v9605_v61, %v1580_v34  ;;  %v11025_v61 = vpop.f32.mrf.mxu1  ;;  %v757_v4 = vadd.f32 %v10771_v22, %v756_v54 }
 0x158   :  { %v10991_v21 = vpop.eup %9610  ;;  %v11018_v36 = vsel %vm1586_vm2, %v1588_v44, %v1584_v46 }
 0x159   :  { %v10993_v0 = vpop.eup %9612  ;;  %v1592_v39 = vmul.f32 %v10991_v21, %v10982_v7  ;;  %vm1597_vm4 = vweird.f32 %v10991_v21  ;;  %v8877_v24 = vpack.c.bf16 %v757_v4, %v755_v62 }
 0x15a   :  { %v9615_v33 = vpop.eup %9614  ;;  %v1607_v45 = vmul.f32 %v10993_v0, %v10984_v10  ;;  %vm1612_vm6 = vweird.f32 %v10993_v0  ;;  %vm11049_vm7 = vmor %vm1596_vm3, %vm1597_vm4 }
 0x15b   :  { %v9617_v57 = vpop.eup %9616  ;;  %v11004_v29 = vadd.f32 1.0, %v9615_v33  ;;  %v1593_v52 = vsub.f32 1.0, %v1592_v39  ;;  %vm11058_vm8 = vmor %vm1611_vm5, %vm1612_vm6  ;;  %v1618_v39 = vor.u32 1.1754944e-38, %v1617_v12 }
 0x15c   :  { %v11010_v60 = vadd.f32 1.0, %v9617_v57  ;;  %v1608_v56 = vsub.f32 1.0, %v1607_v45  ;;  %v9190_v57 = vunpack.c.h.bf16 %v8877_v24 }
 0x15d   :  { %1781 = vrot.lane.b32.xlu2 %v9601_v23, %s10624_s3  ;;  %v1594_v6 = vmul.f32 %v10991_v21, %v1593_v52  ;;  %vm1626_vm11 = vweird.f32 %v11004_v29  ;;  %v1630_v12 = vand.u32 2147483647, %v11004_v29 }
 0x15e   :  { %v1609_v9 = vmul.f32 %v10993_v0, %v1608_v56  ;;  %vm1641_vm13 = vweird.f32 %v11010_v60  ;;  %v1645_v32 = vand.u32 2147483647, %v11010_v60 }
 0x15f   :  { %v1595_v1 = vadd.f32 %v10991_v21, %v1594_v6  ;;  %v1388_v44 = vpop.f32.mrf.mxu1  ;;  %vm1631_vm2 = vcmp.eq.f32.partialorder %v1630_v12, 8.507059e+37 }
 0x160   :  { %v1610_v30 = vadd.f32 %v10993_v0, %v1609_v9  ;;  %v11084_v54 = vadd.f32 %v9190_v57, %v1388_v44  ;;  %vm1646_vm3 = vcmp.eq.f32.partialorder %v1645_v32, 8.507059e+37 }
 0x161   :  { %v1599_v10 = vsel %vm11049_vm7, %v10991_v21, %v1595_v1  ;;  %v1647_v1 = vand.u32 2147483648, %v11010_v60 }
 0x162   :  { %v1614_v45 = vsel %vm11058_vm8, %v10993_v0, %v1610_v30 }
 0x1a7   :  { %v1840_v19 = vpop.permute.xlu0 %1839  ;;  %v1846_v37 = vpop.permute.xlu2 %1845 }
 0x1a8   :  { %v10995_v8 = vadd.f32 %v1840_v19, %v1727_v18  ;;  %v1600_v19 = vand.u32 2147483647, %v10982_v7  ;;  %v8791_v7 = vld [vmem:[%s14437_s1 + $0x140] sm:$0xff]  ;;  %v11082_v52 = vadd.f32 %v1846_v37, %v1730_v47  ;;  %v1648_v37 = vor.u32 1.1754944e-38, %v1647_v1 }
 0x1a9   :  { %8427 = vmatmul.msk.bf16.vlgmr.msra.gmra.mxu2 %vm517_vm0, %v8791_v7 }
 0x1aa   :  { %9618 = vtanh.f32 %v10995_v8  ;;  %vm1601_vm9 = vcmp.eq.f32.partialorder %v1600_v19, 8.507059e+37  ;;  %4332 = vmatpush.bf16.msra.mxu2 %v10705_v2 }
 0x1ab   :  { %9620 = vrcp.f32 %v11004_v29  ;;  %v11086_v0 = vsel %vm1601_vm9, %v1603_v38, %v1599_v10  ;;  %v1732_v10 = vmul.f32 0.0, %v10943_v31 }
 0x1ac   :  { %9622 = vtanh.f32 %v11013_v49 }
 0x1ad   :  { %9624 = vrcp.f32 %v11010_v60 }
 0x1ae   :  { %4333 = vmatpush.bf16.msra.mxu2 %v10717_v5 }
 0x1af   :  { %v1842_v50 = vpop.permute.xlu1 %1841  ;;  %v1774_v55 = vpop.permute.xlu0 %1773 }
 0x1b0   :  { %v11016_v23 = vadd.f32 %v1842_v50, %v1728_v48  ;;  %v9619_v43 = vpop.eup %9618  ;;  %v1814_v58 = vmul.f32 %v1774_v55, %v11018_v36  ;;  %v9189_v50 = vunpack.c.l.bf16 %v8877_v24  ;;  %v11088_v55 = vsel %vm1616_vm10, %v1618_v39, %v1614_v45  ;;  %v1848_v9 = vpop.permute.xlu2 %1847 }
 0x1b1   :  { %1935 = vrot.lane.b32.xlu2 %v9619_v43, %s10624_s3  ;;  %v11037_v3 = vpop.eup %9620 }
 0x1b2   :  { %9626 = vtanh.f32 %v11016_v23  ;;  %1853 = vrot.lane.b32.xlu1 %v1814_v58, %s10624_s3  ;;  %v9623_v22 = vpop.eup %9622  ;;  %v1622_v46 = vmul.f32 %v11037_v3, %v11004_v29  ;;  %v11095_v2 = vadd.f32 %v9189_v50, %v11025_v61  ;;  %vm1627_vm12 = vweird.f32 %v11037_v3 }
 0x1b3   :  { %9628 = vtanh.f32 %v11023_v59  ;;  %v11045_v16 = vpop.eup %9624  ;;  %vm11120_vm15 = vmor %vm1626_vm11, %vm1627_vm12  ;;  %v8472_v50 = vmul.f32 -1.442695, %v11013_v49 }
 0x1b4   :  { %v1637_v21 = vmul.f32 %v11045_v16, %v11010_v60  ;;  %v1623_v4 = vsub.f32 1.0, %v1622_v46  ;;  %vm1642_vm14 = vweird.f32 %v11045_v16 }
 0x1b5   :  { %vm11124_vm1 = vmor %vm1641_vm13, %vm1642_vm14 }
 0x1b6   :  { %v1638_v6 = vsub.f32 1.0, %v1637_v21 }
 0x1b7   :  { %v1844_v40 = vpop.permute.xlu1 %1843  ;;  %v1776_v48 = vpop.permute.xlu0 %1775 }
 0x1b8   :  { %v11047_v18 = vadd.f32 %v1844_v40, %v1729_v42  ;;  %v9627_v33 = vpop.eup %9626  ;;  %v1815_v58 = vmul.f32 %v1776_v48, %v11086_v0  ;;  %v1624_v42 = vmul.f32 %v11037_v3, %v1623_v4  ;;  %v1639_v5 = vmul.f32 %v11045_v16, %v1638_v6  ;;  %v1782_v39 = vpop.permute.xlu2 %1781 }
 0x1b9   :  { %v9629_v35 = vpop.eup %9628  ;;  %1937 = vrot.lane.b32.xlu0 %v9627_v33, %s10624_s3  ;;  %1785 = vrot.lane.b32.xlu2 %v9623_v22, %s10624_s3  ;;  %v1731_v22 = vmul.f32 0.0, %v10968_v41  ;;  %v1632_v40 = vand.u32 2147483648, %v11004_v29  ;;  %v8471_v6 = vmul.f32 -1.442695, %v11023_v59  ;;  %v8474_v59 = vmul.f32 -1.442695, %v11084_v54 }
 0x1ba   :  { %9630 = vtanh.f32 %v11047_v18  ;;  %1783 = vrot.lane.b32.xlu1 %v9629_v35, %s10624_s3  ;;  %v1625_v11 = vadd.f32 %v11037_v3, %v1624_v42  ;;  %v1640_v30 = vadd.f32 %v11045_v16, %v1639_v5  ;;  %8428 = vmatmul.msk.bf16.gmra.mxu2 %vm517_vm0, %v8792_v27  ;;  %v8796_v42 = vld [vmem:[%s14437_s1 + $0x168] sm:$0xff]  ;;  %v8473_v27 = vmul.f32 -1.442695, %v11095_v2 }
 0x1bb   :  { %9632 = vtanh.f32 %v11084_v54  ;;  %v11107_v24 = vadd.f32 %v1848_v9, %v1731_v22  ;;  %v1633_v29 = vor.u32 1.1754944e-38, %v1632_v40  ;;  %v8797_v54 = vld [vmem:[%s14437_s1 + $0x170] sm:$0xff] }
 0x1bc   :  { %9634 = vtanh.f32 %v11082_v52  ;;  %v1629_v7 = vsel %vm11120_vm15, %v11037_v3, %v1625_v11  ;;  %v1644_v57 = vsel %vm11124_vm1, %v11045_v16, %v1640_v30  ;;  %v8793_v16 = vld [vmem:[%s14437_s1 + $0x150] sm:$0xff] }
 0x1bd   :  { %9636 = vtanh.f32 %v11095_v2  ;;  %v11142_v45 = vsel %vm1631_vm2, %v1633_v29, %v1629_v7  ;;  %v11144_v46 = vsel %vm1646_vm3, %v1648_v37, %v1644_v57 }
 0x1be   :  { %9638 = vtanh.f32 %v11107_v24  ;;  %v1818_v21 = vmul.f32 %v1782_v39, %v11144_v46 }
 0x1bf   :  { %v1778_v56 = vpop.permute.xlu1 %1777 }
 0x1c0   :  { %v9631_v43 = vpop.eup %9630  ;;  %v1816_v62 = vmul.f32 %v1778_v56, %v11088_v55  ;;  %v1850_v60 = vpop.permute.xlu0 %1849  ;;  %v8794_v56 = vld [vmem:[%s14437_s1 + $0x158] sm:$0xff] }
 0x1c1   :  { %1855 = vrot.lane.b32.xlu0 %v1815_v58, %s10624_s3  ;;  %1939 = vrot.lane.b32.xlu2 %v9631_v43, %s10624_s3  ;;  %v9633_v61 = vpop.eup %9632  ;;  %v11140_v44 = vadd.f32 %v1850_v60, %v1732_v10 }
 0x1c2   :  { %1857 = vrot.lane.b32.xlu1 %v1816_v62, %s10624_s3  ;;  %v9635_v19 = vpop.eup %9634  ;;  %v8795_v62 = vld [vmem:[%s14437_s1 + $0x160] sm:$0xff] }
 0x1c3   :  { %v9637_v34 = vpop.eup %9636  ;;  %9640 = vtanh.f32 %v11140_v44 }
 0x1c4   :  { %v9639_v47 = vpop.eup %9638  ;;  %9642 = vpow2.f32 %v8472_v50 }
 0x1c7   :  { %v1780_v38 = vpop.permute.xlu1 %1779 }
 0x1c8   :  { %v1817_v3 = vmul.f32 %v1780_v38, %v11142_v45  ;;  %v1852_v38 = vpop.permute.xlu0 %1851 }
 0x1c9   :  { %1941 = vrot.lane.b32.xlu0 %v9635_v19, %s10624_s3  ;;  %1789 = vrot.lane.b32.xlu2 %v9633_v61, %s10624_s3  ;;  %v9641_v48 = vpop.eup %9640 }
 0x1ca   :  { %1787 = vrot.lane.b32.xlu1 %v9637_v34, %s10624_s3  ;;  %8429 = vmatmul.msk.bf16.gmra.mxu2 %vm517_vm0, %v8793_v16  ;;  %v9643_v43 = vpop.eup %9642 }
 0x1cb   :  { %v1468_v58 = vadd.f32 1.0, %v9643_v43 }
 0x1cd   :  { %9644 = vrcp.f32 %v1468_v58  ;;  %vm1671_vm4 = vweird.f32 %v1468_v58  ;;  %v1677_v1 = vand.u32 2147483648, %v1468_v58  ;;  %v1675_v12 = vand.u32 2147483647, %v1468_v58 }
 0x1ce   :  { %9646 = vpow2.f32 %v8471_v6  ;;  %v1733_v6 = vmul.f32 0.0, %v10972_v53 }
 0x1cf   :  { %v1678_v19 = vor.u32 1.1754944e-38, %v1677_v1  ;;  %vm1676_vm7 = vcmp.eq.f32.partialorder %v1675_v12, 8.507059e+37 }
 0x1d1   :  { %1859 = vrot.lane.b32.xlu0 %v1817_v3, %s10624_s3  ;;  %1943 = vrot.lane.b32.xlu2 %v9639_v47, %s10624_s3 }
 0x1d2   :  { %1861 = vrot.lane.b32.xlu1 %v1818_v21, %s10624_s3 }
 0x1d3   :  { %v9645_v4 = vpop.eup %9644 }
 0x1d4   :  { %v1667_v49 = vmul.f32 %v9645_v4, %v1468_v58  ;;  %v9647_v22 = vpop.eup %9646  ;;  %vm1672_vm5 = vweird.f32 %v9645_v4  ;;  %v8798_v58 = vld [vmem:[%s14437_s1 + $0x178] sm:$0xff] }
 0x1d5   :  { %v1467_v61 = vadd.f32 1.0, %v9647_v22  ;;  %vm1673_vm6 = vmor %vm1671_vm4, %vm1672_vm5 }
 0x1d6   :  { %v1668_v9 = vsub.f32 1.0, %v1667_v49 }
 0x1d7   :  { %9648 = vrcp.f32 %v1467_v61  ;;  %vm1656_vm8 = vweird.f32 %v1467_v61  ;;  %v1662_v39 = vand.u32 2147483648, %v1467_v61  ;;  %v1660_v21 = vand.u32 2147483647, %v1467_v61 }
 0x1d8   :  { %v1669_v5 = vmul.f32 %v9645_v4, %v1668_v9  ;;  %9650 = vpow2.f32 %v8474_v59 }
 0x1d9   :  { %1945 = vrot.lane.b32.xlu0 %v9641_v48, %s10624_s3  ;;  %9652 = vpow2.f32 %v8473_v27  ;;  %v1663_v50 = vor.u32 1.1754944e-38, %v1662_v39  ;;  %vm1661_vm11 = vcmp.eq.f32.partialorder %v1660_v21, 8.507059e+37 }
 0x1da   :  { %8430 = vmatmul.msk.bf16.gmra.mxu2 %vm517_vm0, %v8794_v56  ;;  %v1670_v11 = vadd.f32 %v9645_v4, %v1669_v5 }
 0x1dc   :  { %v1674_v30 = vsel %vm1673_vm6, %v9645_v4, %v1670_v11  ;;  %v1734_v4 = vmul.f32 0.0, %v11018_v36  ;;  %v11204_v11 = vadd.f32 %v1852_v38, %v1733_v6 }
 0x1dd   :  { %v11173_v32 = vsel %vm1676_vm7, %v1678_v19, %v1674_v30  ;;  %v9649_v35 = vpop.eup %9648 }
 0x1de   :  { %v9651_v29 = vpop.eup %9650  ;;  %v1652_v37 = vmul.f32 %v9649_v35, %v1467_v61  ;;  %vm1657_vm9 = vweird.f32 %v9649_v35 }
 0x1df   :  { %v9653_v2 = vpop.eup %9652  ;;  %v11180_v60 = vadd.f32 1.0, %v9651_v29  ;;  %vm1658_vm10 = vmor %vm1656_vm8, %vm1657_vm9 }
 0x1e0   :  { %v11183_v7 = vadd.f32 1.0, %v9653_v2  ;;  %v1653_v57 = vsub.f32 1.0, %v1652_v37 }
 0x1e1   :  { %9654 = vrcp.f32 %v11180_v60  ;;  %vm1701_vm12 = vweird.f32 %v11180_v60 }
 0x1e2   :  { %9656 = vrcp.f32 %v11183_v7  ;;  %v1654_v10 = vmul.f32 %v9649_v35, %v1653_v57  ;;  %vm1686_vm14 = vweird.f32 %v11183_v7  ;;  %v1692_v29 = vand.u32 2147483648, %v11183_v7 }
 0x1e3   :  { %v1690_v2 = vand.u32 2147483647, %v11183_v7 }
 0x1e4   :  { %v1655_v47 = vadd.f32 %v9649_v35, %v1654_v10 }
 0x1e5   :  { %vm1691_vm4 = vcmp.eq.f32.partialorder %v1690_v2, 8.507059e+37 }
 0x1e6   :  { %v1659_v43 = vsel %vm1658_vm10, %v9649_v35, %v1655_v47 }
 0x1e7   :  { %v9655_v16 = vpop.eup %9654  ;;  %v11197_v9 = vsel %vm1661_vm11, %v1663_v50, %v1659_v43  ;;  %v1735_v50 = vmul.f32 0.0, %v11086_v0  ;;  %v1736_v43 = vmul.f32 0.0, %v11088_v55 }
 0x1e8   :  { %v11187_v48 = vpop.eup %9656  ;;  %v1697_v56 = vmul.f32 %v9655_v16, %v11180_v60  ;;  %vm1702_vm13 = vweird.f32 %v9655_v16 }
 0x1e9   :  { %vm1687_vm15 = vweird.f32 %v11187_v48  ;;  %vm11218_vm1 = vmor %vm1701_vm12, %vm1702_vm13 }
 0x1ea   :  { %8431 = vmatmul.msk.bf16.gmra.mxu2 %vm517_vm0, %v8795_v62  ;;  %v1682_v62 = vmul.f32 %v11187_v48, %v11183_v7  ;;  %v1698_v22 = vsub.f32 1.0, %v1697_v56  ;;  %vm11224_vm2 = vmor %vm1686_vm14, %vm1687_vm15  ;;  %v1693_v7 = vor.u32 1.1754944e-38, %v1692_v29 }
 0x1ec   :  { %v1683_v59 = vsub.f32 1.0, %v1682_v62  ;;  %v1699_v30 = vmul.f32 %v9655_v16, %v1698_v22 }
 0x1fa   :  { %8432 = vmatmul.msk.bf16.gmra.mxu2 %vm517_vm0, %v8796_v42 }
 0x20a   :  { %8433 = vmatmul.msk.bf16.gmra.mxu2 %vm517_vm0, %v8797_v54 }
 0x20b   :  { %v1936_v40 = vpop.permute.xlu2 %1935 }
 0x20c   :  { %v1983_v42 = vmul.f32 %v1936_v40, %v10837_v63  ;;  %v1684_v63 = vmul.f32 %v11187_v48, %v1683_v59 }
 0x20e   :  { %v1685_v54 = vadd.f32 %v11187_v48, %v1684_v63 }
 0x210   :  { %v1689_v47 = vsel %vm11224_vm2, %v11187_v48, %v1685_v54 }
 0x211   :  { %v11247_v6 = vsel %vm1691_vm4, %v1693_v7, %v1689_v47  ;;  %v8760_v47 = vld [vmem:[%s14437_s1 + $0x48] sm:$0xff] }
 0x213   :  { %v1786_v33 = vpop.permute.xlu2 %1785 }
 0x214   :  { %v1820_v34 = vmul.f32 %v1786_v33, %v11173_v32  ;;  %v1700_v33 = vadd.f32 %v9655_v16, %v1699_v30 }
 0x216   :  { %1865 = vrot.lane.b32.xlu0 %v1820_v34, %s10624_s3  ;;  %v1705_v34 = vand.u32 2147483647, %v11180_v60 }
 0x218   :  { %vm1706_vm3 = vcmp.eq.f32.partialorder %v1705_v34, 8.507059e+37 }
 0x21a   :  { %8434 = vmatmul.msk.bf16.gmra.mxu2 %vm517_vm0, %v8798_v58 }
 0x21b   :  { %v1940_v19 = vpop.permute.xlu2 %1939 }
 0x223   :  { %v1790_v21 = vpop.permute.xlu2 %1789 }
 0x224   :  { %v1854_v3 = vpop.permute.xlu1 %1853 }
 0x225   :  { %v11201_v5 = vadd.f32 %v1854_v3, %v1734_v4  ;;  %v1704_v3 = vsel %vm11218_vm1, %v9655_v16, %v1700_v33  ;;  %v1985_v16 = vmul.f32 %v1940_v19, %v10895_v51  ;;  %v1737_v51 = vmul.f32 0.0, %v11142_v45 }
 0x227   :  { %9658 = vtanh.f32 %v11201_v5 }
 0x228   :  { %9660 = vtanh.f32 %v11204_v11 }
 0x22b   :  { %v1938_v49 = vpop.permute.xlu0 %1937  ;;  %v1944_v33 = vpop.permute.xlu2 %1943 }
 0x22c   :  { %v1984_v61 = vmul.f32 %v1938_v49, %v10867_v26  ;;  %v1784_v1 = vpop.permute.xlu1 %1783  ;;  %v1707_v26 = vand.u32 2147483648, %v11180_v60  ;;  %v8799_v60 = vld [vmem:[%s14437_s1 + $0x180] sm:$0xff] }
 0x22d   :  { %v1819_v12 = vmul.f32 %v1784_v1, %v11197_v9  ;;  %v9659_v57 = vpop.eup %9658  ;;  %8435 = vmatmul.msk.bf16.gmra.mxu2 %vm517_vm0, %v8799_v60  ;;  %v11253_v1 = vpop.f32.mrf.mxu2  ;;  %v8759_v60 = vld [vmem:[%s14437_s1 + $0x40] sm:$0xff] }
 0x22e   :  { %v2032_v27 = vpack.c.bf16 %v1984_v61, %v1983_v42  ;;  %v9661_v38 = vpop.eup %9660  ;;  %v1708_v39 = vor.u32 1.1754944e-38, %v1707_v26  ;;  %8395 = vmatmul.msk.bf16.gmra.mxu0 %vm517_vm0, %v8759_v60  ;;  %v1741_v60 = vmul.f32 0.0, %v11247_v6 }
 0x22f   :  { %1863 = vrot.lane.b32.xlu2 %v1819_v12, %s10624_s3  ;;  %v1738_v12 = vmul.f32 0.0, %v11144_v46 }
 0x230   :  { %2048 = vrot.lane.b32.xlu1 %v2032_v27, %s10625_s21  ;;  %v11239_v56 = vsel %vm1706_vm3, %v1708_v39, %v1704_v3  ;;  %v8802_v39 = vld [vmem:[%s14437_s1 + $0x198] sm:$0xff] }
 0x231   :  { %v1822_v49 = vmul.f32 %v1790_v21, %v11239_v56  ;;  %v1740_v21 = vmul.f32 0.0, %v11173_v32 }
 0x233   :  { %v1856_v40 = vpop.permute.xlu0 %1855 }
 0x234   :  { %v1858_v35 = vpop.permute.xlu1 %1857  ;;  %v11244_v62 = vadd.f32 %v1856_v40, %v1735_v50  ;;  %v8800_v40 = vld [vmem:[%s14437_s1 + $0x188] sm:$0xff] }
 0x235   :  { %v11250_v42 = vadd.f32 %v1858_v35, %v1736_v43  ;;  %v11266_v63 = vpop.f32.mrf.mxu2  ;;  %v1987_v35 = vmul.f32 %v1944_v33, %v10968_v41 }
 0x236   :  { %9662 = vtanh.f32 %v11244_v62 }
 0x237   :  { %1949 = vrot.lane.b32.xlu2 %v9659_v57, %s10624_s3  ;;  %9664 = vtanh.f32 %v11250_v42 }
 0x238   :  { %1947 = vrot.lane.b32.xlu1 %v9661_v38, %s10624_s3  ;;  %v8801_v38 = vld [vmem:[%s14437_s1 + $0x190] sm:$0xff] }
 0x23b   :  { %v1942_v58 = vpop.permute.xlu0 %1941 }
 0x23c   :  { %v1986_v4 = vmul.f32 %v1942_v58, %v10937_v28  ;;  %v1788_v48 = vpop.permute.xlu1 %1787  ;;  %v9663_v30 = vpop.eup %9662  ;;  %v1739_v58 = vmul.f32 0.0, %v11197_v9 }
 0x23d   :  { %v1821_v22 = vmul.f32 %v1788_v48, %v11247_v6  ;;  %v9665_v26 = vpop.eup %9664  ;;  %8436 = vmatmul.msk.bf16.gmra.mxu2 %vm517_vm0, %v8800_v40  ;;  %v11278_v2 = vpop.f32.mrf.mxu2 }
 0x23e   :  { %v2033_v61 = vpack.c.bf16 %v1986_v4, %v1985_v16  ;;  %8396 = vmatmul.msk.bf16.gmra.mxu0 %vm517_vm0, %v8760_v47 }
 0x23f   :  { %1869 = vrot.lane.b32.xlu2 %v1822_v49, %s10624_s3 }
 0x240   :  { %1867 = vrot.lane.b32.xlu1 %v1821_v22, %s10624_s3  ;;  %2050 = vrot.lane.b32.xlu0 %v2033_v61, %s10625_s21 }
 0x243   :  { %v1860_v28 = vpop.permute.xlu0 %1859 }
 0x244   :  { %v11262_v59 = vadd.f32 %v1860_v28, %v1737_v51  ;;  %v1862_v27 = vpop.permute.xlu1 %1861  ;;  %v1742_v28 = vmul.f32 0.0, %v11239_v56 }
 0x245   :  { %v11264_v19 = vadd.f32 %v1862_v27, %v1738_v12  ;;  %v11283_v10 = vpop.f32.mrf.mxu2 }
 0x246   :  { %9666 = vtanh.f32 %v11262_v59  ;;  %14472 = vst [vmem:[#allocation3_spill] sm:$0xff] %v11283_v10 }
 0x247   :  { %9668 = vtanh.f32 %v11264_v19 }
 0x248   :  { %1953 = vrot.lane.b32.xlu1 %v9665_v26, %s10624_s3  ;;  %1951 = vrot.lane.b32.xlu0 %v9663_v30, %s10624_s3  ;;  %v8761_v30 = vld [vmem:[%s14437_s1 + $0x50] sm:$0xff] }
 0x24b   :  { %v1946_v34 = vpop.permute.xlu0 %1945 }
 0x24c   :  { %v1988_v29 = vmul.f32 %v1946_v34, %v10943_v31  ;;  %v9667_v37 = vpop.eup %9666  ;;  %v11338_v34 = vld [vmem:[%s14435_s4 + $0x8] sm:$0xff] }
 0x24d   :  { %v9669_v57 = vpop.eup %9668  ;;  %8437 = vmatmul.msk.bf16.gmra.mxu2 %vm517_vm0, %v8801_v38  ;;  %v11289_v31 = vpop.f32.mrf.mxu2 }
 0x24e   :  { %v2034_v54 = vpack.c.bf16 %v1988_v29, %v1987_v35  ;;  %14473 = vst [vmem:[#allocation4_spill] sm:$0xff] %v11289_v31  ;;  %8397 = vmatmul.msk.bf16.gmra.mxu0 %vm517_vm0, %v8761_v30  ;;  %v11346_v29 = vld [vmem:[%s14435_s4] sm:$0xff] }
 0x250   :  { %1957 = vrot.lane.b32.xlu1 %v9669_v57, %s10624_s3  ;;  %1955 = vrot.lane.b32.xlu0 %v9667_v37, %s10624_s3 }
 0x251   :  { %2052 = vrot.lane.b32.xlu2 %v2034_v54, %s10625_s21 }
 0x255   :  { %v11291_v41 = vpop.f32.mrf.mxu2 }
 0x256   :  { %14474 = vst [vmem:[#allocation5_spill] sm:$0xff] %v11291_v41 }
 0x25d   :  { %8438 = vmatmul.msk.bf16.gmra.mxu2 %vm517_vm0, %v8802_v39  ;;  %v11300_v3 = vpop.f32.mrf.mxu2 }
 0x25e   :  { %14475 = vst [vmem:[#allocation6_spill] sm:$0xff] %v11300_v3 }
 0x265   :  { %v11303_v7 = vpop.f32.mrf.mxu2 }
 0x266   :  { %14476 = vst [vmem:[#allocation7_spill] sm:$0xff] %v11303_v7 }
 0x26d   :  { %v11310_v50 = vpop.f32.mrf.mxu2 }
 0x26e   :  { %14477 = vst [vmem:[#allocation8_spill] sm:$0xff] %v11310_v50 }
 0x275   :  { %v11319_v61 = vpop.f32.mrf.mxu2 }
 0x276   :  { %14478 = vst [vmem:[#allocation9_spill] sm:$0xff] %v11319_v61 }
 0x27d   :  { %v11329_v26 = vpop.f32.mrf.mxu2 }
 0x27e   :  { %14479 = vst [vmem:[#allocation10_spill] sm:$0xff] %v11329_v26 }
 0x285   :  { %v11341_v35 = vpop.f32.mrf.mxu2 }
 0x286   :  { %14480 = vst [vmem:[#allocation11_spill] sm:$0xff] %v11341_v35 }
 0x288   :  { %v1866_v43 = vpop.permute.xlu0 %1865 }
 0x289   :  { %v11313_v16 = vadd.f32 %v1866_v43, %v1740_v21  ;;  %v1864_v4 = vpop.permute.xlu2 %1863 }
 0x28a   :  { %v11315_v48 = vadd.f32 %v1864_v4, %v1739_v58 }
 0x28b   :  { %9670 = vtanh.f32 %v11313_v16 }
 0x28c   :  { %9672 = vtanh.f32 %v11315_v48 }
 0x28d   :  { %v11352_v39 = vpop.f32.mrf.mxu2 }
 0x28e   :  { %14481 = vst [vmem:[#allocation12_spill] sm:$0xff] %v11352_v39 }
 0x291   :  { %v9671_v49 = vpop.eup %9670  ;;  %v1950_v22 = vpop.permute.xlu2 %1949 }
 0x292   :  { %v9673_v51 = vpop.eup %9672  ;;  %1961 = vrot.lane.b32.xlu1 %v9671_v49, %s10624_s3  ;;  %v1990_v54 = vmul.f32 %v1950_v22, %v11018_v36 }
 0x293   :  { %1959 = vrot.lane.b32.xlu0 %v9673_v51, %s10624_s3 }
 0x295   :  { %v11359_v58 = vpop.f32.mrf.mxu2 }
 0x296   :  { %14482 = vst [vmem:[#allocation13_spill] sm:$0xff] %v11359_v58 }
 0x299   :  { %v1870_v12 = vpop.permute.xlu2 %1869 }
 0x29a   :  { %v11324_v27 = vadd.f32 %v1870_v12, %v1742_v28  ;;  %v8762_v28 = vld [vmem:[%s14437_s1 + $0x58] sm:$0xff] }
 0x29b   :  { %8398 = vmatmul.msk.bf16.gmra.mxu0 %vm517_vm0, %v8762_v28 }
 0x29c   :  { %9674 = vtanh.f32 %v11324_v27 }
 0x2a2   :  { %v9675_v40 = vpop.eup %9674  ;;  %v2049_v33 = vpop.permute.xlu1 %2048 }
 0x2a3   :  { %8475 = vmatmul.msk.bf16.vlgmr.msrb.gmra.mxu2 %vm517_vm0, %v2049_v33  ;;  %1965 = vrot.lane.b32.xlu1 %v9675_v40, %s10624_s3 }
 0x2a4   :  { %6570 = vmatpush.bf16.msrb.mxu2 %v11338_v34 }
 0x2a8   :  { %6571 = vmatpush.bf16.msrb.mxu2 %v11346_v29 }
 0x2aa   :  { %v1948_v37 = vpop.permute.xlu1 %1947 }
 0x2ab   :  { %v1989_v57 = vmul.f32 %v1948_v37, %v10972_v53  ;;  %v2053_v12 = vpop.permute.xlu2 %2052 }
 0x2ad   :  { %v2035_v38 = vpack.c.bf16 %v1990_v54, %v1989_v57 }
 0x2af   :  { %2054 = vrot.lane.b32.xlu2 %v2035_v38, %s10625_s21 }
 0x2b2   :  { %v1868_v47 = vpop.permute.xlu1 %1867  ;;  %v2051_v21 = vpop.permute.xlu0 %2050 }
 0x2b3   :  { %v11355_v43 = vadd.f32 %v1868_v47, %v1741_v60  ;;  %8476 = vmatmul.msk.bf16.gmra.mxu2 %vm517_vm0, %v2051_v21  ;;  %v8763_v60 = vld [vmem:[%s14437_s1 + $0x60] sm:$0xff]  ;;  %v8764_v21 = vld [vmem:[%s14437_s1 + $0x68] sm:$0xff] }
 0x2b4   :  { %8399 = vmatmul.msk.bf16.gmra.mxu0 %vm517_vm0, %v8763_v60 }
 0x2b5   :  { %9676 = vtanh.f32 %v11355_v43 }
 0x2ba   :  { %v1954_v36 = vpop.permute.xlu1 %1953  ;;  %v1952_v4 = vpop.permute.xlu0 %1951 }
 0x2bb   :  { %v9677_v53 = vpop.eup %9676  ;;  %v1992_v49 = vmul.f32 %v1954_v36, %v11088_v55  ;;  %v1991_v22 = vmul.f32 %v1952_v4, %v11086_v0  ;;  %v11372_v0 = vpop.f32.mrf.mxu2 }
 0x2bc   :  { %1963 = vrot.lane.b32.xlu0 %v9677_v53, %s10624_s3  ;;  %14483 = vst [vmem:[#allocation14_spill] sm:$0xff] %v11372_v0 }
 0x2bd   :  { %v2036_v51 = vpack.c.bf16 %v1992_v49, %v1991_v22  ;;  %v759_v22 = vpop.f32.mrf.mxu0 }
 0x2bf   :  { %2056 = vrot.lane.b32.xlu2 %v2036_v51, %s10625_s21 }
 0x2c2   :  { %v1958_v30 = vpop.permute.xlu1 %1957  ;;  %v1956_v40 = vpop.permute.xlu0 %1955 }
 0x2c3   :  { %v1994_v33 = vmul.f32 %v1958_v30, %v11144_v46  ;;  %v1993_v55 = vmul.f32 %v1956_v40, %v11142_v45  ;;  %8477 = vmatmul.msk.bf16.gmra.mxu2 %vm517_vm0, %v2053_v12  ;;  %v11375_v54 = vpop.f32.mrf.mxu2 }
 0x2c4   :  { %14484 = vst [vmem:[#allocation15_spill] sm:$0xff] %v11375_v54  ;;  %8400 = vmatmul.msk.bf16.gmra.mxu0 %vm517_vm0, %v8764_v21 }
 0x2c5   :  { %v2037_v37 = vpack.c.bf16 %v1994_v33, %v1993_v55  ;;  %v761_v30 = vpop.f32.mrf.mxu0 }
 0x2c7   :  { %2058 = vrot.lane.b32.xlu2 %v2037_v37, %s10625_s21 }
 0x2cb   :  { %v11377_v57 = vpop.f32.mrf.mxu2 }
 0x2cc   :  { %14485 = vst [vmem:[#allocation16_spill] sm:$0xff] %v11377_v57 }
 0x2cd   :  { %v764_v55 = vpop.f32.mrf.mxu0 }
 0x2d3   :  { %v11379_v38 = vpop.f32.mrf.mxu2 }
 0x2d4   :  { %14486 = vst [vmem:[#allocation17_spill] sm:$0xff] %v11379_v38 }
 0x2db   :  { %v11384_v46 = vpop.f32.mrf.mxu2 }
 0x2dc   :  { %14487 = vst [vmem:[#allocation18_spill] sm:$0xff] %v11384_v46 }
 0x2e3   :  { %v11387_v45 = vpop.f32.mrf.mxu2 }
 0x2e4   :  { %14488 = vst [vmem:[#allocation19_spill] sm:$0xff] %v11387_v45 }
 0x2eb   :  { %v11389_v47 = vpop.f32.mrf.mxu2 }
 0x2ec   :  { %14489 = vst [vmem:[#allocation20_spill] sm:$0xff] %v11389_v47 }
 0x2f3   :  { %v11397_v12 = vpop.f32.mrf.mxu2 }
 0x2f4   :  { %14490 = vst [vmem:[#allocation21_spill] sm:$0xff] %v11397_v12 }
 0x2fb   :  { %v11401_v40 = vpop.f32.mrf.mxu2 }
 0x2fc   :  { %14491 = vst [vmem:[#allocation22_spill] sm:$0xff] %v11401_v40 }
 0x303   :  { %v11411_v60 = vpop.f32.mrf.mxu2 }
 0x304   :  { %v1962_v36 = vpop.permute.xlu1 %1961  ;;  %14492 = vst [vmem:[#allocation23_spill] sm:$0xff] %v11411_v60 }
 0x305   :  { %v1996_v4 = vmul.f32 %v1962_v36, %v11173_v32  ;;  %v1960_v53 = vpop.permute.xlu0 %1959  ;;  %v11407_v32 = vld [vmem:[%s14436_s5] ss:$0 sm:$0xff] }
 0x306   :  { %v1995_v49 = vmul.f32 %v1960_v53, %v11197_v9  ;;  %v760_v9 = vadd.f32 %v11407_v32, %v759_v22  ;;  %v762_v37 = vadd.f32 %v11407_v32, %v761_v30 }
 0x308   :  { %v2038_v51 = vpack.c.bf16 %v1996_v4, %v1995_v49  ;;  %v8882_v21 = vpack.c.bf16 %v762_v37, %v760_v9  ;;  %v766_v4 = vpop.f32.mrf.mxu0 }
 0x309   :  { %v2055_v28 = vpop.permute.xlu2 %2054  ;;  %v767_v40 = vadd.f32 %v11407_v32, %v766_v4 }
 0x30a   :  { %2060 = vrot.lane.b32.xlu0 %v2038_v51, %s10625_s21  ;;  %8478 = vmatmul.msk.bf16.gmra.mxu2 %vm517_vm0, %v2055_v28  ;;  %v9193_v36 = vunpack.c.l.bf16 %v8882_v21  ;;  %v9194_v12 = vunpack.c.h.bf16 %v8882_v21 }
 0x310   :  { %v769_v22 = vpop.f32.mrf.mxu0 }
 0x315   :  { %v1966_v28 = vpop.permute.xlu1 %1965 }
 0x316   :  { %v1998_v9 = vmul.f32 %v1966_v28, %v11239_v56  ;;  %v770_v56 = vadd.f32 %v11407_v32, %v769_v22 }
 0x318   :  { %v771_v46 = vpop.f32.mrf.mxu0 }
 0x319   :  { %v2057_v33 = vpop.permute.xlu2 %2056 }
 0x31a   :  { %8479 = vmatmul.msk.bf16.gmra.mxu2 %vm517_vm0, %v2057_v33  ;;  %v765_v33 = vadd.f32 %v11407_v32, %v764_v55 }
 0x321   :  { %v2059_v51 = vpop.permute.xlu2 %2058 }
 0x326   :  { %v2097_v53 = vpop.f32.mrf.mxu2 }
 0x327   :  { %v2137_v49 = vadd.f32 %v9193_v36, %v2097_v53  ;;  %v8887_v36 = vpack.c.bf16 %v767_v40, %v765_v33 }
 0x329   :  { %9678 = vtanh.f32 %v2137_v49  ;;  %v9197_v55 = vunpack.c.l.bf16 %v8887_v36 }
 0x32a   :  { %8480 = vmatmul.msk.bf16.gmra.mxu2 %vm517_vm0, %v2059_v51 }
 0x32e   :  { %v2099_v47 = vpop.f32.mrf.mxu2  ;;  %v1964_v30 = vpop.permute.xlu0 %1963 }
 0x32f   :  { %v9679_v45 = vpop.eup %9678  ;;  %v2138_v37 = vadd.f32 %v9194_v12, %v2099_v47  ;;  %v1997_v60 = vmul.f32 %v1964_v30, %v11247_v6  ;;  %v772_v47 = vadd.f32 %v11407_v32, %v771_v46  ;;  %v8765_v6 = vld [vmem:[%s14437_s1 + $0x70] sm:$0xff] }
 0x330   :  { %2505 = vrot.lane.b32.xlu2 %v9679_v45, %s10624_s3  ;;  %v9198_v45 = vunpack.c.h.bf16 %v8887_v36  ;;  %8401 = vmatmul.msk.bf16.gmra.mxu0 %vm517_vm0, %v8765_v6  ;;  %v774_v6 = vpop.f32.mrf.mxu0 }
 0x331   :  { %9680 = vtanh.f32 %v2138_v37  ;;  %v2039_v53 = vpack.c.bf16 %v1998_v9, %v1997_v60  ;;  %v8892_v28 = vpack.c.bf16 %v772_v47, %v770_v56 }
 0x333   :  { %2062 = vrot.lane.b32.xlu1 %v2039_v53, %s10625_s21  ;;  %v9201_v33 = vunpack.c.l.bf16 %v8892_v28  ;;  %v9202_v46 = vunpack.c.h.bf16 %v8892_v28 }
 0x336   :  { %v2102_v51 = vpop.f32.mrf.mxu2 }
 0x337   :  { %v9681_v4 = vpop.eup %9680  ;;  %v2139_v21 = vadd.f32 %v9197_v55, %v2102_v51 }
 0x338   :  { %2507 = vrot.lane.b32.xlu0 %v9681_v4, %s10624_s3  ;;  %v8483_v4 = vmul.f32 -1.442695, %v2137_v49  ;;  %v776_v28 = vpop.f32.mrf.mxu0 }
 0x339   :  { %9682 = vtanh.f32 %v2139_v21 }
 0x33e   :  { %v2104_v12 = vpop.f32.mrf.mxu2 }
 0x33f   :  { %v9683_v40 = vpop.eup %9682  ;;  %v2140_v60 = vadd.f32 %v9198_v45, %v2104_v12 }
 0x340   :  { %2509 = vrot.lane.b32.xlu1 %v9683_v40, %s10624_s3 }
 0x341   :  { %9684 = vtanh.f32 %v2140_v60  ;;  %v8486_v12 = vmul.f32 -1.442695, %v2140_v60  ;;  %v775_v60 = vadd.f32 %v11407_v32, %v774_v6 }
 0x346   :  { %v2107_v30 = vpop.f32.mrf.mxu2 }
 0x347   :  { %v9685_v9 = vpop.eup %9684  ;;  %v11428_v22 = vadd.f32 %v9201_v33, %v2107_v30 }
 0x348   :  { %2511 = vrot.lane.b32.xlu2 %v9685_v9, %s10624_s3  ;;  %v8766_v9 = vld [vmem:[%s14437_s1 + $0x78] sm:$0xff] }
 0x349   :  { %9686 = vtanh.f32 %v11428_v22  ;;  %8402 = vmatmul.msk.bf16.gmra.mxu0 %vm517_vm0, %v8766_v9 }
 0x34e   :  { %v2109_v36 = vpop.f32.mrf.mxu2 }
 0x34f   :  { %v9687_v53 = vpop.eup %9686  ;;  %v11432_v55 = vadd.f32 %v9202_v46, %v2109_v36  ;;  %v8484_v46 = vmul.f32 -1.442695, %v2138_v37  ;;  %v779_v37 = vpop.f32.mrf.mxu0 }
 0x350   :  { %2513 = vrot.lane.b32.xlu0 %v9687_v53, %s10624_s3 }
 0x351   :  { %9688 = vtanh.f32 %v11432_v55 }
 0x352   :  { %9690 = vpow2.f32 %v8483_v4 }
 0x357   :  { %v9689_v51 = vpop.eup %9688 }
 0x358   :  { %2515 = vrot.lane.b32.xlu1 %v9689_v51, %s10624_s3  ;;  %v9691_v56 = vpop.eup %9690  ;;  %v777_v51 = vadd.f32 %v11407_v32, %v776_v28 }
 0x359   :  { %v2201_v47 = vadd.f32 1.0, %v9691_v56 }
 0x35b   :  { %9692 = vrcp.f32 %v2201_v47  ;;  %v2228_v56 = vand.u32 2147483648, %v2201_v47  ;;  %vm2222_vm6 = vweird.f32 %v2201_v47 }
 0x35c   :  { %9694 = vpow2.f32 %v8486_v12  ;;  %v8485_v12 = vmul.f32 -1.442695, %v2139_v21 }
 0x35d   :  { %9696 = vpow2.f32 %v8484_v46  ;;  %v2229_v46 = vor.u32 1.1754944e-38, %v2228_v56 }
 0x361   :  { %v9693_v45 = vpop.eup %9692 }
 0x362   :  { %v2218_v40 = vmul.f32 %v9693_v45, %v2201_v47  ;;  %v9695_v49 = vpop.eup %9694  ;;  %vm2223_vm5 = vweird.f32 %v9693_v45 }
 0x363   :  { %v11442_v53 = vadd.f32 1.0, %v9695_v49  ;;  %vm2224_vm7 = vmor %vm2222_vm6, %vm2223_vm5  ;;  %v9697_v9 = vpop.eup %9696 }
 0x364   :  { %v2219_v33 = vsub.f32 1.0, %v2218_v40  ;;  %v2226_v40 = vand.u32 2147483647, %v2201_v47  ;;  %v11447_v49 = vadd.f32 1.0, %v9697_v9 }
 0x365   :  { %9698 = vrcp.f32 %v11442_v53  ;;  %vm2267_vm10 = vweird.f32 %v11442_v53 }
 0x366   :  { %v2220_v36 = vmul.f32 %v9693_v45, %v2219_v33  ;;  %9700 = vpow2.f32 %v8485_v12  ;;  %vm2227_vm8 = vcmp.eq.f32.partialorder %v2226_v40, 8.507059e+37  ;;  %v780_v12 = vadd.f32 %v11407_v32, %v779_v37 }
 0x367   :  { %9702 = vrcp.f32 %v11447_v49  ;;  %vm2237_vm14 = vweird.f32 %v11447_v49 }
 0x368   :  { %v2221_v4 = vadd.f32 %v9693_v45, %v2220_v36 }
 0x36a   :  { %v2225_v33 = vsel %vm2224_vm7, %v9693_v45, %v2221_v4 }
 0x36b   :  { %v11449_v6 = vsel %vm2227_vm8, %v2229_v46, %v2225_v33  ;;  %v9699_v38 = vpop.eup %9698 }
 0x36c   :  { %v9701_v45 = vpop.eup %9700  ;;  %v2263_v4 = vmul.f32 %v9699_v38, %v11442_v53  ;;  %vm2268_vm9 = vweird.f32 %v9699_v38 }
 0x36d   :  { %v11458_v56 = vadd.f32 1.0, %v9701_v45  ;;  %v9703_v46 = vpop.eup %9702  ;;  %vm2269_vm11 = vmor %vm2267_vm10, %vm2268_vm9 }
 0x36e   :  { %v2264_v33 = vsub.f32 1.0, %v2263_v4  ;;  %v2233_v37 = vmul.f32 %v9703_v46, %v11447_v49  ;;  %vm2238_vm13 = vweird.f32 %v9703_v46 }
 0x36f   :  { %vm2239_vm15 = vmor %vm2237_vm14, %vm2238_vm13  ;;  %vm2252_vm3 = vweird.f32 %v11458_v56 }
 0x370   :  { %v2265_v45 = vmul.f32 %v9699_v38, %v2264_v33  ;;  %v2271_v33 = vand.u32 2147483647, %v11442_v53 }
 0x372   :  { %vm2272_vm12 = vcmp.eq.f32.partialorder %v2271_v33, 8.507059e+37 }
 0x37c   :  { %v2061_v30 = vpop.permute.xlu0 %2060 }
 0x37d   :  { %8481 = vmatmul.msk.bf16.gmra.mxu2 %vm517_vm0, %v2061_v30  ;;  %v8897_v30 = vpack.c.bf16 %v777_v51, %v775_v60  ;;  %v781_v51 = vpop.f32.mrf.mxu0 }
 0x37e   :  { %v782_v9 = vadd.f32 %v11407_v32, %v781_v51  ;;  %v2266_v51 = vadd.f32 %v9699_v38, %v2265_v45 }
 0x37f   :  { %v9205_v36 = vunpack.c.l.bf16 %v8897_v30  ;;  %v9206_v40 = vunpack.c.h.bf16 %v8897_v30 }
 0x380   :  { %v11466_v57 = vpack.c.bf16 %v782_v9, %v780_v12  ;;  %v8488_v12 = vmul.f32 -1.442695, %v11432_v55  ;;  %v2270_v45 = vsel %vm2269_vm11, %v9699_v38, %v2266_v51  ;;  %v2243_v51 = vand.u32 2147483648, %v11447_v49 }
 0x382   :  { %v9209_v30 = vunpack.c.l.bf16 %v11466_v57 }
 0x385   :  { %v784_v0 = vpop.f32.mrf.mxu0 }
 0x38a   :  { %v2506_v28 = vpop.permute.xlu2 %2505 }
 0x38b   :  { %v2553_v21 = vmul.f32 %v2506_v28, %v11449_v6  ;;  %v8487_v28 = vmul.f32 -1.442695, %v11428_v22  ;;  %v2234_v22 = vsub.f32 1.0, %v2233_v37 }
 0x38d   :  { %v2112_v47 = vpop.f32.mrf.mxu2  ;;  %2585 = vrot.lane.b32.xlu2 %v2553_v21, %s10624_s3  ;;  %v2235_v37 = vmul.f32 %v9703_v46, %v2234_v22 }
 0x38e   :  { %v11454_v60 = vadd.f32 %v9205_v36, %v2112_v47 }
 0x38f   :  { %v2236_v39 = vadd.f32 %v9703_v46, %v2235_v37 }
 0x390   :  { %9704 = vtanh.f32 %v11454_v60 }
 0x391   :  { %9706 = vrcp.f32 %v11458_v56 }
 0x395   :  { %v2114_v21 = vpop.f32.mrf.mxu2 }
 0x396   :  { %v9705_v36 = vpop.eup %9704  ;;  %v11464_v47 = vadd.f32 %v9206_v40, %v2114_v21  ;;  %v2273_v40 = vand.u32 2147483648, %v11442_v53 }
 0x397   :  { %2517 = vrot.lane.b32.xlu1 %v9705_v36, %s10624_s3  ;;  %v11472_v4 = vpop.eup %9706 }
 0x398   :  { %9708 = vtanh.f32 %v11464_v47  ;;  %v2248_v54 = vmul.f32 %v11472_v4, %v11458_v56  ;;  %v2274_v55 = vor.u32 1.1754944e-38, %v2273_v40  ;;  %v2241_v40 = vand.u32 2147483647, %v11447_v49 }
 0x399   :  { %9710 = vpow2.f32 %v8487_v28  ;;  %vm2253_vm2 = vweird.f32 %v11472_v4 }
 0x39a   :  { %v11486_v53 = vsel %vm2272_vm12, %v2274_v55, %v2270_v45  ;;  %v2249_v38 = vsub.f32 1.0, %v2248_v54  ;;  %vm2242_vm1 = vcmp.eq.f32.partialorder %v2241_v40, 8.507059e+37  ;;  %vm2254_vm4 = vmor %vm2252_vm3, %vm2253_vm2 }
 0x39c   :  { %v2250_v54 = vmul.f32 %v11472_v4, %v2249_v38  ;;  %v785_v38 = vadd.f32 %v11407_v32, %v784_v0 }
 0x39d   :  { %v2117_v9 = vpop.f32.mrf.mxu2 }
 0x39e   :  { %v9709_v21 = vpop.eup %9708  ;;  %v11478_v36 = vadd.f32 %v9209_v30, %v2117_v9 }
 0x39f   :  { %v9711_v28 = vpop.eup %9710  ;;  %2519 = vrot.lane.b32.xlu2 %v9709_v21, %s10624_s3  ;;  %v2240_v21 = vsel %vm2239_vm15, %v9703_v46, %v2236_v39  ;;  %v2258_v39 = vand.u32 2147483648, %v11458_v56  ;;  %v2256_v46 = vand.u32 2147483647, %v11458_v56 }
 0x3a0   :  { %9712 = vtanh.f32 %v11478_v36  ;;  %v11484_v58 = vadd.f32 1.0, %v9711_v28  ;;  %v2244_v28 = vor.u32 1.1754944e-38, %v2243_v51  ;;  %v9210_v51 = vunpack.c.h.bf16 %v11466_v57 }
 0x3a1   :  { %9714 = vpow2.f32 %v8488_v12  ;;  %vm2257_vm5 = vcmp.eq.f32.partialorder %v2256_v46, 8.507059e+37 }
 0x3a2   :  { %v2512_v30 = vpop.permute.xlu2 %2511  ;;  %9716 = vrcp.f32 %v11484_v58  ;;  %v11499_v37 = vsel %vm2242_vm1, %v2244_v28, %v2240_v21  ;;  %v2259_v21 = vor.u32 1.1754944e-38, %v2258_v39  ;;  %vm2282_vm7 = vweird.f32 %v11484_v58 }
 0x3a3   :  { %v2556_v9 = vmul.f32 %v2512_v30, %v11486_v53  ;;  %v786_v30 = vpop.f32.mrf.mxu0 }
 0x3a4   :  { %v787_v40 = vadd.f32 %v11407_v32, %v786_v30 }
 0x3a5   :  { %v2063_v22 = vpop.permute.xlu1 %2062  ;;  %2591 = vrot.lane.b32.xlu1 %v2556_v9, %s10624_s3  ;;  %v2119_v49 = vpop.f32.mrf.mxu2 }
 0x3a6   :  { %v9713_v12 = vpop.eup %9712  ;;  %8482 = vmatmul.msk.bf16.gmra.mxu2 %vm517_vm0, %v2063_v22  ;;  %v2251_v22 = vadd.f32 %v11472_v4, %v2250_v54  ;;  %v11514_v54 = vadd.f32 %v9210_v51, %v2119_v49  ;;  %v8907_v28 = vpack.c.bf16 %v787_v40, %v785_v38  ;;  %v2288_v51 = vand.u32 2147483648, %v11484_v58 }
 0x3a7   :  { %v9715_v33 = vpop.eup %9714  ;;  %2521 = vrot.lane.b32.xlu2 %v9713_v12, %s10624_s3  ;;  %v2286_v40 = vand.u32 2147483647, %v11484_v58 }
 0x3a8   :  { %v11497_v45 = vadd.f32 1.0, %v9715_v33  ;;  %v9717_v35 = vpop.eup %9716  ;;  %v2255_v12 = vsel %vm2254_vm4, %v11472_v4, %v2251_v22  ;;  %v9213_v4 = vunpack.c.l.bf16 %v8907_v28 }
 0x3a9   :  { %v2278_v33 = vmul.f32 %v9717_v35, %v11484_v58  ;;  %vm2283_vm6 = vweird.f32 %v9717_v35  ;;  %vm2287_vm9 = vcmp.eq.f32.partialorder %v2286_v40, 8.507059e+37 }
 0x3aa   :  { %v2508_v55 = vpop.permute.xlu0 %2507  ;;  %9718 = vrcp.f32 %v11497_v45  ;;  %vm2284_vm8 = vmor %vm2282_vm7, %vm2283_vm6  ;;  %v2303_v58 = vand.u32 2147483648, %v11497_v45  ;;  %vm2297_vm11 = vweird.f32 %v11497_v45 }
 0x3ab   :  { %v2554_v9 = vmul.f32 %v2508_v55, %v11499_v37  ;;  %v11516_v55 = vsel %vm2257_vm5, %v2259_v21, %v2255_v12  ;;  %v2279_v0 = vsub.f32 1.0, %v2278_v33  ;;  %9720 = vtanh.f32 %v11514_v54 }
 0x3ac   :  { %v9214_v12 = vunpack.c.h.bf16 %v8907_v28 }
 0x3ad   :  { %2587 = vrot.lane.b32.xlu0 %v2554_v9, %s10624_s3  ;;  %v2122_v57 = vpop.f32.mrf.mxu2  ;;  %v2280_v30 = vmul.f32 %v9717_v35, %v2279_v0 }
 0x3ae   :  { %v11522_v39 = vadd.f32 %v9213_v4, %v2122_v57 }
 0x3af   :  { %v2281_v49 = vadd.f32 %v9717_v35, %v2280_v30 }
 0x3b0   :  { %v9719_v26 = vpop.eup %9718  ;;  %9722 = vtanh.f32 %v11522_v39 }
 0x3b1   :  { %v2293_v22 = vmul.f32 %v9719_v26, %v11497_v45  ;;  %v9721_v38 = vpop.eup %9720  ;;  %v2285_v21 = vsel %vm2284_vm8, %v9717_v35, %v2281_v49  ;;  %vm2298_vm10 = vweird.f32 %v9719_v26  ;;  %v2301_v35 = vand.u32 2147483647, %v11497_v45 }
 0x3b2   :  { %v2510_v56 = vpop.permute.xlu1 %2509  ;;  %vm2299_vm12 = vmor %vm2297_vm11, %vm2298_vm10  ;;  %v2304_v49 = vor.u32 1.1754944e-38, %v2303_v58 }
 0x3b3   :  { %v2555_v9 = vmul.f32 %v2510_v56, %v11516_v55  ;;  %v2294_v46 = vsub.f32 1.0, %v2293_v22  ;;  %vm2302_vm13 = vcmp.eq.f32.partialorder %v2301_v35, 8.507059e+37 }
 0x3b5   :  { %2589 = vrot.lane.b32.xlu0 %v2555_v9, %s10624_s3  ;;  %v2124_v33 = vpop.f32.mrf.mxu2  ;;  %v2295_v56 = vmul.f32 %v9719_v26, %v2294_v46  ;;  %v2289_v9 = vor.u32 1.1754944e-38, %v2288_v51 }
 0x3b6   :  { %v11529_v0 = vadd.f32 %v9214_v12, %v2124_v33  ;;  %v8490_v33 = vmul.f32 -1.442695, %v11464_v47  ;;  %v789_v47 = vpop.f32.mrf.mxu0 }
 0x3b7   :  { %v11531_v4 = vsel %vm2287_vm9, %v2289_v9, %v2285_v21  ;;  %v2296_v22 = vadd.f32 %v9719_v26, %v2295_v56  ;;  %v8489_v56 = vmul.f32 -1.442695, %v11454_v60 }
 0x3b8   :  { %9724 = vtanh.f32 %v11529_v0 }
 0x3b9   :  { %v2300_v28 = vsel %vm2299_vm12, %v9719_v26, %v2296_v22  ;;  %9726 = vpow2.f32 %v8490_v33  ;;  %v790_v33 = vadd.f32 %v11407_v32, %v789_v47  ;;  %v8491_v47 = vmul.f32 -1.442695, %v11478_v36 }
 0x3ba   :  { %v11540_v51 = vsel %vm2302_vm13, %v2304_v49, %v2300_v28 }
 0x3bd   :  { %2523 = vrot.lane.b32.xlu0 %v9721_v38, %s10624_s3  ;;  %v9723_v38 = vpop.eup %9722 }
 0x3be   :  { %v9725_v12 = vpop.eup %9724 }
 0x3bf   :  { %v9727_v45 = vpop.eup %9726 }
 0x3c0   :  { %v2208_v21 = vadd.f32 1.0, %v9727_v45 }
 0x3c2   :  { %v2514_v57 = vpop.permute.xlu0 %2513  ;;  %9728 = vrcp.f32 %v2208_v21  ;;  %vm2327_vm15 = vweird.f32 %v2208_v21 }
 0x3c3   :  { %v2557_v30 = vmul.f32 %v2514_v57, %v11531_v4  ;;  %9730 = vpow2.f32 %v8489_v56  ;;  %v2473_v57 = vmul.f32 %v11449_v6, %v10995_v8  ;;  %v2331_v8 = vand.u32 2147483647, %v2208_v21 }
 0x3c5   :  { %2525 = vrot.lane.b32.xlu0 %v9723_v38, %s10624_s3  ;;  %2593 = vrot.lane.b32.xlu1 %v2557_v30, %s10624_s3  ;;  %vm2332_vm2 = vcmp.eq.f32.partialorder %v2331_v8, 8.507059e+37 }
 0x3c8   :  { %v9729_v26 = vpop.eup %9728 }
 0x3c9   :  { %v9731_v9 = vpop.eup %9730  ;;  %v2323_v30 = vmul.f32 %v9729_v26, %v2208_v21  ;;  %vm2328_vm14 = vweird.f32 %v9729_v26 }
 0x3ca   :  { %v2516_v46 = vpop.permute.xlu1 %2515  ;;  %v2207_v58 = vadd.f32 1.0, %v9731_v9  ;;  %vm2329_vm1 = vmor %vm2327_vm15, %vm2328_vm14 }
 0x3cb   :  { %v2558_v40 = vmul.f32 %v2516_v46, %v11540_v51  ;;  %v2324_v35 = vsub.f32 1.0, %v2323_v30  ;;  %v791_v46 = vpop.f32.mrf.mxu0 }
 0x3cc   :  { %v792_v45 = vadd.f32 %v11407_v32, %v791_v46  ;;  %v2318_v46 = vand.u32 2147483648, %v2207_v58  ;;  %vm2312_vm4 = vweird.f32 %v2207_v58 }
 0x3cd   :  { %2595 = vrot.lane.b32.xlu2 %v2558_v40, %s10624_s3  ;;  %2527 = vrot.lane.b32.xlu1 %v9725_v12, %s10624_s3  ;;  %v2325_v28 = vmul.f32 %v9729_v26, %v2324_v35  ;;  %v2333_v12 = vand.u32 2147483648, %v2208_v21 }
 0x3ce   :  { %v8912_v35 = vpack.c.bf16 %v792_v45, %v790_v33  ;;  %v2319_v45 = vor.u32 1.1754944e-38, %v2318_v46 }
 0x3cf   :  { %v2326_v60 = vadd.f32 %v9729_v26, %v2325_v28 }
 0x3d0   :  { %v9217_v61 = vunpack.c.l.bf16 %v8912_v35  ;;  %v9218_v8 = vunpack.c.h.bf16 %v8912_v35  ;;  %v8493_v35 = vmul.f32 -1.442695, %v11522_v39  ;;  %v8803_v39 = vld [vmem:[%s14437_s1 + $0x1a0] sm:$0xff] }
 0x3d1   :  { %v2330_v56 = vsel %vm2329_vm1, %v9729_v26, %v2326_v60  ;;  %v8492_v26 = vmul.f32 -1.442695, %v11514_v54  ;;  %8439 = vmatmul.msk.bf16.vlgmr.msra.gmra.mxu3 %vm517_vm0, %v8803_v39 }
 0x3d2   :  { %5078 = vmatpush.bf16.msra.mxu3 %v11338_v34 }
 0x3d6   :  { %5079 = vmatpush.bf16.msra.mxu3 %v11346_v29 }
 0x3e7   :  { %v2586_v22 = vpop.permute.xlu2 %2585 }
 0x3e8   :  { %v11549_v38 = vadd.f32 %v2586_v22, %v2473_v57  ;;  %v2334_v57 = vor.u32 1.1754944e-38, %v2333_v12  ;;  %v2316_v12 = vand.u32 2147483647, %v2207_v58 }
 0x3ea   :  { %9732 = vtanh.f32 %v11549_v38  ;;  %v11555_v30 = vsel %vm2332_vm2, %v2334_v57, %v2330_v56  ;;  %vm2317_vm6 = vcmp.eq.f32.partialorder %v2316_v12, 8.507059e+37 }
 0x3eb   :  { %9734 = vrcp.f32 %v2207_v58 }
 0x3f0   :  { %v9733_v49 = vpop.eup %9732 }
 0x3f1   :  { %2681 = vrot.lane.b32.xlu1 %v9733_v49, %s10624_s3  ;;  %v9735_v40 = vpop.eup %9734 }
 0x3f2   :  { %v2308_v9 = vmul.f32 %v9735_v40, %v2207_v58  ;;  %vm2313_vm3 = vweird.f32 %v9735_v40 }
 0x3f3   :  { %vm2314_vm5 = vmor %vm2312_vm4, %vm2313_vm3 }
 0x3f4   :  { %v2309_v49 = vsub.f32 1.0, %v2308_v9 }
 0x3f6   :  { %v2310_v21 = vmul.f32 %v9735_v40, %v2309_v49  ;;  %v8494_v49 = vmul.f32 -1.442695, %v11529_v0 }
 0x3f8   :  { %v2311_v60 = vadd.f32 %v9735_v40, %v2310_v21  ;;  %v794_v21 = vpop.f32.mrf.mxu0 }
 0x3f9   :  { %v2520_v22 = vpop.permute.xlu2 %2519 }
 0x3fa   :  { %v2560_v28 = vmul.f32 %v2520_v22, %v11555_v30  ;;  %v2315_v33 = vsel %vm2314_vm5, %v9735_v40, %v2311_v60 }
 0x3fb   :  { %v11566_v54 = vsel %vm2317_vm6, %v2319_v45, %v2315_v33  ;;  %v2474_v33 = vmul.f32 %v11499_v37, %v11016_v23 }
 0x3fc   :  { %2599 = vrot.lane.b32.xlu0 %v2560_v28, %s10624_s3 }
 0x400   :  { %v2127_v50 = vpop.f32.mrf.mxu2 }
 0x401   :  { %v11560_v7 = vadd.f32 %v9217_v61, %v2127_v50 }
 0x403   :  { %9736 = vtanh.f32 %v11560_v7 }
 0x404   :  { %9738 = vpow2.f32 %v8491_v47 }
 0x405   :  { %9740 = vpow2.f32 %v8492_v26 }
 0x408   :  { %v2129_v56 = vpop.f32.mrf.mxu2 }
 0x409   :  { %v9737_v36 = vpop.eup %9736  ;;  %v11564_v50 = vadd.f32 %v9218_v8, %v2129_v56  ;;  %v2518_v61 = vpop.permute.xlu1 %2517 }
 0x40a   :  { %v2559_v9 = vmul.f32 %v2518_v61, %v11566_v54  ;;  %2529 = vrot.lane.b32.xlu0 %v9737_v36, %s10624_s3  ;;  %v9739_v57 = vpop.eup %9738 }
 0x40b   :  { %9742 = vtanh.f32 %v11564_v50  ;;  %v9741_v58 = vpop.eup %9740  ;;  %v11572_v40 = vadd.f32 1.0, %v9739_v57 }
 0x40c   :  { %2597 = vrot.lane.b32.xlu2 %v2559_v9, %s10624_s3  ;;  %v11574_v22 = vadd.f32 1.0, %v9741_v58  ;;  %v796_v9 = vpop.f32.mrf.mxu0  ;;  %v795_v58 = vadd.f32 %v11407_v32, %v794_v21 }
 0x40d   :  { %9744 = vrcp.f32 %v11572_v40  ;;  %v797_v23 = vadd.f32 %v11407_v32, %v796_v9  ;;  %vm2342_vm9 = vweird.f32 %v11572_v40 }
 0x40e   :  { %9746 = vrcp.f32 %v11574_v22  ;;  %vm2357_vm11 = vweird.f32 %v11574_v22 }
 0x40f   :  { %9748 = vpow2.f32 %v8493_v35  ;;  %v8917_v39 = vpack.c.bf16 %v797_v23, %v795_v58 }
 0x410   :  { %9750 = vpow2.f32 %v8494_v49 }
 0x411   :  { %v9743_v28 = vpop.eup %9742  ;;  %v9221_v58 = vunpack.c.l.bf16 %v8917_v39  ;;  %v9222_v10 = vunpack.c.h.bf16 %v8917_v39 }
 0x412   :  { %2531 = vrot.lane.b32.xlu1 %v9743_v28, %s10624_s3  ;;  %v2475_v28 = vmul.f32 %v11516_v55, %v11047_v18  ;;  %v2346_v18 = vand.u32 2147483647, %v11572_v40 }
 0x413   :  { %v9745_v47 = vpop.eup %9744 }
 0x414   :  { %v11581_v26 = vpop.eup %9746  ;;  %v2338_v46 = vmul.f32 %v9745_v47, %v11572_v40  ;;  %vm2343_vm7 = vweird.f32 %v9745_v47  ;;  %vm2347_vm13 = vcmp.eq.f32.partialorder %v2346_v18, 8.507059e+37 }
 0x415   :  { %v9749_v60 = vpop.eup %9748  ;;  %v2353_v0 = vmul.f32 %v11581_v26, %v11574_v22  ;;  %vm2358_vm8 = vweird.f32 %v11581_v26  ;;  %vm11625_vm10 = vmor %vm2342_vm9, %vm2343_vm7 }
 0x416   :  { %v9751_v12 = vpop.eup %9750  ;;  %v11590_v8 = vadd.f32 1.0, %v9749_v60  ;;  %v2339_v56 = vsub.f32 1.0, %v2338_v46  ;;  %vm11636_vm12 = vmor %vm2357_vm11, %vm2358_vm8 }
 0x417   :  { %v11595_v45 = vadd.f32 1.0, %v9751_v12  ;;  %v2354_v57 = vsub.f32 1.0, %v2353_v0  ;;  %v2348_v12 = vand.u32 2147483648, %v11572_v40  ;;  %v2361_v40 = vand.u32 2147483647, %v11574_v22 }
 0x418   :  { %9752 = vrcp.f32 %v11590_v8  ;;  %v2340_v34 = vmul.f32 %v9745_v47, %v2339_v56  ;;  %v2363_v56 = vand.u32 2147483648, %v11574_v22  ;;  %vm2372_vm2 = vweird.f32 %v11590_v8 }
 0x419   :  { %v2355_v35 = vmul.f32 %v11581_v26, %v2354_v57  ;;  %vm2362_vm14 = vcmp.eq.f32.partialorder %v2361_v40, 8.507059e+37  ;;  %v2477_v40 = vmul.f32 %v11531_v4, %v11107_v24  ;;  %v2376_v24 = vand.u32 2147483647, %v11590_v8 }
 0x41a   :  { %v2341_v60 = vadd.f32 %v9745_v47, %v2340_v34  ;;  %v2592_v34 = vpop.permute.xlu1 %2591  ;;  %vm2387_vm4 = vweird.f32 %v11595_v45 }
 0x41b   :  { %v2356_v21 = vadd.f32 %v11581_v26, %v2355_v35  ;;  %vm2377_vm6 = vcmp.eq.f32.partialorder %v2376_v24, 8.507059e+37 }
 0x41c   :  { %v2345_v57 = vsel %vm11625_vm10, %v9745_v47, %v2341_v60  ;;  %v2364_v60 = vor.u32 1.1754944e-38, %v2363_v56 }
 0x41d   :  { %v2360_v22 = vsel %vm11636_vm12, %v11581_v26, %v2356_v21 }
 0x41e   :  { %v11608_v49 = vpop.eup %9752  ;;  %v11657_v31 = vsel %vm2362_vm14, %v2364_v60, %v2360_v22  ;;  %v2393_v22 = vand.u32 2147483648, %v11595_v45 }
 0x41f   :  { %v2588_v36 = vpop.permute.xlu0 %2587  ;;  %v2368_v35 = vmul.f32 %v11608_v49, %v11590_v8  ;;  %vm2373_vm15 = vweird.f32 %v11608_v49 }
 0x420   :  { %v11597_v61 = vadd.f32 %v2588_v36, %v2474_v33  ;;  %v8804_v36 = vld [vmem:[%s14437_s1 + $0x1a8] sm:$0xff]  ;;  %vm11686_vm3 = vmor %vm2372_vm2, %vm2373_vm15 }
 0x421   :  { %8440 = vmatmul.msk.bf16.gmra.mxu3 %vm517_vm0, %v8804_v36  ;;  %v2369_v26 = vsub.f32 1.0, %v2368_v35 }
 0x422   :  { %9754 = vtanh.f32 %v11597_v61 }
 0x423   :  { %9756 = vrcp.f32 %v11595_v45 }
 0x427   :  { %v2590_v29 = vpop.permute.xlu0 %2589 }
 0x428   :  { %v9755_v46 = vpop.eup %9754  ;;  %v11611_v0 = vadd.f32 %v2590_v29, %v2475_v28  ;;  %v2349_v28 = vor.u32 1.1754944e-38, %v2348_v12  ;;  %v2522_v29 = vpop.permute.xlu2 %2521 }
 0x429   :  { %v11615_v32 = vpop.eup %9756  ;;  %v2132_v33 = vpop.f32.mrf.mxu2  ;;  %2683 = vrot.lane.b32.xlu2 %v9755_v46, %s10624_s3  ;;  %v2476_v46 = vmul.f32 %v11486_v53, %v11082_v52 }
 0x42a   :  { %9758 = vtanh.f32 %v11611_v0  ;;  %v2383_v47 = vmul.f32 %v11615_v32, %v11595_v45  ;;  %v11650_v9 = vsel %vm2347_vm13, %v2349_v28, %v2345_v57  ;;  %v11655_v41 = vadd.f32 %v9221_v58, %v2132_v33 }
 0x42b   :  { %v11652_v3 = vadd.f32 %v2592_v34, %v2476_v46  ;;  %v2561_v12 = vmul.f32 %v2522_v29, %v11650_v9  ;;  %v2370_v33 = vmul.f32 %v11608_v49, %v2369_v26  ;;  %v2378_v58 = vand.u32 2147483648, %v11590_v8  ;;  %v8805_v29 = vld [vmem:[%s14437_s1 + $0x1b0] sm:$0xff] }
 0x42c   :  { %v2384_v36 = vsub.f32 1.0, %v2383_v47  ;;  %vm2388_vm1 = vweird.f32 %v11615_v32  ;;  %v2478_v26 = vmul.f32 %v11540_v51, %v11140_v44 }
 0x42d   :  { %9760 = vtanh.f32 %v11652_v3  ;;  %v2371_v57 = vadd.f32 %v11608_v49, %v2370_v33  ;;  %vm2389_vm5 = vmor %vm2387_vm4, %vm2388_vm1 }
 0x42e   :  { %9762 = vtanh.f32 %v11655_v41  ;;  %v2385_v39 = vmul.f32 %v11615_v32, %v2384_v36 }
 0x42f   :  { %v2524_v52 = vpop.permute.xlu0 %2523  ;;  %v2375_v8 = vsel %vm11686_vm3, %v11608_v49, %v2371_v57 }
 0x430   :  { %v9759_v21 = vpop.eup %9758  ;;  %v2562_v23 = vmul.f32 %v2524_v52, %v11657_v31  ;;  %v2386_v28 = vadd.f32 %v11615_v32, %v2385_v39  ;;  %v2596_v52 = vpop.permute.xlu2 %2595 }
 0x431   :  { %v2134_v18 = vpop.f32.mrf.mxu2  ;;  %2685 = vrot.lane.b32.xlu1 %v9759_v21, %s10624_s3  ;;  %2601 = vrot.lane.b32.xlu2 %v2561_v12, %s10624_s3  ;;  %v2391_v12 = vand.u32 2147483647, %v11595_v45  ;;  %v2394_v45 = vor.u32 1.1754944e-38, %v2393_v22 }
 0x432   :  { %v11663_v56 = vadd.f32 %v9222_v10, %v2134_v18  ;;  %2603 = vrot.lane.b32.xlu0 %v2562_v23, %s10624_s3  ;;  %v2379_v23 = vor.u32 1.1754944e-38, %v2378_v58  ;;  %v2390_v36 = vsel %vm2389_vm5, %v11615_v32, %v2386_v28  ;;  %8441 = vmatmul.msk.bf16.gmra.mxu3 %vm517_vm0, %v8805_v29  ;;  %v11704_v18 = vadd.f32 %v2596_v52, %v2478_v26  ;;  %v8807_v28 = vld [vmem:[%s14437_s1 + $0x1c0] sm:$0xff] }
 0x433   :  { %v9761_v10 = vpop.eup %9760  ;;  %vm2392_vm7 = vcmp.eq.f32.partialorder %v2391_v12, 8.507059e+37  ;;  %v8496_v58 = vmul.f32 -1.442695, %v11564_v50 }
 0x434   :  { %9764 = vtanh.f32 %v11663_v56  ;;  %v9763_v46 = vpop.eup %9762  ;;  %v11706_v49 = vsel %vm2377_vm6, %v2379_v23, %v2375_v8  ;;  %v11709_v39 = vsel %vm2392_vm7, %v2394_v45, %v2390_v36 }
 0x437   :  { %v2594_v34 = vpop.permute.xlu1 %2593  ;;  %v2526_v21 = vpop.permute.xlu0 %2525 }
 0x438   :  { %v11675_v35 = vadd.f32 %v2594_v34, %v2477_v40  ;;  %v2563_v33 = vmul.f32 %v2526_v21, %v11706_v49  ;;  %v8806_v34 = vld [vmem:[%s14437_s1 + $0x1b8] sm:$0xff] }
 0x439   :  { %2687 = vrot.lane.b32.xlu2 %v9761_v10, %s10624_s3  ;;  %v8495_v10 = vmul.f32 -1.442695, %v11560_v7  ;;  %v8808_v7 = vld [vmem:[%s14437_s1 + $0x1c8] sm:$0xff] }
 0x43a   :  { %v9765_v47 = vpop.eup %9764  ;;  %2533 = vrot.lane.b32.xlu0 %v9763_v46, %s10624_s3  ;;  %9766 = vtanh.f32 %v11675_v35 }
 0x43b   :  { %2535 = vrot.lane.b32.xlu1 %v9765_v47, %s10624_s3  ;;  %9768 = vtanh.f32 %v11704_v18 }
 0x43c   :  { %9770 = vpow2.f32 %v8495_v10 }
 0x43d   :  { %9772 = vpow2.f32 %v8496_v58 }
 0x43f   :  { %v2528_v44 = vpop.permute.xlu1 %2527 }
 0x440   :  { %v2564_v40 = vmul.f32 %v2528_v44, %v11709_v39  ;;  %v9767_v57 = vpop.eup %9766 }
 0x441   :  { %2605 = vrot.lane.b32.xlu2 %v2563_v33, %s10624_s3  ;;  %v9769_v32 = vpop.eup %9768  ;;  %v8809_v33 = vld [vmem:[%s14437_s1 + $0x1d0] sm:$0xff] }
 0x442   :  { %2607 = vrot.lane.b32.xlu0 %v2564_v40, %s10624_s3  ;;  %8442 = vmatmul.msk.bf16.gmra.mxu3 %vm517_vm0, %v8806_v34  ;;  %v9771_v29 = vpop.eup %9770 }
 0x443   :  { %2689 = vrot.lane.b32.xlu1 %v9767_v57, %s10624_s3  ;;  %v2213_v46 = vadd.f32 1.0, %v9771_v29  ;;  %v9773_v24 = vpop.eup %9772  ;;  %v2480_v57 = vmul.f32 %v11555_v30, %v11201_v5 }
 0x444   :  { %v2214_v22 = vadd.f32 1.0, %v9773_v24 }
 0x445   :  { %9774 = vrcp.f32 %v2213_v46  ;;  %v2408_v36 = vand.u32 2147483648, %v2213_v46  ;;  %vm2402_vm9 = vweird.f32 %v2213_v46  ;;  %v2406_v45 = vand.u32 2147483647, %v2213_v46 }
 0x446   :  { %9776 = vrcp.f32 %v2214_v22  ;;  %vm2417_vm13 = vweird.f32 %v2214_v22  ;;  %v2421_v5 = vand.u32 2147483647, %v2214_v22 }
 0x447   :  { %vm2407_vm11 = vcmp.eq.f32.partialorder %v2406_v45, 8.507059e+37 }
 0x448   :  { %vm2422_vm15 = vcmp.eq.f32.partialorder %v2421_v5, 8.507059e+37 }
 0x449   :  { %2691 = vrot.lane.b32.xlu2 %v9769_v32, %s10624_s3  ;;  %v2409_v32 = vor.u32 1.1754944e-38, %v2408_v36 }
 0x44b   :  { %v9775_v47 = vpop.eup %9774 }
 0x44c   :  { %v2398_v60 = vmul.f32 %v9775_v47, %v2213_v46  ;;  %v9777_v12 = vpop.eup %9776  ;;  %vm2403_vm8 = vweird.f32 %v9775_v47 }
 0x44d   :  { %v2413_v8 = vmul.f32 %v9777_v12, %v2214_v22  ;;  %vm2404_vm10 = vmor %vm2402_vm9, %vm2403_vm8  ;;  %vm2418_vm12 = vweird.f32 %v9777_v12 }
 0x44e   :  { %v2399_v50 = vsub.f32 1.0, %v2398_v60  ;;  %v8498_v60 = vmul.f32 -1.442695, %v11663_v56  ;;  %vm2419_vm14 = vmor %vm2417_vm13, %vm2418_vm12 }
 0x44f   :  { %v2414_v23 = vsub.f32 1.0, %v2413_v8  ;;  %v2479_v8 = vmul.f32 %v11566_v54, %v11204_v11  ;;  %v8810_v11 = vld [vmem:[%s14437_s1 + $0x1d8] sm:$0xff] }
 0x450   :  { %v2400_v52 = vmul.f32 %v9775_v47, %v2399_v50 }
 0x451   :  { %v2415_v40 = vmul.f32 %v9777_v12, %v2414_v23 }
 0x452   :  { %8443 = vmatmul.msk.bf16.gmra.mxu3 %vm517_vm0, %v8807_v28  ;;  %v2401_v21 = vadd.f32 %v9775_v47, %v2400_v52 }
 0x453   :  { %v2416_v24 = vadd.f32 %v9777_v12, %v2415_v40 }
 0x454   :  { %v2405_v44 = vsel %vm2404_vm10, %v9775_v47, %v2401_v21  ;;  %v2423_v47 = vand.u32 2147483648, %v2214_v22  ;;  %v11768_v5 = vpop.f32.mrf.mxu3 }
 0x455   :  { %v11738_v28 = vsel %vm2407_vm11, %v2409_v32, %v2405_v44  ;;  %v2420_v50 = vsel %vm2419_vm14, %v9777_v12, %v2416_v24 }
 0x456   :  { %v2424_v52 = vor.u32 1.1754944e-38, %v2423_v47 }
 0x458   :  { %v11750_v23 = vsel %vm2422_vm15, %v2424_v52, %v2420_v50  ;;  %v2481_v52 = vmul.f32 %v11650_v9, %v11244_v62 }
 0x462   :  { %8444 = vmatmul.msk.bf16.gmra.mxu3 %vm517_vm0, %v8808_v7  ;;  %v8497_v7 = vmul.f32 -1.442695, %v11655_v41 }
 0x463   :  { %v2682_v10 = vpop.permute.xlu1 %2681 }
 0x464   :  { %v2729_v41 = vmul.f32 %v2682_v10, %v11449_v6 }
 0x466   :  { %v2598_v34 = vpop.permute.xlu2 %2597 }
 0x467   :  { %v11752_v56 = vadd.f32 %v2598_v34, %v2479_v8 }
 0x46e   :  { %v2600_v26 = vpop.permute.xlu0 %2599 }
 0x46f   :  { %v11736_v58 = vadd.f32 %v2600_v26, %v2480_v57 }
 0x471   :  { %9778 = vtanh.f32 %v11736_v58 }
 0x472   :  { %8445 = vmatmul.msk.bf16.gmra.mxu3 %vm517_vm0, %v8809_v33  ;;  %9780 = vpow2.f32 %v8497_v7 }
 0x473   :  { %9782 = vpow2.f32 %v8498_v60 }
 0x474   :  { %9784 = vtanh.f32 %v11752_v56 }
 0x477   :  { %v9779_v12 = vpop.eup %9778 }
 0x478   :  { %v9781_v6 = vpop.eup %9780 }
 0x479   :  { %v2215_v33 = vadd.f32 1.0, %v9781_v6 }
 0x47b   :  { %9786 = vrcp.f32 %v2215_v33  ;;  %vm2432_vm3 = vweird.f32 %v2215_v33  ;;  %v2436_v6 = vand.u32 2147483647, %v2215_v33 }
 0x47c   :  { %v2530_v29 = vpop.permute.xlu0 %2529 }
 0x47d   :  { %v2565_v46 = vmul.f32 %v2530_v29, %v11738_v28  ;;  %vm2437_vm7 = vcmp.eq.f32.partialorder %v2436_v6, 8.507059e+37 }
 0x47f   :  { %2609 = vrot.lane.b32.xlu1 %v2565_v46, %s10624_s3  ;;  %v8811_v46 = vld [vmem:[%s14437_s1 + $0x1e0] sm:$0xff] }
 0x482   :  { %8446 = vmatmul.msk.bf16.gmra.mxu3 %vm517_vm0, %v8810_v11 }
 0x483   :  { %v2684_v26 = vpop.permute.xlu2 %2683 }
 0x484   :  { %v2730_v21 = vmul.f32 %v2684_v26, %v11499_v37  ;;  %v2532_v22 = vpop.permute.xlu1 %2531  ;;  %v9783_v37 = vpop.eup %9782 }
 0x485   :  { %v2566_v36 = vmul.f32 %v2532_v22, %v11750_v23  ;;  %v2216_v44 = vadd.f32 1.0, %v9783_v37  ;;  %v9785_v40 = vpop.eup %9784 }
 0x486   :  { %v2778_v45 = vpack.c.bf16 %v2730_v21, %v2729_v41  ;;  %v9787_v32 = vpop.eup %9786 }
 0x487   :  { %2695 = vrot.lane.b32.xlu1 %v9779_v12, %s10624_s3  ;;  %2611 = vrot.lane.b32.xlu2 %v2566_v36, %s10624_s3  ;;  %9788 = vrcp.f32 %v2216_v44  ;;  %v2428_v10 = vmul.f32 %v9787_v32, %v2215_v33  ;;  %vm2433_vm1 = vweird.f32 %v9787_v32  ;;  %v2453_v37 = vand.u32 2147483648, %v2216_v44 }
 0x488   :  { %2794 = vrot.lane.b32.xlu0 %v2778_v45, %s10625_s21  ;;  %v2438_v45 = vand.u32 2147483648, %v2215_v33  ;;  %vm11779_vm4 = vmor %vm2432_vm3, %vm2433_vm1  ;;  %vm2447_vm5 = vweird.f32 %v2216_v44 }
 0x489   :  { %v2429_v24 = vsub.f32 1.0, %v2428_v10  ;;  %v2482_v10 = vmul.f32 %v11657_v31, %v11250_v42 }
 0x48b   :  { %v2602_v57 = vpop.permute.xlu2 %2601  ;;  %v2430_v60 = vmul.f32 %v9787_v32, %v2429_v24  ;;  %v2483_v24 = vmul.f32 %v11706_v49, %v11262_v59 }
 0x48c   :  { %v11774_v22 = vadd.f32 %v2602_v57, %v2481_v52 }
 0x48d   :  { %v9789_v34 = vpop.eup %9788  ;;  %v2431_v36 = vadd.f32 %v9787_v32, %v2430_v60 }
 0x48e   :  { %v2443_v29 = vmul.f32 %v9789_v34, %v2216_v44  ;;  %vm2448_vm2 = vweird.f32 %v9789_v34  ;;  %9790 = vtanh.f32 %v11774_v22 }
 0x48f   :  { %v2435_v33 = vsel %vm11779_vm4, %v9787_v32, %v2431_v36  ;;  %vm2449_vm6 = vmor %vm2447_vm5, %vm2448_vm2 }
 0x490   :  { %2693 = vrot.lane.b32.xlu0 %v9785_v40, %s10624_s3  ;;  %v2444_v47 = vsub.f32 1.0, %v2443_v29  ;;  %v11776_v40 = vpop.f32.mrf.mxu3  ;;  %v2439_v29 = vor.u32 1.1754944e-38, %v2438_v45 }
 0x492   :  { %8447 = vmatmul.msk.bf16.gmra.mxu3 %vm517_vm0, %v8811_v46  ;;  %v2445_v50 = vmul.f32 %v9789_v34, %v2444_v47 }
 0x493   :  { %v2688_v7 = vpop.permute.xlu2 %2687 }
 0x494   :  { %v2732_v26 = vmul.f32 %v2688_v7, %v11486_v53  ;;  %v2446_v11 = vadd.f32 %v9789_v34, %v2445_v50  ;;  %v2451_v53 = vand.u32 2147483647, %v2216_v44  ;;  %v2454_v44 = vor.u32 1.1754944e-38, %v2453_v37  ;;  %v9791_v59 = vpop.eup %9790 }
 0x495   :  { %v11795_v7 = vsel %vm2437_vm7, %v2439_v29, %v2435_v33 }
 0x496   :  { %v2450_v46 = vsel %vm2449_vm6, %v9789_v34, %v2446_v11  ;;  %vm2452_vm8 = vcmp.eq.f32.partialorder %v2451_v53, 8.507059e+37 }
 0x497   :  { %v11801_v42 = vsel %vm2452_vm8, %v2454_v44, %v2450_v46 }
 0x49b   :  { %v2606_v57 = vpop.permute.xlu2 %2605 }
 0x49c   :  { %v11798_v32 = vadd.f32 %v2606_v57, %v2483_v24  ;;  %v8814_v57 = vld [vmem:[%s14437_s1 + $0x1f8] sm:$0xff]  ;;  %v2486_v24 = vmul.f32 %v11750_v23, %v11313_v16 }
 0x4a3   :  { %v2686_v8 = vpop.permute.xlu1 %2685 }
 0x4a4   :  { %v2731_v41 = vmul.f32 %v2686_v8, %v11516_v55  ;;  %v2604_v21 = vpop.permute.xlu0 %2603  ;;  %v8812_v55 = vld [vmem:[%s14437_s1 + $0x1e8] sm:$0xff]  ;;  %v11805_v8 = vpop.f32.mrf.mxu3 }
 0x4a5   :  { %v11793_v47 = vadd.f32 %v2604_v21, %v2482_v10  ;;  %8448 = vmatmul.msk.bf16.gmra.mxu3 %vm517_vm0, %v8812_v55  ;;  %v8767_v10 = vld [vmem:[%s14437_s1 + $0x80] sm:$0xff] }
 0x4a6   :  { %v2779_v12 = vpack.c.bf16 %v2732_v26, %v2731_v41  ;;  %v2692_v26 = vpop.permute.xlu2 %2691  ;;  %v2484_v41 = vmul.f32 %v11709_v39, %v11264_v19  ;;  %v8813_v19 = vld [vmem:[%s14437_s1 + $0x1f0] sm:$0xff]  ;;  %8403 = vmatmul.msk.bf16.gmra.mxu0 %vm517_vm0, %v8767_v10 }
 0x4a7   :  { %9792 = vtanh.f32 %v11793_v47  ;;  %v2734_v11 = vmul.f32 %v2692_v26, %v11540_v51 }
 0x4a8   :  { %2796 = vrot.lane.b32.xlu2 %v2779_v12, %s10625_s21  ;;  %9794 = vtanh.f32 %v11798_v32 }
 0x4ac   :  { %v2534_v60 = vpop.permute.xlu0 %2533  ;;  %v11819_v62 = vpop.f32.mrf.mxu3 }
 0x4ad   :  { %v2567_v50 = vmul.f32 %v2534_v60, %v11795_v7  ;;  %v2536_v34 = vpop.permute.xlu1 %2535  ;;  %v9793_v45 = vpop.eup %9792  ;;  %14501 = vst [vmem:[#allocation24_spill] sm:$0xff] %v11819_v62 }
 0x4ae   :  { %v2568_v52 = vmul.f32 %v2536_v34, %v11801_v42  ;;  %v9795_v37 = vpop.eup %9794 }
 0x4af   :  { %2613 = vrot.lane.b32.xlu0 %v2567_v50, %s10624_s3  ;;  %v8768_v50 = vld [vmem:[%s14437_s1 + $0x88] sm:$0xff] }
 0x4b0   :  { %2615 = vrot.lane.b32.xlu1 %v2568_v52, %s10624_s3  ;;  %2697 = vrot.lane.b32.xlu2 %v9791_v59, %s10624_s3  ;;  %v2485_v59 = vmul.f32 %v11738_v28, %v11315_v48 }
 0x4b4   :  { %v2608_v21 = vpop.permute.xlu0 %2607 }
 0x4b5   :  { %v11813_v36 = vadd.f32 %v2608_v21, %v2484_v41  ;;  %v2690_v12 = vpop.permute.xlu1 %2689  ;;  %8449 = vmatmul.msk.bf16.gmra.mxu3 %vm517_vm0, %v8813_v19 }
 0x4b6   :  { %v2733_v6 = vmul.f32 %v2690_v12, %v11531_v4  ;;  %v11828_v4 = vpop.f32.mrf.mxu3  ;;  %8404 = vmatmul.msk.bf16.gmra.mxu0 %vm517_vm0, %v8768_v50 }
 0x4b7   :  { %9796 = vtanh.f32 %v11813_v36  ;;  %2699 = vrot.lane.b32.xlu0 %v9793_v45, %s10624_s3  ;;  %14502 = vst [vmem:[#allocation25_spill] sm:$0xff] %v11828_v4 }
 0x4b8   :  { %v2780_v53 = vpack.c.bf16 %v2734_v11, %v2733_v6  ;;  %2701 = vrot.lane.b32.xlu2 %v9795_v37, %s10624_s3 }
 0x4ba   :  { %2798 = vrot.lane.b32.xlu1 %v2780_v53, %s10625_s21  ;;  %v8769_v53 = vld [vmem:[%s14437_s1 + $0x90] sm:$0xff] }
 0x4bd   :  { %v9797_v51 = vpop.eup %9796 }
 0x4be   :  { %v11830_v55 = vpop.f32.mrf.mxu3 }
 0x4bf   :  { %2703 = vrot.lane.b32.xlu0 %v9797_v51, %s10624_s3  ;;  %14503 = vst [vmem:[#allocation26_spill] sm:$0xff] %v11830_v55 }
 0x4c5   :  { %8450 = vmatmul.msk.bf16.gmra.mxu3 %vm517_vm0, %v8814_v57 }
 0x4c6   :  { %v11836_v33 = vpop.f32.mrf.mxu3  ;;  %8405 = vmatmul.msk.bf16.gmra.mxu0 %vm517_vm0, %v8769_v53 }
 0x4c7   :  { %14504 = vst [vmem:[#allocation27_spill] sm:$0xff] %v11836_v33 }
 0x4ce   :  { %v11842_v29 = vpop.f32.mrf.mxu3 }
 0x4cf   :  { %14505 = vst [vmem:[#allocation28_spill] sm:$0xff] %v11842_v29 }
 0x4d6   :  { %v11844_v46 = vpop.f32.mrf.mxu3 }
 0x4d7   :  { %14506 = vst [vmem:[#allocation29_spill] sm:$0xff] %v11844_v46 }
 0x4de   :  { %v11855_v34 = vpop.f32.mrf.mxu3 }
 0x4df   :  { %14507 = vst [vmem:[#allocation30_spill] sm:$0xff] %v11855_v34 }
 0x4e1   :  { %v2612_v44 = vpop.permute.xlu2 %2611 }
 0x4e2   :  { %v11848_v60 = vadd.f32 %v2612_v44, %v2486_v24  ;;  %v2488_v44 = vmul.f32 %v11801_v42, %v11324_v27 }
 0x4e4   :  { %9798 = vtanh.f32 %v11848_v60 }
 0x4e6   :  { %v11862_v41 = vpop.f32.mrf.mxu3 }
 0x4e7   :  { %14508 = vst [vmem:[#allocation31_spill] sm:$0xff] %v11862_v41 }
 0x4ea   :  { %v9799_v52 = vpop.eup %9798 }
 0x4eb   :  { %2707 = vrot.lane.b32.xlu0 %v9799_v52, %s10624_s3 }
 0x4ee   :  { %v11867_v45 = vpop.f32.mrf.mxu3 }
 0x4ef   :  { %14509 = vst [vmem:[#allocation32_spill] sm:$0xff] %v11867_v45 }
 0x4f1   :  { %v2610_v16 = vpop.permute.xlu1 %2609 }
 0x4f2   :  { %v11860_v26 = vadd.f32 %v2610_v16, %v2485_v59 }
 0x4f4   :  { %9800 = vtanh.f32 %v11860_v26 }
 0x4f6   :  { %v11874_v51 = vpop.f32.mrf.mxu3 }
 0x4f7   :  { %14510 = vst [vmem:[#allocation33_spill] sm:$0xff] %v11874_v51 }
 0x4f9   :  { %v2696_v11 = vpop.permute.xlu1 %2695 }
 0x4fa   :  { %v9801_v21 = vpop.eup %9800  ;;  %v2795_v12 = vpop.permute.xlu0 %2794  ;;  %v2736_v37 = vmul.f32 %v2696_v11, %v11555_v30  ;;  %v2487_v30 = vmul.f32 %v11795_v7, %v11355_v43 }
 0x4fb   :  { %8499 = vmatmul.msk.bf16.vlgmr.msrb.gmra.mxu3 %vm517_vm0, %v2795_v12  ;;  %2705 = vrot.lane.b32.xlu2 %v9801_v21, %s10624_s3 }
 0x4fe   :  { %v11879_v10 = vpop.f32.mrf.mxu3 }
 0x4ff   :  { %14511 = vst [vmem:[#allocation34_spill] sm:$0xff] %v11879_v10 }
 0x502   :  { %v2694_v6 = vpop.permute.xlu0 %2693  ;;  %v2797_v57 = vpop.permute.xlu2 %2796 }
 0x503   :  { %v2735_v48 = vmul.f32 %v2694_v6, %v11566_v54 }
 0x505   :  { %v2781_v19 = vpack.c.bf16 %v2736_v37, %v2735_v48 }
 0x506   :  { %v11881_v24 = vpop.f32.mrf.mxu3 }
 0x507   :  { %2800 = vrot.lane.b32.xlu1 %v2781_v19, %s10625_s21  ;;  %14512 = vst [vmem:[#allocation35_spill] sm:$0xff] %v11881_v24 }
 0x50a   :  { %v2698_v21 = vpop.permute.xlu2 %2697 }
 0x50b   :  { %8500 = vmatmul.msk.bf16.gmra.mxu3 %vm517_vm0, %v2797_v57  ;;  %v2737_v43 = vmul.f32 %v2698_v21, %v11650_v9 }
 0x50e   :  { %v11892_v16 = vpop.f32.mrf.mxu3 }
 0x50f   :  { %14513 = vst [vmem:[#allocation36_spill] sm:$0xff] %v11892_v16 }
 0x512   :  { %v2702_v19 = vpop.permute.xlu2 %2701 }
 0x516   :  { %v11901_v53 = vpop.f32.mrf.mxu3 }
 0x517   :  { %14514 = vst [vmem:[#allocation37_spill] sm:$0xff] %v11901_v53 }
 0x521   :  { %v2614_v54 = vpop.permute.xlu0 %2613 }
 0x522   :  { %v11887_v50 = vadd.f32 %v2614_v54, %v2487_v30  ;;  %v2616_v52 = vpop.permute.xlu1 %2615  ;;  %v2739_v30 = vmul.f32 %v2702_v19, %v11706_v49  ;;  %v11906_v54 = vpop.f32.mrf.mxu3 }
 0x523   :  { %v11889_v59 = vadd.f32 %v2616_v52, %v2488_v44  ;;  %14515 = vst [vmem:[#allocation38_spill] sm:$0xff] %v11906_v54  ;;  %v8770_v52 = vld [vmem:[%s14437_s1 + $0x98] sm:$0xff] }
 0x524   :  { %9802 = vtanh.f32 %v11887_v50  ;;  %8406 = vmatmul.msk.bf16.gmra.mxu0 %vm517_vm0, %v8770_v52 }
 0x525   :  { %9804 = vtanh.f32 %v11889_v59 }
 0x529   :  { %v2700_v12 = vpop.permute.xlu0 %2699 }
 0x52a   :  { %v9803_v11 = vpop.eup %9802  ;;  %v2738_v6 = vmul.f32 %v2700_v12, %v11657_v31  ;;  %v11908_v44 = vpop.f32.mrf.mxu3 }
 0x52b   :  { %v9805_v37 = vpop.eup %9804  ;;  %2709 = vrot.lane.b32.xlu2 %v9803_v11, %s10624_s3  ;;  %14516 = vst [vmem:[#allocation39_spill] sm:$0xff] %v11908_v44 }
 0x52c   :  { %v2782_v27 = vpack.c.bf16 %v2738_v6, %v2737_v43  ;;  %v2799_v48 = vpop.permute.xlu1 %2798  ;;  %2711 = vrot.lane.b32.xlu0 %v9805_v37, %s10624_s3 }
 0x52d   :  { %8501 = vmatmul.msk.bf16.gmra.mxu3 %vm517_vm0, %v2799_v48 }
 0x52e   :  { %2802 = vrot.lane.b32.xlu1 %v2782_v27, %s10625_s21  ;;  %v799_v27 = vpop.f32.mrf.mxu0 }
 0x531   :  { %v2704_v57 = vpop.permute.xlu0 %2703 }
 0x532   :  { %v2740_v9 = vmul.f32 %v2704_v57, %v11709_v39  ;;  %v11914_v21 = vpop.f32.mrf.mxu3  ;;  %v8771_v57 = vld [vmem:[%s14437_s1 + $0xa0] sm:$0xff] }
 0x533   :  { %14517 = vst [vmem:[#allocation40_spill] sm:$0xff] %v11914_v21 }
 0x534   :  { %v2783_v31 = vpack.c.bf16 %v2740_v9, %v2739_v30  ;;  %8407 = vmatmul.msk.bf16.gmra.mxu0 %vm517_vm0, %v8771_v57 }
 0x536   :  { %2804 = vrot.lane.b32.xlu1 %v2783_v31, %s10625_s21  ;;  %v801_v19 = vpop.f32.mrf.mxu0 }
 0x53a   :  { %v11916_v12 = vpop.f32.mrf.mxu3 }
 0x53b   :  { %14518 = vst [vmem:[#allocation41_spill] sm:$0xff] %v11916_v12 }
 0x542   :  { %v11920_v37 = vpop.f32.mrf.mxu3 }
 0x543   :  { %14519 = vst [vmem:[#allocation42_spill] sm:$0xff] %v11920_v37 }
 0x54a   :  { %v11923_v48 = vpop.f32.mrf.mxu3 }
 0x54b   :  { %14520 = vst [vmem:[#allocation43_spill] sm:$0xff] %v11923_v48 }
 0x552   :  { %v11936_v9 = vpop.f32.mrf.mxu3 }
 0x553   :  { %14521 = vst [vmem:[#allocation44_spill] sm:$0xff] %v11936_v9  ;;  %v8773_v9 = vld [vmem:[%s14437_s1 + $0xb0] sm:$0xff] }
 0x555   :  { %v2706_v49 = vpop.permute.xlu2 %2705 }
 0x556   :  { %v2741_v39 = vmul.f32 %v2706_v49, %v11738_v28  ;;  %v11932_v28 = vld [vmem:[%s14436_s5] ss:$0 sm:$0xff] }
 0x557   :  { %v802_v30 = vadd.f32 %v11932_v28, %v801_v19 }
 0x55d   :  { %v2708_v11 = vpop.permute.xlu0 %2707 }
 0x55e   :  { %v2742_v43 = vmul.f32 %v2708_v11, %v11750_v23  ;;  %v800_v23 = vadd.f32 %v11932_v28, %v799_v27  ;;  %v8772_v27 = vld [vmem:[%s14437_s1 + $0xa8] sm:$0xff] }
 0x55f   :  { %8408 = vmatmul.msk.bf16.gmra.mxu0 %vm517_vm0, %v8772_v27 }
 0x560   :  { %v2784_v6 = vpack.c.bf16 %v2742_v43, %v2741_v39  ;;  %v8922_v31 = vpack.c.bf16 %v802_v30, %v800_v23  ;;  %v804_v43 = vpop.f32.mrf.mxu0 }
 0x561   :  { %v805_v23 = vadd.f32 %v11932_v28, %v804_v43 }
 0x562   :  { %2806 = vrot.lane.b32.xlu2 %v2784_v6, %s10625_s21  ;;  %v9225_v49 = vunpack.c.l.bf16 %v8922_v31  ;;  %v9226_v6 = vunpack.c.h.bf16 %v8922_v31 }
 0x568   :  { %v806_v19 = vpop.f32.mrf.mxu0 }
 0x569   :  { %v807_v30 = vadd.f32 %v11932_v28, %v806_v19 }
 0x56b   :  { %v8927_v31 = vpack.c.bf16 %v807_v30, %v805_v23 }
 0x56d   :  { %v9229_v43 = vunpack.c.l.bf16 %v8927_v31 }
 0x56f   :  { %8409 = vmatmul.msk.bf16.gmra.mxu0 %vm517_vm0, %v8773_v9 }
 0x579   :  { %v2801_v52 = vpop.permute.xlu1 %2800 }
 0x57a   :  { %8502 = vmatmul.msk.bf16.gmra.mxu3 %vm517_vm0, %v2801_v52 }
 0x57e   :  { %v2843_v11 = vpop.f32.mrf.mxu3 }
 0x57f   :  { %v11939_v39 = vadd.f32 %v9225_v49, %v2843_v11  ;;  %v9230_v11 = vunpack.c.h.bf16 %v8927_v31 }
 0x581   :  { %9806 = vtanh.f32 %v11939_v39 }
 0x585   :  { %v2710_v27 = vpop.permute.xlu2 %2709 }
 0x586   :  { %v2845_v57 = vpop.f32.mrf.mxu3  ;;  %v2743_v21 = vmul.f32 %v2710_v27, %v11795_v7 }
 0x587   :  { %v9807_v48 = vpop.eup %9806  ;;  %v2884_v37 = vadd.f32 %v9226_v6, %v2845_v57  ;;  %v809_v57 = vpop.f32.mrf.mxu0 }
 0x588   :  { %3251 = vrot.lane.b32.xlu1 %v9807_v48, %s10624_s3  ;;  %v810_v9 = vadd.f32 %v11932_v28, %v809_v57 }
 0x589   :  { %9808 = vtanh.f32 %v2884_v37  ;;  %v8508_v57 = vmul.f32 -1.442695, %v2884_v37 }
 0x58e   :  { %v2848_v52 = vpop.f32.mrf.mxu3 }
 0x58f   :  { %v9809_v49 = vpop.eup %9808  ;;  %v11956_v23 = vadd.f32 %v9229_v43, %v2848_v52 }
 0x590   :  { %3253 = vrot.lane.b32.xlu2 %v9809_v49, %s10624_s3 }
 0x596   :  { %v2850_v6 = vpop.f32.mrf.mxu3 }
 0x597   :  { %v2886_v48 = vadd.f32 %v9230_v11, %v2850_v6  ;;  %v811_v6 = vpop.f32.mrf.mxu0 }
 0x598   :  { %v812_v31 = vadd.f32 %v11932_v28, %v811_v6 }
 0x599   :  { %9810 = vtanh.f32 %v2886_v48 }
 0x59a   :  { %9812 = vtanh.f32 %v11956_v23  ;;  %v8932_v7 = vpack.c.bf16 %v812_v31, %v810_v9 }
 0x59e   :  { %v2712_v12 = vpop.permute.xlu0 %2711 }
 0x59f   :  { %v9811_v19 = vpop.eup %9810  ;;  %v2744_v49 = vmul.f32 %v2712_v12, %v11801_v42  ;;  %v9233_v42 = vunpack.c.l.bf16 %v8932_v7 }
 0x5a0   :  { %v2803_v30 = vpop.permute.xlu1 %2802  ;;  %3257 = vrot.lane.b32.xlu1 %v9811_v19, %s10624_s3  ;;  %v9813_v27 = vpop.eup %9812 }
 0x5a1   :  { %v2785_v11 = vpack.c.bf16 %v2744_v49, %v2743_v21  ;;  %8503 = vmatmul.msk.bf16.gmra.mxu3 %vm517_vm0, %v2803_v30  ;;  %v9234_v21 = vunpack.c.h.bf16 %v8932_v7  ;;  %v8507_v7 = vmul.f32 -1.442695, %v11939_v39  ;;  %v814_v44 = vpop.f32.mrf.mxu0 }
 0x5a3   :  { %2808 = vrot.lane.b32.xlu0 %v2785_v11, %s10625_s21 }
 0x5a8   :  { %v2805_v12 = vpop.permute.xlu1 %2804 }
 0x5a9   :  { %v816_v53 = vpop.f32.mrf.mxu0 }
 0x5ab   :  { %3255 = vrot.lane.b32.xlu0 %v9813_v27, %s10624_s3 }
 0x5b0   :  { %v2853_v52 = vpop.f32.mrf.mxu3 }
 0x5b1   :  { %v2887_v43 = vadd.f32 %v9233_v42, %v2853_v52  ;;  %8504 = vmatmul.msk.bf16.gmra.mxu3 %vm517_vm0, %v2805_v12 }
 0x5b3   :  { %9814 = vtanh.f32 %v2887_v43 }
 0x5b8   :  { %v2855_v19 = vpop.f32.mrf.mxu3 }
 0x5b9   :  { %v9815_v49 = vpop.eup %9814  ;;  %v11966_v30 = vadd.f32 %v9234_v21, %v2855_v19 }
 0x5ba   :  { %3259 = vrot.lane.b32.xlu2 %v9815_v49, %s10624_s3 }
 0x5bb   :  { %9816 = vtanh.f32 %v11966_v30 }
 0x5bc   :  { %v2807_v11 = vpop.permute.xlu2 %2806  ;;  %9818 = vpow2.f32 %v8508_v57 }
 0x5c1   :  { %v9817_v6 = vpop.eup %9816  ;;  %8505 = vmatmul.msk.bf16.gmra.mxu3 %vm517_vm0, %v2807_v11  ;;  %v8510_v11 = vmul.f32 -1.442695, %v2886_v48  ;;  %v8774_v48 = vld [vmem:[%s14437_s1 + $0xb8] sm:$0xff] }
 0x5c2   :  { %3261 = vrot.lane.b32.xlu0 %v9817_v6, %s10624_s3  ;;  %v9819_v9 = vpop.eup %9818  ;;  %8410 = vmatmul.msk.bf16.gmra.mxu0 %vm517_vm0, %v8774_v48 }
 0x5c3   :  { %v2948_v31 = vadd.f32 1.0, %v9819_v9 }
 0x5c5   :  { %9820 = vrcp.f32 %v2948_v31  ;;  %v2989_v57 = vand.u32 2147483648, %v2948_v31  ;;  %vm2983_vm10 = vweird.f32 %v2948_v31  ;;  %v2987_v6 = vand.u32 2147483647, %v2948_v31 }
 0x5c6   :  { %9822 = vpow2.f32 %v8507_v7 }
 0x5c7   :  { %v2990_v54 = vor.u32 1.1754944e-38, %v2989_v57  ;;  %vm2988_vm12 = vcmp.eq.f32.partialorder %v2987_v6, 8.507059e+37  ;;  %v815_v57 = vadd.f32 %v11932_v28, %v814_v44 }
 0x5cb   :  { %v9821_v27 = vpop.eup %9820 }
 0x5cc   :  { %v9823_v42 = vpop.eup %9822  ;;  %v2979_v12 = vmul.f32 %v9821_v27, %v2948_v31  ;;  %vm2984_vm9 = vweird.f32 %v9821_v27 }
 0x5cd   :  { %v2947_v52 = vadd.f32 1.0, %v9823_v42  ;;  %vm2985_vm11 = vmor %vm2983_vm10, %vm2984_vm9 }
 0x5ce   :  { %v2980_v21 = vsub.f32 1.0, %v2979_v12 }
 0x5cf   :  { %9824 = vrcp.f32 %v2947_v52  ;;  %v2974_v6 = vand.u32 2147483648, %v2947_v52  ;;  %vm2968_vm14 = vweird.f32 %v2947_v52 }
 0x5d0   :  { %v2981_v37 = vmul.f32 %v9821_v27, %v2980_v21  ;;  %9826 = vpow2.f32 %v8510_v11  ;;  %v817_v11 = vadd.f32 %v11932_v28, %v816_v53 }
 0x5d2   :  { %v2982_v19 = vadd.f32 %v9821_v27, %v2981_v37  ;;  %v8511_v37 = vmul.f32 -1.442695, %v2887_v43 }
 0x5d4   :  { %v2986_v9 = vsel %vm2985_vm11, %v9821_v27, %v2982_v19  ;;  %v8509_v19 = vmul.f32 -1.442695, %v11956_v23  ;;  %9828 = vpow2.f32 %v8511_v37 }
 0x5d5   :  { %v9825_v49 = vpop.eup %9824  ;;  %v11973_v7 = vsel %vm2988_vm12, %v2990_v54, %v2986_v9  ;;  %v2972_v9 = vand.u32 2147483647, %v2947_v52 }
 0x5d6   :  { %v2964_v39 = vmul.f32 %v9825_v49, %v2947_v52  ;;  %v9827_v31 = vpop.eup %9826  ;;  %vm2969_vm13 = vweird.f32 %v9825_v49  ;;  %9830 = vpow2.f32 %v8509_v19 }
 0x5d7   :  { %v2950_v54 = vadd.f32 1.0, %v9827_v31  ;;  %vm2970_vm15 = vmor %vm2968_vm14, %vm2969_vm13  ;;  %vm2973_vm1 = vcmp.eq.f32.partialorder %v2972_v9, 8.507059e+37 }
 0x5d8   :  { %v2965_v21 = vsub.f32 1.0, %v2964_v39  ;;  %v8937_v39 = vpack.c.bf16 %v817_v11, %v815_v57 }
 0x5d9   :  { %9832 = vrcp.f32 %v2950_v54  ;;  %v3019_v16 = vand.u32 2147483648, %v2950_v54  ;;  %vm3013_vm3 = vweird.f32 %v2950_v54 }
 0x5da   :  { %v2966_v27 = vmul.f32 %v9825_v49, %v2965_v21  ;;  %v2975_v21 = vor.u32 1.1754944e-38, %v2974_v6  ;;  %v9237_v53 = vunpack.c.l.bf16 %v8937_v39  ;;  %v9238_v11 = vunpack.c.h.bf16 %v8937_v39 }
 0x5db   :  { %v3020_v24 = vor.u32 1.1754944e-38, %v3019_v16 }
 0x5dc   :  { %v2967_v43 = vadd.f32 %v9825_v49, %v2966_v27 }
 0x5ea   :  { %v3254_v42 = vpop.permute.xlu2 %3253 }
 0x5eb   :  { %v3300_v12 = vmul.f32 %v3254_v42, %v11973_v7  ;;  %v9829_v42 = vpop.eup %9828 }
 0x5ec   :  { %v9831_v23 = vpop.eup %9830  ;;  %v11984_v37 = vadd.f32 1.0, %v9829_v42 }
 0x5ed   :  { %3333 = vrot.lane.b32.xlu2 %v3300_v12, %s10624_s3  ;;  %v2971_v12 = vsel %vm2970_vm15, %v9825_v49, %v2967_v43  ;;  %v9833_v27 = vpop.eup %9832  ;;  %v11989_v19 = vadd.f32 1.0, %v9831_v23  ;;  %v8512_v23 = vmul.f32 -1.442695, %v11966_v30 }
 0x5ee   :  { %v11986_v48 = vsel %vm2973_vm1, %v2975_v21, %v2971_v12  ;;  %9834 = vrcp.f32 %v11984_v37  ;;  %v3009_v57 = vmul.f32 %v9833_v27, %v2950_v54  ;;  %vm3014_vm2 = vweird.f32 %v9833_v27 }
 0x5ef   :  { %vm3015_vm4 = vmor %vm3013_vm3, %vm3014_vm2  ;;  %vm3028_vm7 = vweird.f32 %v11984_v37  ;;  %vm2998_vm10 = vweird.f32 %v11989_v19 }
 0x5f0   :  { %v3010_v43 = vsub.f32 1.0, %v3009_v57 }
 0x5f4   :  { %v9835_v6 = vpop.eup %9834 }
 0x5f5   :  { %vm3029_vm6 = vweird.f32 %v9835_v6 }
 0x5f6   :  { %vm3030_vm8 = vmor %vm3028_vm7, %vm3029_vm6 }
 0x5fa   :  { %v3252_v44 = vpop.permute.xlu1 %3251 }
 0x5fb   :  { %v3299_v31 = vmul.f32 %v3252_v44, %v11986_v48  ;;  %v3011_v44 = vmul.f32 %v9833_v27, %v3010_v43 }
 0x5fd   :  { %v2858_v52 = vpop.f32.mrf.mxu3  ;;  %3331 = vrot.lane.b32.xlu1 %v3299_v31, %s10624_s3  ;;  %v819_v31 = vpop.f32.mrf.mxu0  ;;  %v3012_v39 = vadd.f32 %v9833_v27, %v3011_v44 }
 0x5fe   :  { %v11993_v49 = vadd.f32 %v9237_v53, %v2858_v52  ;;  %v3024_v53 = vmul.f32 %v9835_v6, %v11984_v37 }
 0x5ff   :  { %v3016_v43 = vsel %vm3015_vm4, %v9833_v27, %v3012_v39  ;;  %v3032_v27 = vand.u32 2147483647, %v11984_v37 }
 0x600   :  { %9836 = vtanh.f32 %v11993_v49  ;;  %v3025_v57 = vsub.f32 1.0, %v3024_v53 }
 0x601   :  { %9838 = vrcp.f32 %v11989_v19  ;;  %vm3033_vm11 = vcmp.eq.f32.partialorder %v3032_v27, 8.507059e+37 }
 0x605   :  { %v2860_v9 = vpop.f32.mrf.mxu3  ;;  %v821_v34 = vpop.f32.mrf.mxu0 }
 0x606   :  { %v9837_v42 = vpop.eup %9836  ;;  %v11997_v12 = vadd.f32 %v9238_v11, %v2860_v9  ;;  %v3017_v11 = vand.u32 2147483647, %v2950_v54  ;;  %v3034_v54 = vand.u32 2147483648, %v11984_v37 }
 0x607   :  { %v9839_v21 = vpop.eup %9838  ;;  %3263 = vrot.lane.b32.xlu0 %v9837_v42, %s10624_s3  ;;  %v3026_v42 = vmul.f32 %v9835_v6, %v3025_v57  ;;  %v3002_v57 = vand.u32 2147483647, %v11989_v19 }
 0x608   :  { %9840 = vtanh.f32 %v11997_v12  ;;  %v2994_v52 = vmul.f32 %v9839_v21, %v11989_v19  ;;  %vm3018_vm5 = vcmp.eq.f32.partialorder %v3017_v11, 8.507059e+37  ;;  %vm2999_vm9 = vweird.f32 %v9839_v21 }
 0x609   :  { %9842 = vpow2.f32 %v8512_v23  ;;  %v12005_v51 = vsel %vm3018_vm5, %v3020_v24, %v3016_v43  ;;  %v3027_v53 = vadd.f32 %v9835_v6, %v3026_v42  ;;  %vm3000_vm12 = vmor %vm2998_vm10, %vm2999_vm9  ;;  %vm3003_vm13 = vcmp.eq.f32.partialorder %v3002_v57, 8.507059e+37 }
 0x60a   :  { %v2995_v30 = vsub.f32 1.0, %v2994_v52 }
 0x60b   :  { %v3031_v52 = vsel %vm3030_vm8, %v9835_v6, %v3027_v53  ;;  %v822_v6 = vadd.f32 %v11932_v28, %v821_v34 }
 0x60c   :  { %v2996_v23 = vmul.f32 %v9839_v21, %v2995_v30 }
 0x60d   :  { %v824_v42 = vpop.f32.mrf.mxu0 }
 0x60e   :  { %v9841_v9 = vpop.eup %9840  ;;  %v2997_v24 = vadd.f32 %v9839_v21, %v2996_v23 }
 0x60f   :  { %3265 = vrot.lane.b32.xlu1 %v9841_v9, %s10624_s3  ;;  %v9843_v10 = vpop.eup %9842  ;;  %v820_v9 = vadd.f32 %v11932_v28, %v819_v31 }
 0x610   :  { %v2952_v41 = vadd.f32 1.0, %v9843_v10  ;;  %v3035_v10 = vor.u32 1.1754944e-38, %v3034_v54  ;;  %v3001_v11 = vsel %vm3000_vm12, %v9839_v21, %v2997_v24 }
 0x611   :  { %v8942_v54 = vpack.c.bf16 %v822_v6, %v820_v9 }
 0x612   :  { %v3258_v45 = vpop.permute.xlu1 %3257  ;;  %9844 = vrcp.f32 %v2952_v41  ;;  %v12016_v37 = vsel %vm3033_vm11, %v3035_v10, %v3031_v52  ;;  %v825_v52 = vadd.f32 %v11932_v28, %v824_v42  ;;  %vm3043_vm15 = vweird.f32 %v2952_v41 }
 0x613   :  { %v3302_v44 = vmul.f32 %v3258_v45, %v12005_v51  ;;  %v3004_v45 = vand.u32 2147483648, %v11989_v19  ;;  %v9241_v31 = vunpack.c.l.bf16 %v8942_v54 }
 0x614   :  { %v3260_v39 = vpop.permute.xlu2 %3259 }
 0x615   :  { %3337 = vrot.lane.b32.xlu0 %v3302_v44, %s10624_s3  ;;  %v2809_v16 = vpop.permute.xlu0 %2808  ;;  %v3303_v30 = vmul.f32 %v3260_v39, %v12016_v37  ;;  %v3005_v43 = vor.u32 1.1754944e-38, %v3004_v45  ;;  %v826_v24 = vpop.f32.mrf.mxu0  ;;  %v9242_v39 = vunpack.c.h.bf16 %v8942_v54 }
 0x616   :  { %8506 = vmatmul.msk.bf16.gmra.mxu3 %vm517_vm0, %v2809_v16  ;;  %v827_v45 = vadd.f32 %v11932_v28, %v826_v24 }
 0x617   :  { %v12021_v23 = vsel %vm3003_vm13, %v3005_v43, %v3001_v11  ;;  %v3049_v43 = vand.u32 2147483648, %v2952_v41 }
 0x618   :  { %v9845_v19 = vpop.eup %9844 }
 0x619   :  { %v3039_v21 = vmul.f32 %v9845_v19, %v2952_v41  ;;  %vm3044_vm14 = vweird.f32 %v9845_v19  ;;  %v3050_v42 = vor.u32 1.1754944e-38, %v3049_v43 }
 0x61a   :  { %vm3045_vm1 = vmor %vm3043_vm15, %vm3044_vm14 }
 0x61b   :  { %v3040_v34 = vsub.f32 1.0, %v3039_v21 }
 0x61d   :  { %v3256_v44 = vpop.permute.xlu0 %3255  ;;  %3339 = vrot.lane.b32.xlu0 %v3303_v30, %s10624_s3  ;;  %v3041_v10 = vmul.f32 %v9845_v19, %v3040_v34  ;;  %v8947_v30 = vpack.c.bf16 %v827_v45, %v825_v52 }
 0x61e   :  { %v3301_v53 = vmul.f32 %v3256_v44, %v12021_v23  ;;  %v3047_v44 = vand.u32 2147483647, %v2952_v41 }
 0x61f   :  { %v3042_v6 = vadd.f32 %v9845_v19, %v3041_v10  ;;  %v9246_v41 = vunpack.c.h.bf16 %v8947_v30 }
 0x620   :  { %3335 = vrot.lane.b32.xlu2 %v3301_v53, %s10624_s3  ;;  %v9245_v53 = vunpack.c.l.bf16 %v8947_v30  ;;  %vm3048_vm2 = vcmp.eq.f32.partialorder %v3047_v44, 8.507059e+37  ;;  %v829_v44 = vpop.f32.mrf.mxu0 }
 0x621   :  { %v3046_v21 = vsel %vm3045_vm1, %v9845_v19, %v3042_v6 }
 0x624   :  { %v2863_v27 = vpop.f32.mrf.mxu3 }
 0x625   :  { %v12026_v16 = vadd.f32 %v9241_v31, %v2863_v27  ;;  %v12032_v27 = vsel %vm3048_vm2, %v3050_v42, %v3046_v21 }
 0x627   :  { %9846 = vtanh.f32 %v12026_v16 }
 0x62c   :  { %v2865_v57 = vpop.f32.mrf.mxu3 }
 0x62d   :  { %v9847_v11 = vpop.eup %9846  ;;  %v2892_v9 = vadd.f32 %v9242_v39, %v2865_v57  ;;  %v8513_v57 = vmul.f32 -1.442695, %v11993_v49 }
 0x62e   :  { %3267 = vrot.lane.b32.xlu1 %v9847_v11, %s10624_s3  ;;  %v8514_v11 = vmul.f32 -1.442695, %v11997_v12  ;;  %v830_v12 = vadd.f32 %v11932_v28, %v829_v44 }
 0x62f   :  { %9848 = vtanh.f32 %v2892_v9  ;;  %v8516_v42 = vmul.f32 -1.442695, %v2892_v9 }
 0x634   :  { %v2868_v31 = vpop.f32.mrf.mxu3  ;;  %v3262_v54 = vpop.permute.xlu0 %3261 }
 0x635   :  { %v9849_v34 = vpop.eup %9848  ;;  %v12034_v24 = vadd.f32 %v9245_v53, %v2868_v31  ;;  %v3304_v52 = vmul.f32 %v3262_v54, %v12032_v27  ;;  %v831_v54 = vpop.f32.mrf.mxu0 }
 0x636   :  { %3269 = vrot.lane.b32.xlu2 %v9849_v34, %s10624_s3 }
 0x637   :  { %9850 = vtanh.f32 %v12034_v24  ;;  %3341 = vrot.lane.b32.xlu1 %v3304_v52, %s10624_s3 }
 0x63c   :  { %v2870_v45 = vpop.f32.mrf.mxu3 }
 0x63d   :  { %v9851_v19 = vpop.eup %9850  ;;  %v12040_v10 = vadd.f32 %v9246_v41, %v2870_v45  ;;  %v832_v41 = vadd.f32 %v11932_v28, %v831_v54  ;;  %v8515_v54 = vmul.f32 -1.442695, %v12026_v16 }
 0x63e   :  { %3271 = vrot.lane.b32.xlu2 %v9851_v19, %s10624_s3  ;;  %v3219_v19 = vmul.f32 %v11986_v48, %v11549_v38 }
 0x63f   :  { %9852 = vtanh.f32 %v12040_v10 }
 0x640   :  { %9854 = vpow2.f32 %v8513_v57 }
 0x641   :  { %9856 = vpow2.f32 %v8514_v11 }
 0x644   :  { %v2873_v34 = vpop.f32.mrf.mxu3 }
 0x645   :  { %v9853_v39 = vpop.eup %9852 }
 0x646   :  { %3273 = vrot.lane.b32.xlu0 %v9853_v39, %s10624_s3  ;;  %v9855_v6 = vpop.eup %9854 }
 0x647   :  { %v2953_v43 = vadd.f32 1.0, %v9855_v6  ;;  %v9857_v30 = vpop.eup %9856  ;;  %v8952_v6 = vpack.c.bf16 %v832_v41, %v830_v12  ;;  %v3334_v46 = vpop.permute.xlu2 %3333 }
 0x648   :  { %v12047_v53 = vadd.f32 1.0, %v9857_v30 }
 0x649   :  { %9858 = vrcp.f32 %v2953_v43  ;;  %v3064_v38 = vand.u32 2147483648, %v2953_v43  ;;  %vm3058_vm4 = vweird.f32 %v2953_v43 }
 0x64a   :  { %9860 = vrcp.f32 %v12047_v53  ;;  %vm3073_vm8 = vweird.f32 %v12047_v53 }
 0x64b   :  { %9862 = vpow2.f32 %v8516_v42  ;;  %v9250_v42 = vunpack.c.h.bf16 %v8952_v6 }
 0x64c   :  { %v2875_v29 = vpop.f32.mrf.mxu3 }
 0x64f   :  { %v9859_v21 = vpop.eup %9858 }
 0x650   :  { %v3054_v31 = vmul.f32 %v9859_v21, %v2953_v43  ;;  %v9861_v52 = vpop.eup %9860  ;;  %vm3059_vm3 = vweird.f32 %v9859_v21 }
 0x651   :  { %v9863_v45 = vpop.eup %9862  ;;  %v3069_v57 = vmul.f32 %v9861_v52, %v12047_v53  ;;  %vm3060_vm5 = vmor %vm3058_vm4, %vm3059_vm3  ;;  %vm3074_vm7 = vweird.f32 %v9861_v52 }
 0x652   :  { %v3055_v49 = vsub.f32 1.0, %v3054_v31  ;;  %v12055_v11 = vadd.f32 1.0, %v9863_v45  ;;  %v12062_v45 = vadd.f32 %v9250_v42, %v2875_v29  ;;  %vm3075_vm9 = vmor %vm3073_vm8, %vm3074_vm7 }
 0x653   :  { %v3070_v31 = vsub.f32 1.0, %v3069_v57 }
 0x654   :  { %v3056_v39 = vmul.f32 %v9859_v21, %v3055_v49  ;;  %v3062_v49 = vand.u32 2147483647, %v2953_v43  ;;  %vm3103_vm12 = vweird.f32 %v12055_v11 }
 0x655   :  { %v3071_v41 = vmul.f32 %v9861_v52, %v3070_v31 }
 0x656   :  { %v3057_v44 = vadd.f32 %v9859_v21, %v3056_v39  ;;  %v3065_v39 = vor.u32 1.1754944e-38, %v3064_v38  ;;  %vm3063_vm6 = vcmp.eq.f32.partialorder %v3062_v49, 8.507059e+37 }
 0x658   :  { %v3061_v12 = vsel %vm3060_vm5, %v9859_v21, %v3057_v44  ;;  %v3072_v21 = vadd.f32 %v9861_v52, %v3071_v41  ;;  %v3221_v44 = vmul.f32 %v12021_v23, %v11611_v0 }
 0x65a   :  { %v3076_v49 = vsel %vm3075_vm9, %v9861_v52, %v3072_v21  ;;  %v8517_v52 = vmul.f32 -1.442695, %v12034_v24  ;;  %v3109_v24 = vand.u32 2147483648, %v12055_v11 }
 0x66f   :  { %v3332_v9 = vpop.permute.xlu1 %3331 }
 0x670   :  { %v12057_v30 = vadd.f32 %v3332_v9, %v3219_v19  ;;  %v3220_v19 = vmul.f32 %v11973_v7, %v11597_v61  ;;  %v12068_v9 = vsel %vm3063_vm6, %v3065_v39, %v3061_v12  ;;  %v3079_v61 = vand.u32 2147483648, %v12047_v53 }
 0x672   :  { %9864 = vtanh.f32 %v12057_v30  ;;  %v12066_v16 = vadd.f32 %v3334_v46, %v3220_v19  ;;  %v3077_v46 = vand.u32 2147483647, %v12047_v53  ;;  %v3080_v12 = vor.u32 1.1754944e-38, %v3079_v61 }
 0x673   :  { %9866 = vrcp.f32 %v12055_v11 }
 0x674   :  { %9868 = vpow2.f32 %v8515_v54  ;;  %v9249_v54 = vunpack.c.l.bf16 %v8952_v6  ;;  %vm3078_vm10 = vcmp.eq.f32.partialorder %v3077_v46, 8.507059e+37  ;;  %v834_v6 = vpop.f32.mrf.mxu0  ;;  %v8518_v46 = vmul.f32 -1.442695, %v12040_v10 }
 0x675   :  { %9870 = vtanh.f32 %v12062_v45  ;;  %v12087_v39 = vsel %vm3078_vm10, %v3080_v12, %v3076_v49 }
 0x676   :  { %9872 = vtanh.f32 %v12066_v16  ;;  %v12085_v0 = vadd.f32 %v9249_v54, %v2873_v34  ;;  %v3107_v54 = vand.u32 2147483647, %v12055_v11 }
 0x678   :  { %v9865_v57 = vpop.eup %9864  ;;  %vm3108_vm14 = vcmp.eq.f32.partialorder %v3107_v54, 8.507059e+37 }
 0x679   :  { %v3264_v33 = vpop.permute.xlu0 %3263  ;;  %3427 = vrot.lane.b32.xlu0 %v9865_v57, %s10624_s3  ;;  %v9867_v43 = vpop.eup %9866 }
 0x67a   :  { %v3305_v29 = vmul.f32 %v3264_v33, %v12068_v9  ;;  %v3336_v42 = vpop.permute.xlu2 %3335  ;;  %v9869_v31 = vpop.eup %9868  ;;  %v3099_v33 = vmul.f32 %v9867_v43, %v12055_v11  ;;  %vm3104_vm11 = vweird.f32 %v9867_v43 }
 0x67b   :  { %v12081_v38 = vadd.f32 %v3336_v42, %v3221_v44  ;;  %v9871_v41 = vpop.eup %9870  ;;  %v12083_v19 = vadd.f32 1.0, %v9869_v31  ;;  %vm3105_vm13 = vmor %vm3103_vm12, %vm3104_vm11 }
 0x67c   :  { %3343 = vrot.lane.b32.xlu1 %v3305_v29, %s10624_s3  ;;  %v3100_v57 = vsub.f32 1.0, %v3099_v33  ;;  %v9873_v42 = vpop.eup %9872  ;;  %v836_v33 = vpop.f32.mrf.mxu0 }
 0x67d   :  { %9874 = vtanh.f32 %v12081_v38  ;;  %v837_v10 = vadd.f32 %v11932_v28, %v836_v33  ;;  %v3094_v33 = vand.u32 2147483648, %v12083_v19  ;;  %vm3088_vm1 = vweird.f32 %v12083_v19 }
 0x67e   :  { %9876 = vrcp.f32 %v12083_v19  ;;  %v3101_v34 = vmul.f32 %v9867_v43, %v3100_v57  ;;  %v3110_v57 = vor.u32 1.1754944e-38, %v3109_v24 }
 0x67f   :  { %9878 = vtanh.f32 %v12085_v0 }
 0x680   :  { %9880 = vpow2.f32 %v8517_v52  ;;  %v3102_v61 = vadd.f32 %v9867_v43, %v3101_v34 }
 0x681   :  { %v3266_v53 = vpop.permute.xlu1 %3265  ;;  %3277 = vrot.lane.b32.xlu0 %v9871_v41, %s10624_s3  ;;  %9882 = vpow2.f32 %v8518_v46 }
 0x682   :  { %v3306_v29 = vmul.f32 %v3266_v53, %v12087_v39  ;;  %v3106_v12 = vsel %vm3105_vm13, %v9867_v43, %v3102_v61  ;;  %v835_v53 = vadd.f32 %v11932_v28, %v834_v6 }
 0x683   :  { %v9875_v21 = vpop.eup %9874 }
 0x684   :  { %3345 = vrot.lane.b32.xlu2 %v3306_v29, %s10624_s3  ;;  %3429 = vrot.lane.b32.xlu1 %v9873_v42, %s10624_s3  ;;  %v9877_v44 = vpop.eup %9876  ;;  %v12108_v42 = vsel %vm3108_vm14, %v3110_v57, %v3106_v12  ;;  %v3092_v12 = vand.u32 2147483647, %v12083_v19 }
 0x685   :  { %v9879_v31 = vpop.eup %9878  ;;  %v3084_v41 = vmul.f32 %v9877_v44, %v12083_v19  ;;  %vm3089_vm15 = vweird.f32 %v9877_v44 }
 0x686   :  { %v9881_v49 = vpop.eup %9880  ;;  %vm3090_vm2 = vmor %vm3088_vm1, %vm3089_vm15  ;;  %vm3093_vm3 = vcmp.eq.f32.partialorder %v3092_v12, 8.507059e+37 }
 0x687   :  { %v12106_v29 = vadd.f32 1.0, %v9881_v49  ;;  %v3085_v34 = vsub.f32 1.0, %v3084_v41  ;;  %v3338_v49 = vpop.permute.xlu0 %3337  ;;  %v3222_v41 = vmul.f32 %v12005_v51, %v11652_v3 }
 0x689   :  { %3431 = vrot.lane.b32.xlu0 %v9875_v21, %s10624_s3  ;;  %v8957_v21 = vpack.c.bf16 %v837_v10, %v835_v53  ;;  %9884 = vrcp.f32 %v12106_v29  ;;  %v3086_v43 = vmul.f32 %v9877_v44, %v3085_v34  ;;  %v3095_v10 = vor.u32 1.1754944e-38, %v3094_v33 }
 0x68a   :  { %vm3118_vm5 = vweird.f32 %v12106_v29 }
 0x68b   :  { %v9253_v6 = vunpack.c.l.bf16 %v8957_v21  ;;  %v3087_v46 = vadd.f32 %v9877_v44, %v3086_v43 }
 0x68c   :  { %3275 = vrot.lane.b32.xlu2 %v9879_v31, %s10624_s3  ;;  %v9883_v31 = vpop.eup %9882 }
 0x68d   :  { %v12113_v61 = vadd.f32 1.0, %v9883_v31  ;;  %v3091_v57 = vsel %vm3090_vm2, %v9877_v44, %v3087_v46  ;;  %v3223_v46 = vmul.f32 %v12016_v37, %v11675_v35 }
 0x68e   :  { %v12127_v34 = vsel %vm3093_vm3, %v3095_v10, %v3091_v57  ;;  %v3124_v57 = vand.u32 2147483648, %v12106_v29 }
 0x68f   :  { %v9885_v24 = vpop.eup %9884  ;;  %9886 = vrcp.f32 %v12113_v61  ;;  %v3340_v3 = vpop.permute.xlu0 %3339  ;;  %vm3133_vm9 = vweird.f32 %v12113_v61 }
 0x690   :  { %v3270_v11 = vpop.permute.xlu2 %3269  ;;  %v3114_v53 = vmul.f32 %v9885_v24, %v12106_v29  ;;  %v12139_v33 = vadd.f32 %v3340_v3, %v3223_v46  ;;  %vm3119_vm4 = vweird.f32 %v9885_v24  ;;  %v3139_v46 = vand.u32 2147483648, %v12113_v61 }
 0x691   :  { %v3308_v52 = vmul.f32 %v3270_v11, %v12108_v42  ;;  %v9254_v11 = vunpack.c.h.bf16 %v8957_v21  ;;  %vm3120_vm6 = vmor %vm3118_vm5, %vm3119_vm4 }
 0x694   :  { %3349 = vrot.lane.b32.xlu2 %v3308_v52, %s10624_s3  ;;  %v12125_v52 = vadd.f32 %v3338_v49, %v3222_v41 }
 0x695   :  { %v9887_v43 = vpop.eup %9886 }
 0x696   :  { %v3129_v21 = vmul.f32 %v9887_v43, %v12113_v61  ;;  %vm3134_vm8 = vweird.f32 %v9887_v43 }
 0x697   :  { %vm3135_vm10 = vmor %vm3133_vm9, %vm3134_vm8 }
 0x698   :  { %v3130_v41 = vsub.f32 1.0, %v3129_v21 }
 0x699   :  { %v2878_v28 = vpop.f32.mrf.mxu3 }
 0x69a   :  { %v12115_v54 = vadd.f32 %v9253_v6, %v2878_v28  ;;  %v3115_v6 = vsub.f32 1.0, %v3114_v53 }
 0x69c   :  { %9888 = vtanh.f32 %v12115_v54  ;;  %v3116_v44 = vmul.f32 %v9885_v24, %v3115_v6  ;;  %v3272_v6 = vpop.permute.xlu2 %3271 }
 0x69d   :  { %9890 = vtanh.f32 %v12125_v52 }
 0x69e   :  { %v3117_v12 = vadd.f32 %v9885_v24, %v3116_v44 }
 0x6a0   :  { %v3268_v31 = vpop.permute.xlu1 %3267  ;;  %v3121_v35 = vsel %vm3120_vm6, %v9885_v24, %v3117_v12 }
 0x6a1   :  { %v3307_v19 = vmul.f32 %v3268_v31, %v12127_v34  ;;  %v2880_v28 = vpop.f32.mrf.mxu3  ;;  %v3125_v31 = vor.u32 1.1754944e-38, %v3124_v57 }
 0x6a2   :  { %v9889_v55 = vpop.eup %9888  ;;  %v12130_v4 = vadd.f32 %v9254_v11, %v2880_v28  ;;  %v3131_v11 = vmul.f32 %v9887_v43, %v3130_v41 }
 0x6a3   :  { %3347 = vrot.lane.b32.xlu1 %v3307_v19, %s10624_s3  ;;  %3279 = vrot.lane.b32.xlu2 %v9889_v55, %s10624_s3  ;;  %v9891_v49 = vpop.eup %9890  ;;  %v3122_v55 = vand.u32 2147483647, %v12106_v29  ;;  %v3224_v19 = vmul.f32 %v12032_v27, %v11704_v18  ;;  %v3137_v18 = vand.u32 2147483647, %v12113_v61 }
 0x6a4   :  { %9892 = vtanh.f32 %v12130_v4  ;;  %v3132_v44 = vadd.f32 %v9887_v43, %v3131_v11 }
 0x6a5   :  { %9894 = vtanh.f32 %v12139_v33  ;;  %vm3123_vm7 = vcmp.eq.f32.partialorder %v3122_v55, 8.507059e+37  ;;  %vm3138_vm11 = vcmp.eq.f32.partialorder %v3137_v18, 8.507059e+37 }
 0x6a6   :  { %v12149_v28 = vsel %vm3123_vm7, %v3125_v31, %v3121_v35  ;;  %v3136_v24 = vsel %vm3135_vm10, %v9887_v43, %v3132_v44  ;;  %v8520_v35 = vmul.f32 -1.442695, %v12062_v45 }
 0x6a7   :  { %v3309_v29 = vmul.f32 %v3272_v6, %v12149_v28 }
 0x6a9   :  { %v3342_v10 = vpop.permute.xlu1 %3341 }
 0x6aa   :  { %v9893_v53 = vpop.eup %9892  ;;  %v12151_v3 = vadd.f32 %v3342_v10, %v3224_v19  ;;  %v8521_v19 = vmul.f32 -1.442695, %v12115_v54 }
 0x6ab   :  { %3433 = vrot.lane.b32.xlu1 %v9891_v49, %s10624_s3  ;;  %3281 = vrot.lane.b32.xlu0 %v9893_v53, %s10624_s3  ;;  %v9895_v21 = vpop.eup %9894  ;;  %v3140_v49 = vor.u32 1.1754944e-38, %v3139_v46  ;;  %v8519_v53 = vmul.f32 -1.442695, %v12085_v0 }
 0x6ac   :  { %9896 = vtanh.f32 %v12151_v3 }
 0x6ad   :  { %v12160_v12 = vsel %vm3138_vm11, %v3140_v49, %v3136_v24  ;;  %9898 = vpow2.f32 %v8519_v53 }
 0x6ae   :  { %9900 = vpow2.f32 %v8520_v35 }
 0x6b2   :  { %v9897_v55 = vpop.eup %9896 }
 0x6b3   :  { %3435 = vrot.lane.b32.xlu0 %v9895_v21, %s10624_s3  ;;  %3351 = vrot.lane.b32.xlu1 %v3309_v29, %s10624_s3  ;;  %v9899_v61 = vpop.eup %9898 }
 0x6b4   :  { %v2959_v10 = vadd.f32 1.0, %v9899_v61  ;;  %v9901_v43 = vpop.eup %9900 }
 0x6b5   :  { %v2960_v31 = vadd.f32 1.0, %v9901_v43 }
 0x6b6   :  { %9902 = vrcp.f32 %v2959_v10  ;;  %v3154_v18 = vand.u32 2147483648, %v2959_v10  ;;  %vm3148_vm13 = vweird.f32 %v2959_v10  ;;  %v3152_v45 = vand.u32 2147483647, %v2959_v10 }
 0x6b7   :  { %9904 = vrcp.f32 %v2960_v31  ;;  %vm3163_vm2 = vweird.f32 %v2960_v31 }
 0x6b8   :  { %v3274_v41 = vpop.permute.xlu0 %3273  ;;  %9906 = vpow2.f32 %v8521_v19  ;;  %v3155_v53 = vor.u32 1.1754944e-38, %v3154_v18  ;;  %vm3153_vm15 = vcmp.eq.f32.partialorder %v3152_v45, 8.507059e+37 }
 0x6b9   :  { %v3310_v57 = vmul.f32 %v3274_v41, %v12160_v12  ;;  %v3226_v41 = vmul.f32 %v12087_v39, %v11736_v58 }
 0x6bb   :  { %3353 = vrot.lane.b32.xlu2 %v3310_v57, %s10624_s3  ;;  %3437 = vrot.lane.b32.xlu1 %v9897_v55, %s10624_s3 }
 0x6bc   :  { %v9903_v11 = vpop.eup %9902 }
 0x6bd   :  { %v3144_v6 = vmul.f32 %v9903_v11, %v2959_v10  ;;  %v9905_v44 = vpop.eup %9904  ;;  %vm3149_vm12 = vweird.f32 %v9903_v11 }
 0x6be   :  { %v3159_v24 = vmul.f32 %v9905_v44, %v2960_v31  ;;  %vm3150_vm14 = vmor %vm3148_vm13, %vm3149_vm12  ;;  %v9907_v55 = vpop.eup %9906  ;;  %vm3164_vm1 = vweird.f32 %v9905_v44 }
 0x6bf   :  { %v3145_v0 = vsub.f32 1.0, %v3144_v6  ;;  %v2961_v6 = vadd.f32 1.0, %v9907_v55  ;;  %vm3165_vm3 = vmor %vm3163_vm2, %vm3164_vm1 }
 0x6c0   :  { %v3160_v57 = vsub.f32 1.0, %v3159_v24 }
 0x6c1   :  { %v3146_v29 = vmul.f32 %v9903_v11, %v3145_v0  ;;  %vm3178_vm6 = vweird.f32 %v2961_v6 }
 0x6c2   :  { %v3161_v0 = vmul.f32 %v9905_v44, %v3160_v57 }
 0x6c3   :  { %v3147_v46 = vadd.f32 %v9903_v11, %v3146_v29  ;;  %v3167_v29 = vand.u32 2147483647, %v2960_v31 }
 0x6c4   :  { %v3162_v58 = vadd.f32 %v9905_v44, %v3161_v0 }
 0x6c5   :  { %v3151_v49 = vsel %vm3150_vm14, %v9903_v11, %v3147_v46  ;;  %v3169_v11 = vand.u32 2147483648, %v2960_v31  ;;  %v8522_v46 = vmul.f32 -1.442695, %v12130_v4  ;;  %vm3168_vm4 = vcmp.eq.f32.partialorder %v3167_v29, 8.507059e+37 }
 0x6c6   :  { %v12172_v61 = vsel %vm3153_vm15, %v3155_v53, %v3151_v49  ;;  %v3166_v18 = vsel %vm3165_vm3, %v9905_v44, %v3162_v58  ;;  %v3225_v31 = vmul.f32 %v12068_v9, %v11752_v56 }
 0x6c7   :  { %v3170_v24 = vor.u32 1.1754944e-38, %v3169_v11 }
 0x6c9   :  { %v12179_v49 = vsel %vm3168_vm4, %v3170_v24, %v3166_v18  ;;  %v3184_v18 = vand.u32 2147483648, %v2961_v6 }
 0x6de   :  { %v3346_v21 = vpop.permute.xlu2 %3345 }
 0x6df   :  { %v12170_v54 = vadd.f32 %v3346_v21, %v3226_v41 }
 0x6e1   :  { %9908 = vtanh.f32 %v12170_v54 }
 0x6e2   :  { %9910 = vrcp.f32 %v2961_v6 }
 0x6e3   :  { %9912 = vpow2.f32 %v8522_v46 }
 0x6e6   :  { %v3276_v35 = vpop.permute.xlu2 %3275 }
 0x6e7   :  { %v3311_v43 = vmul.f32 %v3276_v35, %v12172_v61  ;;  %v9909_v21 = vpop.eup %9908 }
 0x6e8   :  { %v9911_v45 = vpop.eup %9910 }
 0x6e9   :  { %3355 = vrot.lane.b32.xlu0 %v3311_v43, %s10624_s3  ;;  %v3174_v57 = vmul.f32 %v9911_v45, %v2961_v6  ;;  %v9913_v58 = vpop.eup %9912  ;;  %vm3179_vm5 = vweird.f32 %v9911_v45 }
 0x6ea   :  { %v2962_v11 = vadd.f32 1.0, %v9913_v58  ;;  %vm3180_vm7 = vmor %vm3178_vm6, %vm3179_vm5 }
 0x6eb   :  { %v3428_v10 = vpop.permute.xlu0 %3427  ;;  %v3175_v0 = vsub.f32 1.0, %v3174_v57 }
 0x6ec   :  { %v3475_v4 = vmul.f32 %v3428_v10, %v11986_v48  ;;  %v3182_v48 = vand.u32 2147483647, %v2961_v6  ;;  %v3228_v10 = vmul.f32 %v12108_v42, %v11793_v47  ;;  %v8775_v47 = vld [vmem:[%s14437_s1 + $0xc0] sm:$0xff]  ;;  %vm3193_vm10 = vweird.f32 %v2962_v11 }
 0x6ed   :  { %v3176_v29 = vmul.f32 %v9911_v45, %v3175_v0  ;;  %8411 = vmatmul.msk.bf16.gmra.mxu0 %vm517_vm0, %v8775_v47 }
 0x6ee   :  { %v3344_v19 = vpop.permute.xlu1 %3343  ;;  %vm3183_vm8 = vcmp.eq.f32.partialorder %v3182_v48, 8.507059e+37 }
 0x6ef   :  { %v12187_v35 = vadd.f32 %v3344_v19, %v3225_v31  ;;  %v3177_v56 = vadd.f32 %v9911_v45, %v3176_v29  ;;  %v3185_v19 = vor.u32 1.1754944e-38, %v3184_v18 }
 0x6f1   :  { %3441 = vrot.lane.b32.xlu0 %v9909_v21, %s10624_s3  ;;  %9914 = vtanh.f32 %v12187_v35  ;;  %v3350_v21 = vpop.permute.xlu2 %3349 }
 0x6f2   :  { %9916 = vrcp.f32 %v2962_v11 }
 0x6f3   :  { %v3278_v41 = vpop.permute.xlu0 %3277 }
 0x6f4   :  { %v3312_v53 = vmul.f32 %v3278_v41, %v12179_v49 }
 0x6f6   :  { %v3430_v55 = vpop.permute.xlu1 %3429  ;;  %3357 = vrot.lane.b32.xlu1 %v3312_v53, %s10624_s3  ;;  %v12194_v53 = vadd.f32 %v3350_v21, %v3228_v10 }
 0x6f7   :  { %v3476_v44 = vmul.f32 %v3430_v55, %v11973_v7  ;;  %v9915_v46 = vpop.eup %9914  ;;  %v3181_v7 = vsel %vm3180_vm7, %v9911_v45, %v3177_v56  ;;  %v3199_v56 = vand.u32 2147483648, %v2962_v11 }
 0x6f8   :  { %v9917_v41 = vpop.eup %9916  ;;  %v12196_v57 = vsel %vm3183_vm8, %v3185_v19, %v3181_v7  ;;  %9918 = vtanh.f32 %v12194_v53 }
 0x6f9   :  { %v3524_v43 = vpack.c.bf16 %v3476_v44, %v3475_v4  ;;  %v3189_v55 = vmul.f32 %v9917_v41, %v2962_v11  ;;  %vm3194_vm9 = vweird.f32 %v9917_v41  ;;  %v3200_v48 = vor.u32 1.1754944e-38, %v3199_v56 }
 0x6fa   :  { %vm3195_vm11 = vmor %vm3193_vm10, %vm3194_vm9 }
 0x6fb   :  { %3540 = vrot.lane.b32.xlu2 %v3524_v43, %s10625_s21  ;;  %v3190_v6 = vsub.f32 1.0, %v3189_v55  ;;  %v3432_v44 = vpop.permute.xlu0 %3431  ;;  %v3230_v43 = vmul.f32 %v12160_v12, %v11813_v36  ;;  %v3227_v36 = vmul.f32 %v12127_v34, %v11774_v22  ;;  %v3229_v22 = vmul.f32 %v12149_v28, %v11798_v32 }
 0x6fd   :  { %v3280_v24 = vpop.permute.xlu2 %3279  ;;  %v3191_v4 = vmul.f32 %v9917_v41, %v3190_v6 }
 0x6fe   :  { %v3313_v31 = vmul.f32 %v3280_v24, %v12196_v57  ;;  %v9919_v45 = vpop.eup %9918  ;;  %v3477_v24 = vmul.f32 %v3432_v44, %v12021_v23 }
 0x6ff   :  { %v3192_v21 = vadd.f32 %v9917_v41, %v3191_v4 }
 0x701   :  { %v3196_v18 = vsel %vm3195_vm11, %v9917_v41, %v3192_v21  ;;  %v3231_v21 = vmul.f32 %v12172_v61, %v11860_v26  ;;  %v3233_v26 = vmul.f32 %v12196_v57, %v11887_v50 }
 0x703   :  { %3439 = vrot.lane.b32.xlu2 %v9915_v46, %s10624_s3  ;;  %v3197_v46 = vand.u32 2147483647, %v2962_v11 }
 0x705   :  { %vm3198_vm12 = vcmp.eq.f32.partialorder %v3197_v46, 8.507059e+37  ;;  %v8776_v46 = vld [vmem:[%s14437_s1 + $0xc8] sm:$0xff] }
 0x706   :  { %v12213_v10 = vsel %vm3198_vm12, %v3200_v48, %v3196_v18  ;;  %8412 = vmatmul.msk.bf16.gmra.mxu0 %vm517_vm0, %v8776_v46 }
 0x70b   :  { %3359 = vrot.lane.b32.xlu2 %v3313_v31, %s10624_s3 }
 0x713   :  { %3445 = vrot.lane.b32.xlu2 %v9919_v45, %s10624_s3 }
 0x715   :  { %v3348_v0 = vpop.permute.xlu1 %3347  ;;  %v3354_v58 = vpop.permute.xlu2 %3353 }
 0x716   :  { %v12208_v29 = vadd.f32 %v3354_v58, %v3230_v43  ;;  %v12218_v6 = vadd.f32 %v3348_v0, %v3227_v36 }
 0x718   :  { %9920 = vtanh.f32 %v12208_v29 }
 0x719   :  { %9922 = vtanh.f32 %v12218_v6 }
 0x71d   :  { %v3434_v7 = vpop.permute.xlu1 %3433  ;;  %v3282_v19 = vpop.permute.xlu0 %3281 }
 0x71e   :  { %v3478_v31 = vmul.f32 %v3434_v7, %v12005_v51  ;;  %v3314_v55 = vmul.f32 %v3282_v19, %v12213_v10  ;;  %v9921_v11 = vpop.eup %9920 }
 0x71f   :  { %3449 = vrot.lane.b32.xlu2 %v9921_v11, %s10624_s3  ;;  %v9923_v51 = vpop.eup %9922 }
 0x720   :  { %v3525_v45 = vpack.c.bf16 %v3478_v31, %v3477_v24  ;;  %3361 = vrot.lane.b32.xlu0 %v3314_v55, %s10624_s3  ;;  %v3232_v55 = vmul.f32 %v12179_v49, %v11848_v60  ;;  %v3234_v60 = vmul.f32 %v12213_v10, %v11889_v59 }
 0x722   :  { %3542 = vrot.lane.b32.xlu1 %v3525_v45, %s10625_s21  ;;  %v8777_v45 = vld [vmem:[%s14437_s1 + $0xd0] sm:$0xff] }
 0x723   :  { %8413 = vmatmul.msk.bf16.gmra.mxu0 %vm517_vm0, %v8777_v45 }
 0x725   :  { %v3352_v23 = vpop.permute.xlu1 %3351  ;;  %v3436_v4 = vpop.permute.xlu0 %3435 }
 0x726   :  { %v12226_v41 = vadd.f32 %v3352_v23, %v3229_v22  ;;  %v3479_v44 = vmul.f32 %v3436_v4, %v12016_v37 }
 0x728   :  { %9924 = vtanh.f32 %v12226_v41 }
 0x72a   :  { %3443 = vrot.lane.b32.xlu1 %v9923_v51, %s10624_s3 }
 0x72d   :  { %v3438_v47 = vpop.permute.xlu1 %3437 }
 0x72e   :  { %v3480_v43 = vmul.f32 %v3438_v47, %v12032_v27  ;;  %v9925_v58 = vpop.eup %9924 }
 0x730   :  { %v3526_v0 = vpack.c.bf16 %v3480_v43, %v3479_v44 }
 0x732   :  { %3447 = vrot.lane.b32.xlu1 %v9925_v58, %s10624_s3  ;;  %3544 = vrot.lane.b32.xlu0 %v3526_v0, %s10625_s21 }
 0x755   :  { %v3541_v32 = vpop.permute.xlu2 %3540 }
 0x756   :  { %8523 = vmatmul.msk.bf16.vlgmr.msra.gmra.mxu1 %vm517_vm0, %v3541_v32 }
 0x75b   :  { %v3356_v56 = vpop.permute.xlu0 %3355 }
 0x75c   :  { %v12240_v37 = vadd.f32 %v3356_v56, %v3231_v21 }
 0x75d   :  { %v3440_v27 = vpop.permute.xlu2 %3439 }
 0x75e   :  { %9926 = vtanh.f32 %v12240_v37  ;;  %v3481_v36 = vmul.f32 %v3440_v27, %v12068_v9 }
 0x763   :  { %v3442_v18 = vpop.permute.xlu0 %3441 }
 0x764   :  { %v9927_v48 = vpop.eup %9926  ;;  %v3482_v7 = vmul.f32 %v3442_v18, %v12087_v39 }
 0x765   :  { %3451 = vrot.lane.b32.xlu1 %v9927_v48, %s10624_s3  ;;  %v3360_v19 = vpop.permute.xlu2 %3359  ;;  %v12285_v48 = vld [vmem:[%s14436_s5] ss:$0 sm:$0xff] }
 0x766   :  { %v3527_v24 = vpack.c.bf16 %v3482_v7, %v3481_v36  ;;  %v12249_v31 = vadd.f32 %v3360_v19, %v3233_v26 }
 0x768   :  { %9928 = vtanh.f32 %v12249_v31  ;;  %v3358_v11 = vpop.permute.xlu1 %3357  ;;  %3546 = vrot.lane.b32.xlu0 %v3527_v24, %s10625_s21 }
 0x769   :  { %v12255_v9 = vadd.f32 %v3358_v11, %v3232_v55 }
 0x76b   :  { %9930 = vtanh.f32 %v12255_v9 }
 0x76d   :  { %v3446_v4 = vpop.permute.xlu2 %3445 }
 0x76e   :  { %v9929_v39 = vpop.eup %9928  ;;  %v3484_v43 = vmul.f32 %v3446_v4, %v12108_v42  ;;  %v8778_v42 = vld [vmem:[%s14437_s1 + $0xd8] sm:$0xff] }
 0x76f   :  { %3455 = vrot.lane.b32.xlu1 %v9929_v39, %s10624_s3  ;;  %8414 = vmatmul.msk.bf16.gmra.mxu0 %vm517_vm0, %v8778_v42 }
 0x771   :  { %v9931_v50 = vpop.eup %9930 }
 0x772   :  { %3453 = vrot.lane.b32.xlu2 %v9931_v50, %s10624_s3 }
 0x779   :  { %v3450_v59 = vpop.permute.xlu2 %3449 }
 0x77a   :  { %v3486_v56 = vmul.f32 %v3450_v59, %v12160_v12 }
 0x792   :  { %v3362_v22 = vpop.permute.xlu0 %3361 }
 0x793   :  { %v12266_v23 = vadd.f32 %v3362_v22, %v3234_v60 }
 0x794   :  { %v3543_v51 = vpop.permute.xlu1 %3542 }
 0x795   :  { %9932 = vtanh.f32 %v12266_v23  ;;  %8524 = vmatmul.msk.bf16.gmra.mxu1 %vm517_vm0, %v3543_v51  ;;  %v8779_v51 = vld [vmem:[%s14437_s1 + $0xe0] sm:$0xff] }
 0x796   :  { %8415 = vmatmul.msk.bf16.gmra.mxu0 %vm517_vm0, %v8779_v51 }
 0x79b   :  { %v9933_v47 = vpop.eup %9932 }
 0x79c   :  { %v3444_v44 = vpop.permute.xlu1 %3443  ;;  %3457 = vrot.lane.b32.xlu2 %v9933_v47, %s10624_s3 }
 0x79d   :  { %v3483_v0 = vmul.f32 %v3444_v44, %v12127_v34  ;;  %v839_v34 = vpop.f32.mrf.mxu0  ;;  %v8780_v44 = vld [vmem:[%s14437_s1 + $0xe8] sm:$0xff] }
 0x79f   :  { %v3528_v58 = vpack.c.bf16 %v3484_v43, %v3483_v0 }
 0x7a1   :  { %3548 = vrot.lane.b32.xlu0 %v3528_v58, %s10625_s21 }
 0x7a4   :  { %v3448_v32 = vpop.permute.xlu1 %3447  ;;  %v3545_v21 = vpop.permute.xlu0 %3544 }
 0x7a5   :  { %v3485_v46 = vmul.f32 %v3448_v32, %v12149_v28  ;;  %8525 = vmatmul.msk.bf16.gmra.mxu1 %vm517_vm0, %v3545_v21  ;;  %v841_v18 = vpop.f32.mrf.mxu0  ;;  %v840_v28 = vadd.f32 %v12285_v48, %v839_v34 }
 0x7a6   :  { %v842_v12 = vadd.f32 %v12285_v48, %v841_v18  ;;  %8416 = vmatmul.msk.bf16.gmra.mxu0 %vm517_vm0, %v8780_v44 }
 0x7a7   :  { %v3529_v27 = vpack.c.bf16 %v3486_v56, %v3485_v46 }
 0x7a8   :  { %v8962_v36 = vpack.c.bf16 %v842_v12, %v840_v28 }
 0x7a9   :  { %3550 = vrot.lane.b32.xlu0 %v3529_v27, %s10625_s21 }
 0x7aa   :  { %v9257_v7 = vunpack.c.l.bf16 %v8962_v36  ;;  %v9258_v50 = vunpack.c.h.bf16 %v8962_v36 }
 0x7ad   :  { %v844_v0 = vpop.f32.mrf.mxu0 }
 0x7ae   :  { %v845_v56 = vadd.f32 %v12285_v48, %v844_v0 }
 0x7b5   :  { %v846_v21 = vpop.f32.mrf.mxu0 }
 0x7b6   :  { %v847_v46 = vadd.f32 %v12285_v48, %v846_v21 }
 0x7b8   :  { %v8967_v42 = vpack.c.bf16 %v847_v46, %v845_v56 }
 0x7ba   :  { %v9261_v34 = vunpack.c.l.bf16 %v8967_v42  ;;  %v9262_v36 = vunpack.c.h.bf16 %v8967_v42 }
 0x7bd   :  { %v849_v27 = vpop.f32.mrf.mxu0 }
 0x7cc   :  { %v3454_v24 = vpop.permute.xlu2 %3453 }
 0x7cd   :  { %v3488_v11 = vmul.f32 %v3454_v24, %v12179_v49 }
 0x7d3   :  { %v3589_v26 = vpop.f32.mrf.mxu1 }
 0x7d4   :  { %v3629_v19 = vadd.f32 %v9257_v7, %v3589_v26  ;;  %v8781_v26 = vld [vmem:[%s14437_s1 + $0xf0] sm:$0xff] }
 0x7d5   :  { %8417 = vmatmul.msk.bf16.gmra.mxu0 %vm517_vm0, %v8781_v26 }
 0x7d6   :  { %9934 = vtanh.f32 %v3629_v19 }
 0x7d7   :  { %v3452_v55 = vpop.permute.xlu1 %3451 }
 0x7d8   :  { %v3487_v39 = vmul.f32 %v3452_v55, %v12172_v61 }
 0x7da   :  { %v3530_v45 = vpack.c.bf16 %v3488_v11, %v3487_v39  ;;  %v3547_v60 = vpop.permute.xlu0 %3546 }
 0x7db   :  { %v3591_v22 = vpop.f32.mrf.mxu1  ;;  %8526 = vmatmul.msk.bf16.gmra.mxu1 %vm517_vm0, %v3547_v60 }
 0x7dc   :  { %v9935_v4 = vpop.eup %9934  ;;  %v3630_v47 = vadd.f32 %v9258_v50, %v3591_v22  ;;  %3552 = vrot.lane.b32.xlu1 %v3530_v45, %s10625_s21  ;;  %v8531_v45 = vmul.f32 -1.442695, %v3629_v19 }
 0x7dd   :  { %3997 = vrot.lane.b32.xlu0 %v9935_v4, %s10624_s3 }
 0x7de   :  { %9936 = vtanh.f32 %v3630_v47 }
 0x7e1   :  { %v3456_v49 = vpop.permute.xlu1 %3455 }
 0x7e2   :  { %v3489_v58 = vmul.f32 %v3456_v49, %v12196_v57  ;;  %v851_v57 = vpop.f32.mrf.mxu0  ;;  %v8532_v49 = vmul.f32 -1.442695, %v3630_v47 }
 0x7e3   :  { %v852_v7 = vadd.f32 %v12285_v48, %v851_v57 }
 0x7e4   :  { %v9937_v61 = vpop.eup %9936 }
 0x7e5   :  { %3999 = vrot.lane.b32.xlu1 %v9937_v61, %s10624_s3 }
 0x7f6   :  { %v3458_v43 = vpop.permute.xlu2 %3457 }
 0x7f7   :  { %v3490_v59 = vmul.f32 %v3458_v43, %v12213_v10  ;;  %v850_v10 = vadd.f32 %v12285_v48, %v849_v27  ;;  %v854_v27 = vpop.f32.mrf.mxu0 }
 0x7f9   :  { %v3531_v32 = vpack.c.bf16 %v3490_v59, %v3489_v58  ;;  %v8972_v39 = vpack.c.bf16 %v852_v7, %v850_v10  ;;  %v8782_v59 = vld [vmem:[%s14437_s1 + $0xf8] sm:$0xff] }
 0x7fa   :  { %8418 = vmatmul.msk.bf16.gmra.mxu0 %vm517_vm0, %v8782_v59 }
 0x7fb   :  { %3554 = vrot.lane.b32.xlu2 %v3531_v32, %s10625_s21  ;;  %v9265_v50 = vunpack.c.l.bf16 %v8972_v39  ;;  %v9266_v61 = vunpack.c.h.bf16 %v8972_v39 }
 0x812   :  { %v3594_v18 = vpop.f32.mrf.mxu1 }
 0x813   :  { %v3631_v28 = vadd.f32 %v9261_v34, %v3594_v18  ;;  %v3549_v12 = vpop.permute.xlu0 %3548 }
 0x814   :  { %8527 = vmatmul.msk.bf16.gmra.mxu1 %vm517_vm0, %v3549_v12 }
 0x815   :  { %9938 = vtanh.f32 %v3631_v28 }
 0x81a   :  { %v3596_v24 = vpop.f32.mrf.mxu1 }
 0x81b   :  { %v9939_v55 = vpop.eup %9938  ;;  %v12315_v11 = vadd.f32 %v9262_v36, %v3596_v24  ;;  %v3551_v51 = vpop.permute.xlu0 %3550  ;;  %v8533_v36 = vmul.f32 -1.442695, %v3631_v28 }
 0x81c   :  { %4001 = vrot.lane.b32.xlu2 %v9939_v55, %s10624_s3  ;;  %v856_v24 = vpop.f32.mrf.mxu0 }
 0x81d   :  { %9940 = vtanh.f32 %v12315_v11 }
 0x822   :  { %v3599_v60 = vpop.f32.mrf.mxu1 }
 0x823   :  { %v9941_v22 = vpop.eup %9940  ;;  %v12319_v4 = vadd.f32 %v9265_v50, %v3599_v60  ;;  %v855_v50 = vadd.f32 %v12285_v48, %v854_v27  ;;  %v857_v60 = vadd.f32 %v12285_v48, %v856_v24 }
 0x824   :  { %4003 = vrot.lane.b32.xlu0 %v9941_v22, %s10624_s3  ;;  %8528 = vmatmul.msk.bf16.gmra.mxu1 %vm517_vm0, %v3551_v51 }
 0x825   :  { %9942 = vtanh.f32 %v12319_v4 }
 0x826   :  { %9944 = vpow2.f32 %v8531_v45 }
 0x82a   :  { %v3601_v44 = vpop.f32.mrf.mxu1 }
 0x82b   :  { %v9943_v43 = vpop.eup %9942  ;;  %v12324_v0 = vadd.f32 %v9266_v61, %v3601_v44  ;;  %v8977_v44 = vpack.c.bf16 %v857_v60, %v855_v50 }
 0x82c   :  { %v9945_v58 = vpop.eup %9944  ;;  %4005 = vrot.lane.b32.xlu1 %v9943_v43, %s10624_s3 }
 0x82d   :  { %9946 = vtanh.f32 %v12324_v0  ;;  %v3693_v19 = vadd.f32 1.0, %v9945_v58 }
 0x82e   :  { %9948 = vpow2.f32 %v8532_v49 }
 0x82f   :  { %9950 = vrcp.f32 %v3693_v19  ;;  %v3720_v7 = vand.u32 2147483648, %v3693_v19  ;;  %vm3714_vm14 = vweird.f32 %v3693_v19  ;;  %v3718_v26 = vand.u32 2147483647, %v3693_v19 }
 0x831   :  { %v3721_v45 = vor.u32 1.1754944e-38, %v3720_v7  ;;  %vm3719_vm1 = vcmp.eq.f32.partialorder %v3718_v26, 8.507059e+37 }
 0x833   :  { %v9947_v32 = vpop.eup %9946 }
 0x834   :  { %v9949_v47 = vpop.eup %9948  ;;  %4007 = vrot.lane.b32.xlu2 %v9947_v32, %s10624_s3 }
 0x835   :  { %v3694_v21 = vadd.f32 1.0, %v9949_v47  ;;  %v9951_v56 = vpop.eup %9950  ;;  %v9269_v47 = vunpack.c.l.bf16 %v8977_v44 }
 0x836   :  { %v3710_v46 = vmul.f32 %v9951_v56, %v3693_v19  ;;  %vm3715_vm13 = vweird.f32 %v9951_v56 }
 0x837   :  { %9952 = vrcp.f32 %v3694_v21  ;;  %vm3716_vm15 = vmor %vm3714_vm14, %vm3715_vm13  ;;  %v3735_v43 = vand.u32 2147483648, %v3694_v21  ;;  %vm3729_vm3 = vweird.f32 %v3694_v21  ;;  %v3733_v58 = vand.u32 2147483647, %v3694_v21 }
 0x838   :  { %v3711_v42 = vsub.f32 1.0, %v3710_v46  ;;  %9954 = vpow2.f32 %v8533_v36 }
 0x839   :  { %v3736_v32 = vor.u32 1.1754944e-38, %v3735_v43  ;;  %vm3734_vm5 = vcmp.eq.f32.partialorder %v3733_v58, 8.507059e+37 }
 0x83a   :  { %v3712_v18 = vmul.f32 %v9951_v56, %v3711_v42 }
 0x83c   :  { %v3713_v57 = vadd.f32 %v9951_v56, %v3712_v18 }
 0x83d   :  { %v9953_v34 = vpop.eup %9952 }
 0x83e   :  { %v3725_v12 = vmul.f32 %v9953_v34, %v3694_v21  ;;  %v3717_v55 = vsel %vm3716_vm15, %v9951_v56, %v3713_v57  ;;  %vm3730_vm2 = vweird.f32 %v9953_v34  ;;  %v9955_v19 = vpop.eup %9954  ;;  %v9270_v57 = vunpack.c.h.bf16 %v8977_v44 }
 0x83f   :  { %v12335_v51 = vsel %vm3719_vm1, %v3721_v45, %v3717_v55  ;;  %vm3731_vm4 = vmor %vm3729_vm3, %vm3730_vm2  ;;  %v3695_v56 = vadd.f32 1.0, %v9955_v19 }
 0x840   :  { %v3726_v10 = vsub.f32 1.0, %v3725_v12 }
 0x841   :  { %9956 = vrcp.f32 %v3695_v56  ;;  %v3750_v60 = vand.u32 2147483648, %v3695_v56  ;;  %vm3744_vm7 = vweird.f32 %v3695_v56 }
 0x842   :  { %v3727_v39 = vmul.f32 %v9953_v34, %v3726_v10 }
 0x843   :  { %v3751_v43 = vor.u32 1.1754944e-38, %v3750_v60 }
 0x844   :  { %v3728_v49 = vadd.f32 %v9953_v34, %v3727_v39  ;;  %v8534_v39 = vmul.f32 -1.442695, %v12315_v11 }
 0x846   :  { %v3732_v59 = vsel %vm3731_vm4, %v9953_v34, %v3728_v49  ;;  %v8536_v49 = vmul.f32 -1.442695, %v12324_v0 }
 0x847   :  { %v12340_v46 = vsel %vm3734_vm5, %v3736_v32, %v3732_v59  ;;  %v9957_v34 = vpop.eup %9956  ;;  %v859_v32 = vpop.f32.mrf.mxu0 }
 0x848   :  { %v3740_v26 = vmul.f32 %v9957_v34, %v3695_v56  ;;  %vm3745_vm6 = vweird.f32 %v9957_v34 }
 0x849   :  { %vm3746_vm8 = vmor %vm3744_vm7, %vm3745_vm6 }
 0x84a   :  { %v3741_v24 = vsub.f32 1.0, %v3740_v26 }
 0x84c   :  { %v3742_v50 = vmul.f32 %v9957_v34, %v3741_v24 }
 0x84e   :  { %v3553_v22 = vpop.permute.xlu1 %3552  ;;  %v3743_v45 = vadd.f32 %v9957_v34, %v3742_v50 }
 0x84f   :  { %v3998_v61 = vpop.permute.xlu0 %3997  ;;  %8529 = vmatmul.msk.bf16.gmra.mxu1 %vm517_vm0, %v3553_v22  ;;  %v8535_v22 = vmul.f32 -1.442695, %v12319_v4 }
 0x850   :  { %v4045_v28 = vmul.f32 %v3998_v61, %v12335_v51  ;;  %v3748_v61 = vand.u32 2147483647, %v3695_v56  ;;  %v3747_v44 = vsel %vm3746_vm8, %v9957_v34, %v3743_v45  ;;  %v860_v34 = vadd.f32 %v12285_v48, %v859_v32 }
 0x852   :  { %4077 = vrot.lane.b32.xlu0 %v4045_v28, %s10624_s3  ;;  %vm3749_vm9 = vcmp.eq.f32.partialorder %v3748_v61, 8.507059e+37 }
 0x853   :  { %v12353_v58 = vsel %vm3749_vm9, %v3751_v43, %v3747_v44 }
 0x855   :  { %v3555_v21 = vpop.permute.xlu2 %3554 }
 0x857   :  { %v4000_v27 = vpop.permute.xlu1 %3999 }
 0x858   :  { %v4046_v42 = vmul.f32 %v4000_v27, %v12340_v46  ;;  %v3604_v18 = vpop.f32.mrf.mxu1 }
 0x859   :  { %v3635_v12 = vadd.f32 %v9269_v47, %v3604_v18 }
 0x85a   :  { %4079 = vrot.lane.b32.xlu1 %v4046_v42, %s10624_s3  ;;  %v861_v42 = vpop.f32.mrf.mxu0 }
 0x85b   :  { %9958 = vtanh.f32 %v3635_v12  ;;  %v8537_v45 = vmul.f32 -1.442695, %v3635_v12 }
 0x85f   :  { %8530 = vmatmul.msk.bf16.gmra.mxu1 %vm517_vm0, %v3555_v21 }
 0x860   :  { %v3606_v10 = vpop.f32.mrf.mxu1 }
 0x861   :  { %v9959_v36 = vpop.eup %9958  ;;  %v12345_v7 = vadd.f32 %v9270_v57, %v3606_v10  ;;  %v862_v10 = vadd.f32 %v12285_v48, %v861_v42 }
 0x862   :  { %4009 = vrot.lane.b32.xlu2 %v9959_v36, %s10624_s3  ;;  %v864_v36 = vpop.f32.mrf.mxu0 }
 0x863   :  { %9960 = vtanh.f32 %v12345_v7  ;;  %v865_v42 = vadd.f32 %v12285_v48, %v864_v36 }
 0x864   :  { %9962 = vpow2.f32 %v8534_v39  ;;  %v8982_v39 = vpack.c.bf16 %v862_v10, %v860_v34 }
 0x865   :  { %9964 = vpow2.f32 %v8535_v22 }
 0x866   :  { %9966 = vpow2.f32 %v8536_v49  ;;  %v9273_v61 = vunpack.c.l.bf16 %v8982_v39  ;;  %v9274_v10 = vunpack.c.h.bf16 %v8982_v39 }
 0x869   :  { %v9961_v55 = vpop.eup %9960 }
 0x86a   :  { %4011 = vrot.lane.b32.xlu0 %v9961_v55, %s10624_s3  ;;  %v9963_v28 = vpop.eup %9962  ;;  %v866_v32 = vpop.f32.mrf.mxu0 }
 0x86b   :  { %v3696_v11 = vadd.f32 1.0, %v9963_v28  ;;  %v9965_v4 = vpop.eup %9964 }
 0x86c   :  { %v9967_v47 = vpop.eup %9966  ;;  %v12357_v56 = vadd.f32 1.0, %v9965_v4 }
 0x86d   :  { %9968 = vrcp.f32 %v3696_v11  ;;  %v12359_v27 = vadd.f32 1.0, %v9967_v47  ;;  %v3765_v28 = vand.u32 2147483648, %v3696_v11  ;;  %vm3759_vm11 = vweird.f32 %v3696_v11 }
 0x86e   :  { %9970 = vrcp.f32 %v12357_v56  ;;  %v3763_v43 = vand.u32 2147483647, %v3696_v11  ;;  %vm3774_vm1 = vweird.f32 %v12357_v56 }
 0x86f   :  { %9972 = vrcp.f32 %v12359_v27  ;;  %v3766_v12 = vor.u32 1.1754944e-38, %v3765_v28  ;;  %vm3789_vm3 = vweird.f32 %v12359_v27  ;;  %v3793_v28 = vand.u32 2147483647, %v12359_v27 }
 0x870   :  { %9974 = vpow2.f32 %v8537_v45  ;;  %vm3764_vm13 = vcmp.eq.f32.partialorder %v3763_v43, 8.507059e+37  ;;  %v3778_v45 = vand.u32 2147483647, %v12357_v56 }
 0x871   :  { %vm3794_vm6 = vcmp.eq.f32.partialorder %v3793_v28, 8.507059e+37 }
 0x872   :  { %vm3779_vm5 = vcmp.eq.f32.partialorder %v3778_v45, 8.507059e+37  ;;  %v8538_v45 = vmul.f32 -1.442695, %v12345_v7 }
 0x873   :  { %v9969_v0 = vpop.eup %9968 }
 0x874   :  { %v3755_v18 = vmul.f32 %v9969_v0, %v3696_v11  ;;  %v12363_v21 = vpop.eup %9970  ;;  %vm3760_vm10 = vweird.f32 %v9969_v0  ;;  %v867_v11 = vadd.f32 %v12285_v48, %v866_v32 }
 0x875   :  { %v12367_v26 = vpop.eup %9972  ;;  %v3770_v55 = vmul.f32 %v12363_v21, %v12357_v56  ;;  %vm3761_vm12 = vmor %vm3759_vm11, %vm3760_vm10  ;;  %vm3775_vm14 = vweird.f32 %v12363_v21 }
 0x876   :  { %v4002_v19 = vpop.permute.xlu2 %4001  ;;  %v3756_v57 = vsub.f32 1.0, %v3755_v18  ;;  %v3785_v50 = vmul.f32 %v12367_v26, %v12359_v27  ;;  %vm3790_vm15 = vweird.f32 %v12367_v26  ;;  %v8987_v39 = vpack.c.bf16 %v867_v11, %v865_v42  ;;  %vm3776_vm2 = vmor %vm3774_vm1, %vm3775_vm14 }
 0x877   :  { %v4047_v59 = vmul.f32 %v4002_v19, %v12353_v58  ;;  %v3771_v22 = vsub.f32 1.0, %v3770_v55  ;;  %v9975_v55 = vpop.eup %9974  ;;  %vm3791_vm4 = vmor %vm3789_vm3, %vm3790_vm15 }
 0x878   :  { %v3757_v24 = vmul.f32 %v9969_v0, %v3756_v57  ;;  %v3786_v49 = vsub.f32 1.0, %v3785_v50 }
 0x879   :  { %4081 = vrot.lane.b32.xlu1 %v4047_v59, %s10624_s3  ;;  %v3772_v4 = vmul.f32 %v12363_v21, %v3771_v22  ;;  %v3795_v22 = vand.u32 2147483648, %v12359_v27  ;;  %v9277_v27 = vunpack.c.l.bf16 %v8987_v39 }
 0x87a   :  { %v3758_v60 = vadd.f32 %v9969_v0, %v3757_v24  ;;  %v3787_v47 = vmul.f32 %v12367_v26, %v3786_v49  ;;  %v3780_v24 = vand.u32 2147483648, %v12357_v56 }
 0x87c   :  { %v3762_v59 = vsel %vm3761_vm12, %v9969_v0, %v3758_v60  ;;  %v3773_v0 = vadd.f32 %v12363_v21, %v3772_v4  ;;  %v3788_v50 = vadd.f32 %v12367_v26, %v3787_v47  ;;  %v3781_v56 = vor.u32 1.1754944e-38, %v3780_v24 }
 0x87d   :  { %v12379_v18 = vsel %vm3764_vm13, %v3766_v12, %v3762_v59  ;;  %v3796_v59 = vor.u32 1.1754944e-38, %v3795_v22 }
 0x87e   :  { %v3777_v49 = vsel %vm3776_vm2, %v12363_v21, %v3773_v0  ;;  %v3792_v43 = vsel %vm3791_vm4, %v12367_v26, %v3788_v50  ;;  %v9278_v0 = vunpack.c.h.bf16 %v8987_v39 }
 0x87f   :  { %v12402_v4 = vsel %vm3779_vm5, %v3781_v56, %v3777_v49  ;;  %v12405_v21 = vsel %vm3794_vm6, %v3796_v59, %v3792_v43 }
 0x88e   :  { %v4008_v32 = vpop.permute.xlu2 %4007 }
 0x88f   :  { %v4050_v42 = vmul.f32 %v4008_v32, %v12405_v21 }
 0x891   :  { %v3609_v44 = vpop.f32.mrf.mxu1 }
 0x892   :  { %v12373_v19 = vadd.f32 %v9273_v61, %v3609_v44  ;;  %v3699_v44 = vadd.f32 1.0, %v9975_v55 }
 0x894   :  { %9976 = vtanh.f32 %v12373_v19  ;;  %v3810_v39 = vand.u32 2147483648, %v3699_v44  ;;  %vm3804_vm8 = vweird.f32 %v3699_v44  ;;  %v3808_v49 = vand.u32 2147483647, %v3699_v44 }
 0x896   :  { %v4004_v57 = vpop.permute.xlu0 %4003  ;;  %v3811_v59 = vor.u32 1.1754944e-38, %v3810_v39  ;;  %vm3809_vm10 = vcmp.eq.f32.partialorder %v3808_v49, 8.507059e+37 }
 0x897   :  { %v4048_v34 = vmul.f32 %v4004_v57, %v12379_v18 }
 0x899   :  { %v3611_v36 = vpop.f32.mrf.mxu1  ;;  %4083 = vrot.lane.b32.xlu2 %v4048_v34, %s10624_s3 }
 0x89a   :  { %v9977_v60 = vpop.eup %9976  ;;  %v12392_v61 = vadd.f32 %v9274_v10, %v3611_v36 }
 0x89b   :  { %4013 = vrot.lane.b32.xlu0 %v9977_v60, %s10624_s3 }
 0x89c   :  { %9978 = vtanh.f32 %v12392_v61 }
 0x89d   :  { %9980 = vrcp.f32 %v3699_v44 }
 0x89e   :  { %v4006_v12 = vpop.permute.xlu1 %4005 }
 0x89f   :  { %v4049_v47 = vmul.f32 %v4006_v12, %v12402_v4 }
 0x8a1   :  { %v3614_v57 = vpop.f32.mrf.mxu1  ;;  %4085 = vrot.lane.b32.xlu2 %v4049_v47, %s10624_s3  ;;  %v869_v47 = vpop.f32.mrf.mxu0 }
 0x8a2   :  { %v9979_v11 = vpop.eup %9978  ;;  %v12409_v26 = vadd.f32 %v9277_v27, %v3614_v57 }
 0x8a3   :  { %4015 = vrot.lane.b32.xlu1 %v9979_v11, %s10624_s3  ;;  %4087 = vrot.lane.b32.xlu0 %v4050_v42, %s10624_s3  ;;  %v9981_v34 = vpop.eup %9980  ;;  %v3965_v42 = vmul.f32 %v12335_v51, %v12057_v30 }
 0x8a4   :  { %9982 = vtanh.f32 %v12409_v26  ;;  %v3800_v24 = vmul.f32 %v9981_v34, %v3699_v44  ;;  %vm3805_vm7 = vweird.f32 %v9981_v34 }
 0x8a5   :  { %vm3806_vm9 = vmor %vm3804_vm8, %vm3805_vm7 }
 0x8a6   :  { %v3801_v36 = vsub.f32 1.0, %v3800_v24 }
 0x8a8   :  { %v3802_v60 = vmul.f32 %v9981_v34, %v3801_v36 }
 0x8a9   :  { %v3616_v10 = vpop.f32.mrf.mxu1 }
 0x8aa   :  { %v9983_v55 = vpop.eup %9982  ;;  %v12414_v50 = vadd.f32 %v9278_v0, %v3616_v10  ;;  %v3803_v28 = vadd.f32 %v9981_v34, %v3802_v60  ;;  %v870_v10 = vadd.f32 %v12285_v48, %v869_v47 }
 0x8ab   :  { %4017 = vrot.lane.b32.xlu1 %v9983_v55, %s10624_s3  ;;  %v3966_v55 = vmul.f32 %v12340_v46, %v12066_v16 }
 0x8ac   :  { %9984 = vtanh.f32 %v12414_v50  ;;  %v3807_v43 = vsel %vm3806_vm9, %v9981_v34, %v3803_v28  ;;  %v871_v34 = vpop.f32.mrf.mxu0 }
 0x8ad   :  { %9986 = vpow2.f32 %v8538_v45  ;;  %v12420_v12 = vsel %vm3809_vm10, %v3811_v59, %v3807_v43  ;;  %v872_v24 = vadd.f32 %v12285_v48, %v871_v34 }
 0x8af   :  { %v8992_v28 = vpack.c.bf16 %v872_v24, %v870_v10 }
 0x8b1   :  { %v9282_v39 = vunpack.c.h.bf16 %v8992_v28  ;;  %v9281_v47 = vunpack.c.l.bf16 %v8992_v28 }
 0x8b2   :  { %v9985_v22 = vpop.eup %9984 }
 0x8b3   :  { %4019 = vrot.lane.b32.xlu2 %v9985_v22, %s10624_s3  ;;  %v9987_v56 = vpop.eup %9986 }
 0x8b4   :  { %v3700_v32 = vadd.f32 1.0, %v9987_v56  ;;  %v874_v34 = vpop.f32.mrf.mxu0 }
 0x8b5   :  { %v875_v28 = vadd.f32 %v12285_v48, %v874_v34 }
 0x8b6   :  { %9988 = vrcp.f32 %v3700_v32  ;;  %v3825_v16 = vand.u32 2147483648, %v3700_v32  ;;  %vm3819_vm12 = vweird.f32 %v3700_v32 }
 0x8bc   :  { %v4010_v27 = vpop.permute.xlu2 %4009  ;;  %v9989_v11 = vpop.eup %9988 }
 0x8bd   :  { %v4051_v7 = vmul.f32 %v4010_v27, %v12420_v12  ;;  %v3815_v0 = vmul.f32 %v9989_v11, %v3700_v32  ;;  %vm3820_vm11 = vweird.f32 %v9989_v11 }
 0x8be   :  { %vm3821_vm13 = vmor %vm3819_vm12, %vm3820_vm11 }
 0x8bf   :  { %4089 = vrot.lane.b32.xlu0 %v4051_v7, %s10624_s3  ;;  %v3816_v30 = vsub.f32 1.0, %v3815_v0  ;;  %v3823_v7 = vand.u32 2147483647, %v3700_v32  ;;  %v8539_v32 = vmul.f32 -1.442695, %v12373_v19 }
 0x8c1   :  { %v3817_v49 = vmul.f32 %v9989_v11, %v3816_v30  ;;  %vm3824_vm14 = vcmp.eq.f32.partialorder %v3823_v7, 8.507059e+37  ;;  %v8540_v30 = vmul.f32 -1.442695, %v12392_v61 }
 0x8c3   :  { %v3818_v59 = vadd.f32 %v9989_v11, %v3817_v49 }
 0x8c4   :  { %v4078_v57 = vpop.permute.xlu0 %4077 }
 0x8c5   :  { %v12426_v44 = vadd.f32 %v4078_v57, %v3965_v42  ;;  %v3822_v42 = vsel %vm3821_vm13, %v9989_v11, %v3818_v59  ;;  %v3826_v57 = vor.u32 1.1754944e-38, %v3825_v16  ;;  %v876_v11 = vpop.f32.mrf.mxu0 }
 0x8c7   :  { %9990 = vtanh.f32 %v12426_v44  ;;  %v12443_v10 = vsel %vm3824_vm14, %v3826_v57, %v3822_v42 }
 0x8cc   :  { %v3619_v36 = vpop.f32.mrf.mxu1  ;;  %v4080_v45 = vpop.permute.xlu1 %4079 }
 0x8cd   :  { %v9991_v60 = vpop.eup %9990  ;;  %v12433_v22 = vadd.f32 %v4080_v45, %v3966_v55  ;;  %v12441_v0 = vadd.f32 %v9281_v47, %v3619_v36  ;;  %v8541_v47 = vmul.f32 -1.442695, %v12409_v26  ;;  %v3969_v26 = vmul.f32 %v12402_v4, %v12139_v33 }
 0x8ce   :  { %4173 = vrot.lane.b32.xlu2 %v9991_v60, %s10624_s3 }
 0x8cf   :  { %9992 = vtanh.f32 %v12433_v22 }
 0x8d4   :  { %v3621_v56 = vpop.f32.mrf.mxu1 }
 0x8d5   :  { %v12437_v43 = vadd.f32 %v9282_v39, %v3621_v56  ;;  %v9993_v27 = vpop.eup %9992  ;;  %v877_v39 = vadd.f32 %v12285_v48, %v876_v11  ;;  %v3967_v56 = vmul.f32 %v12353_v58, %v12081_v38 }
 0x8d6   :  { %4175 = vrot.lane.b32.xlu0 %v9993_v27, %s10624_s3 }
 0x8d7   :  { %9994 = vtanh.f32 %v12437_v43  ;;  %v12458_v59 = vpack.c.bf16 %v877_v39, %v875_v28 }
 0x8d8   :  { %9996 = vtanh.f32 %v12441_v0 }
 0x8d9   :  { %9998 = vpow2.f32 %v8539_v32  ;;  %v9286_v7 = vunpack.c.h.bf16 %v12458_v59 }
 0x8da   :  { %10000 = vpow2.f32 %v8540_v30 }
 0x8dc   :  { %v4012_v24 = vpop.permute.xlu0 %4011  ;;  %v12450_v60 = vpop.f32.mrf.mxu1 }
 0x8dd   :  { %v9995_v55 = vpop.eup %9994  ;;  %v4052_v45 = vmul.f32 %v4012_v24, %v12443_v10 }
 0x8de   :  { %4023 = vrot.lane.b32.xlu2 %v9995_v55, %s10624_s3  ;;  %v9997_v36 = vpop.eup %9996  ;;  %v8542_v55 = vmul.f32 -1.442695, %v12414_v50 }
 0x8df   :  { %4091 = vrot.lane.b32.xlu1 %v4052_v45, %s10624_s3  ;;  %v9999_v49 = vpop.eup %9998 }
 0x8e0   :  { %v3701_v16 = vadd.f32 1.0, %v9999_v49  ;;  %v10001_v48 = vpop.eup %10000 }
 0x8e1   :  { %v3702_v34 = vadd.f32 1.0, %v10001_v48 }
 0x8e2   :  { %vm3834_vm1 = vweird.f32 %v3701_v16 }
 0x8e3   :  { %vm3849_vm5 = vweird.f32 %v3702_v34 }
 0x8e4   :  { %v3626_v61 = vpop.f32.mrf.mxu1 }
 0x8e5   :  { %v12465_v42 = vadd.f32 %v9286_v7, %v3626_v61 }
 0x8e7   :  { %4021 = vrot.lane.b32.xlu1 %v9997_v36, %s10624_s3 }
 0x8eb   :  { %v4082_v19 = vpop.permute.xlu1 %4081 }
 0x8ec   :  { %v12460_v27 = vadd.f32 %v4082_v19, %v3967_v56 }
 0x8ee   :  { %10002 = vtanh.f32 %v12460_v27 }
 0x8ef   :  { %10004 = vrcp.f32 %v3701_v16 }
 0x8f0   :  { %10006 = vpow2.f32 %v8541_v47 }
 0x8f1   :  { %10008 = vtanh.f32 %v12465_v42 }
 0x8f2   :  { %10010 = vrcp.f32 %v3702_v34 }
 0x8f3   :  { %v4084_v57 = vpop.permute.xlu2 %4083  ;;  %10012 = vpow2.f32 %v8542_v55  ;;  %v3838_v55 = vand.u32 2147483647, %v3701_v16 }
 0x8f4   :  { %v10003_v38 = vpop.eup %10002 }
 0x8f5   :  { %4177 = vrot.lane.b32.xlu2 %v10003_v38, %s10624_s3  ;;  %v10005_v24 = vpop.eup %10004  ;;  %v3840_v38 = vand.u32 2147483648, %v3701_v16  ;;  %vm3839_vm3 = vcmp.eq.f32.partialorder %v3838_v55, 8.507059e+37 }
 0x8f6   :  { %v10007_v45 = vpop.eup %10006  ;;  %v3830_v32 = vmul.f32 %v10005_v24, %v3701_v16  ;;  %vm3835_vm15 = vweird.f32 %v10005_v24 }
 0x8f7   :  { %v10009_v36 = vpop.eup %10008  ;;  %v12474_v28 = vadd.f32 1.0, %v10007_v45  ;;  %vm3836_vm2 = vmor %vm3834_vm1, %vm3835_vm15 }
 0x8f8   :  { %v3831_v39 = vsub.f32 1.0, %v3830_v32  ;;  %v10011_v49 = vpop.eup %10010 }
 0x8f9   :  { %v10013_v50 = vpop.eup %10012  ;;  %v3845_v19 = vmul.f32 %v10011_v49, %v3702_v34  ;;  %vm3850_vm4 = vweird.f32 %v10011_v49  ;;  %vm3864_vm9 = vweird.f32 %v12474_v28 }
 0x8fa   :  { %v3832_v56 = vmul.f32 %v10005_v24, %v3831_v39  ;;  %v12479_v7 = vadd.f32 1.0, %v10013_v50  ;;  %v3841_v39 = vor.u32 1.1754944e-38, %v3840_v38  ;;  %vm3851_vm6 = vmor %vm3849_vm5, %vm3850_vm4 }
 0x8fb   :  { %v4086_v11 = vpop.permute.xlu2 %4085  ;;  %v3846_v47 = vsub.f32 1.0, %v3845_v19 }
 0x8fc   :  { %v12472_v30 = vadd.f32 %v4086_v11, %v3969_v26  ;;  %v3833_v61 = vadd.f32 %v10005_v24, %v3832_v56  ;;  %v8544_v11 = vmul.f32 -1.442695, %v12437_v43  ;;  %v3853_v43 = vand.u32 2147483647, %v3702_v34 }
 0x8fd   :  { %4027 = vrot.lane.b32.xlu2 %v10009_v36, %s10624_s3  ;;  %v3847_v26 = vmul.f32 %v10011_v49, %v3846_v47  ;;  %v3968_v36 = vmul.f32 %v12379_v18, %v12125_v52  ;;  %v3855_v47 = vand.u32 2147483648, %v3702_v34  ;;  %v9285_v52 = vunpack.c.l.bf16 %v12458_v59 }
 0x8fe   :  { %10014 = vtanh.f32 %v12472_v30  ;;  %v3837_v45 = vsel %vm3836_vm2, %v10005_v24, %v3833_v61  ;;  %vm3854_vm7 = vcmp.eq.f32.partialorder %v3853_v43, 8.507059e+37  ;;  %vm3879_vm13 = vweird.f32 %v12479_v7 }
 0x8ff   :  { %10016 = vrcp.f32 %v12474_v28  ;;  %v12487_v50 = vadd.f32 %v4084_v57, %v3968_v36  ;;  %v12489_v56 = vsel %vm3839_vm3, %v3841_v39, %v3837_v45  ;;  %v3856_v45 = vor.u32 1.1754944e-38, %v3855_v47 }
 0x900   :  { %10018 = vrcp.f32 %v12479_v7  ;;  %v3970_v47 = vmul.f32 %v12405_v21, %v12151_v3 }
 0x901   :  { %10020 = vpow2.f32 %v8544_v11 }
 0x902   :  { %10022 = vtanh.f32 %v12487_v50 }
 0x904   :  { %v10015_v33 = vpop.eup %10014 }
 0x905   :  { %4181 = vrot.lane.b32.xlu2 %v10015_v33, %s10624_s3  ;;  %v10017_v48 = vpop.eup %10016  ;;  %v3848_v33 = vadd.f32 %v10011_v49, %v3847_v26 }
 0x906   :  { %v3860_v32 = vmul.f32 %v10017_v48, %v12474_v28  ;;  %v10019_v61 = vpop.eup %10018  ;;  %vm3865_vm8 = vweird.f32 %v10017_v48 }
 0x907   :  { %v3875_v57 = vmul.f32 %v10019_v61, %v12479_v7  ;;  %v3852_v38 = vsel %vm3851_vm6, %v10011_v49, %v3848_v33  ;;  %v10021_v26 = vpop.eup %10020  ;;  %vm3866_vm10 = vmor %vm3864_vm9, %vm3865_vm8  ;;  %vm3880_vm12 = vweird.f32 %v10019_v61 }
 0x908   :  { %v3861_v24 = vsub.f32 1.0, %v3860_v32  ;;  %v12497_v32 = vadd.f32 %v9285_v52, %v12450_v60  ;;  %v12499_v11 = vsel %vm3854_vm7, %v3856_v45, %v3852_v38  ;;  %v3706_v62 = vadd.f32 1.0, %v10021_v26  ;;  %vm3881_vm14 = vmor %vm3879_vm13, %vm3880_vm12 }
 0x909   :  { %v3876_v39 = vsub.f32 1.0, %v3875_v57  ;;  %v3868_v60 = vand.u32 2147483647, %v12474_v28  ;;  %v3885_v26 = vand.u32 2147483648, %v12479_v7 }
 0x90a   :  { %v3862_v55 = vmul.f32 %v10017_v48, %v3861_v24  ;;  %10024 = vtanh.f32 %v12497_v32  ;;  %vm3909_vm2 = vweird.f32 %v3706_v62 }
 0x90b   :  { %v3877_v49 = vmul.f32 %v10019_v61, %v3876_v39  ;;  %10026 = vrcp.f32 %v3706_v62  ;;  %vm3869_vm11 = vcmp.eq.f32.partialorder %v3868_v60, 8.507059e+37  ;;  %v3886_v39 = vor.u32 1.1754944e-38, %v3885_v26 }
 0x90c   :  { %v3863_v59 = vadd.f32 %v10017_v48, %v3862_v55 }
 0x90d   :  { %v4014_v19 = vpop.permute.xlu0 %4013  ;;  %v3878_v55 = vadd.f32 %v10019_v61, %v3877_v49  ;;  %v8543_v49 = vmul.f32 -1.442695, %v12441_v0  ;;  %v8546_v0 = vmul.f32 -1.442695, %v12465_v42 }
 0x90e   :  { %v4053_v16 = vmul.f32 %v4014_v19, %v12489_v56  ;;  %v10023_v19 = vpop.eup %10022  ;;  %v3867_v24 = vsel %vm3866_vm10, %v10017_v48, %v3863_v59  ;;  %v3883_v48 = vand.u32 2147483647, %v12479_v7 }
 0x910   :  { %4093 = vrot.lane.b32.xlu0 %v4053_v16, %s10624_s3  ;;  %v3870_v16 = vand.u32 2147483648, %v12474_v28  ;;  %v10025_v45 = vpop.eup %10024  ;;  %vm3884_vm15 = vcmp.eq.f32.partialorder %v3883_v48, 8.507059e+37 }
 0x911   :  { %v10027_v3 = vpop.eup %10026 }
 0x912   :  { %v3871_v43 = vor.u32 1.1754944e-38, %v3870_v16  ;;  %vm3910_vm1 = vweird.f32 %v10027_v3 }
 0x913   :  { %vm3911_vm3 = vmor %vm3909_vm2, %vm3910_vm1 }
 0x914   :  { %v12512_v57 = vsel %vm3869_vm11, %v3871_v43, %v3867_v24  ;;  %v3913_v43 = vand.u32 2147483647, %v3706_v62 }
 0x915   :  { %v4016_v36 = vpop.permute.xlu1 %4015  ;;  %v4088_v33 = vpop.permute.xlu0 %4087 }
 0x916   :  { %v4054_v34 = vmul.f32 %v4016_v36, %v12499_v11  ;;  %v12510_v52 = vadd.f32 %v4088_v33, %v3970_v47  ;;  %v3882_v36 = vsel %vm3881_vm14, %v10019_v61, %v3878_v55  ;;  %v3915_v47 = vand.u32 2147483648, %v3706_v62 }
 0x917   :  { %v12521_v59 = vsel %vm3884_vm15, %v3886_v39, %v3882_v36  ;;  %vm3914_vm4 = vcmp.eq.f32.partialorder %v3913_v43, 8.507059e+37 }
 0x918   :  { %4095 = vrot.lane.b32.xlu1 %v4054_v34, %s10624_s3  ;;  %4179 = vrot.lane.b32.xlu0 %v10023_v19, %s10624_s3  ;;  %10028 = vtanh.f32 %v12510_v52  ;;  %v4020_v34 = vpop.permute.xlu2 %4019  ;;  %v3905_v19 = vmul.f32 %v10027_v3, %v3706_v62 }
 0x919   :  { %v4056_v16 = vmul.f32 %v4020_v34, %v12521_v59  ;;  %10030 = vpow2.f32 %v8543_v49 }
 0x91a   :  { %v3906_v7 = vsub.f32 1.0, %v3905_v19 }
 0x91c   :  { %v3907_v33 = vmul.f32 %v10027_v3, %v3906_v7 }
 0x91d   :  { %v4018_v38 = vpop.permute.xlu1 %4017 }
 0x91e   :  { %v4055_v28 = vmul.f32 %v4018_v38, %v12512_v57  ;;  %v10029_v60 = vpop.eup %10028  ;;  %v3908_v61 = vadd.f32 %v10027_v3, %v3907_v33 }
 0x91f   :  { %v10031_v55 = vpop.eup %10030 }
 0x920   :  { %4025 = vrot.lane.b32.xlu1 %v10025_v45, %s10624_s3  ;;  %4097 = vrot.lane.b32.xlu0 %v4055_v28, %s10624_s3  ;;  %v3912_v38 = vsel %vm3911_vm3, %v10027_v3, %v3908_v61  ;;  %v3916_v28 = vor.u32 1.1754944e-38, %v3915_v47  ;;  %v3705_v48 = vadd.f32 1.0, %v10031_v55 }
 0x922   :  { %v12527_v45 = vsel %vm3914_vm4, %v3916_v28, %v3912_v38  ;;  %10032 = vrcp.f32 %v3705_v48  ;;  %vm3894_vm6 = vweird.f32 %v3705_v48  ;;  %v3898_v28 = vand.u32 2147483647, %v3705_v48 }
 0x923   :  { %10034 = vpow2.f32 %v8546_v0 }
 0x924   :  { %vm3899_vm8 = vcmp.eq.f32.partialorder %v3898_v28, 8.507059e+37 }
 0x928   :  { %4183 = vrot.lane.b32.xlu0 %v10029_v60, %s10624_s3  ;;  %4099 = vrot.lane.b32.xlu1 %v4056_v16, %s10624_s3  ;;  %v4174_v24 = vpop.permute.xlu2 %4173  ;;  %v10033_v34 = vpop.eup %10032  ;;  %v3971_v16 = vmul.f32 %v12420_v12, %v12187_v35  ;;  %v3900_v35 = vand.u32 2147483648, %v3705_v48 }
 0x929   :  { %v10035_v62 = vpop.eup %10034  ;;  %v3890_v19 = vmul.f32 %v10033_v34, %v3705_v48  ;;  %v4221_v7 = vmul.f32 %v4174_v24, %v12335_v51  ;;  %vm3895_vm5 = vweird.f32 %v10033_v34 }
 0x92a   :  { %v3708_v3 = vadd.f32 1.0, %v10035_v62  ;;  %vm3896_vm7 = vmor %vm3894_vm6, %vm3895_vm5 }
 0x92b   :  { %v3891_v33 = vsub.f32 1.0, %v3890_v19 }
 0x92c   :  { %10036 = vrcp.f32 %v3708_v3  ;;  %vm3939_vm10 = vweird.f32 %v3708_v3 }
 0x92d   :  { %v3892_v42 = vmul.f32 %v10033_v34, %v3891_v33  ;;  %v8545_v33 = vmul.f32 -1.442695, %v12497_v32 }
 0x92f   :  { %v3893_v38 = vadd.f32 %v10033_v34, %v3892_v42 }
 0x931   :  { %v4090_v39 = vpop.permute.xlu0 %4089  ;;  %v3897_v24 = vsel %vm3896_vm7, %v10033_v34, %v3893_v38 }
 0x932   :  { %v12536_v61 = vadd.f32 %v4090_v39, %v3971_v16  ;;  %v10037_v55 = vpop.eup %10036 }
 0x933   :  { %vm3940_vm9 = vweird.f32 %v10037_v55 }
 0x934   :  { %10038 = vtanh.f32 %v12536_v61  ;;  %vm3941_vm11 = vmor %vm3939_vm10, %vm3940_vm9 }
 0x938   :  { %v4024_v26 = vpop.permute.xlu2 %4023 }
 0x939   :  { %v4058_v36 = vmul.f32 %v4024_v26, %v12527_v45  ;;  %v3972_v26 = vmul.f32 %v12443_v10, %v12170_v54  ;;  %v3945_v54 = vand.u32 2147483648, %v3708_v3 }
 0x93a   :  { %v10039_v51 = vpop.eup %10038 }
 0x93b   :  { %4103 = vrot.lane.b32.xlu0 %v4058_v36, %s10624_s3  ;;  %v3901_v36 = vor.u32 1.1754944e-38, %v3900_v35  ;;  %v3946_v42 = vor.u32 1.1754944e-38, %v3945_v54 }
 0x93d   :  { %v12545_v39 = vsel %vm3899_vm8, %v3901_v36, %v3897_v24 }
 0x948   :  { %v4176_v60 = vpop.permute.xlu0 %4175 }
 0x949   :  { %v4222_v49 = vmul.f32 %v4176_v60, %v12340_v46  ;;  %v3935_v46 = vmul.f32 %v10037_v55, %v3708_v3 }
 0x94b   :  { %v4270_v47 = vpack.c.bf16 %v4222_v49, %v4221_v7  ;;  %v3936_v19 = vsub.f32 1.0, %v3935_v46  ;;  %v3943_v49 = vand.u32 2147483647, %v3708_v3 }
 0x94d   :  { %4286 = vrot.lane.b32.xlu1 %v4270_v47, %s10625_s21  ;;  %v3937_v60 = vmul.f32 %v10037_v55, %v3936_v19  ;;  %vm3944_vm12 = vcmp.eq.f32.partialorder %v3943_v49, 8.507059e+37 }
 0x94f   :  { %v4178_v48 = vpop.permute.xlu2 %4177  ;;  %v3938_v34 = vadd.f32 %v10037_v55, %v3937_v60 }
 0x950   :  { %v4223_v19 = vmul.f32 %v4178_v48, %v12353_v58 }
 0x951   :  { %v4092_v43 = vpop.permute.xlu1 %4091  ;;  %v3942_v47 = vsel %vm3941_vm11, %v10037_v55, %v3938_v34  ;;  %v3973_v55 = vmul.f32 %v12489_v56, %v12218_v6  ;;  %v3974_v6 = vmul.f32 %v12499_v11, %v12194_v53  ;;  %v8783_v53 = vld [vmem:[%s14437_s1 + $0x100] sm:$0xff] }
 0x952   :  { %v12543_v0 = vadd.f32 %v4092_v43, %v3972_v26  ;;  %v12552_v38 = vsel %vm3944_vm12, %v3946_v42, %v3942_v47  ;;  %v3975_v42 = vmul.f32 %v12512_v57, %v12226_v41  ;;  %v3976_v41 = vmul.f32 %v12521_v59, %v12208_v29  ;;  %8419 = vmatmul.msk.bf16.gmra.mxu0 %vm517_vm0, %v8783_v53 }
 0x954   :  { %10040 = vtanh.f32 %v12543_v0 }
 0x955   :  { %4185 = vrot.lane.b32.xlu1 %v10039_v51, %s10624_s3  ;;  %10042 = vpow2.f32 %v8545_v33 }
 0x957   :  { %v4028_v43 = vpop.permute.xlu2 %4027 }
 0x958   :  { %v4060_v35 = vmul.f32 %v4028_v43, %v12552_v38 }
 0x959   :  { %v4022_v62 = vpop.permute.xlu1 %4021 }
 0x95a   :  { %v4057_v16 = vmul.f32 %v4022_v62, %v12545_v39  ;;  %v10041_v7 = vpop.eup %10040 }
 0x95b   :  { %v10043_v28 = vpop.eup %10042 }
 0x95c   :  { %4101 = vrot.lane.b32.xlu2 %v4057_v16, %s10624_s3  ;;  %v3707_v51 = vadd.f32 1.0, %v10043_v28 }
 0x95e   :  { %10044 = vrcp.f32 %v3707_v51  ;;  %vm3924_vm14 = vweird.f32 %v3707_v51  ;;  %v3928_v49 = vand.u32 2147483647, %v3707_v51 }
 0x960   :  { %vm3929_vm1 = vcmp.eq.f32.partialorder %v3928_v49, 8.507059e+37 }
 0x964   :  { %4187 = vrot.lane.b32.xlu2 %v10041_v7, %s10624_s3  ;;  %v10045_v3 = vpop.eup %10044  ;;  %v3930_v7 = vand.u32 2147483648, %v3707_v51 }
 0x965   :  { %v3920_v46 = vmul.f32 %v10045_v3, %v3707_v51  ;;  %vm3925_vm13 = vweird.f32 %v10045_v3 }
 0x966   :  { %vm3926_vm15 = vmor %vm3924_vm14, %vm3925_vm13  ;;  %v3931_v58 = vor.u32 1.1754944e-38, %v3930_v7  ;;  %v3977_v7 = vmul.f32 %v12545_v39, %v12240_v37 }
 0x967   :  { %v3921_v26 = vsub.f32 1.0, %v3920_v46 }
 0x969   :  { %v3922_v32 = vmul.f32 %v10045_v3, %v3921_v26 }
 0x96b   :  { %v3923_v60 = vadd.f32 %v10045_v3, %v3922_v32 }
 0x96c   :  { %4107 = vrot.lane.b32.xlu2 %v4060_v35, %s10624_s3 }
 0x96d   :  { %v3927_v33 = vsel %vm3926_vm15, %v10045_v3, %v3923_v60  ;;  %v4182_v3 = vpop.permute.xlu2 %4181  ;;  %v8784_v60 = vld [vmem:[%s14437_s1 + $0x108] sm:$0xff] }
 0x96e   :  { %v12568_v48 = vsel %vm3929_vm1, %v3931_v58, %v3927_v33  ;;  %v4225_v26 = vmul.f32 %v4182_v3, %v12402_v4  ;;  %v3978_v4 = vmul.f32 %v12527_v45, %v12255_v9  ;;  %8420 = vmatmul.msk.bf16.gmra.mxu0 %vm517_vm0, %v8784_v60 }
 0x982   :  { %v4094_v24 = vpop.permute.xlu0 %4093 }
 0x983   :  { %v12560_v34 = vadd.f32 %v4094_v24, %v3973_v55 }
 0x985   :  { %10046 = vtanh.f32 %v12560_v34 }
 0x98a   :  { %v4096_v36 = vpop.permute.xlu1 %4095  ;;  %v4180_v62 = vpop.permute.xlu0 %4179 }
 0x98b   :  { %v4224_v16 = vmul.f32 %v4180_v62, %v12379_v18  ;;  %v12566_v18 = vadd.f32 %v4096_v36, %v3974_v6  ;;  %v10047_v51 = vpop.eup %10046 }
 0x98d   :  { %v4271_v54 = vpack.c.bf16 %v4224_v16, %v4223_v19  ;;  %10048 = vtanh.f32 %v12566_v18 }
 0x98f   :  { %4288 = vrot.lane.b32.xlu0 %v4271_v54, %s10625_s21 }
 0x992   :  { %v4026_v47 = vpop.permute.xlu1 %4025  ;;  %v4098_v43 = vpop.permute.xlu0 %4097 }
 0x993   :  { %v4059_v35 = vmul.f32 %v4026_v47, %v12568_v48  ;;  %v12573_v28 = vadd.f32 %v4098_v43, %v3975_v42  ;;  %v10049_v36 = vpop.eup %10048  ;;  %v3980_v47 = vmul.f32 %v12552_v38, %v12266_v23  ;;  %v8785_v23 = vld [vmem:[%s14437_s1 + $0x110] sm:$0xff] }
 0x994   :  { %8421 = vmatmul.msk.bf16.gmra.mxu0 %vm517_vm0, %v8785_v23 }
 0x995   :  { %4105 = vrot.lane.b32.xlu1 %v4059_v35, %s10624_s3  ;;  %10050 = vtanh.f32 %v12573_v28 }
 0x997   :  { %4189 = vrot.lane.b32.xlu0 %v10047_v51, %s10624_s3 }
 0x99a   :  { %v4184_v46 = vpop.permute.xlu0 %4183  ;;  %v4100_v24 = vpop.permute.xlu1 %4099 }
 0x99b   :  { %v4226_v32 = vmul.f32 %v4184_v46, %v12405_v21  ;;  %v12587_v55 = vadd.f32 %v4100_v24, %v3976_v41  ;;  %v10051_v19 = vpop.eup %10050 }
 0x99d   :  { %v4272_v62 = vpack.c.bf16 %v4226_v32, %v4225_v26  ;;  %10052 = vtanh.f32 %v12587_v55  ;;  %4191 = vrot.lane.b32.xlu1 %v10049_v36, %s10624_s3 }
 0x99f   :  { %4193 = vrot.lane.b32.xlu0 %v10051_v19, %s10624_s3  ;;  %4290 = vrot.lane.b32.xlu2 %v4272_v62, %s10625_s21 }
 0x9a3   :  { %v10053_v29 = vpop.eup %10052 }
 0x9a5   :  { %4195 = vrot.lane.b32.xlu1 %v10053_v29, %s10624_s3 }
 0x9ad   :  { %v4104_v21 = vpop.permute.xlu0 %4103 }
 0x9ae   :  { %v12596_v16 = vadd.f32 %v4104_v21, %v3978_v4 }
 0x9b0   :  { %10054 = vtanh.f32 %v12596_v16 }
 0x9b6   :  { %v10055_v54 = vpop.eup %10054  ;;  %v4102_v49 = vpop.permute.xlu2 %4101 }
 0x9b7   :  { %v12605_v33 = vadd.f32 %v4102_v49, %v3977_v7  ;;  %4199 = vrot.lane.b32.xlu1 %v10055_v54, %s10624_s3 }
 0x9b9   :  { %10056 = vtanh.f32 %v12605_v33 }
 0x9be   :  { %v4188_v9 = vpop.permute.xlu2 %4187 }
 0x9bf   :  { %v10057_v6 = vpop.eup %10056  ;;  %v4287_v58 = vpop.permute.xlu1 %4286  ;;  %v4228_v35 = vmul.f32 %v4188_v9, %v12443_v10  ;;  %v8786_v10 = vld [vmem:[%s14437_s1 + $0x118] sm:$0xff] }
 0x9c0   :  { %4197 = vrot.lane.b32.xlu0 %v10057_v6, %s10624_s3  ;;  %8547 = vmatmul.msk.bf16.vlgmr.msra.gmra.mxu2 %vm517_vm0, %v4287_v58 }
 0x9c1   :  { %8422 = vmatmul.msk.bf16.gmra.mxu0 %vm517_vm0, %v8786_v10 }
 0x9c6   :  { %v4108_v42 = vpop.permute.xlu2 %4107 }
 0x9c7   :  { %v12613_v37 = vadd.f32 %v4108_v42, %v3980_v47  ;;  %v4186_v43 = vpop.permute.xlu1 %4185 }
 0x9c8   :  { %v4227_v51 = vmul.f32 %v4186_v43, %v12420_v12  ;;  %v3979_v12 = vmul.f32 %v12568_v48, %v12249_v31 }
 0x9c9   :  { %10058 = vtanh.f32 %v12613_v37 }
 0x9ca   :  { %v4273_v53 = vpack.c.bf16 %v4228_v35, %v4227_v51  ;;  %v8787_v35 = vld [vmem:[%s14437_s1 + $0x120] sm:$0xff] }
 0x9cc   :  { %4292 = vrot.lane.b32.xlu2 %v4273_v53, %s10625_s21 }
 0x9cf   :  { %v10059_v3 = vpop.eup %10058 }
 0x9d0   :  { %4203 = vrot.lane.b32.xlu1 %v10059_v3, %s10624_s3 }
 0x9d1   :  { %8423 = vmatmul.msk.bf16.gmra.mxu0 %vm517_vm0, %v8787_v35 }
 0x9f9   :  { %v4291_v29 = vpop.permute.xlu2 %4290 }
 0xa01   :  { %v4289_v41 = vpop.permute.xlu0 %4288 }
 0xa02   :  { %8548 = vmatmul.msk.bf16.gmra.mxu2 %vm517_vm0, %v4289_v41 }
 0xa07   :  { %v4106_v46 = vpop.permute.xlu1 %4105 }
 0xa08   :  { %v12631_v24 = vadd.f32 %v4106_v46, %v3979_v12 }
 0xa09   :  { %v4190_v26 = vpop.permute.xlu0 %4189 }
 0xa0a   :  { %10060 = vtanh.f32 %v12631_v24  ;;  %v4229_v62 = vmul.f32 %v4190_v26, %v12489_v56 }
 0xa0f   :  { %v4192_v32 = vpop.permute.xlu1 %4191 }
 0xa10   :  { %v10061_v36 = vpop.eup %10060  ;;  %v4230_v19 = vmul.f32 %v4192_v32, %v12499_v11  ;;  %v879_v11 = vpop.f32.mrf.mxu0 }
 0xa11   :  { %4201 = vrot.lane.b32.xlu0 %v10061_v36, %s10624_s3  ;;  %v4194_v31 = vpop.permute.xlu0 %4193 }
 0xa12   :  { %v4274_v4 = vpack.c.bf16 %v4230_v19, %v4229_v62  ;;  %8549 = vmatmul.msk.bf16.gmra.mxu2 %vm517_vm0, %v4291_v29  ;;  %v4231_v60 = vmul.f32 %v4194_v31, %v12512_v57  ;;  %v12649_v57 = vld [vmem:[%s14436_s5] ss:$0 sm:$0xff] }
 0xa14   :  { %4294 = vrot.lane.b32.xlu2 %v4274_v4, %s10625_s21 }
 0xa17   :  { %v4196_v21 = vpop.permute.xlu1 %4195 }
 0xa18   :  { %v4232_v7 = vmul.f32 %v4196_v21, %v12521_v59  ;;  %v881_v42 = vpop.f32.mrf.mxu0  ;;  %v880_v59 = vadd.f32 %v12649_v57, %v879_v11 }
 0xa19   :  { %v882_v43 = vadd.f32 %v12649_v57, %v881_v42 }
 0xa1a   :  { %v4275_v54 = vpack.c.bf16 %v4232_v7, %v4231_v60 }
 0xa1c   :  { %4296 = vrot.lane.b32.xlu2 %v4275_v54, %s10625_s21 }
 0xa20   :  { %v884_v46 = vpop.f32.mrf.mxu0 }
 0xa21   :  { %v885_v62 = vadd.f32 %v12649_v57, %v884_v46 }
 0xa26   :  { %v4293_v56 = vpop.permute.xlu2 %4292 }
 0xa27   :  { %8550 = vmatmul.msk.bf16.gmra.mxu2 %vm517_vm0, %v4293_v56 }
 0xa28   :  { %v886_v32 = vpop.f32.mrf.mxu0 }
 0xa29   :  { %v4200_v49 = vpop.permute.xlu1 %4199  ;;  %v887_v19 = vadd.f32 %v12649_v57, %v886_v32 }
 0xa2a   :  { %v4234_v6 = vmul.f32 %v4200_v49, %v12527_v45  ;;  %v9002_v45 = vpack.c.bf16 %v882_v43, %v880_v59 }
 0xa2b   :  { %v9007_v31 = vpack.c.bf16 %v887_v19, %v885_v62 }
 0xa2c   :  { %v9290_v3 = vunpack.c.h.bf16 %v9002_v45 }
 0xa2d   :  { %v9293_v56 = vunpack.c.l.bf16 %v9007_v31 }
 0xa30   :  { %v889_v29 = vpop.f32.mrf.mxu0 }
 0xa31   :  { %v890_v42 = vadd.f32 %v12649_v57, %v889_v29 }
 0xa32   :  { %v4198_v9 = vpop.permute.xlu0 %4197 }
 0xa33   :  { %v4233_v58 = vmul.f32 %v4198_v9, %v12545_v39  ;;  %v9289_v39 = vunpack.c.l.bf16 %v9002_v45 }
 0xa35   :  { %v4276_v47 = vpack.c.bf16 %v4234_v6, %v4233_v58 }
 0xa37   :  { %4298 = vrot.lane.b32.xlu0 %v4276_v47, %s10625_s21 }
 0xa38   :  { %v891_v58 = vpop.f32.mrf.mxu0 }
 0xa39   :  { %v892_v59 = vadd.f32 %v12649_v57, %v891_v58 }
 0xa3b   :  { %v9012_v45 = vpack.c.bf16 %v892_v59, %v890_v42 }
 0xa42   :  { %v4204_v21 = vpop.permute.xlu1 %4203 }
 0xa43   :  { %v4335_v51 = vpop.f32.mrf.mxu2  ;;  %v4236_v7 = vmul.f32 %v4204_v21, %v12552_v38  ;;  %v9294_v38 = vunpack.c.h.bf16 %v9007_v31 }
 0xa44   :  { %v4375_v53 = vadd.f32 %v9289_v39, %v4335_v51  ;;  %v9297_v51 = vunpack.c.l.bf16 %v9012_v45 }
 0xa46   :  { %10062 = vtanh.f32 %v4375_v53  ;;  %v8555_v36 = vmul.f32 -1.442695, %v4375_v53  ;;  %v894_v53 = vpop.f32.mrf.mxu0 }
 0xa47   :  { %v895_v31 = vadd.f32 %v12649_v57, %v894_v53 }
 0xa4b   :  { %v4337_v23 = vpop.f32.mrf.mxu2 }
 0xa4c   :  { %v10063_v10 = vpop.eup %10062  ;;  %v4376_v41 = vadd.f32 %v9290_v3, %v4337_v23 }
 0xa4d   :  { %4743 = vrot.lane.b32.xlu2 %v10063_v10, %s10624_s3 }
 0xa4e   :  { %10064 = vtanh.f32 %v4376_v41  ;;  %v8556_v32 = vmul.f32 -1.442695, %v4376_v41  ;;  %v896_v62 = vpop.f32.mrf.mxu0 }
 0xa4f   :  { %10066 = vpow2.f32 %v8555_v36  ;;  %v897_v21 = vadd.f32 %v12649_v57, %v896_v62 }
 0xa54   :  { %v10065_v12 = vpop.eup %10064 }
 0xa55   :  { %4745 = vrot.lane.b32.xlu0 %v10065_v12, %s10624_s3  ;;  %v10067_v11 = vpop.eup %10066 }
 0xa56   :  { %v4439_v47 = vadd.f32 1.0, %v10067_v11 }
 0xa58   :  { %vm4460_vm3 = vweird.f32 %v4439_v47  ;;  %v4464_v41 = vand.u32 2147483647, %v4439_v47 }
 0xa5a   :  { %vm4465_vm5 = vcmp.eq.f32.partialorder %v4464_v41, 8.507059e+37 }
 0xa6e   :  { %v4295_v26 = vpop.permute.xlu2 %4294 }
 0xa6f   :  { %8551 = vmatmul.msk.bf16.gmra.mxu2 %vm517_vm0, %v4295_v26  ;;  %v9298_v26 = vunpack.c.h.bf16 %v9012_v45 }
 0xa76   :  { %v4297_v4 = vpop.permute.xlu2 %4296 }
 0xa7f   :  { %8552 = vmatmul.msk.bf16.gmra.mxu2 %vm517_vm0, %v4297_v4 }
 0xa83   :  { %v4202_v60 = vpop.permute.xlu0 %4201 }
 0xa84   :  { %v4235_v54 = vmul.f32 %v4202_v60, %v12568_v48 }
 0xa85   :  { %v4340_v49 = vpop.f32.mrf.mxu2 }
 0xa86   :  { %v4277_v9 = vpack.c.bf16 %v4236_v7, %v4235_v54  ;;  %v12665_v6 = vadd.f32 %v9293_v56, %v4340_v49  ;;  %v4466_v7 = vand.u32 2147483648, %v4439_v47  ;;  %v9017_v54 = vpack.c.bf16 %v897_v21, %v895_v31 }
 0xa88   :  { %10068 = vtanh.f32 %v12665_v6  ;;  %4300 = vrot.lane.b32.xlu1 %v4277_v9, %s10625_s21  ;;  %v4467_v9 = vor.u32 1.1754944e-38, %v4466_v7 }
 0xa89   :  { %10070 = vrcp.f32 %v4439_v47 }
 0xa8d   :  { %v4342_v43 = vpop.f32.mrf.mxu2 }
 0xa8e   :  { %v10069_v48 = vpop.eup %10068  ;;  %v12671_v35 = vadd.f32 %v9294_v38, %v4342_v43  ;;  %v9301_v38 = vunpack.c.l.bf16 %v9017_v54 }
 0xa8f   :  { %v10071_v39 = vpop.eup %10070 }
 0xa90   :  { %10072 = vtanh.f32 %v12671_v35  ;;  %4747 = vrot.lane.b32.xlu1 %v10069_v48, %s10624_s3  ;;  %v4456_v23 = vmul.f32 %v10071_v39, %v4439_v47  ;;  %vm4461_vm2 = vweird.f32 %v10071_v39 }
 0xa91   :  { %vm4462_vm4 = vmor %vm4460_vm3, %vm4461_vm2 }
 0xa92   :  { %v4457_v46 = vsub.f32 1.0, %v4456_v23 }
 0xa94   :  { %v4458_v19 = vmul.f32 %v10071_v39, %v4457_v46 }
 0xa95   :  { %v4345_v3 = vpop.f32.mrf.mxu2 }
 0xa96   :  { %v10073_v10 = vpop.eup %10072  ;;  %v12675_v12 = vadd.f32 %v9297_v51, %v4345_v3  ;;  %v4459_v60 = vadd.f32 %v10071_v39, %v4458_v19 }
 0xa97   :  { %4749 = vrot.lane.b32.xlu2 %v10073_v10, %s10624_s3 }
 0xa98   :  { %10074 = vtanh.f32 %v12675_v12  ;;  %v4463_v11 = vsel %vm4462_vm4, %v10071_v39, %v4459_v60  ;;  %v9302_v39 = vunpack.c.h.bf16 %v9017_v54 }
 0xa99   :  { %10076 = vpow2.f32 %v8556_v32  ;;  %v12686_v42 = vsel %vm4465_vm5, %v4467_v9, %v4463_v11  ;;  %v8557_v11 = vmul.f32 -1.442695, %v12665_v6 }
 0xa9d   :  { %v4347_v36 = vpop.f32.mrf.mxu2 }
 0xa9e   :  { %v10075_v29 = vpop.eup %10074  ;;  %v12679_v4 = vadd.f32 %v9298_v26, %v4347_v36 }
 0xa9f   :  { %4751 = vrot.lane.b32.xlu0 %v10075_v29, %s10624_s3  ;;  %v10077_v56 = vpop.eup %10076  ;;  %v8558_v29 = vmul.f32 -1.442695, %v12671_v35 }
 0xaa0   :  { %10078 = vtanh.f32 %v12679_v4  ;;  %v4440_v58 = vadd.f32 1.0, %v10077_v56 }
 0xaa2   :  { %10080 = vrcp.f32 %v4440_v58  ;;  %v4481_v62 = vand.u32 2147483648, %v4440_v58  ;;  %vm4475_vm7 = vweird.f32 %v4440_v58  ;;  %v4479_v19 = vand.u32 2147483647, %v4440_v58 }
 0xaa4   :  { %v4482_v21 = vor.u32 1.1754944e-38, %v4481_v62  ;;  %vm4480_vm9 = vcmp.eq.f32.partialorder %v4479_v19, 8.507059e+37 }
 0xaa6   :  { %v10079_v49 = vpop.eup %10078 }
 0xaa7   :  { %4753 = vrot.lane.b32.xlu1 %v10079_v49, %s10624_s3  ;;  %v4744_v59 = vpop.permute.xlu2 %4743  ;;  %v899_v49 = vpop.f32.mrf.mxu0 }
 0xaa8   :  { %v4791_v43 = vmul.f32 %v4744_v59, %v12686_v42  ;;  %v10081_v51 = vpop.eup %10080 }
 0xaa9   :  { %v4299_v48 = vpop.permute.xlu0 %4298  ;;  %v4471_v10 = vmul.f32 %v10081_v51, %v4440_v58  ;;  %vm4476_vm6 = vweird.f32 %v10081_v51 }
 0xaaa   :  { %8553 = vmatmul.msk.bf16.gmra.mxu2 %vm517_vm0, %v4299_v48  ;;  %v4350_v47 = vpop.f32.mrf.mxu2  ;;  %4823 = vrot.lane.b32.xlu2 %v4791_v43, %s10624_s3  ;;  %vm4477_vm8 = vmor %vm4475_vm7, %vm4476_vm6  ;;  %v8559_v43 = vmul.f32 -1.442695, %v12675_v12 }
 0xaab   :  { %v12691_v45 = vadd.f32 %v9301_v38, %v4350_v47  ;;  %v4472_v46 = vsub.f32 1.0, %v4471_v10 }
 0xaad   :  { %10082 = vtanh.f32 %v12691_v45  ;;  %v4473_v32 = vmul.f32 %v10081_v51, %v4472_v46 }
 0xaaf   :  { %v4474_v36 = vadd.f32 %v10081_v51, %v4473_v32  ;;  %v901_v48 = vpop.f32.mrf.mxu0 }
 0xab0   :  { %v902_v6 = vadd.f32 %v12649_v57, %v901_v48 }
 0xab1   :  { %v4478_v31 = vsel %vm4477_vm8, %v10081_v51, %v4474_v36 }
 0xab2   :  { %v4352_v53 = vpop.f32.mrf.mxu2  ;;  %v12697_v60 = vsel %vm4480_vm9, %v4482_v21, %v4478_v31 }
 0xab3   :  { %v10083_v3 = vpop.eup %10082  ;;  %v4382_v23 = vadd.f32 %v9302_v39, %v4352_v53  ;;  %v900_v39 = vadd.f32 %v12649_v57, %v899_v49  ;;  %v8560_v53 = vmul.f32 -1.442695, %v12679_v4 }
 0xab4   :  { %4755 = vrot.lane.b32.xlu1 %v10083_v3, %s10624_s3 }
 0xab5   :  { %10084 = vtanh.f32 %v4382_v23  ;;  %v9022_v3 = vpack.c.bf16 %v902_v6, %v900_v39  ;;  %v8562_v12 = vmul.f32 -1.442695, %v4382_v23 }
 0xab6   :  { %10086 = vpow2.f32 %v8558_v29 }
 0xab7   :  { %v9305_v19 = vunpack.c.l.bf16 %v9022_v3 }
 0xabb   :  { %v10085_v26 = vpop.eup %10084 }
 0xabc   :  { %4757 = vrot.lane.b32.xlu2 %v10085_v26, %s10624_s3  ;;  %v10087_v54 = vpop.eup %10086 }
 0xabd   :  { %v4442_v56 = vadd.f32 1.0, %v10087_v54 }
 0xabf   :  { %10088 = vrcp.f32 %v4442_v56  ;;  %v4511_v10 = vand.u32 2147483648, %v4442_v56  ;;  %vm4505_vm11 = vweird.f32 %v4442_v56  ;;  %v4509_v26 = vand.u32 2147483647, %v4442_v56 }
 0xac0   :  { %10090 = vpow2.f32 %v8557_v11 }
 0xac1   :  { %v4512_v62 = vor.u32 1.1754944e-38, %v4511_v10  ;;  %vm4510_vm13 = vcmp.eq.f32.partialorder %v4509_v26, 8.507059e+37  ;;  %v907_v26 = vadd.f32 %v12649_v57, %v10756_v14 }
 0xac5   :  { %v10089_v35 = vpop.eup %10088 }
 0xac6   :  { %v4501_v9 = vmul.f32 %v10089_v35, %v4442_v56  ;;  %v10091_v58 = vpop.eup %10090  ;;  %vm4506_vm10 = vweird.f32 %v10089_v35 }
 0xac7   :  { %v4746_v7 = vpop.permute.xlu0 %4745  ;;  %v12702_v59 = vadd.f32 1.0, %v10091_v58  ;;  %vm4507_vm12 = vmor %vm4505_vm11, %vm4506_vm10 }
 0xac8   :  { %v4792_v41 = vmul.f32 %v4746_v7, %v12697_v60  ;;  %v4502_v38 = vsub.f32 1.0, %v4501_v9  ;;  %v8561_v9 = vmul.f32 -1.442695, %v12691_v45 }
 0xac9   :  { %10092 = vrcp.f32 %v12702_v59  ;;  %v4496_v6 = vand.u32 2147483648, %v12702_v59  ;;  %vm4490_vm15 = vweird.f32 %v12702_v59  ;;  %v4494_v45 = vand.u32 2147483647, %v12702_v59 }
 0xaca   :  { %4825 = vrot.lane.b32.xlu0 %v4792_v41, %s10624_s3  ;;  %v4503_v47 = vmul.f32 %v10089_v35, %v4502_v38  ;;  %10094 = vpow2.f32 %v8559_v43 }
 0xacb   :  { %10096 = vpow2.f32 %v8560_v53  ;;  %vm4495_vm2 = vcmp.eq.f32.partialorder %v4494_v45, 8.507059e+37 }
 0xacc   :  { %v4504_v51 = vadd.f32 %v10089_v35, %v4503_v47  ;;  %10098 = vpow2.f32 %v8562_v12 }
 0xace   :  { %v4508_v36 = vsel %vm4507_vm12, %v10089_v35, %v4504_v51  ;;  %v9306_v51 = vunpack.c.h.bf16 %v9022_v3 }
 0xacf   :  { %v10093_v46 = vpop.eup %10092  ;;  %v12712_v21 = vsel %vm4510_vm13, %v4512_v62, %v4508_v36  ;;  %v905_v36 = vadd.f32 %v12649_v57, %v10754_v13 }
 0xad0   :  { %v10095_v32 = vpop.eup %10094  ;;  %v4486_v29 = vmul.f32 %v10093_v46, %v12702_v59  ;;  %vm4491_vm14 = vweird.f32 %v10093_v46 }
 0xad1   :  { %v12710_v31 = vadd.f32 1.0, %v10095_v32  ;;  %v10097_v56 = vpop.eup %10096  ;;  %vm4492_vm1 = vmor %vm4490_vm15, %vm4491_vm14  ;;  %v4497_v32 = vor.u32 1.1754944e-38, %v4496_v6 }
 0xad2   :  { %v4487_v23 = vsub.f32 1.0, %v4486_v29  ;;  %v10099_v11 = vpop.eup %10098  ;;  %v12720_v35 = vadd.f32 1.0, %v10097_v56 }
 0xad3   :  { %10100 = vrcp.f32 %v12710_v31  ;;  %v12725_v38 = vadd.f32 1.0, %v10099_v11  ;;  %vm4520_vm4 = vweird.f32 %v12710_v31  ;;  %v4524_v6 = vand.u32 2147483647, %v12710_v31 }
 0xad4   :  { %v4488_v49 = vmul.f32 %v10093_v46, %v4487_v23  ;;  %vm4535_vm9 = vweird.f32 %v12720_v35 }
 0xad5   :  { %vm4525_vm6 = vcmp.eq.f32.partialorder %v4524_v6, 8.507059e+37  ;;  %vm4565_vm10 = vweird.f32 %v12725_v38 }
 0xad6   :  { %v4489_v39 = vadd.f32 %v10093_v46, %v4488_v49 }
 0xad8   :  { %v4493_v10 = vsel %vm4492_vm1, %v10093_v46, %v4489_v39 }
 0xad9   :  { %v12723_v58 = vpop.eup %10100  ;;  %v12744_v59 = vsel %vm4495_vm2, %v4497_v32, %v4493_v10 }
 0xada   :  { %v4516_v53 = vmul.f32 %v12723_v58, %v12710_v31  ;;  %vm4521_vm3 = vweird.f32 %v12723_v58 }
 0xadb   :  { %vm4522_vm5 = vmor %vm4520_vm4, %vm4521_vm3 }
 0xaf1   :  { %v4750_v4 = vpop.permute.xlu2 %4749 }
 0xaf2   :  { %v4794_v7 = vmul.f32 %v4750_v4, %v12712_v21  ;;  %v4355_v41 = vpop.f32.mrf.mxu2 }
 0xaf3   :  { %v12715_v54 = vadd.f32 %v9305_v19, %v4355_v41  ;;  %v4517_v19 = vsub.f32 1.0, %v4516_v53 }
 0xaf4   :  { %4829 = vrot.lane.b32.xlu1 %v4794_v7, %s10624_s3  ;;  %v9027_v7 = vpack.c.bf16 %v907_v26, %v905_v36 }
 0xaf5   :  { %10102 = vtanh.f32 %v12715_v54  ;;  %v4518_v41 = vmul.f32 %v12723_v58, %v4517_v19 }
 0xaf6   :  { %10104 = vrcp.f32 %v12720_v35  ;;  %v9309_v11 = vunpack.c.l.bf16 %v9027_v7  ;;  %v9310_v10 = vunpack.c.h.bf16 %v9027_v7  ;;  %v4541_v7 = vand.u32 2147483648, %v12720_v35 }
 0xaf7   :  { %10106 = vpow2.f32 %v8561_v9  ;;  %v4519_v9 = vadd.f32 %v12723_v58, %v4518_v41 }
 0xaf8   :  { %10108 = vrcp.f32 %v12725_v38 }
 0xafa   :  { %v4301_v43 = vpop.permute.xlu1 %4300  ;;  %v4357_v48 = vpop.f32.mrf.mxu2 }
 0xafb   :  { %v10103_v47 = vpop.eup %10102  ;;  %8554 = vmatmul.msk.bf16.gmra.mxu2 %vm517_vm0, %v4301_v43  ;;  %v12742_v62 = vadd.f32 %v9306_v51, %v4357_v48  ;;  %v4526_v48 = vand.u32 2147483648, %v12710_v31  ;;  %v4523_v51 = vsel %vm4522_vm5, %v12723_v58, %v4519_v9  ;;  %v4569_v9 = vand.u32 2147483647, %v12725_v38 }
 0xafc   :  { %4759 = vrot.lane.b32.xlu2 %v10103_v47, %s10624_s3  ;;  %v12738_v12 = vpop.eup %10104 }
 0xafd   :  { %v10107_v29 = vpop.eup %10106  ;;  %10110 = vtanh.f32 %v12742_v62  ;;  %v4531_v13 = vmul.f32 %v12738_v12, %v12720_v35  ;;  %v4527_v26 = vor.u32 1.1754944e-38, %v4526_v48  ;;  %vm4536_vm7 = vweird.f32 %v12738_v12 }
 0xafe   :  { %v12747_v46 = vpop.eup %10108  ;;  %v12754_v23 = vadd.f32 1.0, %v10107_v29  ;;  %vm4537_vm11 = vmor %vm4535_vm9, %vm4536_vm7  ;;  %v4711_v48 = vmul.f32 %v12686_v42, %v12426_v44  ;;  %vm4570_vm14 = vcmp.eq.f32.partialorder %v4569_v9, 8.507059e+37 }
 0xaff   :  { %v4561_v56 = vmul.f32 %v12747_v46, %v12725_v38  ;;  %v4532_v43 = vsub.f32 1.0, %v4531_v13  ;;  %v12773_v29 = vsel %vm4525_vm6, %v4527_v26, %v4523_v51  ;;  %vm4566_vm8 = vweird.f32 %v12747_v46 }
 0xb00   :  { %10112 = vrcp.f32 %v12754_v23  ;;  %v4571_v13 = vand.u32 2147483648, %v12725_v38  ;;  %vm4567_vm12 = vmor %vm4565_vm10, %vm4566_vm8  ;;  %vm4550_vm1 = vweird.f32 %v12754_v23 }
 0xb01   :  { %v4562_v47 = vsub.f32 1.0, %v4561_v56  ;;  %v4533_v53 = vmul.f32 %v12738_v12, %v4532_v43  ;;  %v4539_v56 = vand.u32 2147483647, %v12720_v35  ;;  %v4542_v35 = vor.u32 1.1754944e-38, %v4541_v7 }
 0xb02   :  { %v4748_v3 = vpop.permute.xlu1 %4747  ;;  %v4360_v14 = vpop.f32.mrf.mxu2 }
 0xb03   :  { %v4793_v4 = vmul.f32 %v4748_v3, %v12744_v59  ;;  %v12758_v49 = vadd.f32 %v9309_v11, %v4360_v14  ;;  %v10111_v39 = vpop.eup %10110  ;;  %v4563_v32 = vmul.f32 %v12747_v46, %v4562_v47  ;;  %v4534_v14 = vadd.f32 %v12738_v12, %v4533_v53 }
 0xb04   :  { %v4824_v36 = vpop.permute.xlu2 %4823  ;;  %vm4540_vm13 = vcmp.eq.f32.partialorder %v4539_v56, 8.507059e+37 }
 0xb05   :  { %4827 = vrot.lane.b32.xlu0 %v4793_v4, %s10624_s3  ;;  %10114 = vtanh.f32 %v12758_v49  ;;  %v4564_v58 = vadd.f32 %v12747_v46, %v4563_v32  ;;  %v4538_v43 = vsel %vm4537_vm11, %v12738_v12, %v4534_v14  ;;  %v12794_v51 = vadd.f32 %v4824_v36, %v4711_v48 }
 0xb06   :  { %v10113_v3 = vpop.eup %10112  ;;  %v4556_v36 = vand.u32 2147483648, %v12754_v23  ;;  %v912_v14 = vadd.f32 %v12649_v57, %v10760_v17 }
 0xb07   :  { %v4546_v11 = vmul.f32 %v10113_v3, %v12754_v23  ;;  %v4568_v47 = vsel %vm4567_vm12, %v12747_v46, %v4564_v58  ;;  %vm4551_vm15 = vweird.f32 %v10113_v3 }
 0xb08   :  { %vm4552_vm2 = vmor %vm4550_vm1, %vm4551_vm15  ;;  %v4557_v7 = vor.u32 1.1754944e-38, %v4556_v36 }
 0xb0a   :  { %v4362_v45 = vpop.f32.mrf.mxu2 }
 0xb0b   :  { %v12771_v19 = vadd.f32 %v9310_v10, %v4362_v45  ;;  %v10115_v41 = vpop.eup %10114  ;;  %v4547_v45 = vsub.f32 1.0, %v4546_v11  ;;  %v12796_v10 = vsel %vm4540_vm13, %v4542_v35, %v4538_v43 }
 0xb0d   :  { %4761 = vrot.lane.b32.xlu0 %v10111_v39, %s10624_s3  ;;  %10116 = vtanh.f32 %v12771_v19  ;;  %v4572_v39 = vor.u32 1.1754944e-38, %v4571_v13  ;;  %v4548_v46 = vmul.f32 %v10113_v3, %v4547_v45 }
 0xb0e   :  { %10118 = vtanh.f32 %v12794_v51 }
 0xb0f   :  { %v12798_v38 = vsel %vm4570_vm14, %v4572_v39, %v4568_v47  ;;  %v4549_v32 = vadd.f32 %v10113_v3, %v4548_v46 }
 0xb11   :  { %v4752_v31 = vpop.permute.xlu0 %4751  ;;  %v4553_v58 = vsel %vm4552_vm2, %v10113_v3, %v4549_v32 }
 0xb12   :  { %v4795_v4 = vmul.f32 %v4752_v31, %v12773_v29  ;;  %v4554_v31 = vand.u32 2147483647, %v12754_v23  ;;  %v8563_v23 = vmul.f32 -1.442695, %v12715_v54  ;;  %v4712_v54 = vmul.f32 %v12697_v60, %v12433_v22 }
 0xb13   :  { %v10117_v26 = vpop.eup %10116 }
 0xb14   :  { %4831 = vrot.lane.b32.xlu1 %v4795_v4, %s10624_s3  ;;  %v10119_v4 = vpop.eup %10118  ;;  %vm4555_vm3 = vcmp.eq.f32.partialorder %v4554_v31, 8.507059e+37  ;;  %10120 = vpow2.f32 %v8563_v23 }
 0xb15   :  { %4763 = vrot.lane.b32.xlu0 %v10115_v41, %s10624_s3  ;;  %v910_v41 = vadd.f32 %v12649_v57, %v10758_v15  ;;  %v12814_v56 = vsel %vm4555_vm3, %v4557_v7, %v4553_v58 }
 0xb16   :  { %v4758_v6 = vpop.permute.xlu2 %4757 }
 0xb17   :  { %v4798_v44 = vmul.f32 %v4758_v6, %v12798_v38  ;;  %v9032_v11 = vpack.c.bf16 %v912_v14, %v910_v41  ;;  %v8564_v14 = vmul.f32 -1.442695, %v12742_v62 }
 0xb19   :  { %v4754_v53 = vpop.permute.xlu1 %4753  ;;  %v9313_v43 = vunpack.c.l.bf16 %v9032_v11  ;;  %v9314_v15 = vunpack.c.h.bf16 %v9032_v11 }
 0xb1a   :  { %v4796_v12 = vmul.f32 %v4754_v53, %v12796_v10  ;;  %v10121_v3 = vpop.eup %10120 }
 0xb1b   :  { %v4447_v39 = vadd.f32 1.0, %v10121_v3  ;;  %v4714_v3 = vmul.f32 %v12712_v21, %v12487_v50 }
 0xb1c   :  { %4833 = vrot.lane.b32.xlu2 %v4796_v12, %s10624_s3  ;;  %4765 = vrot.lane.b32.xlu1 %v10117_v26, %s10624_s3 }
 0xb1d   :  { %4837 = vrot.lane.b32.xlu0 %v4798_v44, %s10624_s3  ;;  %vm4580_vm5 = vweird.f32 %v4447_v39  ;;  %v4584_v22 = vand.u32 2147483647, %v4447_v39 }
 0xb1f   :  { %vm4585_vm7 = vcmp.eq.f32.partialorder %v4584_v22, 8.507059e+37 }
 0xb24   :  { %4919 = vrot.lane.b32.xlu1 %v10119_v4, %s10624_s3  ;;  %v4586_v4 = vand.u32 2147483648, %v4447_v39 }
 0xb26   :  { %v4756_v13 = vpop.permute.xlu1 %4755  ;;  %v4587_v7 = vor.u32 1.1754944e-38, %v4586_v4 }
 0xb27   :  { %v4797_v9 = vmul.f32 %v4756_v13, %v12814_v56 }
 0xb29   :  { %4835 = vrot.lane.b32.xlu2 %v4797_v9, %s10624_s3  ;;  %v8565_v9 = vmul.f32 -1.442695, %v12758_v49 }
 0xb2d   :  { %v4365_v17 = vpop.f32.mrf.mxu2 }
 0xb2e   :  { %v12819_v48 = vadd.f32 %v9313_v43, %v4365_v17  ;;  %v8566_v17 = vmul.f32 -1.442695, %v12771_v19 }
 0xb30   :  { %10122 = vtanh.f32 %v12819_v48 }
 0xb35   :  { %v4367_v47 = vpop.f32.mrf.mxu2 }
 0xb36   :  { %v10123_v35 = vpop.eup %10122  ;;  %v12822_v6 = vadd.f32 %v9314_v15, %v4367_v47 }
 0xb37   :  { %4767 = vrot.lane.b32.xlu0 %v10123_v35, %s10624_s3 }
 0xb38   :  { %10124 = vtanh.f32 %v12822_v6 }
 0xb39   :  { %10126 = vrcp.f32 %v4447_v39 }
 0xb3c   :  { %v4826_v45 = vpop.permute.xlu0 %4825 }
 0xb3d   :  { %v12828_v12 = vadd.f32 %v4826_v45, %v4712_v54 }
 0xb3e   :  { %v10125_v53 = vpop.eup %10124 }
 0xb3f   :  { %4769 = vrot.lane.b32.xlu1 %v10125_v53, %s10624_s3  ;;  %v10127_v26 = vpop.eup %10126  ;;  %10128 = vtanh.f32 %v12828_v12 }
 0xb40   :  { %v4576_v44 = vmul.f32 %v10127_v26, %v4447_v39  ;;  %vm4581_vm4 = vweird.f32 %v10127_v26  ;;  %10130 = vpow2.f32 %v8564_v14 }
 0xb41   :  { %vm4582_vm6 = vmor %vm4580_vm5, %vm4581_vm4  ;;  %10132 = vpow2.f32 %v8565_v9 }
 0xb42   :  { %v4577_v32 = vsub.f32 1.0, %v4576_v44 }
 0xb44   :  { %v4578_v36 = vmul.f32 %v10127_v26, %v4577_v32  ;;  %v4713_v32 = vmul.f32 %v12744_v59, %v12460_v27 }
 0xb45   :  { %v10129_v46 = vpop.eup %10128 }
 0xb46   :  { %4921 = vrot.lane.b32.xlu2 %v10129_v46, %s10624_s3  ;;  %v4579_v31 = vadd.f32 %v10127_v26, %v4578_v36  ;;  %v10131_v23 = vpop.eup %10130  ;;  %v917_v46 = vadd.f32 %v12649_v57, %v10775_v25  ;;  %v915_v36 = vadd.f32 %v12649_v57, %v10766_v20  ;;  %v8567_v20 = vmul.f32 -1.442695, %v12819_v48 }
 0xb47   :  { %v4448_v43 = vadd.f32 1.0, %v10131_v23  ;;  %v10133_v62 = vpop.eup %10132 }
 0xb48   :  { %v4583_v58 = vsel %vm4582_vm6, %v10127_v26, %v4579_v31  ;;  %v12842_v47 = vadd.f32 1.0, %v10133_v62 }
 0xb49   :  { %v12834_v41 = vsel %vm4585_vm7, %v4587_v7, %v4583_v58  ;;  %10134 = vrcp.f32 %v4448_v43  ;;  %v9037_v7 = vpack.c.bf16 %v917_v46, %v915_v36  ;;  %vm4595_vm9 = vweird.f32 %v4448_v43 }
 0xb4a   :  { %10136 = vpow2.f32 %v8566_v17  ;;  %v4599_v25 = vand.u32 2147483647, %v4448_v43  ;;  %v4616_v48 = vand.u32 2147483648, %v12842_v47  ;;  %vm4610_vm13 = vweird.f32 %v12842_v47 }
 0xb4b   :  { %v9317_v9 = vunpack.c.l.bf16 %v9037_v7  ;;  %v4716_v36 = vmul.f32 %v12796_v10, %v12510_v52 }
 0xb4c   :  { %vm4600_vm11 = vcmp.eq.f32.partialorder %v4599_v25, 8.507059e+37 }
 0xb4f   :  { %v10135_v39 = vpop.eup %10134 }
 0xb50   :  { %v10137_v49 = vpop.eup %10136  ;;  %v4591_v54 = vmul.f32 %v10135_v39, %v4448_v43  ;;  %vm4596_vm8 = vweird.f32 %v10135_v39 }
 0xb51   :  { %v12848_v45 = vadd.f32 1.0, %v10137_v49  ;;  %vm4597_vm10 = vmor %vm4595_vm9, %vm4596_vm8 }
 0xb52   :  { %v4592_v53 = vsub.f32 1.0, %v4591_v54 }
 0xb53   :  { %vm4625_vm2 = vweird.f32 %v12848_v45 }
 0xb54   :  { %v4593_v50 = vmul.f32 %v10135_v39, %v4592_v53 }
 0xb56   :  { %v4760_v13 = vpop.permute.xlu2 %4759  ;;  %v4594_v14 = vadd.f32 %v10135_v39, %v4593_v50 }
 0xb57   :  { %v4799_v11 = vmul.f32 %v4760_v13, %v12834_v41  ;;  %v4601_v13 = vand.u32 2147483648, %v4448_v43 }
 0xb58   :  { %v4598_v57 = vsel %vm4597_vm10, %v10135_v39, %v4594_v14  ;;  %v4614_v39 = vand.u32 2147483647, %v12842_v47  ;;  %v4617_v14 = vor.u32 1.1754944e-38, %v4616_v48 }
 0xb59   :  { %4839 = vrot.lane.b32.xlu2 %v4799_v11, %s10624_s3  ;;  %v4602_v23 = vor.u32 1.1754944e-38, %v4601_v13 }
 0xb5a   :  { %vm4615_vm15 = vcmp.eq.f32.partialorder %v4614_v39, 8.507059e+37 }
 0xb66   :  { %v4830_v15 = vpop.permute.xlu1 %4829 }
 0xb67   :  { %v12844_v35 = vadd.f32 %v4830_v15, %v4714_v3  ;;  %v12869_v15 = vsel %vm4600_vm11, %v4602_v23, %v4598_v57  ;;  %v4715_v23 = vmul.f32 %v12773_v29, %v12472_v30 }
 0xb69   :  { %10138 = vtanh.f32 %v12844_v35 }
 0xb6a   :  { %10140 = vrcp.f32 %v12842_v47 }
 0xb6b   :  { %10142 = vrcp.f32 %v12848_v45 }
 0xb6f   :  { %v10139_v19 = vpop.eup %10138 }
 0xb70   :  { %4925 = vrot.lane.b32.xlu2 %v10139_v19, %s10624_s3  ;;  %v10141_v26 = vpop.eup %10140 }
 0xb71   :  { %v4606_v44 = vmul.f32 %v10141_v26, %v12842_v47  ;;  %v12859_v4 = vpop.eup %10142  ;;  %vm4611_vm12 = vweird.f32 %v10141_v26 }
 0xb72   :  { %v4621_v27 = vmul.f32 %v12859_v4, %v12848_v45  ;;  %vm12878_vm14 = vmor %vm4610_vm13, %vm4611_vm12  ;;  %vm4626_vm1 = vweird.f32 %v12859_v4 }
 0xb73   :  { %v4607_v58 = vsub.f32 1.0, %v4606_v44  ;;  %v8568_v44 = vmul.f32 -1.442695, %v12822_v6  ;;  %vm4627_vm3 = vmor %vm4625_vm2, %vm4626_vm1 }
 0xb74   :  { %v4622_v49 = vsub.f32 1.0, %v4621_v27 }
 0xb75   :  { %v4608_v11 = vmul.f32 %v10141_v26, %v4607_v58 }
 0xb76   :  { %v4623_v50 = vmul.f32 %v12859_v4, %v4622_v49  ;;  %v4834_v46 = vpop.permute.xlu2 %4833 }
 0xb77   :  { %v4828_v31 = vpop.permute.xlu0 %4827  ;;  %v4609_v19 = vadd.f32 %v10141_v26, %v4608_v11  ;;  %v12889_v25 = vadd.f32 %v4834_v46, %v4716_v36 }
 0xb78   :  { %v12861_v22 = vadd.f32 %v4828_v31, %v4713_v32  ;;  %v9318_v31 = vunpack.c.h.bf16 %v9037_v7  ;;  %v4631_v7 = vand.u32 2147483648, %v12848_v45 }
 0xb79   :  { %v4613_v32 = vsel %vm12878_vm14, %v10141_v26, %v4609_v19  ;;  %v4624_v26 = vadd.f32 %v12859_v4, %v4623_v50 }
 0xb7a   :  { %10144 = vtanh.f32 %v12861_v22 }
 0xb7b   :  { %10146 = vpow2.f32 %v8567_v20  ;;  %v12893_v20 = vsel %vm4615_vm15, %v4617_v14, %v4613_v32 }
 0xb7e   :  { %v4370_v17 = vpop.f32.mrf.mxu2 }
 0xb7f   :  { %v12867_v62 = vadd.f32 %v9317_v9, %v4370_v17  ;;  %v4762_v3 = vpop.permute.xlu0 %4761  ;;  %v4629_v9 = vand.u32 2147483647, %v12848_v45  ;;  %v4628_v17 = vsel %vm4627_vm3, %v12859_v4, %v4624_v26 }
 0xb80   :  { %v10145_v54 = vpop.eup %10144  ;;  %v4800_v43 = vmul.f32 %v4762_v3, %v12869_v15  ;;  %v4632_v3 = vor.u32 1.1754944e-38, %v4631_v7 }
 0xb81   :  { %4923 = vrot.lane.b32.xlu1 %v10145_v54, %s10624_s3  ;;  %10148 = vtanh.f32 %v12867_v62  ;;  %v10147_v47 = vpop.eup %10146  ;;  %vm4630_vm4 = vcmp.eq.f32.partialorder %v4629_v9, 8.507059e+37 }
 0xb82   :  { %4841 = vrot.lane.b32.xlu0 %v4800_v43, %s10624_s3  ;;  %10150 = vpow2.f32 %v8568_v44  ;;  %v4451_v11 = vadd.f32 1.0, %v10147_v47  ;;  %v12911_v54 = vsel %vm4630_vm4, %v4632_v3, %v4628_v17  ;;  %v4717_v47 = vmul.f32 %v12814_v56, %v12536_v61 }
 0xb83   :  { %v4836_v44 = vpop.permute.xlu2 %4835 }
 0xb84   :  { %v4646_v9 = vand.u32 2147483648, %v4451_v11  ;;  %vm4640_vm6 = vweird.f32 %v4451_v11  ;;  %v4644_v17 = vand.u32 2147483647, %v4451_v11 }
 0xb86   :  { %v4372_v58 = vpop.f32.mrf.mxu2  ;;  %v4832_v13 = vpop.permute.xlu1 %4831  ;;  %vm4645_vm8 = vcmp.eq.f32.partialorder %v4644_v17, 8.507059e+37 }
 0xb87   :  { %v12891_v27 = vadd.f32 %v9318_v31, %v4372_v58  ;;  %v4764_v6 = vpop.permute.xlu0 %4763  ;;  %v10149_v57 = vpop.eup %10148  ;;  %v12909_v49 = vadd.f32 %v4832_v13, %v4715_v23 }
 0xb88   :  { %v4801_v52 = vmul.f32 %v4764_v6, %v12893_v20  ;;  %v10151_v45 = vpop.eup %10150 }
 0xb89   :  { %10152 = vtanh.f32 %v12891_v27  ;;  %v4452_v53 = vadd.f32 1.0, %v10151_v45  ;;  %v4647_v45 = vor.u32 1.1754944e-38, %v4646_v9 }
 0xb8a   :  { %4771 = vrot.lane.b32.xlu0 %v10149_v57, %s10624_s3  ;;  %4843 = vrot.lane.b32.xlu2 %v4801_v52, %s10624_s3  ;;  %10154 = vtanh.f32 %v12889_v25  ;;  %v12923_v57 = vadd.f32 %v4836_v44, %v4717_v47 }
 0xb8b   :  { %10156 = vrcp.f32 %v4451_v11  ;;  %vm4655_vm10 = vweird.f32 %v4452_v53 }
 0xb8c   :  { %10158 = vtanh.f32 %v12909_v49 }
 0xb8d   :  { %10160 = vrcp.f32 %v4452_v53 }
 0xb8e   :  { %v4766_v43 = vpop.permute.xlu1 %4765  ;;  %10162 = vtanh.f32 %v12923_v57 }
 0xb8f   :  { %v10153_v19 = vpop.eup %10152  ;;  %v4802_v48 = vmul.f32 %v4766_v43, %v12911_v54  ;;  %v4838_v58 = vpop.permute.xlu0 %4837 }
 0xb90   :  { %4773 = vrot.lane.b32.xlu1 %v10153_v19, %s10624_s3  ;;  %v10155_v39 = vpop.eup %10154 }
 0xb91   :  { %v10157_v30 = vpop.eup %10156 }
 0xb92   :  { %4845 = vrot.lane.b32.xlu0 %v4802_v48, %s10624_s3  ;;  %4929 = vrot.lane.b32.xlu2 %v10155_v39, %s10624_s3  ;;  %v4636_v4 = vmul.f32 %v10157_v30, %v4451_v11  ;;  %v10159_v50 = vpop.eup %10158  ;;  %vm4641_vm5 = vweird.f32 %v10157_v30  ;;  %v4661_v39 = vand.u32 2147483648, %v4452_v53 }
 0xb93   :  { %v10161_v32 = vpop.eup %10160  ;;  %vm4642_vm7 = vmor %vm4640_vm6, %vm4641_vm5 }
 0xb94   :  { %v4637_v46 = vsub.f32 1.0, %v4636_v4  ;;  %v4651_v31 = vmul.f32 %v10161_v32, %v4452_v53  ;;  %vm4656_vm9 = vweird.f32 %v10161_v32  ;;  %v10163_v4 = vpop.eup %10162 }
 0xb95   :  { %vm4657_vm11 = vmor %vm4655_vm10, %vm4656_vm9 }
 0xb96   :  { %v4638_v36 = vmul.f32 %v10157_v30, %v4637_v46  ;;  %v4920_v14 = vpop.permute.xlu1 %4919  ;;  %v4652_v7 = vsub.f32 1.0, %v4651_v31 }
 0xb97   :  { %v4967_v6 = vmul.f32 %v4920_v14, %v12686_v42  ;;  %v4718_v42 = vmul.f32 %v12798_v38, %v12543_v0  ;;  %v8570_v14 = vmul.f32 -1.442695, %v12891_v27 }
 0xb98   :  { %4927 = vrot.lane.b32.xlu1 %v10159_v50, %s10624_s3  ;;  %v4639_v52 = vadd.f32 %v10157_v30, %v4638_v36  ;;  %v4653_v61 = vmul.f32 %v10161_v32, %v4652_v7  ;;  %v4662_v50 = vor.u32 1.1754944e-38, %v4661_v39 }
 0xb9a   :  { %v4643_v3 = vsel %vm4642_vm7, %v10157_v30, %v4639_v52  ;;  %v4654_v11 = vadd.f32 %v10161_v32, %v4653_v61  ;;  %v4659_v30 = vand.u32 2147483647, %v4452_v53  ;;  %v8569_v53 = vmul.f32 -1.442695, %v12867_v62 }
 0xb9b   :  { %v12931_v43 = vsel %vm4645_vm8, %v4647_v45, %v4643_v3  ;;  %v4719_v62 = vmul.f32 %v12834_v41, %v12560_v34 }
 0xb9c   :  { %v4658_v0 = vsel %vm4657_vm11, %v10161_v32, %v4654_v11  ;;  %vm4660_vm12 = vcmp.eq.f32.partialorder %v4659_v30, 8.507059e+37 }
 0xb9d   :  { %v12937_v44 = vsel %vm4660_vm12, %v4662_v50, %v4658_v0 }
 0xba0   :  { %v4922_v13 = vpop.permute.xlu2 %4921 }
 0xba1   :  { %v4968_v26 = vmul.f32 %v4922_v13, %v12697_v60  ;;  %v12929_v60 = vadd.f32 %v4838_v58, %v4718_v42 }
 0xba3   :  { %v5016_v23 = vpack.c.bf16 %v4968_v26, %v4967_v6  ;;  %10164 = vtanh.f32 %v12929_v60 }
 0xba4   :  { %10166 = vpow2.f32 %v8569_v53 }
 0xba5   :  { %5032 = vrot.lane.b32.xlu0 %v5016_v23, %s10625_s21  ;;  %10168 = vpow2.f32 %v8570_v14 }
 0xba9   :  { %v4768_v19 = vpop.permute.xlu0 %4767  ;;  %v10165_v31 = vpop.eup %10164 }
 0xbaa   :  { %v4803_v48 = vmul.f32 %v4768_v19, %v12931_v43  ;;  %v10167_v47 = vpop.eup %10166 }
 0xbab   :  { %v4453_v32 = vadd.f32 1.0, %v10167_v47  ;;  %v10169_v58 = vpop.eup %10168 }
 0xbac   :  { %4847 = vrot.lane.b32.xlu1 %v4803_v48, %s10624_s3  ;;  %v4454_v13 = vadd.f32 1.0, %v10169_v58 }
 0xbad   :  { %4931 = vrot.lane.b32.xlu0 %v10163_v4, %s10624_s3  ;;  %10170 = vrcp.f32 %v4453_v32  ;;  %v4676_v30 = vand.u32 2147483648, %v4453_v32  ;;  %vm4670_vm14 = vweird.f32 %v4453_v32  ;;  %v4674_v4 = vand.u32 2147483647, %v4453_v32 }
 0xbae   :  { %10172 = vrcp.f32 %v4454_v13  ;;  %v4691_v47 = vand.u32 2147483648, %v4454_v13  ;;  %vm4685_vm3 = vweird.f32 %v4454_v13 }
 0xbaf   :  { %vm4675_vm1 = vcmp.eq.f32.partialorder %v4674_v4, 8.507059e+37 }
 0xbb1   :  { %v4770_v46 = vpop.permute.xlu1 %4769 }
 0xbb2   :  { %v4804_v36 = vmul.f32 %v4770_v46, %v12937_v44  ;;  %v4721_v46 = vmul.f32 %v12893_v20, %v12573_v28 }
 0xbb3   :  { %v10171_v6 = vpop.eup %10170  ;;  %v4840_v26 = vpop.permute.xlu2 %4839 }
 0xbb4   :  { %4933 = vrot.lane.b32.xlu1 %v10165_v31, %s10624_s3  ;;  %4849 = vrot.lane.b32.xlu2 %v4804_v36, %s10624_s3  ;;  %v4666_v52 = vmul.f32 %v10171_v6, %v4453_v32  ;;  %v10173_v7 = vpop.eup %10172  ;;  %v12948_v48 = vadd.f32 %v4840_v26, %v4719_v62  ;;  %vm4671_vm13 = vweird.f32 %v10171_v6  ;;  %v4692_v26 = vor.u32 1.1754944e-38, %v4691_v47 }
 0xbb5   :  { %v4681_v23 = vmul.f32 %v10173_v7, %v4454_v13  ;;  %vm4672_vm15 = vmor %vm4670_vm14, %vm4671_vm13  ;;  %vm4686_vm2 = vweird.f32 %v10173_v7 }
 0xbb6   :  { %v4667_v9 = vsub.f32 1.0, %v4666_v52  ;;  %10174 = vtanh.f32 %v12948_v48  ;;  %vm4687_vm4 = vmor %vm4685_vm3, %vm4686_vm2 }
 0xbb7   :  { %v4682_v27 = vsub.f32 1.0, %v4681_v23 }
 0xbb8   :  { %v4668_v3 = vmul.f32 %v10171_v6, %v4667_v9 }
 0xbb9   :  { %v4683_v0 = vmul.f32 %v10173_v7, %v4682_v27 }
 0xbba   :  { %v4669_v11 = vadd.f32 %v10171_v6, %v4668_v3 }
 0xbbb   :  { %v4684_v36 = vadd.f32 %v10173_v7, %v4683_v0 }
 0xbbc   :  { %v4673_v34 = vsel %vm4672_vm15, %v10171_v6, %v4669_v11  ;;  %v4689_v6 = vand.u32 2147483647, %v4454_v13  ;;  %v4722_v13 = vmul.f32 %v12911_v54, %v12587_v55  ;;  %v4724_v11 = vmul.f32 %v12937_v44, %v12596_v16 }
 0xbbd   :  { %v4688_v28 = vsel %vm4687_vm4, %v10173_v7, %v4684_v36 }
 0xbbe   :  { %vm4690_vm5 = vcmp.eq.f32.partialorder %v4689_v6, 8.507059e+37 }
 0xbbf   :  { %v12967_v52 = vsel %vm4690_vm5, %v4692_v26, %v4688_v28 }
 0xbca   :  { %v4926_v17 = vpop.permute.xlu2 %4925 }
 0xbcb   :  { %v4970_v42 = vmul.f32 %v4926_v17, %v12712_v21  ;;  %v4720_v21 = vmul.f32 %v12869_v15, %v12566_v18  ;;  %v10175_v18 = vpop.eup %10174 }
 0xbe4   :  { %v4844_v50 = vpop.permute.xlu2 %4843 }
 0xbe5   :  { %v12960_v32 = vadd.f32 %v4844_v50, %v4721_v46 }
 0xbec   :  { %v4930_v62 = vpop.permute.xlu2 %4929 }
 0xbf3   :  { %v4924_v61 = vpop.permute.xlu1 %4923 }
 0xbf4   :  { %v4969_v45 = vmul.f32 %v4924_v61, %v12744_v59  ;;  %v4842_v19 = vpop.permute.xlu0 %4841  ;;  %v4677_v59 = vor.u32 1.1754944e-38, %v4676_v30 }
 0xbf5   :  { %v12956_v31 = vadd.f32 %v4842_v19, %v4720_v21 }
 0xbf6   :  { %v5017_v39 = vpack.c.bf16 %v4970_v42, %v4969_v45  ;;  %v12958_v53 = vsel %vm4675_vm1, %v4677_v59, %v4673_v34  ;;  %v4972_v42 = vmul.f32 %v4930_v62, %v12796_v10 }
 0xbf7   :  { %10176 = vtanh.f32 %v12956_v31 }
 0xbf8   :  { %5034 = vrot.lane.b32.xlu2 %v5017_v39, %s10625_s21  ;;  %10178 = vtanh.f32 %v12960_v32 }
 0xbfc   :  { %v4772_v14 = vpop.permute.xlu0 %4771 }
 0xbfd   :  { %v4805_v58 = vmul.f32 %v4772_v14, %v12958_v53  ;;  %v10177_v7 = vpop.eup %10176 }
 0xbfe   :  { %v10179_v61 = vpop.eup %10178 }
 0xbff   :  { %4851 = vrot.lane.b32.xlu0 %v4805_v58, %s10624_s3 }
 0xc00   :  { %4935 = vrot.lane.b32.xlu2 %v10175_v18, %s10624_s3 }
 0xc02   :  { %v4774_v9 = vpop.permute.xlu1 %4773 }
 0xc03   :  { %v4806_v23 = vmul.f32 %v4774_v9, %v12967_v52 }
 0xc04   :  { %v4846_v17 = vpop.permute.xlu0 %4845 }
 0xc05   :  { %v12972_v3 = vadd.f32 %v4846_v17, %v4722_v13  ;;  %4853 = vrot.lane.b32.xlu1 %v4806_v23, %s10624_s3 }
 0xc07   :  { %10180 = vtanh.f32 %v12972_v3  ;;  %4937 = vrot.lane.b32.xlu0 %v10177_v7, %s10624_s3 }
 0xc08   :  { %4939 = vrot.lane.b32.xlu2 %v10179_v61, %s10624_s3 }
 0xc0a   :  { %v4928_v27 = vpop.permute.xlu1 %4927 }
 0xc0b   :  { %v4971_v45 = vmul.f32 %v4928_v27, %v12773_v29  ;;  %v4723_v29 = vmul.f32 %v12931_v43, %v12605_v33  ;;  %v4725_v33 = vmul.f32 %v12958_v53, %v12631_v24 }
 0xc0d   :  { %v10181_v55 = vpop.eup %10180  ;;  %v5018_v19 = vpack.c.bf16 %v4972_v42, %v4971_v45 }
 0xc0e   :  { %v4850_v39 = vpop.permute.xlu2 %4849 }
 0xc0f   :  { %v12982_v30 = vadd.f32 %v4850_v39, %v4724_v11  ;;  %4941 = vrot.lane.b32.xlu0 %v10181_v55, %s10624_s3  ;;  %5036 = vrot.lane.b32.xlu1 %v5018_v19, %s10625_s21 }
 0xc11   :  { %10182 = vtanh.f32 %v12982_v30 }
 0xc17   :  { %v10183_v4 = vpop.eup %10182  ;;  %v5033_v0 = vpop.permute.xlu0 %5032 }
 0xc18   :  { %4945 = vrot.lane.b32.xlu0 %v10183_v4, %s10624_s3  ;;  %8571 = vmatmul.msk.bf16.vlgmr.msra.gmra.mxu3 %vm517_vm0, %v5033_v0 }
 0xc1e   :  { %v4848_v10 = vpop.permute.xlu1 %4847 }
 0xc1f   :  { %v12991_v16 = vadd.f32 %v4848_v10, %v4723_v29  ;;  %v4932_v34 = vpop.permute.xlu0 %4931 }
 0xc20   :  { %v4973_v59 = vmul.f32 %v4932_v34, %v12814_v56 }
 0xc21   :  { %10184 = vtanh.f32 %v12991_v16 }
 0xc26   :  { %v4934_v50 = vpop.permute.xlu1 %4933 }
 0xc27   :  { %v10185_v21 = vpop.eup %10184  ;;  %v4974_v46 = vmul.f32 %v4934_v50, %v12798_v38  ;;  %v4726_v38 = vmul.f32 %v12967_v52, %v12613_v37 }
 0xc28   :  { %4943 = vrot.lane.b32.xlu2 %v10185_v21, %s10624_s3 }
 0xc29   :  { %v5019_v36 = vpack.c.bf16 %v4974_v46, %v4973_v59 }
 0xc2b   :  { %5038 = vrot.lane.b32.xlu1 %v5019_v36, %s10625_s21 }
 0xc52   :  { %v5035_v14 = vpop.permute.xlu2 %5034 }
 0xc53   :  { %8572 = vmatmul.msk.bf16.gmra.mxu3 %vm517_vm0, %v5035_v14 }
 0xc5a   :  { %v4936_v6 = vpop.permute.xlu2 %4935 }
 0xc5b   :  { %v4975_v9 = vmul.f32 %v4936_v6, %v12834_v41 }
 0xc62   :  { %v4940_v13 = vpop.permute.xlu2 %4939 }
 0xc63   :  { %v4977_v62 = vmul.f32 %v4940_v13, %v12893_v20  ;;  %v13024_v20 = vld [vmem:[%s14436_s5] ss:$0 sm:$0xff] }
 0xc64   :  { %v922_v19 = vadd.f32 %v13024_v20, %v11266_v63  ;;  %v14524_v63 = vld [vmem:[#allocation3_spill] sm:$0xff] }
 0xc65   :  { %v927_v21 = vadd.f32 %v13024_v20, %v14524_v63 }
 0xc71   :  { %v4852_v47 = vpop.permute.xlu0 %4851 }
 0xc72   :  { %v13001_v58 = vadd.f32 %v4852_v47, %v4725_v33 }
 0xc74   :  { %10186 = vtanh.f32 %v13001_v58 }
 0xc77   :  { %v4854_v56 = vpop.permute.xlu1 %4853 }
 0xc78   :  { %v13006_v18 = vadd.f32 %v4854_v56, %v4726_v38 }
 0xc79   :  { %v4938_v28 = vpop.permute.xlu0 %4937 }
 0xc7a   :  { %v10187_v26 = vpop.eup %10186  ;;  %10188 = vtanh.f32 %v13006_v18  ;;  %v4976_v24 = vmul.f32 %v4938_v28, %v12869_v15 }
 0xc7b   :  { %4947 = vrot.lane.b32.xlu2 %v10187_v26, %s10624_s3 }
 0xc7c   :  { %v5020_v23 = vpack.c.bf16 %v4976_v24, %v4975_v9 }
 0xc7e   :  { %5040 = vrot.lane.b32.xlu1 %v5020_v23, %s10625_s21 }
 0xc80   :  { %v10189_v17 = vpop.eup %10188 }
 0xc81   :  { %v4942_v7 = vpop.permute.xlu0 %4941  ;;  %v5037_v37 = vpop.permute.xlu1 %5036  ;;  %4949 = vrot.lane.b32.xlu0 %v10189_v17, %s10624_s3 }
 0xc82   :  { %v4978_v61 = vmul.f32 %v4942_v7, %v12911_v54  ;;  %8573 = vmatmul.msk.bf16.gmra.mxu3 %vm517_vm0, %v5037_v37  ;;  %v4944_v15 = vpop.permute.xlu2 %4943  ;;  %v920_v54 = vadd.f32 %v13024_v20, %v11253_v1  ;;  %v925_v1 = vadd.f32 %v13024_v20, %v11278_v2 }
 0xc83   :  { %v4979_v42 = vmul.f32 %v4944_v15, %v12931_v43  ;;  %v14526_v15 = vld [vmem:[#allocation5_spill] sm:$0xff] }
 0xc84   :  { %v5021_v41 = vpack.c.bf16 %v4978_v61, %v4977_v62  ;;  %v9042_v11 = vpack.c.bf16 %v922_v19, %v920_v54  ;;  %v9047_v46 = vpack.c.bf16 %v927_v21, %v925_v1  ;;  %v14525_v61 = vld [vmem:[#allocation4_spill] sm:$0xff] }
 0xc86   :  { %5042 = vrot.lane.b32.xlu1 %v5021_v41, %s10625_s21  ;;  %v9321_v39 = vunpack.c.l.bf16 %v9042_v11  ;;  %v9326_v36 = vunpack.c.h.bf16 %v9047_v46  ;;  %v9325_v26 = vunpack.c.l.bf16 %v9047_v46  ;;  %v930_v41 = vadd.f32 %v13024_v20, %v14525_v61 }
 0xc8a   :  { %v4946_v27 = vpop.permute.xlu0 %4945 }
 0xc8b   :  { %v4980_v45 = vmul.f32 %v4946_v27, %v12937_v44  ;;  %v9322_v44 = vunpack.c.h.bf16 %v9042_v11  ;;  %v932_v27 = vadd.f32 %v13024_v20, %v14526_v15 }
 0xc8d   :  { %v5022_v55 = vpack.c.bf16 %v4980_v45, %v4979_v42 }
 0xc8f   :  { %5044 = vrot.lane.b32.xlu2 %v5022_v55, %s10625_s21 }
 0xc9b   :  { %v5081_v4 = vpop.f32.mrf.mxu3 }
 0xc9c   :  { %v5121_v43 = vadd.f32 %v9321_v39, %v5081_v4 }
 0xc9d   :  { %v5039_v0 = vpop.permute.xlu1 %5038 }
 0xc9e   :  { %8574 = vmatmul.msk.bf16.gmra.mxu3 %vm517_vm0, %v5039_v0  ;;  %10190 = vtanh.f32 %v5121_v43  ;;  %v8579_v38 = vmul.f32 -1.442695, %v5121_v43 }
 0xca3   :  { %v5083_v29 = vpop.f32.mrf.mxu3 }
 0xca4   :  { %v10191_v10 = vpop.eup %10190  ;;  %v5122_v34 = vadd.f32 %v9322_v44, %v5083_v29 }
 0xca5   :  { %5489 = vrot.lane.b32.xlu1 %v10191_v10, %s10624_s3 }
 0xca6   :  { %10192 = vtanh.f32 %v5122_v34  ;;  %v8580_v6 = vmul.f32 -1.442695, %v5122_v34 }
 0xcac   :  { %v10193_v50 = vpop.eup %10192 }
 0xcad   :  { %5491 = vrot.lane.b32.xlu2 %v10193_v50, %s10624_s3 }
 0xcd5   :  { %v4948_v28 = vpop.permute.xlu2 %4947 }
 0xcd6   :  { %v5086_v59 = vpop.f32.mrf.mxu3  ;;  %v4981_v23 = vmul.f32 %v4948_v28, %v12958_v53 }
 0xcd7   :  { %v13044_v7 = vadd.f32 %v9325_v26, %v5086_v59 }
 0xcde   :  { %v5088_v14 = vpop.f32.mrf.mxu3 }
 0xcdf   :  { %v13037_v33 = vadd.f32 %v9326_v36, %v5088_v14 }
 0xce1   :  { %10194 = vtanh.f32 %v13037_v33 }
 0xce2   :  { %10196 = vpow2.f32 %v8580_v6 }
 0xce3   :  { %10198 = vpow2.f32 %v8579_v38 }
 0xce7   :  { %v10195_v47 = vpop.eup %10194 }
 0xce8   :  { %5495 = vrot.lane.b32.xlu1 %v10195_v47, %s10624_s3  ;;  %v10197_v2 = vpop.eup %10196 }
 0xce9   :  { %v5186_v24 = vadd.f32 1.0, %v10197_v2  ;;  %v10199_v17 = vpop.eup %10198  ;;  %v5045_v29 = vpop.permute.xlu2 %5044 }
 0xcea   :  { %v5185_v62 = vadd.f32 1.0, %v10199_v17  ;;  %v14528_v17 = vld [vmem:[#allocation7_spill] sm:$0xff] }
 0xceb   :  { %10200 = vrcp.f32 %v5186_v24  ;;  %v5227_v21 = vand.u32 2147483648, %v5186_v24  ;;  %vm5221_vm7 = vweird.f32 %v5186_v24  ;;  %v5225_v46 = vand.u32 2147483647, %v5186_v24 }
 0xcec   :  { %10202 = vtanh.f32 %v13044_v7  ;;  %v5212_v38 = vand.u32 2147483648, %v5185_v62  ;;  %vm5206_vm11 = vweird.f32 %v5185_v62 }
 0xced   :  { %10204 = vrcp.f32 %v5185_v62  ;;  %v5228_v47 = vor.u32 1.1754944e-38, %v5227_v21  ;;  %vm5226_vm10 = vcmp.eq.f32.partialorder %v5225_v46, 8.507059e+37 }
 0xcf0   :  { %v5041_v56 = vpop.permute.xlu1 %5040 }
 0xcf1   :  { %8575 = vmatmul.msk.bf16.gmra.mxu3 %vm517_vm0, %v5041_v56  ;;  %v10201_v53 = vpop.eup %10200  ;;  %v5210_v56 = vand.u32 2147483647, %v5185_v62 }
 0xcf2   :  { %v10203_v42 = vpop.eup %10202  ;;  %v5217_v55 = vmul.f32 %v10201_v53, %v5186_v24  ;;  %vm5222_vm6 = vweird.f32 %v10201_v53  ;;  %v5213_v24 = vor.u32 1.1754944e-38, %v5212_v38 }
 0xcf3   :  { %v4950_v9 = vpop.permute.xlu0 %4949  ;;  %v10205_v54 = vpop.eup %10204  ;;  %vm5223_vm8 = vmor %vm5221_vm7, %vm5222_vm6  ;;  %vm5211_vm13 = vcmp.eq.f32.partialorder %v5210_v56, 8.507059e+37 }
 0xcf4   :  { %v4982_v13 = vmul.f32 %v4950_v9, %v12967_v52  ;;  %v9052_v52 = vpack.c.bf16 %v932_v27, %v930_v41  ;;  %v5218_v39 = vsub.f32 1.0, %v5217_v55  ;;  %v5202_v4 = vmul.f32 %v10205_v54, %v5185_v62 }
 0xcf5   :  { %vm5207_vm9 = vweird.f32 %v10205_v54 }
 0xcf6   :  { %v5023_v37 = vpack.c.bf16 %v4982_v13, %v4981_v23  ;;  %v9329_v19 = vunpack.c.l.bf16 %v9052_v52  ;;  %v5219_v0 = vmul.f32 %v10201_v53, %v5218_v39  ;;  %v5203_v44 = vsub.f32 1.0, %v5202_v4  ;;  %vm5208_vm12 = vmor %vm5206_vm11, %vm5207_vm9  ;;  %v14527_v23 = vld [vmem:[#allocation6_spill] sm:$0xff] }
 0xcf7   :  { %v9330_v10 = vunpack.c.h.bf16 %v9052_v52  ;;  %v935_v13 = vadd.f32 %v13024_v20, %v14527_v23 }
 0xcf8   :  { %5046 = vrot.lane.b32.xlu0 %v5023_v37, %s10625_s21  ;;  %v5043_v45 = vpop.permute.xlu1 %5042  ;;  %v5220_v34 = vadd.f32 %v10201_v53, %v5219_v0  ;;  %v5204_v1 = vmul.f32 %v10205_v54, %v5203_v44  ;;  %v937_v37 = vadd.f32 %v13024_v20, %v14528_v17 }
 0xcfa   :  { %v5224_v36 = vsel %vm5223_vm8, %v10201_v53, %v5220_v34  ;;  %v5205_v14 = vadd.f32 %v10205_v54, %v5204_v1  ;;  %v9057_v15 = vpack.c.bf16 %v937_v37, %v935_v13 }
 0xcfb   :  { %v13059_v2 = vsel %vm5226_vm10, %v5228_v47, %v5224_v36 }
 0xcfc   :  { %v5209_v26 = vsel %vm5208_vm12, %v10205_v54, %v5205_v14  ;;  %v9333_v27 = vunpack.c.l.bf16 %v9057_v15  ;;  %v9334_v52 = vunpack.c.h.bf16 %v9057_v15 }
 0xcfd   :  { %v13068_v62 = vsel %vm5211_vm13, %v5213_v24, %v5209_v26 }
 0xd00   :  { %5493 = vrot.lane.b32.xlu0 %v10203_v42, %s10624_s3 }
 0xd01   :  { %8576 = vmatmul.msk.bf16.gmra.mxu3 %vm517_vm0, %v5043_v45 }
 0xd05   :  { %v5091_v11 = vpop.f32.mrf.mxu3 }
 0xd06   :  { %v5125_v43 = vadd.f32 %v9329_v19, %v5091_v11  ;;  %v8582_v19 = vmul.f32 -1.442695, %v13037_v33 }
 0xd07   :  { %v5492_v6 = vpop.permute.xlu2 %5491 }
 0xd08   :  { %10206 = vtanh.f32 %v5125_v43  ;;  %v5538_v28 = vmul.f32 %v5492_v6, %v13059_v2  ;;  %v8583_v0 = vmul.f32 -1.442695, %v5125_v43 }
 0xd0d   :  { %v5093_v50 = vpop.f32.mrf.mxu3 }
 0xd0e   :  { %v10207_v63 = vpop.eup %10206  ;;  %v13054_v59 = vadd.f32 %v9330_v10, %v5093_v50 }
 0xd0f   :  { %5497 = vrot.lane.b32.xlu2 %v10207_v63, %s10624_s3 }
 0xd10   :  { %10208 = vtanh.f32 %v13054_v59  ;;  %v8584_v24 = vmul.f32 -1.442695, %v13054_v59 }
 0xd11   :  { %8577 = vmatmul.msk.bf16.gmra.mxu3 %vm517_vm0, %v5045_v29  ;;  %v8581_v29 = vmul.f32 -1.442695, %v13044_v7 }
 0xd16   :  { %v10209_v9 = vpop.eup %10208 }
 0xd17   :  { %5499 = vrot.lane.b32.xlu0 %v10209_v9, %s10624_s3  ;;  %5571 = vrot.lane.b32.xlu2 %v5538_v28, %s10624_s3  ;;  %v5490_v61 = vpop.permute.xlu1 %5489 }
 0xd18   :  { %v5537_v41 = vmul.f32 %v5490_v61, %v13068_v62 }
 0xd1a   :  { %5569 = vrot.lane.b32.xlu1 %v5537_v41, %s10624_s3 }
 0xd21   :  { %v5096_v53 = vpop.f32.mrf.mxu3 }
 0xd22   :  { %v13072_v42 = vadd.f32 %v9333_v27, %v5096_v53 }
 0xd24   :  { %10210 = vtanh.f32 %v13072_v42 }
 0xd29   :  { %v5098_v45 = vpop.f32.mrf.mxu3 }
 0xd2a   :  { %v10211_v55 = vpop.eup %10210  ;;  %v13075_v54 = vadd.f32 %v9334_v52, %v5098_v45 }
 0xd2b   :  { %5501 = vrot.lane.b32.xlu0 %v10211_v55, %s10624_s3 }
 0xd2c   :  { %10212 = vtanh.f32 %v13075_v54 }
 0xd2d   :  { %10214 = vpow2.f32 %v8582_v19 }
 0xd32   :  { %v10213_v11 = vpop.eup %10212 }
 0xd33   :  { %5503 = vrot.lane.b32.xlu1 %v10213_v11, %s10624_s3  ;;  %v10215_v39 = vpop.eup %10214 }
 0xd34   :  { %v5188_v4 = vadd.f32 1.0, %v10215_v39  ;;  %v14529_v39 = vld [vmem:[#allocation8_spill] sm:$0xff] }
 0xd36   :  { %10216 = vrcp.f32 %v5188_v4  ;;  %v5257_v14 = vand.u32 2147483648, %v5188_v4  ;;  %vm5251_vm15 = vweird.f32 %v5188_v4  ;;  %v5255_v43 = vand.u32 2147483647, %v5188_v4 }
 0xd37   :  { %10218 = vpow2.f32 %v8583_v0  ;;  %v14530_v0 = vld [vmem:[#allocation9_spill] sm:$0xff] }
 0xd38   :  { %10220 = vpow2.f32 %v8581_v29  ;;  %v5258_v7 = vor.u32 1.1754944e-38, %v5257_v14  ;;  %vm5256_vm2 = vcmp.eq.f32.partialorder %v5255_v43, 8.507059e+37 }
 0xd3c   :  { %v10217_v44 = vpop.eup %10216 }
 0xd3d   :  { %v10219_v10 = vpop.eup %10218  ;;  %v5247_v34 = vmul.f32 %v10217_v44, %v5188_v4  ;;  %vm5252_vm14 = vweird.f32 %v10217_v44  ;;  %v940_v4 = vadd.f32 %v13024_v20, %v14529_v39 }
 0xd3e   :  { %v5189_v50 = vadd.f32 1.0, %v10219_v10  ;;  %v10221_v63 = vpop.eup %10220  ;;  %vm5253_vm1 = vmor %vm5251_vm15, %vm5252_vm14 }
 0xd3f   :  { %v5248_v1 = vsub.f32 1.0, %v5247_v34  ;;  %v5187_v21 = vadd.f32 1.0, %v10221_v63  ;;  %v8585_v63 = vmul.f32 -1.442695, %v13072_v42  ;;  %v8586_v42 = vmul.f32 -1.442695, %v13075_v54 }
 0xd40   :  { %10222 = vrcp.f32 %v5189_v50  ;;  %v5272_v37 = vand.u32 2147483648, %v5189_v50  ;;  %vm5266_vm4 = vweird.f32 %v5189_v50  ;;  %v5270_v41 = vand.u32 2147483647, %v5189_v50 }
 0xd41   :  { %v5249_v33 = vmul.f32 %v10217_v44, %v5248_v1  ;;  %10224 = vrcp.f32 %v5187_v21  ;;  %v5242_v10 = vand.u32 2147483648, %v5187_v21  ;;  %vm5236_vm8 = vweird.f32 %v5187_v21 }
 0xd42   :  { %10226 = vpow2.f32 %v8584_v24  ;;  %v5273_v53 = vor.u32 1.1754944e-38, %v5272_v37  ;;  %vm5271_vm6 = vcmp.eq.f32.partialorder %v5270_v41, 8.507059e+37  ;;  %v5240_v34 = vand.u32 2147483647, %v5187_v21  ;;  %v14532_v24 = vld [vmem:[#allocation11_spill] sm:$0xff] }
 0xd43   :  { %v5250_v36 = vadd.f32 %v10217_v44, %v5249_v33  ;;  %v5243_v33 = vor.u32 1.1754944e-38, %v5242_v10 }
 0xd44   :  { %vm5241_vm10 = vcmp.eq.f32.partialorder %v5240_v34, 8.507059e+37 }
 0xd45   :  { %v5254_v6 = vsel %vm5253_vm1, %v10217_v44, %v5250_v36  ;;  %v942_v44 = vadd.f32 %v13024_v20, %v14530_v0 }
 0xd46   :  { %v10223_v46 = vpop.eup %10222  ;;  %v13082_v38 = vsel %vm5256_vm2, %v5258_v7, %v5254_v6 }
 0xd47   :  { %v5262_v47 = vmul.f32 %v10223_v46, %v5189_v50  ;;  %v10225_v9 = vpop.eup %10224  ;;  %vm5267_vm3 = vweird.f32 %v10223_v46  ;;  %v9062_v50 = vpack.c.bf16 %v942_v44, %v940_v4 }
 0xd48   :  { %v5232_v13 = vmul.f32 %v10225_v9, %v5187_v21  ;;  %vm5268_vm5 = vmor %vm5266_vm4, %vm5267_vm3  ;;  %v10227_v15 = vpop.eup %10226  ;;  %vm5237_vm7 = vweird.f32 %v10225_v9 }
 0xd49   :  { %v5263_v28 = vsub.f32 1.0, %v5262_v47  ;;  %v13087_v45 = vadd.f32 1.0, %v10227_v15  ;;  %vm5238_vm9 = vmor %vm5236_vm8, %vm5237_vm7  ;;  %v9337_v47 = vunpack.c.l.bf16 %v9062_v50 }
 0xd4a   :  { %v5233_v61 = vsub.f32 1.0, %v5232_v13  ;;  %v9338_v13 = vunpack.c.h.bf16 %v9062_v50 }
 0xd4b   :  { %v5264_v23 = vmul.f32 %v10223_v46, %v5263_v28  ;;  %10228 = vrcp.f32 %v13087_v45  ;;  %vm5281_vm12 = vweird.f32 %v13087_v45 }
 0xd4c   :  { %v5234_v52 = vmul.f32 %v10225_v9, %v5233_v61  ;;  %10230 = vpow2.f32 %v8585_v63 }
 0xd4d   :  { %v5265_v17 = vadd.f32 %v10223_v46, %v5264_v23  ;;  %v947_v23 = vadd.f32 %v13024_v20, %v14532_v24 }
 0xd4e   :  { %v5235_v29 = vadd.f32 %v10225_v9, %v5234_v52 }
 0xd4f   :  { %v5269_v27 = vsel %vm5268_vm5, %v10223_v46, %v5265_v17 }
 0xd50   :  { %v13089_v59 = vsel %vm5271_vm6, %v5273_v53, %v5269_v27  ;;  %v5239_v1 = vsel %vm5238_vm9, %v10225_v9, %v5235_v29 }
 0xd51   :  { %v13100_v46 = vsel %vm5241_vm10, %v5243_v33, %v5239_v1  ;;  %v10229_v14 = vpop.eup %10228 }
 0xd52   :  { %v5277_v21 = vmul.f32 %v10229_v14, %v13087_v45  ;;  %vm5282_vm11 = vweird.f32 %v10229_v14 }
 0xd53   :  { %vm5283_vm13 = vmor %vm5281_vm12, %vm5282_vm11 }
 0xd54   :  { %v5278_v28 = vsub.f32 1.0, %v5277_v21  ;;  %v5457_v21 = vmul.f32 %v13068_v62, %v12794_v51 }
 0xd56   :  { %v5279_v15 = vmul.f32 %v10229_v14, %v5278_v28  ;;  %v14533_v28 = vld [vmem:[#allocation12_spill] sm:$0xff] }
 0xd58   :  { %v5280_v53 = vadd.f32 %v10229_v14, %v5279_v15 }
 0xd5a   :  { %v5496_v56 = vpop.permute.xlu1 %5495  ;;  %v5284_v44 = vsel %vm5283_vm13, %v10229_v14, %v5280_v53 }
 0xd5b   :  { %v5540_v26 = vmul.f32 %v5496_v56, %v13082_v38  ;;  %v10231_v56 = vpop.eup %10230 }
 0xd5c   :  { %v13113_v61 = vadd.f32 1.0, %v10231_v56 }
 0xd5d   :  { %5575 = vrot.lane.b32.xlu0 %v5540_v26, %s10624_s3  ;;  %v14531_v26 = vld [vmem:[#allocation10_spill] sm:$0xff] }
 0xd5e   :  { %v945_v9 = vadd.f32 %v13024_v20, %v14531_v26  ;;  %v950_v26 = vadd.f32 %v13024_v20, %v14533_v28  ;;  %v5302_v51 = vand.u32 2147483648, %v13113_v61  ;;  %vm5296_vm1 = vweird.f32 %v13113_v61 }
 0xd60   :  { %v9067_v54 = vpack.c.bf16 %v947_v23, %v945_v9  ;;  %v14534_v9 = vld [vmem:[#allocation13_spill] sm:$0xff] }
 0xd61   :  { %v952_v24 = vadd.f32 %v13024_v20, %v14534_v9 }
 0xd62   :  { %v9341_v52 = vunpack.c.l.bf16 %v9067_v54  ;;  %v9342_v63 = vunpack.c.h.bf16 %v9067_v54 }
 0xd63   :  { %v9072_v54 = vpack.c.bf16 %v952_v24, %v950_v26 }
 0xd69   :  { %v5498_v55 = vpop.permute.xlu2 %5497 }
 0xd6a   :  { %v5541_v19 = vmul.f32 %v5498_v55, %v13089_v59  ;;  %v5047_v11 = vpop.permute.xlu0 %5046  ;;  %v5287_v55 = vand.u32 2147483648, %v13087_v45 }
 0xd6b   :  { %8578 = vmatmul.msk.bf16.gmra.mxu3 %vm517_vm0, %v5047_v11  ;;  %v5285_v11 = vand.u32 2147483647, %v13087_v45 }
 0xd6c   :  { %5577 = vrot.lane.b32.xlu0 %v5541_v19, %s10624_s3  ;;  %v5288_v10 = vor.u32 1.1754944e-38, %v5287_v55 }
 0xd6d   :  { %vm5286_vm14 = vcmp.eq.f32.partialorder %v5285_v11, 8.507059e+37  ;;  %v9346_v11 = vunpack.c.h.bf16 %v9072_v54 }
 0xd6e   :  { %v13130_v34 = vsel %vm5286_vm14, %v5288_v10, %v5284_v44 }
 0xd71   :  { %v5572_v53 = vpop.permute.xlu2 %5571 }
 0xd72   :  { %v5494_v36 = vpop.permute.xlu0 %5493 }
 0xd73   :  { %v5539_v43 = vmul.f32 %v5494_v36, %v13100_v46 }
 0xd74   :  { %v5101_v6 = vpop.f32.mrf.mxu3 }
 0xd75   :  { %v13103_v7 = vadd.f32 %v9337_v47, %v5101_v6  ;;  %5573 = vrot.lane.b32.xlu2 %v5539_v43, %s10624_s3 }
 0xd77   :  { %10232 = vtanh.f32 %v13103_v7 }
 0xd78   :  { %10234 = vpow2.f32 %v8586_v42 }
 0xd7c   :  { %v5103_v17 = vpop.f32.mrf.mxu3 }
 0xd7d   :  { %v10233_v37 = vpop.eup %10232  ;;  %v13115_v41 = vadd.f32 %v9338_v13, %v5103_v17 }
 0xd7e   :  { %5505 = vrot.lane.b32.xlu1 %v10233_v37, %s10624_s3  ;;  %v10235_v27 = vpop.eup %10234 }
 0xd7f   :  { %10236 = vtanh.f32 %v13115_v41  ;;  %v13123_v4 = vadd.f32 1.0, %v10235_v27  ;;  %v5300_v27 = vand.u32 2147483647, %v13113_v61 }
 0xd80   :  { %10238 = vrcp.f32 %v13113_v61 }
 0xd81   :  { %vm5301_vm3 = vcmp.eq.f32.partialorder %v5300_v27, 8.507059e+37  ;;  %vm5311_vm5 = vweird.f32 %v13123_v4 }
 0xd84   :  { %v5106_v19 = vpop.f32.mrf.mxu3 }
 0xd85   :  { %v10237_v39 = vpop.eup %10236  ;;  %v13125_v0 = vadd.f32 %v9341_v52, %v5106_v19  ;;  %v5458_v19 = vmul.f32 %v13059_v2, %v12828_v12  ;;  %v5317_v12 = vand.u32 2147483648, %v13123_v4 }
 0xd86   :  { %5507 = vrot.lane.b32.xlu2 %v10237_v39, %s10624_s3  ;;  %v10239_v29 = vpop.eup %10238  ;;  %v5303_v39 = vor.u32 1.1754944e-38, %v5302_v51  ;;  %v5459_v51 = vmul.f32 %v13100_v46, %v12861_v22 }
 0xd87   :  { %10240 = vtanh.f32 %v13125_v0  ;;  %v5292_v1 = vmul.f32 %v10239_v29, %v13113_v61  ;;  %vm5297_vm15 = vweird.f32 %v10239_v29 }
 0xd88   :  { %10242 = vrcp.f32 %v13123_v4  ;;  %vm5298_vm2 = vmor %vm5296_vm1, %vm5297_vm15 }
 0xd89   :  { %v5500_v50 = vpop.permute.xlu0 %5499  ;;  %v5293_v43 = vsub.f32 1.0, %v5292_v1 }
 0xd8a   :  { %v5542_v45 = vmul.f32 %v5500_v50, %v13130_v34  ;;  %v13155_v50 = vadd.f32 %v5572_v53, %v5458_v19 }
 0xd8b   :  { %v5294_v42 = vmul.f32 %v10239_v29, %v5293_v43  ;;  %v9345_v43 = vunpack.c.l.bf16 %v9072_v54 }
 0xd8c   :  { %v5108_v33 = vpop.f32.mrf.mxu3  ;;  %5579 = vrot.lane.b32.xlu1 %v5542_v45, %s10624_s3  ;;  %v5570_v6 = vpop.permute.xlu1 %5569 }
 0xd8d   :  { %v10241_v36 = vpop.eup %10240  ;;  %v13135_v14 = vadd.f32 %v9342_v63, %v5108_v33  ;;  %v13146_v23 = vadd.f32 %v5570_v6, %v5457_v21  ;;  %v5295_v37 = vadd.f32 %v10239_v29, %v5294_v42  ;;  %v5315_v33 = vand.u32 2147483647, %v13123_v4 }
 0xd8e   :  { %5509 = vrot.lane.b32.xlu2 %v10241_v36, %s10624_s3  ;;  %v10243_v47 = vpop.eup %10242  ;;  %v5318_v6 = vor.u32 1.1754944e-38, %v5317_v12 }
 0xd8f   :  { %10244 = vtanh.f32 %v13135_v14  ;;  %v5307_v56 = vmul.f32 %v10243_v47, %v13123_v4  ;;  %v5299_v52 = vsel %vm5298_vm2, %v10239_v29, %v5295_v37  ;;  %vm5312_vm4 = vweird.f32 %v10243_v47 }
 0xd90   :  { %10246 = vtanh.f32 %v13146_v23  ;;  %v13159_v1 = vsel %vm5301_vm3, %v5303_v39, %v5299_v52  ;;  %vm5313_vm6 = vmor %vm5311_vm5, %vm5312_vm4  ;;  %vm5316_vm7 = vcmp.eq.f32.partialorder %v5315_v33, 8.507059e+37  ;;  %v8590_v22 = vmul.f32 -1.442695, %v13135_v14 }
 0xd91   :  { %v5308_v15 = vsub.f32 1.0, %v5307_v56 }
 0xd93   :  { %v5309_v55 = vmul.f32 %v10243_v47, %v5308_v15 }
 0xd94   :  { %v5111_v13 = vpop.f32.mrf.mxu3 }
 0xd95   :  { %v10245_v17 = vpop.eup %10244  ;;  %v5310_v29 = vadd.f32 %v10243_v47, %v5309_v55  ;;  %v5133_v42 = vadd.f32 %v9345_v43, %v5111_v13 }
 0xd96   :  { %5511 = vrot.lane.b32.xlu0 %v10245_v17, %s10624_s3  ;;  %v10247_v10 = vpop.eup %10246  ;;  %v8587_v17 = vmul.f32 -1.442695, %v13103_v7 }
 0xd97   :  { %v5314_v36 = vsel %vm5313_vm6, %v10243_v47, %v5310_v29  ;;  %v8588_v47 = vmul.f32 -1.442695, %v13115_v41  ;;  %v8589_v41 = vmul.f32 -1.442695, %v13125_v0  ;;  %v8591_v12 = vmul.f32 -1.442695, %v5133_v42 }
 0xd98   :  { %v13169_v56 = vsel %vm5316_vm7, %v5318_v6, %v5314_v36 }
 0xd9c   :  { %v5113_v44 = vpop.f32.mrf.mxu3 }
 0xd9d   :  { %v13157_v45 = vadd.f32 %v9346_v11, %v5113_v44  ;;  %v5502_v63 = vpop.permute.xlu0 %5501 }
 0xd9e   :  { %v5543_v61 = vmul.f32 %v5502_v63, %v13159_v1  ;;  %5665 = vrot.lane.b32.xlu0 %v10247_v10, %s10624_s3 }
 0xd9f   :  { %10248 = vtanh.f32 %v13157_v45 }
 0xda0   :  { %5581 = vrot.lane.b32.xlu1 %v5543_v61, %s10624_s3  ;;  %10250 = vtanh.f32 %v13155_v50 }
 0xda1   :  { %10252 = vtanh.f32 %v5133_v42 }
 0xda2   :  { %10254 = vpow2.f32 %v8588_v47 }
 0xda5   :  { %v10249_v21 = vpop.eup %10248  ;;  %v5504_v28 = vpop.permute.xlu1 %5503 }
 0xda6   :  { %v5544_v26 = vmul.f32 %v5504_v28, %v13169_v56  ;;  %5515 = vrot.lane.b32.xlu0 %v10249_v21, %s10624_s3  ;;  %v10251_v9 = vpop.eup %10250  ;;  %v14535_v28 = vld [vmem:[#allocation14_spill] sm:$0xff] }
 0xda7   :  { %v10253_v4 = vpop.eup %10252 }
 0xda8   :  { %5583 = vrot.lane.b32.xlu2 %v5544_v26, %s10624_s3  ;;  %5667 = vrot.lane.b32.xlu1 %v10251_v9, %s10624_s3  ;;  %v10255_v24 = vpop.eup %10254  ;;  %v955_v26 = vadd.f32 %v13024_v20, %v14535_v28  ;;  %v14536_v9 = vld [vmem:[#allocation15_spill] sm:$0xff] }
 0xda9   :  { %v5194_v13 = vadd.f32 1.0, %v10255_v24  ;;  %v957_v42 = vadd.f32 %v13024_v20, %v14536_v9 }
 0xdab   :  { %10256 = vrcp.f32 %v5194_v13  ;;  %v5347_v44 = vand.u32 2147483648, %v5194_v13  ;;  %vm5341_vm9 = vweird.f32 %v5194_v13  ;;  %v5345_v10 = vand.u32 2147483647, %v5194_v13 }
 0xdac   :  { %10258 = vpow2.f32 %v8587_v17 }
 0xdad   :  { %v5348_v29 = vor.u32 1.1754944e-38, %v5347_v44  ;;  %vm5346_vm11 = vcmp.eq.f32.partialorder %v5345_v10, 8.507059e+37 }
 0xdb0   :  { %5513 = vrot.lane.b32.xlu2 %v10253_v4, %s10624_s3 }
 0xdb1   :  { %v10257_v37 = vpop.eup %10256 }
 0xdb2   :  { %v10259_v15 = vpop.eup %10258  ;;  %v5337_v54 = vmul.f32 %v10257_v37, %v5194_v13  ;;  %vm5342_vm8 = vweird.f32 %v10257_v37  ;;  %v9077_v13 = vpack.c.bf16 %v957_v42, %v955_v26 }
 0xdb3   :  { %v5193_v53 = vadd.f32 1.0, %v10259_v15  ;;  %vm5343_vm10 = vmor %vm5341_vm9, %vm5342_vm8 }
 0xdb4   :  { %v5338_v55 = vsub.f32 1.0, %v5337_v54  ;;  %v8592_v54 = vmul.f32 -1.442695, %v13157_v45 }
 0xdb5   :  { %v5332_v15 = vand.u32 2147483648, %v5193_v53  ;;  %vm5326_vm13 = vweird.f32 %v5193_v53 }
 0xdb6   :  { %v5339_v19 = vmul.f32 %v10257_v37, %v5338_v55 }
 0xdb7   :  { %v5333_v44 = vor.u32 1.1754944e-38, %v5332_v15  ;;  %v5461_v15 = vmul.f32 %v13089_v59, %v12909_v49 }
 0xdb8   :  { %v5340_v11 = vadd.f32 %v10257_v37, %v5339_v19 }
 0xdba   :  { %v5344_v61 = vsel %vm5343_vm10, %v10257_v37, %v5340_v11 }
 0xdbb   :  { %v13188_v36 = vsel %vm5346_vm11, %v5348_v29, %v5344_v61  ;;  %v9350_v29 = vunpack.c.h.bf16 %v9077_v13 }
 0xdcf   :  { %v5574_v27 = vpop.permute.xlu2 %5573  ;;  %v5576_v20 = vpop.permute.xlu0 %5575 }
 0xdd0   :  { %v13180_v52 = vadd.f32 %v5574_v27, %v5459_v51  ;;  %v5330_v51 = vand.u32 2147483647, %v5193_v53 }
 0xdd2   :  { %10260 = vtanh.f32 %v13180_v52  ;;  %vm5331_vm15 = vcmp.eq.f32.partialorder %v5330_v51, 8.507059e+37 }
 0xdd3   :  { %10262 = vrcp.f32 %v5193_v53 }
 0xdd4   :  { %10264 = vpow2.f32 %v8589_v41  ;;  %v9349_v41 = vunpack.c.l.bf16 %v9077_v13 }
 0xdd5   :  { %10266 = vpow2.f32 %v8590_v22 }
 0xdd6   :  { %10268 = vpow2.f32 %v8591_v12 }
 0xdd8   :  { %v10261_v7 = vpop.eup %10260 }
 0xdd9   :  { %v10263_v39 = vpop.eup %10262  ;;  %5669 = vrot.lane.b32.xlu0 %v10261_v7, %s10624_s3  ;;  %v5460_v7 = vmul.f32 %v13082_v38, %v12844_v35 }
 0xdda   :  { %v10265_v63 = vpop.eup %10264  ;;  %v5322_v0 = vmul.f32 %v10263_v39, %v5193_v53  ;;  %vm5327_vm12 = vweird.f32 %v10263_v39 }
 0xddb   :  { %v13186_v33 = vadd.f32 1.0, %v10265_v63  ;;  %v10267_v14 = vpop.eup %10266  ;;  %vm5328_vm14 = vmor %vm5326_vm13, %vm5327_vm12  ;;  %v13212_v53 = vadd.f32 %v5576_v20, %v5460_v7 }
 0xddc   :  { %v5323_v21 = vsub.f32 1.0, %v5322_v0  ;;  %v13197_v47 = vadd.f32 1.0, %v10267_v14  ;;  %v10269_v24 = vpop.eup %10268 }
 0xddd   :  { %10270 = vrcp.f32 %v13186_v33  ;;  %v13203_v27 = vadd.f32 1.0, %v10269_v24  ;;  %v5362_v24 = vand.u32 2147483648, %v13186_v33  ;;  %vm5356_vm2 = vweird.f32 %v13186_v33 }
 0xdde   :  { %v5324_v4 = vmul.f32 %v10263_v39, %v5323_v21  ;;  %10272 = vrcp.f32 %v13197_v47  ;;  %vm5371_vm6 = vweird.f32 %v13197_v47 }
 0xddf   :  { %10274 = vpow2.f32 %v8592_v54  ;;  %v5360_v54 = vand.u32 2147483647, %v13186_v33  ;;  %vm5386_vm10 = vweird.f32 %v13203_v27 }
 0xde0   :  { %v5508_v43 = vpop.permute.xlu2 %5507  ;;  %v5325_v17 = vadd.f32 %v10263_v39, %v5324_v4  ;;  %10276 = vrcp.f32 %v13203_v27  ;;  %v5578_v4 = vpop.permute.xlu0 %5577 }
 0xde1   :  { %v5546_v6 = vmul.f32 %v5508_v43, %v13188_v36  ;;  %v13244_v51 = vadd.f32 %v5578_v4, %v5461_v15  ;;  %vm5361_vm4 = vcmp.eq.f32.partialorder %v5360_v54, 8.507059e+37  ;;  %v5464_v15 = vmul.f32 %v13169_v56, %v12929_v60 }
 0xde2   :  { %v5329_v19 = vsel %vm5328_vm14, %v10263_v39, %v5325_v17 }
 0xde3   :  { %5587 = vrot.lane.b32.xlu2 %v5546_v6, %s10624_s3  ;;  %v13199_v37 = vpop.eup %10270  ;;  %v13214_v22 = vsel %vm5331_vm15, %v5333_v44, %v5329_v19  ;;  %v5462_v19 = vmul.f32 %v13130_v34, %v12889_v25 }
 0xde4   :  { %v5352_v55 = vmul.f32 %v13199_v37, %v13186_v33  ;;  %v13218_v61 = vpop.eup %10272  ;;  %vm5357_vm1 = vweird.f32 %v13199_v37 }
 0xde5   :  { %v10275_v35 = vpop.eup %10274  ;;  %v5367_v12 = vmul.f32 %v13218_v61, %v13197_v47  ;;  %vm5358_vm3 = vmor %vm5356_vm2, %vm5357_vm1  ;;  %vm5372_vm5 = vweird.f32 %v13218_v61 }
 0xde6   :  { %v5353_v63 = vsub.f32 1.0, %v5352_v55  ;;  %v13225_v43 = vpop.eup %10276  ;;  %v13229_v28 = vadd.f32 1.0, %v10275_v35  ;;  %vm5373_vm7 = vmor %vm5371_vm6, %vm5372_vm5 }
 0xde7   :  { %v5368_v9 = vsub.f32 1.0, %v5367_v12  ;;  %v5382_v17 = vmul.f32 %v13225_v43, %v13203_v27  ;;  %vm5387_vm8 = vweird.f32 %v13225_v43 }
 0xde8   :  { %v5354_v0 = vmul.f32 %v13199_v37, %v5353_v63  ;;  %v5510_v13 = vpop.permute.xlu2 %5509  ;;  %vm5388_vm11 = vmor %vm5386_vm10, %vm5387_vm8  ;;  %vm5401_vm14 = vweird.f32 %v13229_v28 }
 0xde9   :  { %v5369_v55 = vmul.f32 %v13218_v61, %v5368_v9  ;;  %v5383_v7 = vsub.f32 1.0, %v5382_v17  ;;  %v5392_v9 = vand.u32 2147483648, %v13203_v27 }
 0xdea   :  { %v5355_v26 = vadd.f32 %v13199_v37, %v5354_v0  ;;  %v5375_v0 = vand.u32 2147483647, %v13197_v47 }
 0xdeb   :  { %v5384_v35 = vmul.f32 %v13225_v43, %v5383_v7  ;;  %v5393_v54 = vor.u32 1.1754944e-38, %v5392_v9  ;;  %v5407_v7 = vand.u32 2147483648, %v13229_v28 }
 0xdec   :  { %v5359_v20 = vsel %vm5358_vm3, %v13199_v37, %v5355_v26  ;;  %vm5376_vm9 = vcmp.eq.f32.partialorder %v5375_v0, 8.507059e+37 }
 0xdee   :  { %v5116_v11 = vpop.f32.mrf.mxu3 }
 0xdef   :  { %v13209_v45 = vadd.f32 %v9349_v41, %v5116_v11  ;;  %v5363_v41 = vor.u32 1.1754944e-38, %v5362_v24 }
 0xdf0   :  { %v5506_v10 = vpop.permute.xlu1 %5505 }
 0xdf1   :  { %10278 = vtanh.f32 %v13209_v45  ;;  %v5545_v39 = vmul.f32 %v5506_v10, %v13214_v22  ;;  %v13250_v33 = vsel %vm5361_vm4, %v5363_v41, %v5359_v20  ;;  %v5370_v10 = vadd.f32 %v13218_v61, %v5369_v55 }
 0xdf2   :  { %10280 = vtanh.f32 %v13212_v53  ;;  %v5547_v37 = vmul.f32 %v5510_v13, %v13250_v33 }
 0xdf3   :  { %5585 = vrot.lane.b32.xlu1 %v5545_v39, %s10624_s3  ;;  %v5377_v39 = vand.u32 2147483648, %v13197_v47  ;;  %v5390_v47 = vand.u32 2147483647, %v13203_v27 }
 0xdf5   :  { %vm5391_vm12 = vcmp.eq.f32.partialorder %v5390_v47, 8.507059e+37 }
 0xdf6   :  { %v5118_v6 = vpop.f32.mrf.mxu3 }
 0xdf7   :  { %v10279_v21 = vpop.eup %10278  ;;  %v13227_v14 = vadd.f32 %v9350_v29, %v5118_v6  ;;  %v5374_v29 = vsel %vm5373_vm7, %v13218_v61, %v5370_v10  ;;  %v5378_v6 = vor.u32 1.1754944e-38, %v5377_v39  ;;  %v5408_v10 = vor.u32 1.1754944e-38, %v5407_v7 }
 0xdf8   :  { %5517 = vrot.lane.b32.xlu2 %v10279_v21, %s10624_s3  ;;  %v10281_v42 = vpop.eup %10280  ;;  %v5385_v21 = vadd.f32 %v13225_v43, %v5384_v35 }
 0xdf9   :  { %10282 = vtanh.f32 %v13227_v14 }
 0xdfa   :  { %10284 = vrcp.f32 %v13229_v28  ;;  %v5389_v17 = vsel %vm5388_vm11, %v13225_v43, %v5385_v21 }
 0xdfb   :  { %5671 = vrot.lane.b32.xlu1 %v10281_v42, %s10624_s3  ;;  %10286 = vtanh.f32 %v13244_v51  ;;  %v13270_v42 = vsel %vm5376_vm9, %v5378_v6, %v5374_v29  ;;  %v13283_v27 = vsel %vm5391_vm12, %v5393_v54, %v5389_v17  ;;  %v5463_v29 = vmul.f32 %v13159_v1, %v12923_v57 }
 0xdfe   :  { %v5580_v49 = vpop.permute.xlu1 %5579 }
 0xdff   :  { %v10283_v11 = vpop.eup %10282  ;;  %v13252_v44 = vadd.f32 %v5580_v49, %v5462_v19 }
 0xe00   :  { %5519 = vrot.lane.b32.xlu0 %v10283_v11, %s10624_s3  ;;  %v10285_v63 = vpop.eup %10284  ;;  %v5405_v11 = vand.u32 2147483647, %v13229_v28 }
 0xe01   :  { %10288 = vtanh.f32 %v13252_v44  ;;  %v5397_v12 = vmul.f32 %v10285_v63, %v13229_v28  ;;  %v10287_v26 = vpop.eup %10286  ;;  %vm5402_vm13 = vweird.f32 %v10285_v63 }
 0xe02   :  { %v5584_v25 = vpop.permute.xlu2 %5583  ;;  %vm5403_vm15 = vmor %vm5401_vm14, %vm5402_vm13  ;;  %vm5406_vm1 = vcmp.eq.f32.partialorder %v5405_v11, 8.507059e+37 }
 0xe03   :  { %5589 = vrot.lane.b32.xlu1 %v5547_v37, %s10624_s3  ;;  %v5398_v24 = vsub.f32 1.0, %v5397_v12  ;;  %v13281_v55 = vadd.f32 %v5584_v25, %v5464_v15 }
 0xe05   :  { %v5399_v41 = vmul.f32 %v10285_v63, %v5398_v24  ;;  %10290 = vtanh.f32 %v13281_v55 }
 0xe07   :  { %v10289_v13 = vpop.eup %10288  ;;  %v5400_v60 = vadd.f32 %v10285_v63, %v5399_v41  ;;  %v5466_v41 = vmul.f32 %v13188_v36, %v12956_v31 }
 0xe08   :  { %v5512_v4 = vpop.permute.xlu0 %5511  ;;  %5673 = vrot.lane.b32.xlu0 %v10287_v26, %s10624_s3  ;;  %v8593_v26 = vmul.f32 -1.442695, %v13209_v45 }
 0xe09   :  { %v5548_v61 = vmul.f32 %v5512_v4, %v13270_v42  ;;  %v5404_v37 = vsel %vm5403_vm15, %v10285_v63, %v5400_v60 }
 0xe0a   :  { %v5514_v20 = vpop.permute.xlu2 %5513  ;;  %v13291_v39 = vsel %vm5406_vm1, %v5408_v10, %v5404_v37 }
 0xe0b   :  { %5591 = vrot.lane.b32.xlu2 %v5548_v61, %s10624_s3  ;;  %5675 = vrot.lane.b32.xlu1 %v10289_v13, %s10624_s3  ;;  %v5549_v19 = vmul.f32 %v5514_v20, %v13283_v27  ;;  %v10291_v25 = vpop.eup %10290  ;;  %v8594_v61 = vmul.f32 -1.442695, %v13227_v14 }
 0xe10   :  { %v5666_v49 = vpop.permute.xlu0 %5665  ;;  %5593 = vrot.lane.b32.xlu0 %v5549_v19, %s10624_s3 }
 0xe11   :  { %v5713_v6 = vmul.f32 %v5666_v49, %v13068_v62 }
 0xe12   :  { %v5582_v43 = vpop.permute.xlu1 %5581 }
 0xe13   :  { %v13300_v63 = vadd.f32 %v5582_v43, %v5463_v29 }
 0xe15   :  { %10292 = vtanh.f32 %v13300_v63 }
 0xe16   :  { %10294 = vpow2.f32 %v8593_v26  ;;  %v5465_v26 = vmul.f32 %v13214_v22, %v12948_v48 }
 0xe18   :  { %v5516_v35 = vpop.permute.xlu0 %5515  ;;  %5679 = vrot.lane.b32.xlu0 %v10291_v25, %s10624_s3  ;;  %v5468_v25 = vmul.f32 %v13270_v42, %v12972_v3 }
 0xe19   :  { %v5550_v0 = vmul.f32 %v5516_v35, %v13291_v39 }
 0xe1a   :  { %v5668_v12 = vpop.permute.xlu1 %5667 }
 0xe1b   :  { %v5714_v28 = vmul.f32 %v5668_v12, %v13059_v2  ;;  %5595 = vrot.lane.b32.xlu1 %v5550_v0, %s10624_s3  ;;  %v10293_v9 = vpop.eup %10292 }
 0xe1c   :  { %v10295_v57 = vpop.eup %10294 }
 0xe1d   :  { %v5762_v21 = vpack.c.bf16 %v5714_v28, %v5713_v6  ;;  %v5199_v4 = vadd.f32 1.0, %v10295_v57 }
 0xe1f   :  { %5778 = vrot.lane.b32.xlu2 %v5762_v21, %s10625_s21  ;;  %10296 = vrcp.f32 %v5199_v4  ;;  %v5422_v15 = vand.u32 2147483648, %v5199_v4  ;;  %vm5416_vm3 = vweird.f32 %v5199_v4  ;;  %v5420_v45 = vand.u32 2147483647, %v5199_v4 }
 0xe20   :  { %10298 = vpow2.f32 %v8594_v61 }
 0xe21   :  { %v5423_v19 = vor.u32 1.1754944e-38, %v5422_v15  ;;  %vm5421_vm5 = vcmp.eq.f32.partialorder %v5420_v45, 8.507059e+37 }
 0xe25   :  { %v10297_v62 = vpop.eup %10296 }
 0xe26   :  { %v5412_v2 = vmul.f32 %v10297_v62, %v5199_v4  ;;  %vm5417_vm2 = vweird.f32 %v10297_v62  ;;  %v10299_v54 = vpop.eup %10298 }
 0xe27   :  { %5677 = vrot.lane.b32.xlu2 %v10293_v9, %s10624_s3  ;;  %vm5418_vm4 = vmor %vm5416_vm3, %vm5417_vm2  ;;  %v5200_v49 = vadd.f32 1.0, %v10299_v54 }
 0xe28   :  { %v5413_v47 = vsub.f32 1.0, %v5412_v2 }
 0xe29   :  { %10300 = vrcp.f32 %v5200_v49  ;;  %v5437_v21 = vand.u32 2147483648, %v5200_v49  ;;  %vm5431_vm7 = vweird.f32 %v5200_v49  ;;  %v5435_v57 = vand.u32 2147483647, %v5200_v49 }
 0xe2a   :  { %v5414_v24 = vmul.f32 %v10297_v62, %v5413_v47 }
 0xe2b   :  { %vm5436_vm9 = vcmp.eq.f32.partialorder %v5435_v57, 8.507059e+37 }
 0xe2c   :  { %v5415_v17 = vadd.f32 %v10297_v62, %v5414_v24  ;;  %v5438_v24 = vor.u32 1.1754944e-38, %v5437_v21 }
 0xe2e   :  { %v5419_v20 = vsel %vm5418_vm4, %v10297_v62, %v5415_v17 }
 0xe2f   :  { %v13311_v14 = vsel %vm5421_vm5, %v5423_v19, %v5419_v20  ;;  %v10301_v11 = vpop.eup %10300 }
 0xe30   :  { %v5427_v31 = vmul.f32 %v10301_v11, %v5200_v49  ;;  %vm5432_vm6 = vweird.f32 %v10301_v11 }
 0xe31   :  { %vm5433_vm8 = vmor %vm5431_vm7, %vm5432_vm6 }
 0xe32   :  { %v5428_v10 = vsub.f32 1.0, %v5427_v31 }
 0xe34   :  { %v5429_v12 = vmul.f32 %v10301_v11, %v5428_v10 }
 0xe36   :  { %v5430_v28 = vadd.f32 %v10301_v11, %v5429_v12 }
 0xe38   :  { %v5434_v47 = vsel %vm5433_vm8, %v10301_v11, %v5430_v28 }
 0xe3d   :  { %v5588_v13 = vpop.permute.xlu2 %5587 }
 0xe3e   :  { %v13309_v60 = vadd.f32 %v5588_v13, %v5466_v41  ;;  %v13329_v13 = vsel %vm5436_vm9, %v5438_v24, %v5434_v47  ;;  %v13378_v47 = vld [vmem:[%s14436_s5] ss:$0 sm:$0xff] }
 0xe40   :  { %10302 = vtanh.f32 %v13309_v60 }
 0xe46   :  { %v10303_v37 = vpop.eup %10302 }
 0xe4b   :  { %v5670_v6 = vpop.permute.xlu0 %5669 }
 0xe4c   :  { %v5715_v4 = vmul.f32 %v5670_v6, %v13100_v46 }
 0xe52   :  { %v5518_v43 = vpop.permute.xlu2 %5517 }
 0xe53   :  { %v5551_v7 = vmul.f32 %v5518_v43, %v13311_v14 }
 0xe55   :  { %5597 = vrot.lane.b32.xlu2 %v5551_v7, %s10624_s3  ;;  %v5469_v7 = vmul.f32 %v13283_v27, %v12991_v16  ;;  %v5470_v16 = vmul.f32 %v13291_v39, %v12982_v30 }
 0xe5d   :  { %5683 = vrot.lane.b32.xlu2 %v10303_v37, %s10624_s3 }
 0xe65   :  { %v5586_v35 = vpop.permute.xlu1 %5585  ;;  %v5592_v0 = vpop.permute.xlu2 %5591 }
 0xe66   :  { %v13319_v29 = vadd.f32 %v5592_v0, %v5468_v25  ;;  %v13326_v2 = vadd.f32 %v5586_v35, %v5465_v26  ;;  %v5472_v26 = vmul.f32 %v13329_v13, %v13006_v18  ;;  %v14538_v18 = vld [vmem:[#allocation17_spill] sm:$0xff] }
 0xe68   :  { %10304 = vtanh.f32 %v13319_v29 }
 0xe69   :  { %10306 = vtanh.f32 %v13326_v2 }
 0xe6d   :  { %v5672_v9 = vpop.permute.xlu1 %5671 }
 0xe6e   :  { %v5716_v3 = vmul.f32 %v5672_v9, %v13082_v38  ;;  %v10305_v62 = vpop.eup %10304  ;;  %v5467_v38 = vmul.f32 %v13250_v33, %v12960_v32 }
 0xe6f   :  { %5687 = vrot.lane.b32.xlu2 %v10305_v62, %s10624_s3  ;;  %v10307_v45 = vpop.eup %10306 }
 0xe70   :  { %v5763_v61 = vpack.c.bf16 %v5716_v3, %v5715_v4 }
 0xe72   :  { %v5520_v48 = vpop.permute.xlu0 %5519  ;;  %5780 = vrot.lane.b32.xlu1 %v5763_v61, %s10625_s21  ;;  %v14537_v61 = vld [vmem:[#allocation16_spill] sm:$0xff] }
 0xe73   :  { %v5552_v46 = vmul.f32 %v5520_v48, %v13329_v13  ;;  %v960_v24 = vadd.f32 %v13378_v47, %v14537_v61  ;;  %v962_v48 = vadd.f32 %v13378_v47, %v14538_v18 }
 0xe75   :  { %v5590_v17 = vpop.permute.xlu1 %5589  ;;  %5599 = vrot.lane.b32.xlu0 %v5552_v46, %s10624_s3 }
 0xe76   :  { %v13337_v15 = vadd.f32 %v5590_v17, %v5467_v38 }
 0xe78   :  { %10308 = vtanh.f32 %v13337_v15 }
 0xe79   :  { %v5779_v54 = vpop.permute.xlu2 %5778 }
 0xe7a   :  { %v5674_v20 = vpop.permute.xlu0 %5673  ;;  %5681 = vrot.lane.b32.xlu1 %v10307_v45, %s10624_s3  ;;  %8595 = vmatmul.msk.bf16.vlgmr.msrb.gmra.mxu1 %vm517_vm0, %v5779_v54 }
 0xe7b   :  { %v5717_v19 = vmul.f32 %v5674_v20, %v13089_v59 }
 0xe7d   :  { %v5676_v41 = vpop.permute.xlu1 %5675 }
 0xe7e   :  { %v5718_v49 = vmul.f32 %v5676_v41, %v13130_v34  ;;  %v10309_v43 = vpop.eup %10308 }
 0xe80   :  { %v5764_v32 = vpack.c.bf16 %v5718_v49, %v5717_v19 }
 0xe81   :  { %v5678_v31 = vpop.permute.xlu2 %5677 }
 0xe82   :  { %5685 = vrot.lane.b32.xlu1 %v10309_v43, %s10624_s3  ;;  %5782 = vrot.lane.b32.xlu0 %v5764_v32, %s10625_s21  ;;  %v5594_v11 = vpop.permute.xlu0 %5593  ;;  %v5719_v59 = vmul.f32 %v5678_v31, %v13159_v1  ;;  %v5471_v1 = vmul.f32 %v13311_v14, %v13001_v58 }
 0xe83   :  { %v13348_v37 = vadd.f32 %v5594_v11, %v5469_v7 }
 0xe85   :  { %10310 = vtanh.f32 %v13348_v37 }
 0xe8a   :  { %v5680_v10 = vpop.permute.xlu0 %5679 }
 0xe8b   :  { %v10311_v25 = vpop.eup %10310  ;;  %v5720_v34 = vmul.f32 %v5680_v10, %v13169_v56 }
 0xe8c   :  { %5689 = vrot.lane.b32.xlu1 %v10311_v25, %s10624_s3 }
 0xe8d   :  { %v5765_v35 = vpack.c.bf16 %v5720_v34, %v5719_v59  ;;  %v5596_v0 = vpop.permute.xlu1 %5595 }
 0xe8e   :  { %v13356_v12 = vadd.f32 %v5596_v0, %v5470_v16 }
 0xe8f   :  { %5784 = vrot.lane.b32.xlu0 %v5765_v35, %s10625_s21 }
 0xe90   :  { %10312 = vtanh.f32 %v13356_v12 }
 0xe96   :  { %v10313_v6 = vpop.eup %10312 }
 0xe97   :  { %5691 = vrot.lane.b32.xlu2 %v10313_v6, %s10624_s3 }
 0xeaf   :  { %v5598_v56 = vpop.permute.xlu2 %5597 }
 0xeb0   :  { %v13363_v28 = vadd.f32 %v5598_v56, %v5471_v1 }
 0xeb2   :  { %10314 = vtanh.f32 %v13363_v28 }
 0xeb7   :  { %v5684_v4 = vpop.permute.xlu2 %5683 }
 0xeb8   :  { %v10315_v30 = vpop.eup %10314  ;;  %v5722_v3 = vmul.f32 %v5684_v4, %v13188_v36  ;;  %v9082_v36 = vpack.c.bf16 %v962_v48, %v960_v24 }
 0xeb9   :  { %5693 = vrot.lane.b32.xlu1 %v10315_v30, %s10624_s3 }
 0xeba   :  { %v9353_v41 = vunpack.c.l.bf16 %v9082_v36  ;;  %v9354_v11 = vunpack.c.h.bf16 %v9082_v36 }
 0xec9   :  { %v5688_v17 = vpop.permute.xlu2 %5687 }
 0xeca   :  { %v5724_v54 = vmul.f32 %v5688_v17, %v13270_v42  ;;  %v14542_v17 = vld [vmem:[#allocation21_spill] sm:$0xff] }
 0xee4   :  { %v5781_v21 = vpop.permute.xlu1 %5780 }
 0xee5   :  { %8596 = vmatmul.msk.bf16.gmra.mxu1 %vm517_vm0, %v5781_v21  ;;  %v14539_v21 = vld [vmem:[#allocation18_spill] sm:$0xff] }
 0xee7   :  { %v5600_v9 = vpop.permute.xlu0 %5599 }
 0xee8   :  { %v13370_v57 = vadd.f32 %v5600_v9, %v5472_v26  ;;  %v965_v26 = vadd.f32 %v13378_v47, %v14539_v21  ;;  %v14540_v9 = vld [vmem:[#allocation19_spill] sm:$0xff] }
 0xee9   :  { %v967_v4 = vadd.f32 %v13378_v47, %v14540_v9 }
 0xeea   :  { %10316 = vtanh.f32 %v13370_v57 }
 0xeec   :  { %v5682_v58 = vpop.permute.xlu1 %5681 }
 0xeed   :  { %v5721_v62 = vmul.f32 %v5682_v58, %v13214_v22 }
 0xeef   :  { %v5766_v46 = vpack.c.bf16 %v5722_v3, %v5721_v62  ;;  %v9087_v62 = vpack.c.bf16 %v967_v4, %v965_v26 }
 0xef0   :  { %v10317_v38 = vpop.eup %10316 }
 0xef1   :  { %5695 = vrot.lane.b32.xlu2 %v10317_v38, %s10624_s3  ;;  %5786 = vrot.lane.b32.xlu0 %v5766_v46, %s10625_s21  ;;  %v5692_v43 = vpop.permute.xlu2 %5691  ;;  %v14541_v38 = vld [vmem:[#allocation20_spill] sm:$0xff] }
 0xef2   :  { %v5726_v31 = vmul.f32 %v5692_v43, %v13291_v39  ;;  %v970_v36 = vadd.f32 %v13378_v47, %v14541_v38 }
 0xef4   :  { %v5686_v22 = vpop.permute.xlu1 %5685  ;;  %v5783_v45 = vpop.permute.xlu0 %5782 }
 0xef5   :  { %v5723_v20 = vmul.f32 %v5686_v22, %v13250_v33  ;;  %8597 = vmatmul.msk.bf16.gmra.mxu1 %vm517_vm0, %v5783_v45  ;;  %v972_v22 = vadd.f32 %v13378_v47, %v14542_v17  ;;  %v9358_v45 = vunpack.c.h.bf16 %v9087_v62 }
 0xef7   :  { %v5767_v19 = vpack.c.bf16 %v5724_v54, %v5723_v20  ;;  %v5827_v49 = vpop.f32.mrf.mxu1 }
 0xef8   :  { %v5867_v32 = vadd.f32 %v9353_v41, %v5827_v49 }
 0xef9   :  { %5788 = vrot.lane.b32.xlu0 %v5767_v19, %s10625_s21 }
 0xefa   :  { %10318 = vtanh.f32 %v5867_v32  ;;  %v8603_v39 = vmul.f32 -1.442695, %v5867_v32  ;;  %v9092_v32 = vpack.c.bf16 %v972_v22, %v970_v36 }
 0xefc   :  { %v9362_v9 = vunpack.c.h.bf16 %v9092_v32 }
 0xefe   :  { %v5690_v7 = vpop.permute.xlu1 %5689 }
 0xeff   :  { %v5725_v10 = vmul.f32 %v5690_v7, %v13283_v27  ;;  %v5829_v25 = vpop.f32.mrf.mxu1 }
 0xf00   :  { %v10319_v42 = vpop.eup %10318  ;;  %v5868_v59 = vadd.f32 %v9354_v11, %v5829_v25 }
 0xf01   :  { %v5768_v33 = vpack.c.bf16 %v5726_v31, %v5725_v10  ;;  %6235 = vrot.lane.b32.xlu0 %v10319_v42, %s10624_s3  ;;  %v5785_v34 = vpop.permute.xlu0 %5784  ;;  %v9361_v31 = vunpack.c.l.bf16 %v9092_v32 }
 0xf02   :  { %10320 = vtanh.f32 %v5868_v59  ;;  %v8604_v56 = vmul.f32 -1.442695, %v5868_v59 }
 0xf03   :  { %5790 = vrot.lane.b32.xlu1 %v5768_v33, %s10625_s21  ;;  %10322 = vpow2.f32 %v8603_v39 }
 0xf04   :  { %10324 = vpow2.f32 %v8604_v56 }
 0xf05   :  { %8598 = vmatmul.msk.bf16.gmra.mxu1 %vm517_vm0, %v5785_v34 }
 0xf08   :  { %v10321_v16 = vpop.eup %10320 }
 0xf09   :  { %v10323_v30 = vpop.eup %10322 }
 0xf0a   :  { %v5931_v58 = vadd.f32 1.0, %v10323_v30  ;;  %v10325_v3 = vpop.eup %10324  ;;  %v14544_v30 = vld [vmem:[#allocation23_spill] sm:$0xff] }
 0xf0b   :  { %6237 = vrot.lane.b32.xlu1 %v10321_v16, %s10624_s3  ;;  %v977_v21 = vadd.f32 %v13378_v47, %v14544_v30 }
 0xf0c   :  { %10326 = vrcp.f32 %v5931_v58  ;;  %v5958_v34 = vand.u32 2147483648, %v5931_v58  ;;  %vm5952_vm11 = vweird.f32 %v5931_v58  ;;  %v5956_v16 = vand.u32 2147483647, %v5931_v58 }
 0xf0e   :  { %vm5957_vm13 = vcmp.eq.f32.partialorder %v5956_v16, 8.507059e+37 }
 0xf12   :  { %v10327_v24 = vpop.eup %10326 }
 0xf13   :  { %v5948_v46 = vmul.f32 %v10327_v24, %v5931_v58  ;;  %vm5953_vm10 = vweird.f32 %v10327_v24 }
 0xf14   :  { %vm5954_vm12 = vmor %vm5952_vm11, %vm5953_vm10 }
 0xf15   :  { %v5949_v41 = vsub.f32 1.0, %v5948_v46 }
 0xf17   :  { %v5950_v7 = vmul.f32 %v10327_v24, %v5949_v41 }
 0xf19   :  { %v5951_v25 = vadd.f32 %v10327_v24, %v5950_v7 }
 0xf2b   :  { %v5694_v35 = vpop.permute.xlu1 %5693 }
 0xf2c   :  { %v5727_v27 = vmul.f32 %v5694_v35, %v13311_v14  ;;  %v13403_v14 = vadd.f32 1.0, %v10325_v3 }
 0xf2e   :  { %10328 = vrcp.f32 %v13403_v14  ;;  %vm5967_vm15 = vweird.f32 %v13403_v14 }
 0xf34   :  { %v10329_v54 = vpop.eup %10328 }
 0xf35   :  { %v5963_v11 = vmul.f32 %v10329_v54, %v13403_v14  ;;  %vm5968_vm14 = vweird.f32 %v10329_v54 }
 0xf36   :  { %vm5969_vm1 = vmor %vm5967_vm15, %vm5968_vm14 }
 0xf37   :  { %v5964_v42 = vsub.f32 1.0, %v5963_v11 }
 0xf39   :  { %v5965_v39 = vmul.f32 %v10329_v54, %v5964_v42 }
 0xf3b   :  { %v5966_v3 = vadd.f32 %v10329_v54, %v5965_v39 }
 0xf3d   :  { %v5970_v46 = vsel %vm5969_vm1, %v10329_v54, %v5966_v3 }
 0xf4b   :  { %v5696_v0 = vpop.permute.xlu2 %5695 }
 0xf4c   :  { %v5728_v6 = vmul.f32 %v5696_v0, %v13329_v13  ;;  %v9357_v13 = vunpack.c.l.bf16 %v9087_v62  ;;  %v5955_v0 = vsel %vm5954_vm12, %v10327_v24, %v5951_v25  ;;  %v5971_v24 = vand.u32 2147483647, %v13403_v14 }
 0xf4e   :  { %v5769_v1 = vpack.c.bf16 %v5728_v6, %v5727_v27  ;;  %v5959_v27 = vor.u32 1.1754944e-38, %v5958_v34  ;;  %vm5972_vm2 = vcmp.eq.f32.partialorder %v5971_v24, 8.507059e+37 }
 0xf50   :  { %5792 = vrot.lane.b32.xlu2 %v5769_v1, %s10625_s21  ;;  %v14543_v1 = vld [vmem:[#allocation22_spill] sm:$0xff]  ;;  %v13428_v26 = vsel %vm5957_vm13, %v5959_v27, %v5955_v0 }
 0xf51   :  { %v975_v56 = vadd.f32 %v13378_v47, %v14543_v1 }
 0xf62   :  { %v5832_v61 = vpop.f32.mrf.mxu1 }
 0xf63   :  { %v13405_v18 = vadd.f32 %v9357_v13, %v5832_v61  ;;  %v5787_v48 = vpop.permute.xlu0 %5786  ;;  %v5973_v61 = vand.u32 2147483648, %v13403_v14 }
 0xf64   :  { %8599 = vmatmul.msk.bf16.gmra.mxu1 %vm517_vm0, %v5787_v48  ;;  %v9097_v48 = vpack.c.bf16 %v977_v21, %v975_v56 }
 0xf65   :  { %10330 = vtanh.f32 %v13405_v18  ;;  %v5974_v38 = vor.u32 1.1754944e-38, %v5973_v61  ;;  %v8605_v11 = vmul.f32 -1.442695, %v13405_v18 }
 0xf66   :  { %v9365_v22 = vunpack.c.l.bf16 %v9097_v48  ;;  %v9366_v14 = vunpack.c.h.bf16 %v9097_v48 }
 0xf67   :  { %v13436_v17 = vsel %vm5972_vm2, %v5974_v38, %v5970_v46 }
 0xf6a   :  { %v5834_v20 = vpop.f32.mrf.mxu1 }
 0xf6b   :  { %v10331_v19 = vpop.eup %10330  ;;  %v13414_v49 = vadd.f32 %v9358_v45, %v5834_v20  ;;  %v5789_v43 = vpop.permute.xlu0 %5788 }
 0xf6c   :  { %6239 = vrot.lane.b32.xlu2 %v10331_v19, %s10624_s3 }
 0xf6d   :  { %10332 = vtanh.f32 %v13414_v49  ;;  %v8606_v16 = vmul.f32 -1.442695, %v13414_v49 }
 0xf72   :  { %v5837_v10 = vpop.f32.mrf.mxu1 }
 0xf73   :  { %v10333_v59 = vpop.eup %10332  ;;  %v13419_v33 = vadd.f32 %v9361_v31, %v5837_v10  ;;  %v6236_v6 = vpop.permute.xlu0 %6235 }
 0xf74   :  { %6241 = vrot.lane.b32.xlu0 %v10333_v59, %s10624_s3  ;;  %8600 = vmatmul.msk.bf16.gmra.mxu1 %vm517_vm0, %v5789_v43  ;;  %v6283_v4 = vmul.f32 %v6236_v6, %v13428_v26 }
 0xf75   :  { %10334 = vtanh.f32 %v13419_v33  ;;  %v5791_v35 = vpop.permute.xlu1 %5790  ;;  %v8607_v27 = vmul.f32 -1.442695, %v13419_v33 }
 0xf7a   :  { %v5839_v58 = vpop.f32.mrf.mxu1 }
 0xf7b   :  { %v10335_v62 = vpop.eup %10334  ;;  %v5872_v13 = vadd.f32 %v9362_v9, %v5839_v58 }
 0xf7c   :  { %6315 = vrot.lane.b32.xlu0 %v6283_v4, %s10624_s3  ;;  %6243 = vrot.lane.b32.xlu1 %v10335_v62, %s10624_s3 }
 0xf7d   :  { %10336 = vtanh.f32 %v5872_v13  ;;  %v6238_v36 = vpop.permute.xlu1 %6237  ;;  %v8608_v1 = vmul.f32 -1.442695, %v5872_v13 }
 0xf7e   :  { %v6284_v45 = vmul.f32 %v6238_v36, %v13436_v17  ;;  %v980_v36 = vadd.f32 %v13378_v47, %v11768_v5 }
 0xf82   :  { %v5842_v20 = vpop.f32.mrf.mxu1 }
 0xf83   :  { %v10337_v41 = vpop.eup %10336  ;;  %v5873_v19 = vadd.f32 %v9365_v22, %v5842_v20  ;;  %v982_v22 = vadd.f32 %v13378_v47, %v11776_v40 }
 0xf84   :  { %8601 = vmatmul.msk.bf16.gmra.mxu1 %vm517_vm0, %v5791_v35  ;;  %6317 = vrot.lane.b32.xlu1 %v6284_v45, %s10624_s3 }
 0xf85   :  { %10338 = vtanh.f32 %v5873_v19  ;;  %6245 = vrot.lane.b32.xlu2 %v10337_v41, %s10624_s3  ;;  %v8609_v58 = vmul.f32 -1.442695, %v5873_v19 }
 0xf8a   :  { %v5844_v54 = vpop.f32.mrf.mxu1 }
 0xf8b   :  { %v10339_v32 = vpop.eup %10338  ;;  %v5874_v43 = vadd.f32 %v9366_v14, %v5844_v54  ;;  %v9102_v54 = vpack.c.bf16 %v982_v22, %v980_v36 }
 0xf8d   :  { %10340 = vtanh.f32 %v5874_v43  ;;  %6247 = vrot.lane.b32.xlu2 %v10339_v32, %s10624_s3  ;;  %v8610_v20 = vmul.f32 -1.442695, %v5874_v43  ;;  %v9369_v40 = vunpack.c.l.bf16 %v9102_v54 }
 0xf8e   :  { %10342 = vpow2.f32 %v8605_v11 }
 0xf93   :  { %v10341_v7 = vpop.eup %10340 }
 0xf94   :  { %6249 = vrot.lane.b32.xlu0 %v10341_v7, %s10624_s3  ;;  %v10343_v31 = vpop.eup %10342 }
 0xf95   :  { %v5933_v10 = vadd.f32 1.0, %v10343_v31 }
 0xf97   :  { %10344 = vrcp.f32 %v5933_v10  ;;  %v5988_v39 = vand.u32 2147483648, %v5933_v10  ;;  %vm5982_vm4 = vweird.f32 %v5933_v10  ;;  %v5986_v18 = vand.u32 2147483647, %v5933_v10 }
 0xf98   :  { %10346 = vpow2.f32 %v8606_v16 }
 0xf99   :  { %v5989_v30 = vor.u32 1.1754944e-38, %v5988_v39  ;;  %10348 = vpow2.f32 %v8607_v27  ;;  %vm5987_vm6 = vcmp.eq.f32.partialorder %v5986_v18, 8.507059e+37 }
 0xf9a   :  { %10350 = vpow2.f32 %v8608_v1  ;;  %v985_v1 = vadd.f32 %v13378_v47, %v11805_v8 }
 0xf9d   :  { %v10345_v42 = vpop.eup %10344 }
 0xf9e   :  { %v5978_v59 = vmul.f32 %v10345_v42, %v5933_v10  ;;  %vm5983_vm3 = vweird.f32 %v10345_v42  ;;  %v10347_v6 = vpop.eup %10346 }
 0xf9f   :  { %vm5984_vm5 = vmor %vm5982_vm4, %vm5983_vm3  ;;  %v5934_v21 = vadd.f32 1.0, %v10347_v6  ;;  %v10349_v33 = vpop.eup %10348 }
 0xfa0   :  { %v5979_v34 = vsub.f32 1.0, %v5978_v59  ;;  %v10351_v3 = vpop.eup %10350  ;;  %v13452_v62 = vadd.f32 1.0, %v10349_v33 }
 0xfa1   :  { %10352 = vrcp.f32 %v5934_v21  ;;  %v13454_v61 = vadd.f32 1.0, %v10351_v3  ;;  %v6003_v11 = vand.u32 2147483648, %v5934_v21  ;;  %vm5997_vm8 = vweird.f32 %v5934_v21 }
 0xfa2   :  { %v5980_v35 = vmul.f32 %v10345_v42, %v5979_v34  ;;  %10354 = vpow2.f32 %v8609_v58  ;;  %v6001_v10 = vand.u32 2147483647, %v5934_v21  ;;  %vm6012_vm12 = vweird.f32 %v13452_v62 }
 0xfa3   :  { %10356 = vrcp.f32 %v13452_v62  ;;  %v6018_v33 = vand.u32 2147483648, %v13452_v62  ;;  %vm6027_vm15 = vweird.f32 %v13454_v61  ;;  %v6031_v36 = vand.u32 2147483647, %v13454_v61 }
 0xfa4   :  { %v5981_v0 = vadd.f32 %v10345_v42, %v5980_v35  ;;  %10358 = vrcp.f32 %v13454_v61  ;;  %v6004_v35 = vor.u32 1.1754944e-38, %v6003_v11  ;;  %vm6002_vm10 = vcmp.eq.f32.partialorder %v6001_v10, 8.507059e+37 }
 0xfa5   :  { %vm6032_vm3 = vcmp.eq.f32.partialorder %v6031_v36, 8.507059e+37  ;;  %v6203_v36 = vmul.f32 %v13428_v26, %v13146_v23 }
 0xfa6   :  { %v5985_v56 = vsel %vm5984_vm5, %v10345_v42, %v5981_v0 }
 0xfa7   :  { %v13448_v9 = vsel %vm5987_vm6, %v5989_v30, %v5985_v56  ;;  %v10353_v13 = vpop.eup %10352 }
 0xfa8   :  { %v5993_v24 = vmul.f32 %v10353_v13, %v5934_v21  ;;  %v10355_v48 = vpop.eup %10354  ;;  %vm5998_vm7 = vweird.f32 %v10353_v13  ;;  %v14545_v21 = vld [vmem:[#allocation24_spill] sm:$0xff] }
 0xfa9   :  { %v13458_v38 = vpop.eup %10356  ;;  %v13464_v45 = vadd.f32 1.0, %v10355_v48  ;;  %vm5999_vm9 = vmor %vm5997_vm8, %vm5998_vm7  ;;  %v6033_v48 = vand.u32 2147483648, %v13454_v61 }
 0xfaa   :  { %v5793_v25 = vpop.permute.xlu2 %5792  ;;  %v5994_v46 = vsub.f32 1.0, %v5993_v24  ;;  %v13466_v41 = vpop.eup %10358  ;;  %v6008_v14 = vmul.f32 %v13458_v38, %v13452_v62  ;;  %vm6013_vm11 = vweird.f32 %v13458_v38 }
 0xfab   :  { %8602 = vmatmul.msk.bf16.gmra.mxu1 %vm517_vm0, %v5793_v25  ;;  %10360 = vrcp.f32 %v13464_v45  ;;  %v6023_v32 = vmul.f32 %v13466_v41, %v13454_v61  ;;  %vm6028_vm13 = vweird.f32 %v13466_v41  ;;  %vm6014_vm14 = vmor %vm6012_vm12, %vm6013_vm11  ;;  %vm6042_vm5 = vweird.f32 %v13464_v45 }
 0xfac   :  { %v5995_v19 = vmul.f32 %v10353_v13, %v5994_v46  ;;  %10362 = vpow2.f32 %v8610_v20  ;;  %v6009_v7 = vsub.f32 1.0, %v6008_v14  ;;  %vm6029_vm1 = vmor %vm6027_vm15, %vm6028_vm13 }
 0xfad   :  { %v6024_v31 = vsub.f32 1.0, %v6023_v32  ;;  %v6034_v32 = vor.u32 1.1754944e-38, %v6033_v48 }
 0xfae   :  { %v5996_v5 = vadd.f32 %v10353_v13, %v5995_v19  ;;  %v6010_v16 = vmul.f32 %v13458_v38, %v6009_v7  ;;  %v6019_v19 = vor.u32 1.1754944e-38, %v6018_v33 }
 0xfaf   :  { %v6025_v0 = vmul.f32 %v13466_v41, %v6024_v31 }
 0xfb0   :  { %v6000_v34 = vsel %vm5999_vm9, %v10353_v13, %v5996_v5  ;;  %v6011_v30 = vadd.f32 %v13458_v38, %v6010_v16  ;;  %v6016_v13 = vand.u32 2147483647, %v13452_v62  ;;  %v6046_v16 = vand.u32 2147483647, %v13464_v45 }
 0xfb1   :  { %v13473_v25 = vpop.eup %10360  ;;  %v13484_v18 = vsel %vm6002_vm10, %v6004_v35, %v6000_v34  ;;  %v6026_v58 = vadd.f32 %v13466_v41, %v6025_v0 }
 0xfb2   :  { %v10363_v59 = vpop.eup %10362  ;;  %v6038_v39 = vmul.f32 %v13473_v25, %v13464_v45  ;;  %v6015_v22 = vsel %vm6014_vm14, %v13458_v38, %v6011_v30  ;;  %vm6017_vm2 = vcmp.eq.f32.partialorder %v6016_v13, 8.507059e+37  ;;  %vm6043_vm4 = vweird.f32 %v13473_v25  ;;  %v14547_v13 = vld [vmem:[#allocation26_spill] sm:$0xff] }
 0xfb3   :  { %v13482_v27 = vadd.f32 1.0, %v10363_v59  ;;  %v6030_v14 = vsel %vm6029_vm1, %v13466_v41, %v6026_v58  ;;  %v13514_v5 = vsel %vm6017_vm2, %v6019_v19, %v6015_v22  ;;  %v6048_v59 = vand.u32 2147483648, %v13464_v45  ;;  %vm6044_vm6 = vmor %vm6042_vm5, %vm6043_vm4 }
 0xfb4   :  { %v6039_v3 = vsub.f32 1.0, %v6038_v39  ;;  %v6204_v39 = vmul.f32 %v13436_v17, %v13155_v50  ;;  %vm6047_vm7 = vcmp.eq.f32.partialorder %v6046_v16, 8.507059e+37 }
 0xfb5   :  { %v6063_v19 = vand.u32 2147483648, %v13482_v27  ;;  %vm6057_vm9 = vweird.f32 %v13482_v27 }
 0xfc6   :  { %v6240_v49 = vpop.permute.xlu2 %6239 }
 0xfc7   :  { %v6285_v4 = vmul.f32 %v6240_v49, %v13448_v9  ;;  %v987_v49 = vadd.f32 %v13378_v47, %v14545_v21 }
 0xfc9   :  { %6319 = vrot.lane.b32.xlu1 %v6285_v4, %s10624_s3  ;;  %v9370_v4 = vunpack.c.h.bf16 %v9102_v54  ;;  %v9107_v20 = vpack.c.bf16 %v987_v49, %v985_v1  ;;  %v6040_v54 = vmul.f32 %v13473_v25, %v6039_v3 }
 0xfcb   :  { %v9373_v11 = vunpack.c.l.bf16 %v9107_v20  ;;  %v9374_v49 = vunpack.c.h.bf16 %v9107_v20 }
 0xfdf   :  { %v6246_v62 = vpop.permute.xlu2 %6245 }
 0xfe1   :  { %v5847_v43 = vpop.f32.mrf.mxu1 }
 0xfe2   :  { %v13475_v42 = vadd.f32 %v9369_v40, %v5847_v43  ;;  %v13517_v40 = vsel %vm6032_vm3, %v6034_v32, %v6030_v14  ;;  %v6041_v43 = vadd.f32 %v13473_v25, %v6040_v54  ;;  %v6061_v32 = vand.u32 2147483647, %v13482_v27 }
 0xfe3   :  { %v6288_v31 = vmul.f32 %v6246_v62, %v13517_v40 }
 0xfe4   :  { %10364 = vtanh.f32 %v13475_v42  ;;  %v6045_v0 = vsel %vm6044_vm6, %v13473_v25, %v6041_v43  ;;  %v14546_v25 = vld [vmem:[#allocation25_spill] sm:$0xff]  ;;  %vm6062_vm11 = vcmp.eq.f32.partialorder %v6061_v32, 8.507059e+37 }
 0xfe5   :  { %10366 = vrcp.f32 %v13482_v27 }
 0xfe6   :  { %v6242_v6 = vpop.permute.xlu0 %6241 }
 0xfe7   :  { %v6286_v56 = vmul.f32 %v6242_v6, %v13484_v18  ;;  %v6049_v6 = vor.u32 1.1754944e-38, %v6048_v59  ;;  %v6248_v1 = vpop.permute.xlu2 %6247 }
 0xfe9   :  { %v5849_v8 = vpop.f32.mrf.mxu1  ;;  %6321 = vrot.lane.b32.xlu2 %v6286_v56, %s10624_s3  ;;  %v13537_v21 = vsel %vm6047_vm7, %v6049_v6, %v6045_v0 }
 0xfea   :  { %v10365_v24 = vpop.eup %10364  ;;  %v13501_v46 = vadd.f32 %v9370_v4, %v5849_v8  ;;  %v6289_v4 = vmul.f32 %v6248_v1, %v13537_v21  ;;  %v990_v8 = vadd.f32 %v13378_v47, %v14546_v25 }
 0xfeb   :  { %6251 = vrot.lane.b32.xlu0 %v10365_v24, %s10624_s3  ;;  %v10367_v7 = vpop.eup %10366  ;;  %v992_v24 = vadd.f32 %v13378_v47, %v14547_v13 }
 0xfec   :  { %10368 = vtanh.f32 %v13501_v46  ;;  %v6053_v35 = vmul.f32 %v10367_v7, %v13482_v27  ;;  %vm6058_vm8 = vweird.f32 %v10367_v7  ;;  %v8612_v1 = vmul.f32 -1.442695, %v13501_v46 }
 0xfed   :  { %v9112_v20 = vpack.c.bf16 %v992_v24, %v990_v8  ;;  %vm6059_vm10 = vmor %vm6057_vm9, %vm6058_vm8 }
 0xfee   :  { %v6244_v61 = vpop.permute.xlu1 %6243  ;;  %v6054_v45 = vsub.f32 1.0, %v6053_v35  ;;  %v6316_v48 = vpop.permute.xlu0 %6315 }
 0xfef   :  { %v6287_v38 = vmul.f32 %v6244_v61, %v13514_v5  ;;  %v13552_v62 = vadd.f32 %v6316_v48, %v6203_v36  ;;  %v9378_v27 = vunpack.c.h.bf16 %v9112_v20 }
 0xff0   :  { %v6055_v50 = vmul.f32 %v10367_v7, %v6054_v45 }
 0xff1   :  { %v5852_v41 = vpop.f32.mrf.mxu1  ;;  %6323 = vrot.lane.b32.xlu2 %v6287_v38, %s10624_s3  ;;  %v9377_v38 = vunpack.c.l.bf16 %v9112_v20 }
 0xff2   :  { %v10369_v10 = vpop.eup %10368  ;;  %v13524_v34 = vadd.f32 %v9373_v11, %v5852_v41  ;;  %v6056_v22 = vadd.f32 %v10367_v7, %v6055_v50  ;;  %v6064_v11 = vor.u32 1.1754944e-38, %v6063_v19 }
 0xff3   :  { %6253 = vrot.lane.b32.xlu1 %v10369_v10, %s10624_s3  ;;  %6325 = vrot.lane.b32.xlu0 %v6288_v31, %s10624_s3 }
 0xff4   :  { %10370 = vtanh.f32 %v13524_v34  ;;  %v6060_v23 = vsel %vm6059_vm10, %v10367_v7, %v6056_v22  ;;  %v8613_v46 = vmul.f32 -1.442695, %v13524_v34 }
 0xff5   :  { %v13562_v43 = vsel %vm6062_vm11, %v6064_v11, %v6060_v23 }
 0xff6   :  { %v6318_v56 = vpop.permute.xlu1 %6317 }
 0xff7   :  { %v13535_v30 = vadd.f32 %v6318_v56, %v6204_v39  ;;  %v8611_v39 = vmul.f32 -1.442695, %v13475_v42  ;;  %v14548_v56 = vld [vmem:[#allocation27_spill] sm:$0xff] }
 0xff8   :  { %v995_v45 = vadd.f32 %v13378_v47, %v14548_v56 }
 0xff9   :  { %v5854_v33 = vpop.f32.mrf.mxu1  ;;  %10372 = vtanh.f32 %v13535_v30 }
 0xffa   :  { %v10371_v58 = vpop.eup %10370  ;;  %v13540_v3 = vadd.f32 %v9374_v49, %v5854_v33  ;;  %v14549_v49 = vld [vmem:[#allocation28_spill] sm:$0xff] }
 0xffb   :  { %6255 = vrot.lane.b32.xlu1 %v10371_v58, %s10624_s3  ;;  %6327 = vrot.lane.b32.xlu0 %v6289_v4, %s10624_s3  ;;  %v997_v4 = vadd.f32 %v13378_v47, %v14549_v49  ;;  %v6205_v58 = vmul.f32 %v13448_v9, %v13180_v52 }
 0xffc   :  { %10374 = vtanh.f32 %v13540_v3  ;;  %v8614_v19 = vmul.f32 -1.442695, %v13540_v3 }
 0xffd   :  { %10376 = vtanh.f32 %v13552_v62  ;;  %v13582_v42 = vpack.c.bf16 %v997_v4, %v995_v45 }
 0xfff   :  { %v10373_v14 = vpop.eup %10372  ;;  %v9382_v24 = vunpack.c.h.bf16 %v13582_v42 }
0x1001   :  { %v5857_v54 = vpop.f32.mrf.mxu1 }
0x1002   :  { %v10375_v61 = vpop.eup %10374  ;;  %v13560_v31 = vadd.f32 %v9377_v38, %v5857_v54 }
0x1003   :  { %6257 = vrot.lane.b32.xlu2 %v10375_v61, %s10624_s3  ;;  %6413 = vrot.lane.b32.xlu0 %v10373_v14, %s10624_s3  ;;  %v10377_v16 = vpop.eup %10376  ;;  %v6207_v14 = vmul.f32 %v13514_v5, %v13244_v51 }
0x1004   :  { %10378 = vtanh.f32 %v13560_v31 }
0x1006   :  { %v6250_v41 = vpop.permute.xlu0 %6249 }
0x1007   :  { %v6290_v10 = vmul.f32 %v6250_v41, %v13562_v43 }
0x1009   :  { %v5859_v59 = vpop.f32.mrf.mxu1  ;;  %6329 = vrot.lane.b32.xlu1 %v6290_v10, %s10624_s3 }
0x100a   :  { %v5880_v7 = vadd.f32 %v9378_v27, %v5859_v59  ;;  %v10379_v35 = vpop.eup %10378 }
0x100b   :  { %6411 = vrot.lane.b32.xlu2 %v10377_v16, %s10624_s3 }
0x100c   :  { %10380 = vtanh.f32 %v5880_v7  ;;  %v8616_v41 = vmul.f32 -1.442695, %v5880_v7 }
0x100d   :  { %10382 = vpow2.f32 %v8611_v39 }
0x100e   :  { %10384 = vpow2.f32 %v8612_v1 }
0x1011   :  { %6259 = vrot.lane.b32.xlu1 %v10379_v35, %s10624_s3  ;;  %v8615_v35 = vmul.f32 -1.442695, %v13560_v31 }
0x1012   :  { %v10381_v0 = vpop.eup %10380 }
0x1013   :  { %6261 = vrot.lane.b32.xlu2 %v10381_v0, %s10624_s3  ;;  %v10383_v33 = vpop.eup %10382 }
0x1014   :  { %v5939_v8 = vadd.f32 1.0, %v10383_v33  ;;  %v10385_v47 = vpop.eup %10384  ;;  %v6206_v33 = vmul.f32 %v13484_v18, %v13212_v53 }
0x1015   :  { %v13589_v22 = vadd.f32 1.0, %v10385_v47 }
0x1016   :  { %v6078_v7 = vand.u32 2147483648, %v5939_v8  ;;  %vm6072_vm13 = vweird.f32 %v5939_v8  ;;  %v6076_v56 = vand.u32 2147483647, %v5939_v8 }
0x1017   :  { %vm6087_vm2 = vweird.f32 %v13589_v22  ;;  %v6091_v53 = vand.u32 2147483647, %v13589_v22 }
0x1018   :  { %vm6077_vm15 = vcmp.eq.f32.partialorder %v6076_v56, 8.507059e+37 }
0x1019   :  { %vm6092_vm4 = vcmp.eq.f32.partialorder %v6091_v53, 8.507059e+37 }
0x1028   :  { %v13571_v6 = vpop.f32.mrf.mxu1 }
0x1030   :  { %v5864_v13 = vpop.f32.mrf.mxu1 }
0x1031   :  { %v13587_v48 = vadd.f32 %v9382_v24, %v5864_v13 }
0x103b   :  { %v6320_v50 = vpop.permute.xlu1 %6319 }
0x103c   :  { %v13580_v25 = vadd.f32 %v6320_v50, %v6205_v58  ;;  %v6079_v58 = vor.u32 1.1754944e-38, %v6078_v7 }
0x103e   :  { %10386 = vtanh.f32 %v13580_v25 }
0x103f   :  { %10388 = vrcp.f32 %v5939_v8 }
0x1040   :  { %10390 = vpow2.f32 %v8613_v46 }
0x1041   :  { %10392 = vtanh.f32 %v13587_v48 }
0x1042   :  { %10394 = vrcp.f32 %v13589_v22 }
0x1043   :  { %v6322_v36 = vpop.permute.xlu2 %6321  ;;  %10396 = vpow2.f32 %v8614_v19  ;;  %v6093_v19 = vand.u32 2147483648, %v13589_v22 }
0x1044   :  { %v10387_v52 = vpop.eup %10386  ;;  %v13618_v46 = vadd.f32 %v6322_v36, %v6206_v33 }
0x1045   :  { %6415 = vrot.lane.b32.xlu2 %v10387_v52, %s10624_s3  ;;  %v10389_v20 = vpop.eup %10388 }
0x1046   :  { %v10391_v34 = vpop.eup %10390  ;;  %v6068_v54 = vmul.f32 %v10389_v20, %v5939_v8  ;;  %vm6073_vm12 = vweird.f32 %v10389_v20 }
0x1047   :  { %v10393_v23 = vpop.eup %10392  ;;  %v13599_v38 = vadd.f32 1.0, %v10391_v34  ;;  %vm6074_vm14 = vmor %vm6072_vm13, %vm6073_vm12 }
0x1048   :  { %v6069_v11 = vsub.f32 1.0, %v6068_v54  ;;  %v10395_v3 = vpop.eup %10394 }
0x1049   :  { %v10397_v10 = vpop.eup %10396  ;;  %v6083_v51 = vmul.f32 %v10395_v3, %v13589_v22  ;;  %vm6088_vm1 = vweird.f32 %v10395_v3  ;;  %vm6102_vm6 = vweird.f32 %v13599_v38 }
0x104a   :  { %v6070_v27 = vmul.f32 %v10389_v20, %v6069_v11  ;;  %v13605_v16 = vadd.f32 1.0, %v10397_v10  ;;  %vm6089_vm3 = vmor %vm6087_vm2, %vm6088_vm1  ;;  %v6094_v11 = vor.u32 1.1754944e-38, %v6093_v19 }
0x104b   :  { %v6324_v32 = vpop.permute.xlu2 %6323  ;;  %v6084_v39 = vsub.f32 1.0, %v6083_v51 }
0x104c   :  { %v13597_v61 = vadd.f32 %v6324_v32, %v6207_v14  ;;  %v6071_v0 = vadd.f32 %v10389_v20, %v6070_v27  ;;  %vm6117_vm10 = vweird.f32 %v13605_v16  ;;  %v6121_v19 = vand.u32 2147483647, %v13605_v16 }
0x104d   :  { %6265 = vrot.lane.b32.xlu2 %v10393_v23, %s10624_s3  ;;  %v6085_v4 = vmul.f32 %v10395_v3, %v6084_v39  ;;  %v9381_v23 = vunpack.c.l.bf16 %v13582_v42  ;;  %v6106_v39 = vand.u32 2147483647, %v13599_v38 }
0x104e   :  { %10398 = vtanh.f32 %v13597_v61  ;;  %v6075_v49 = vsel %vm6074_vm14, %v10389_v20, %v6071_v0  ;;  %vm6122_vm12 = vcmp.eq.f32.partialorder %v6121_v19, 8.507059e+37 }
0x104f   :  { %10400 = vrcp.f32 %v13599_v38  ;;  %v13620_v8 = vsel %vm6077_vm15, %v6079_v58, %v6075_v49  ;;  %v6086_v47 = vadd.f32 %v10395_v3, %v6085_v4  ;;  %v6208_v49 = vmul.f32 %v13517_v40, %v13252_v44 }
0x1050   :  { %10402 = vpow2.f32 %v8616_v41  ;;  %v13638_v41 = vadd.f32 %v9381_v23, %v13571_v6  ;;  %v6108_v6 = vand.u32 2147483648, %v13599_v38  ;;  %vm6107_vm8 = vcmp.eq.f32.partialorder %v6106_v39, 8.507059e+37 }
0x1051   :  { %10404 = vrcp.f32 %v13605_v16  ;;  %v6090_v14 = vsel %vm6089_vm3, %v10395_v3, %v6086_v47  ;;  %v6123_v44 = vand.u32 2147483648, %v13605_v16  ;;  %v6209_v39 = vmul.f32 %v13537_v21, %v13300_v63 }
0x1052   :  { %10406 = vpow2.f32 %v8615_v35  ;;  %v13640_v10 = vsel %vm6092_vm4, %v6094_v11, %v6090_v14  ;;  %v6109_v4 = vor.u32 1.1754944e-38, %v6108_v6  ;;  %v8618_v6 = vmul.f32 -1.442695, %v13587_v48 }
0x1054   :  { %v10399_v59 = vpop.eup %10398 }
0x1055   :  { %6419 = vrot.lane.b32.xlu2 %v10399_v59, %s10624_s3  ;;  %v13609_v1 = vpop.eup %10400 }
0x1056   :  { %v10403_v45 = vpop.eup %10402  ;;  %v6098_v31 = vmul.f32 %v13609_v1, %v13599_v38  ;;  %vm6103_vm5 = vweird.f32 %v13609_v1 }
0x1057   :  { %v13616_v50 = vadd.f32 1.0, %v10403_v45  ;;  %v13623_v20 = vpop.eup %10404  ;;  %vm6104_vm7 = vmor %vm6102_vm6, %vm6103_vm5 }
0x1058   :  { %v6099_v52 = vsub.f32 1.0, %v6098_v31  ;;  %v10407_v34 = vpop.eup %10406  ;;  %v6113_v36 = vmul.f32 %v13623_v20, %v13605_v16  ;;  %vm6118_vm9 = vweird.f32 %v13623_v20 }
0x1059   :  { %10408 = vrcp.f32 %v13616_v50  ;;  %v13634_v32 = vadd.f32 1.0, %v10407_v34  ;;  %vm6119_vm11 = vmor %vm6117_vm10, %vm6118_vm9  ;;  %vm6147_vm14 = vweird.f32 %v13616_v50 }
0x105a   :  { %10410 = vtanh.f32 %v13618_v46  ;;  %v6100_v54 = vmul.f32 %v13609_v1, %v6099_v52  ;;  %v6114_v59 = vsub.f32 1.0, %v6113_v36 }
0x105b   :  { %10412 = vrcp.f32 %v13634_v32  ;;  %vm6132_vm3 = vweird.f32 %v13634_v32  ;;  %v6136_v63 = vand.u32 2147483647, %v13634_v32 }
0x105c   :  { %v6101_v35 = vadd.f32 %v13609_v1, %v6100_v54  ;;  %10414 = vtanh.f32 %v13638_v41  ;;  %v6115_v7 = vmul.f32 %v13623_v20, %v6114_v59  ;;  %v6124_v54 = vor.u32 1.1754944e-38, %v6123_v44 }
0x105d   :  { %v6252_v13 = vpop.permute.xlu0 %6251  ;;  %v6258_v42 = vpop.permute.xlu2 %6257  ;;  %v6153_v59 = vand.u32 2147483648, %v13616_v50  ;;  %vm6137_vm5 = vcmp.eq.f32.partialorder %v6136_v63, 8.507059e+37 }
0x105e   :  { %v6291_v24 = vmul.f32 %v6252_v13, %v13620_v8  ;;  %v6105_v56 = vsel %vm6104_vm7, %v13609_v1, %v6101_v35 }
0x105f   :  { %v13642_v51 = vpop.eup %10408  ;;  %v13664_v38 = vsel %vm6107_vm8, %v6109_v4, %v6105_v56 }
0x1060   :  { %6331 = vrot.lane.b32.xlu0 %v6291_v24, %s10624_s3  ;;  %v10411_v0 = vpop.eup %10410  ;;  %v6143_v45 = vmul.f32 %v13642_v51, %v13616_v50  ;;  %v6116_v24 = vadd.f32 %v13623_v20, %v6115_v7  ;;  %vm6148_vm13 = vweird.f32 %v13642_v51  ;;  %v6154_v7 = vor.u32 1.1754944e-38, %v6153_v59 }
0x1061   :  { %v13660_v31 = vpop.eup %10412  ;;  %vm6149_vm15 = vmor %vm6147_vm14, %vm6148_vm13 }
0x1062   :  { %v6144_v47 = vsub.f32 1.0, %v6143_v45  ;;  %v10415_v52 = vpop.eup %10414  ;;  %v6128_v34 = vmul.f32 %v13660_v31, %v13634_v32  ;;  %v6120_v36 = vsel %vm6119_vm11, %v13623_v20, %v6116_v24  ;;  %v6151_v20 = vand.u32 2147483647, %v13616_v50 }
0x1063   :  { %v13679_v11 = vsel %vm6122_vm12, %v6124_v54, %v6120_v36  ;;  %vm6133_vm2 = vweird.f32 %v13660_v31 }
0x1064   :  { %v6145_v14 = vmul.f32 %v13642_v51, %v6144_v47  ;;  %v6129_v23 = vsub.f32 1.0, %v6128_v34  ;;  %v6294_v16 = vmul.f32 %v6258_v42, %v13679_v11  ;;  %vm6152_vm1 = vcmp.eq.f32.partialorder %v6151_v20, 8.507059e+37  ;;  %vm6134_vm4 = vmor %vm6132_vm3, %vm6133_vm2 }
0x1065   :  { %v6254_v22 = vpop.permute.xlu1 %6253  ;;  %v6326_v27 = vpop.permute.xlu0 %6325 }
0x1066   :  { %v6292_v3 = vmul.f32 %v6254_v22, %v13640_v10  ;;  %v13662_v33 = vadd.f32 %v6326_v27, %v6208_v49  ;;  %v6412_v53 = vpop.permute.xlu2 %6411  ;;  %v6146_v22 = vadd.f32 %v13642_v51, %v6145_v14  ;;  %v6130_v35 = vmul.f32 %v13660_v31, %v6129_v23 }
0x1067   :  { %v6459_v50 = vmul.f32 %v6412_v53, %v13428_v26 }
0x1068   :  { %6333 = vrot.lane.b32.xlu1 %v6292_v3, %s10624_s3  ;;  %6417 = vrot.lane.b32.xlu0 %v10411_v0, %s10624_s3  ;;  %10416 = vtanh.f32 %v13662_v33  ;;  %v6150_v0 = vsel %vm6149_vm15, %v13642_v51, %v6146_v22  ;;  %v6131_v49 = vadd.f32 %v13660_v31, %v6130_v35 }
0x1069   :  { %v13700_v51 = vsel %vm6152_vm1, %v6154_v7, %v6150_v0  ;;  %10418 = vpow2.f32 %v8618_v6  ;;  %v8617_v0 = vmul.f32 -1.442695, %v13638_v41 }
0x106a   :  { %v6135_v26 = vsel %vm6134_vm4, %v13660_v31, %v6131_v49  ;;  %v6211_v49 = vmul.f32 %v13620_v8, %v13326_v2  ;;  %v6212_v2 = vmul.f32 %v13640_v10, %v13309_v60 }
0x106d   :  { %v6256_v58 = vpop.permute.xlu1 %6255  ;;  %v6328_v13 = vpop.permute.xlu0 %6327 }
0x106e   :  { %v6293_v1 = vmul.f32 %v6256_v58, %v13664_v38  ;;  %v10417_v27 = vpop.eup %10416  ;;  %v6262_v56 = vpop.permute.xlu2 %6261  ;;  %v13698_v4 = vadd.f32 %v6328_v13, %v6209_v39  ;;  %v6210_v13 = vmul.f32 %v13562_v43, %v13281_v55 }
0x106f   :  { %v6296_v48 = vmul.f32 %v6262_v56, %v13700_v51  ;;  %v10419_v44 = vpop.eup %10418 }
0x1070   :  { %6263 = vrot.lane.b32.xlu1 %v10415_v52, %s10624_s3  ;;  %6335 = vrot.lane.b32.xlu0 %v6293_v1, %s10624_s3  ;;  %10420 = vtanh.f32 %v13698_v4  ;;  %v5946_v31 = vadd.f32 1.0, %v10419_v44 }
0x1072   :  { %vm6177_vm7 = vweird.f32 %v5946_v31  ;;  %v6181_v22 = vand.u32 2147483647, %v5946_v31 }
0x1074   :  { %vm6182_vm9 = vcmp.eq.f32.partialorder %v6181_v22, 8.507059e+37 }
0x1075   :  { %v6414_v3 = vpop.permute.xlu0 %6413 }
0x1076   :  { %v6460_v42 = vmul.f32 %v6414_v3, %v13436_v17  ;;  %v6138_v17 = vand.u32 2147483648, %v13634_v32  ;;  %v10421_v19 = vpop.eup %10420 }
0x1078   :  { %6421 = vrot.lane.b32.xlu0 %v10417_v27, %s10624_s3  ;;  %6337 = vrot.lane.b32.xlu1 %v6294_v16, %s10624_s3  ;;  %v6508_v58 = vpack.c.bf16 %v6460_v42, %v6459_v50  ;;  %v6139_v24 = vor.u32 1.1754944e-38, %v6138_v17  ;;  %v6183_v16 = vand.u32 2147483648, %v5946_v31 }
0x107a   :  { %v13714_v47 = vsel %vm6137_vm5, %v6139_v24, %v6135_v26  ;;  %v6184_v59 = vor.u32 1.1754944e-38, %v6183_v16 }
0x107b   :  { %v6330_v45 = vpop.permute.xlu1 %6329 }
0x107c   :  { %v13712_v1 = vadd.f32 %v6330_v45, %v6210_v13 }
0x107e   :  { %10422 = vtanh.f32 %v13712_v1 }
0x107f   :  { %10424 = vrcp.f32 %v5946_v31 }
0x1080   :  { %6524 = vrot.lane.b32.xlu1 %v6508_v58, %s10625_s21  ;;  %6341 = vrot.lane.b32.xlu0 %v6296_v48, %s10624_s3  ;;  %10426 = vpow2.f32 %v8617_v0 }
0x1083   :  { %v6260_v32 = vpop.permute.xlu1 %6259 }
0x1084   :  { %v6295_v52 = vmul.f32 %v6260_v32, %v13714_v47  ;;  %v10423_v55 = vpop.eup %10422 }
0x1085   :  { %v10425_v34 = vpop.eup %10424 }
0x1086   :  { %6339 = vrot.lane.b32.xlu2 %v6295_v52, %s10624_s3  ;;  %v6173_v53 = vmul.f32 %v10425_v34, %v5946_v31  ;;  %vm6178_vm6 = vweird.f32 %v10425_v34  ;;  %v10427_v42 = vpop.eup %10426 }
0x1087   :  { %vm6179_vm8 = vmor %vm6177_vm7, %vm6178_vm6  ;;  %v5945_v6 = vadd.f32 1.0, %v10427_v42 }
0x1088   :  { %6423 = vrot.lane.b32.xlu1 %v10421_v19, %s10624_s3  ;;  %v6174_v36 = vsub.f32 1.0, %v6173_v53 }
0x1089   :  { %10428 = vrcp.f32 %v5945_v6  ;;  %v6168_v13 = vand.u32 2147483648, %v5945_v6  ;;  %vm6162_vm11 = vweird.f32 %v5945_v6  ;;  %v6166_v32 = vand.u32 2147483647, %v5945_v6 }
0x108a   :  { %v6175_v14 = vmul.f32 %v10425_v34, %v6174_v36 }
0x108b   :  { %vm6167_vm13 = vcmp.eq.f32.partialorder %v6166_v32, 8.507059e+37 }
0x108c   :  { %v6176_v23 = vadd.f32 %v10425_v34, %v6175_v14 }
0x108e   :  { %6425 = vrot.lane.b32.xlu2 %v10423_v55, %s10624_s3  ;;  %v6180_v27 = vsel %vm6179_vm8, %v10425_v34, %v6176_v23  ;;  %v6213_v55 = vmul.f32 %v13664_v38, %v13337_v15  ;;  %v6215_v15 = vmul.f32 %v13714_v47, %v13348_v37  ;;  %v6216_v37 = vmul.f32 %v13700_v51, %v13356_v12 }
0x108f   :  { %v13721_v3 = vsel %vm6182_vm9, %v6184_v59, %v6180_v27  ;;  %v10429_v39 = vpop.eup %10428 }
0x1090   :  { %v6158_v7 = vmul.f32 %v10429_v39, %v5945_v6  ;;  %vm6163_vm10 = vweird.f32 %v10429_v39 }
0x1091   :  { %vm6164_vm12 = vmor %vm6162_vm11, %vm6163_vm10 }
0x1092   :  { %v6159_v45 = vsub.f32 1.0, %v6158_v7 }
0x1094   :  { %v6160_v50 = vmul.f32 %v10429_v39, %v6159_v45 }
0x1096   :  { %v6161_v26 = vadd.f32 %v10429_v39, %v6160_v50 }
0x1098   :  { %v6165_v52 = vsel %vm6164_vm12, %v10429_v39, %v6161_v26 }
0x109f   :  { %v6416_v54 = vpop.permute.xlu2 %6415 }
0x10a0   :  { %v6461_v58 = vmul.f32 %v6416_v54, %v13448_v9  ;;  %v6169_v9 = vor.u32 1.1754944e-38, %v6168_v13  ;;  %v6214_v54 = vmul.f32 %v13679_v11, %v13319_v29 }
0x10a2   :  { %v13738_v19 = vsel %vm6167_vm13, %v6169_v9, %v6165_v52 }
0x10a7   :  { %v6266_v20 = vpop.permute.xlu2 %6265 }
0x10a8   :  { %v6298_v35 = vmul.f32 %v6266_v20, %v13721_v3 }
0x10aa   :  { %6345 = vrot.lane.b32.xlu2 %v6298_v35, %s10624_s3 }
0x10af   :  { %v6420_v44 = vpop.permute.xlu2 %6419 }
0x10b0   :  { %v6463_v22 = vmul.f32 %v6420_v44, %v13514_v5 }
0x10d2   :  { %v6332_v56 = vpop.permute.xlu0 %6331 }
0x10d3   :  { %v13730_v41 = vadd.f32 %v6332_v56, %v6211_v49 }
0x10d5   :  { %10430 = vtanh.f32 %v13730_v41 }
0x10da   :  { %v6334_v17 = vpop.permute.xlu1 %6333  ;;  %v6418_v48 = vpop.permute.xlu0 %6417 }
0x10db   :  { %v6462_v63 = vmul.f32 %v6418_v48, %v13484_v18  ;;  %v13736_v18 = vadd.f32 %v6334_v17, %v6212_v2  ;;  %v10431_v14 = vpop.eup %10430  ;;  %v6218_v17 = vmul.f32 %v13721_v3, %v13370_v57 }
0x10dd   :  { %v6509_v24 = vpack.c.bf16 %v6462_v63, %v6461_v58  ;;  %10432 = vtanh.f32 %v13736_v18 }
0x10df   :  { %6526 = vrot.lane.b32.xlu0 %v6509_v24, %s10625_s21 }
0x10e0   :  { %v6340_v60 = vpop.permute.xlu2 %6339 }
0x10e1   :  { %v13757_v35 = vadd.f32 %v6340_v60, %v6215_v15  ;;  %v14551_v60 = vld [vmem:[#allocation30_spill] sm:$0xff] }
0x10e2   :  { %v6264_v31 = vpop.permute.xlu1 %6263  ;;  %v6336_v34 = vpop.permute.xlu0 %6335 }
0x10e3   :  { %v6297_v53 = vmul.f32 %v6264_v31, %v13738_v19  ;;  %v13743_v36 = vadd.f32 %v6336_v34, %v6213_v55  ;;  %v10433_v20 = vpop.eup %10432 }
0x10e5   :  { %6343 = vrot.lane.b32.xlu1 %v6297_v53, %s10624_s3  ;;  %10434 = vtanh.f32 %v13743_v36 }
0x10e7   :  { %6427 = vrot.lane.b32.xlu0 %v10431_v14, %s10624_s3 }
0x10e8   :  { %v6426_v7 = vpop.permute.xlu2 %6425 }
0x10e9   :  { %v6466_v50 = vmul.f32 %v6426_v7, %v13562_v43 }
0x10ea   :  { %v6422_v23 = vpop.permute.xlu0 %6421  ;;  %v6338_v16 = vpop.permute.xlu1 %6337 }
0x10eb   :  { %v6464_v27 = vmul.f32 %v6422_v23, %v13517_v40  ;;  %v13755_v59 = vadd.f32 %v6338_v16, %v6214_v54  ;;  %v10435_v29 = vpop.eup %10434 }
0x10ed   :  { %v6510_v0 = vpack.c.bf16 %v6464_v27, %v6463_v22  ;;  %10436 = vtanh.f32 %v13755_v59  ;;  %6429 = vrot.lane.b32.xlu1 %v10433_v20, %s10624_s3 }
0x10ee   :  { %10438 = vtanh.f32 %v13757_v35 }
0x10ef   :  { %6431 = vrot.lane.b32.xlu0 %v10435_v29, %s10624_s3  ;;  %6528 = vrot.lane.b32.xlu2 %v6510_v0, %s10625_s21 }
0x10f2   :  { %v6525_v5 = vpop.permute.xlu1 %6524  ;;  %v6342_v40 = vpop.permute.xlu0 %6341 }
0x10f3   :  { %v10437_v42 = vpop.eup %10436  ;;  %v13766_v6 = vadd.f32 %v6342_v40, %v6216_v37  ;;  %8619 = vmatmul.msk.bf16.vlgmr.msrb.gmra.mxu2 %vm517_vm0, %v6525_v5 }
0x10f4   :  { %v10439_v39 = vpop.eup %10438 }
0x10f5   :  { %10440 = vtanh.f32 %v13766_v6  ;;  %6433 = vrot.lane.b32.xlu1 %v10437_v42, %s10624_s3 }
0x10f7   :  { %6435 = vrot.lane.b32.xlu0 %v10439_v39, %s10624_s3 }
0x10fa   :  { %v6424_v56 = vpop.permute.xlu1 %6423 }
0x10fb   :  { %v10441_v45 = vpop.eup %10440  ;;  %v6465_v12 = vmul.f32 %v6424_v56, %v13537_v21  ;;  %v6217_v21 = vmul.f32 %v13738_v19, %v13363_v28  ;;  %v14552_v56 = vld [vmem:[#allocation31_spill] sm:$0xff] }
0x10fd   :  { %v6511_v49 = vpack.c.bf16 %v6466_v50, %v6465_v12  ;;  %6437 = vrot.lane.b32.xlu1 %v10441_v45, %s10624_s3  ;;  %v14553_v50 = vld [vmem:[#allocation32_spill] sm:$0xff] }
0x10ff   :  { %6530 = vrot.lane.b32.xlu2 %v6511_v49, %s10625_s21 }
0x1104   :  { %v6346_v48 = vpop.permute.xlu2 %6345 }
0x1105   :  { %v13778_v58 = vadd.f32 %v6346_v48, %v6218_v17 }
0x1107   :  { %10442 = vtanh.f32 %v13778_v58 }
0x110d   :  { %v10443_v63 = vpop.eup %10442 }
0x110e   :  { %6441 = vrot.lane.b32.xlu1 %v10443_v63, %s10624_s3 }
0x1149   :  { %v6529_v9 = vpop.permute.xlu2 %6528 }
0x1151   :  { %v6527_v26 = vpop.permute.xlu0 %6526 }
0x1152   :  { %8620 = vmatmul.msk.bf16.gmra.mxu2 %vm517_vm0, %v6527_v26 }
0x1157   :  { %v6344_v43 = vpop.permute.xlu1 %6343 }
0x1158   :  { %v13785_v13 = vadd.f32 %v6344_v43, %v6217_v21 }
0x1159   :  { %v6428_v24 = vpop.permute.xlu0 %6427  ;;  %v6531_v22 = vpop.permute.xlu2 %6530 }
0x115a   :  { %10444 = vtanh.f32 %v13785_v13  ;;  %v6467_v52 = vmul.f32 %v6428_v24, %v13620_v8  ;;  %v13799_v8 = vld [vmem:[%s14436_s5] ss:$0 sm:$0xff] }
0x115b   :  { %v1002_v54 = vadd.f32 %v13799_v8, %v14551_v60  ;;  %v1005_v45 = vadd.f32 %v13799_v8, %v14552_v56  ;;  %v1007_v12 = vadd.f32 %v13799_v8, %v14553_v50  ;;  %v14557_v56 = vld [vmem:[#allocation36_spill] sm:$0xff] }
0x115d   :  { %v9127_v63 = vpack.c.bf16 %v1007_v12, %v1005_v45  ;;  %v1017_v45 = vadd.f32 %v13799_v8, %v14557_v56 }
0x115f   :  { %v6430_v57 = vpop.permute.xlu1 %6429 }
0x1160   :  { %v10445_v32 = vpop.eup %10444  ;;  %v6468_v2 = vmul.f32 %v6430_v57, %v13640_v10  ;;  %v14550_v10 = vld [vmem:[#allocation29_spill] sm:$0xff]  ;;  %v9389_v57 = vunpack.c.l.bf16 %v9127_v63 }
0x1161   :  { %6439 = vrot.lane.b32.xlu0 %v10445_v32, %s10624_s3  ;;  %v6432_v31 = vpop.permute.xlu0 %6431  ;;  %v1000_v14 = vadd.f32 %v13799_v8, %v14550_v10 }
0x1162   :  { %v6512_v44 = vpack.c.bf16 %v6468_v2, %v6467_v52  ;;  %8621 = vmatmul.msk.bf16.gmra.mxu2 %vm517_vm0, %v6529_v9  ;;  %v6469_v55 = vmul.f32 %v6432_v31, %v13664_v38 }
0x1163   :  { %v9122_v16 = vpack.c.bf16 %v1002_v54, %v1000_v14 }
0x1164   :  { %6532 = vrot.lane.b32.xlu2 %v6512_v44, %s10625_s21 }
0x1165   :  { %v9385_v20 = vunpack.c.l.bf16 %v9122_v16  ;;  %v9386_v37 = vunpack.c.h.bf16 %v9122_v16 }
0x1167   :  { %v6434_v28 = vpop.permute.xlu1 %6433 }
0x1168   :  { %v6470_v34 = vmul.f32 %v6434_v28, %v13679_v11 }
0x1169   :  { %v6436_v15 = vpop.permute.xlu0 %6435 }
0x116a   :  { %v6513_v53 = vpack.c.bf16 %v6470_v34, %v6469_v55  ;;  %v6471_v38 = vmul.f32 %v6436_v15, %v13714_v47  ;;  %v14554_v55 = vld [vmem:[#allocation33_spill] sm:$0xff] }
0x116b   :  { %v1010_v34 = vadd.f32 %v13799_v8, %v14554_v55 }
0x116c   :  { %6534 = vrot.lane.b32.xlu2 %v6513_v53, %s10625_s21  ;;  %v14555_v53 = vld [vmem:[#allocation34_spill] sm:$0xff] }
0x116f   :  { %v6438_v23 = vpop.permute.xlu1 %6437 }
0x1170   :  { %v6472_v11 = vmul.f32 %v6438_v23, %v13700_v51 }
0x1172   :  { %v6514_v27 = vpack.c.bf16 %v6472_v11, %v6471_v38  ;;  %8622 = vmatmul.msk.bf16.gmra.mxu2 %vm517_vm0, %v6531_v22 }
0x1174   :  { %6536 = vrot.lane.b32.xlu0 %v6514_v27, %s10625_s21 }
0x1176   :  { %v6573_v0 = vpop.f32.mrf.mxu2 }
0x1177   :  { %v6613_v29 = vadd.f32 %v9385_v20, %v6573_v0 }
0x1179   :  { %10446 = vtanh.f32 %v6613_v29  ;;  %v8627_v39 = vmul.f32 -1.442695, %v6613_v29 }
0x117e   :  { %v6575_v5 = vpop.f32.mrf.mxu2 }
0x117f   :  { %v10447_v40 = vpop.eup %10446  ;;  %v6614_v42 = vadd.f32 %v9386_v37, %v6575_v5 }
0x1180   :  { %6981 = vrot.lane.b32.xlu2 %v10447_v40, %s10624_s3  ;;  %v6442_v26 = vpop.permute.xlu1 %6441 }
0x1181   :  { %10448 = vtanh.f32 %v6614_v42  ;;  %v8628_v17 = vmul.f32 -1.442695, %v6614_v42  ;;  %v6474_v43 = vmul.f32 %v6442_v26, %v13721_v3  ;;  %v1012_v3 = vadd.f32 %v13799_v8, %v14555_v53 }
0x1182   :  { %10450 = vpow2.f32 %v8627_v39  ;;  %v14556_v39 = vld [vmem:[#allocation35_spill] sm:$0xff] }
0x1183   :  { %v9132_v15 = vpack.c.bf16 %v1012_v3, %v1010_v34 }
0x1185   :  { %v9393_v11 = vunpack.c.l.bf16 %v9132_v15  ;;  %v9394_v12 = vunpack.c.h.bf16 %v9132_v15 }
0x1187   :  { %v10449_v47 = vpop.eup %10448 }
0x1188   :  { %6983 = vrot.lane.b32.xlu0 %v10449_v47, %s10624_s3  ;;  %v10451_v7 = vpop.eup %10450 }
0x1189   :  { %v6677_v49 = vadd.f32 1.0, %v10451_v7  ;;  %v1015_v7 = vadd.f32 %v13799_v8, %v14556_v39 }
0x118b   :  { %10452 = vrcp.f32 %v6677_v49  ;;  %v6704_v20 = vand.u32 2147483648, %v6677_v49  ;;  %vm6698_vm15 = vweird.f32 %v6677_v49  ;;  %v6702_v37 = vand.u32 2147483647, %v6677_v49 }
0x118c   :  { %10454 = vpow2.f32 %v8628_v17 }
0x118d   :  { %v6705_v42 = vor.u32 1.1754944e-38, %v6704_v20  ;;  %vm6703_vm2 = vcmp.eq.f32.partialorder %v6702_v37, 8.507059e+37 }
0x1191   :  { %v10453_v52 = vpop.eup %10452 }
0x1192   :  { %v10455_v44 = vpop.eup %10454  ;;  %v6694_v31 = vmul.f32 %v10453_v52, %v6677_v49  ;;  %vm6699_vm14 = vweird.f32 %v10453_v52 }
0x1193   :  { %v6678_v28 = vadd.f32 1.0, %v10455_v44  ;;  %vm6700_vm1 = vmor %vm6698_vm15, %vm6699_vm14 }
0x1194   :  { %v6695_v10 = vsub.f32 1.0, %v6694_v31 }
0x1195   :  { %vm6713_vm4 = vweird.f32 %v6678_v28 }
0x1196   :  { %v6696_v23 = vmul.f32 %v10453_v52, %v6695_v10 }
0x1198   :  { %v6697_v16 = vadd.f32 %v10453_v52, %v6696_v23 }
0x119a   :  { %v6701_v40 = vsel %vm6700_vm1, %v10453_v52, %v6697_v16  ;;  %v6717_v52 = vand.u32 2147483647, %v6678_v28 }
0x119b   :  { %v13840_v50 = vsel %vm6703_vm2, %v6705_v42, %v6701_v40  ;;  %v14559_v42 = vld [vmem:[#allocation38_spill] sm:$0xff] }
0x119c   :  { %vm6718_vm6 = vcmp.eq.f32.partialorder %v6717_v52, 8.507059e+37 }
0x11be   :  { %v6533_v51 = vpop.permute.xlu2 %6532 }
0x11bf   :  { %8623 = vmatmul.msk.bf16.gmra.mxu2 %vm517_vm0, %v6533_v51 }
0x11c6   :  { %v6535_v48 = vpop.permute.xlu2 %6534 }
0x11cf   :  { %8624 = vmatmul.msk.bf16.gmra.mxu2 %vm517_vm0, %v6535_v48 }
0x11d3   :  { %v6440_v21 = vpop.permute.xlu0 %6439 }
0x11d4   :  { %v6473_v24 = vmul.f32 %v6440_v21, %v13738_v19  ;;  %v9390_v19 = vunpack.c.h.bf16 %v9127_v63  ;;  %v9137_v21 = vpack.c.bf16 %v1017_v45, %v1015_v7 }
0x11d5   :  { %v6578_v32 = vpop.f32.mrf.mxu2 }
0x11d6   :  { %v6515_v2 = vpack.c.bf16 %v6474_v43, %v6473_v24  ;;  %v13819_v9 = vadd.f32 %v9389_v57, %v6578_v32  ;;  %v9397_v24 = vunpack.c.l.bf16 %v9137_v21  ;;  %v6719_v57 = vand.u32 2147483648, %v6678_v28 }
0x11d8   :  { %10456 = vtanh.f32 %v13819_v9  ;;  %6538 = vrot.lane.b32.xlu1 %v6515_v2, %s10625_s21  ;;  %v6720_v55 = vor.u32 1.1754944e-38, %v6719_v57 }
0x11d9   :  { %10458 = vrcp.f32 %v6678_v28 }
0x11da   :  { %v6982_v47 = vpop.permute.xlu2 %6981 }
0x11db   :  { %v7029_v49 = vmul.f32 %v6982_v47, %v13840_v50 }
0x11dd   :  { %v6580_v14 = vpop.f32.mrf.mxu2 }
0x11de   :  { %v10457_v60 = vpop.eup %10456  ;;  %v13827_v54 = vadd.f32 %v9390_v19, %v6580_v14  ;;  %v9398_v19 = vunpack.c.h.bf16 %v9137_v21 }
0x11df   :  { %v10459_v38 = vpop.eup %10458 }
0x11e0   :  { %10460 = vtanh.f32 %v13827_v54  ;;  %6985 = vrot.lane.b32.xlu1 %v10457_v60, %s10624_s3  ;;  %v6709_v5 = vmul.f32 %v10459_v38, %v6678_v28  ;;  %vm6714_vm3 = vweird.f32 %v10459_v38  ;;  %v8630_v15 = vmul.f32 -1.442695, %v13827_v54  ;;  %v14558_v54 = vld [vmem:[#allocation37_spill] sm:$0xff] }
0x11e1   :  { %vm6715_vm5 = vmor %vm6713_vm4, %vm6714_vm3  ;;  %v1020_v40 = vadd.f32 %v13799_v8, %v14558_v54 }
0x11e2   :  { %v6710_v51 = vsub.f32 1.0, %v6709_v5 }
0x11e4   :  { %v6711_v26 = vmul.f32 %v10459_v38, %v6710_v51 }
0x11e5   :  { %v6583_v22 = vpop.f32.mrf.mxu2 }
0x11e6   :  { %v10461_v27 = vpop.eup %10460  ;;  %v13831_v0 = vadd.f32 %v9393_v11, %v6583_v22  ;;  %v6537_v29 = vpop.permute.xlu0 %6536  ;;  %v6712_v43 = vadd.f32 %v10459_v38, %v6711_v26  ;;  %v8629_v11 = vmul.f32 -1.442695, %v13819_v9  ;;  %v1022_v9 = vadd.f32 %v13799_v8, %v14559_v42 }
0x11e7   :  { %6987 = vrot.lane.b32.xlu2 %v10461_v27, %s10624_s3  ;;  %8625 = vmatmul.msk.bf16.gmra.mxu2 %vm517_vm0, %v6537_v29 }
0x11e8   :  { %10462 = vtanh.f32 %v13831_v0  ;;  %v6716_v31 = vsel %vm6715_vm5, %v10459_v38, %v6712_v43  ;;  %v8631_v37 = vmul.f32 -1.442695, %v13831_v0 }
0x11e9   :  { %v13846_v34 = vsel %vm6718_vm6, %v6720_v55, %v6716_v31 }
0x11ed   :  { %v6585_v17 = vpop.f32.mrf.mxu2 }
0x11ee   :  { %v10463_v48 = vpop.eup %10462  ;;  %v6618_v63 = vadd.f32 %v9394_v12, %v6585_v17  ;;  %v9142_v12 = vpack.c.bf16 %v1022_v9, %v1020_v40 }
0x11ef   :  { %6989 = vrot.lane.b32.xlu0 %v10463_v48, %s10624_s3  ;;  %7061 = vrot.lane.b32.xlu2 %v7029_v49, %s10624_s3 }
0x11f0   :  { %10464 = vtanh.f32 %v6618_v63  ;;  %v8632_v7 = vmul.f32 -1.442695, %v6618_v63 }
0x11f5   :  { %v6588_v32 = vpop.f32.mrf.mxu2 }
0x11f6   :  { %v10465_v2 = vpop.eup %10464  ;;  %v6619_v44 = vadd.f32 %v9397_v24, %v6588_v32  ;;  %v9401_v24 = vunpack.c.l.bf16 %v9142_v12 }
0x11f7   :  { %6991 = vrot.lane.b32.xlu1 %v10465_v2, %s10624_s3 }
0x11f8   :  { %10466 = vtanh.f32 %v6619_v44  ;;  %v8633_v2 = vmul.f32 -1.442695, %v6619_v44 }
0x11fa   :  { %v6984_v53 = vpop.permute.xlu0 %6983 }
0x11fb   :  { %v7030_v3 = vmul.f32 %v6984_v53, %v13846_v34 }
0x11fd   :  { %7063 = vrot.lane.b32.xlu0 %v7030_v3, %s10624_s3  ;;  %v6590_v10 = vpop.f32.mrf.mxu2 }
0x11fe   :  { %v10467_v14 = vpop.eup %10466  ;;  %v6620_v28 = vadd.f32 %v9398_v19, %v6590_v10 }
0x11ff   :  { %6993 = vrot.lane.b32.xlu1 %v10467_v14, %s10624_s3 }
0x1200   :  { %10468 = vtanh.f32 %v6620_v28  ;;  %v8634_v0 = vmul.f32 -1.442695, %v6620_v28 }
0x1201   :  { %10470 = vpow2.f32 %v8630_v15 }
0x1206   :  { %v10469_v60 = vpop.eup %10468 }
0x1207   :  { %6995 = vrot.lane.b32.xlu2 %v10469_v60, %s10624_s3  ;;  %v10471_v23 = vpop.eup %10470 }
0x1208   :  { %v6680_v38 = vadd.f32 1.0, %v10471_v23 }
0x120a   :  { %10472 = vrcp.f32 %v6680_v38  ;;  %v6749_v51 = vand.u32 2147483648, %v6680_v38  ;;  %vm6743_vm8 = vweird.f32 %v6680_v38  ;;  %v6747_v56 = vand.u32 2147483647, %v6680_v38 }
0x120b   :  { %10474 = vpow2.f32 %v8629_v11 }
0x120c   :  { %v6750_v17 = vor.u32 1.1754944e-38, %v6749_v51  ;;  %vm6748_vm10 = vcmp.eq.f32.partialorder %v6747_v56, 8.507059e+37 }
0x1210   :  { %v10473_v16 = vpop.eup %10472 }
0x1211   :  { %v6739_v22 = vmul.f32 %v10473_v16, %v6680_v38  ;;  %v10475_v27 = vpop.eup %10474  ;;  %vm6744_vm7 = vweird.f32 %v10473_v16 }
0x1212   :  { %v13854_v20 = vadd.f32 1.0, %v10475_v27  ;;  %vm6745_vm9 = vmor %vm6743_vm8, %vm6744_vm7 }
0x1213   :  { %v6740_v29 = vsub.f32 1.0, %v6739_v22  ;;  %v14560_v22 = vld [vmem:[#allocation39_spill] sm:$0xff] }
0x1214   :  { %10476 = vrcp.f32 %v13854_v20  ;;  %v6734_v15 = vand.u32 2147483648, %v13854_v20  ;;  %vm6728_vm12 = vweird.f32 %v13854_v20  ;;  %v6732_v23 = vand.u32 2147483647, %v13854_v20 }
0x1215   :  { %v6741_v5 = vmul.f32 %v10473_v16, %v6740_v29  ;;  %10478 = vpow2.f32 %v8631_v37  ;;  %v1025_v27 = vadd.f32 %v13799_v8, %v14560_v22  ;;  %v14561_v29 = vld [vmem:[#allocation40_spill] sm:$0xff] }
0x1216   :  { %10480 = vpow2.f32 %v8632_v7  ;;  %v1027_v37 = vadd.f32 %v13799_v8, %v14561_v29  ;;  %v6735_v54 = vor.u32 1.1754944e-38, %v6734_v15  ;;  %vm6733_vm14 = vcmp.eq.f32.partialorder %v6732_v23, 8.507059e+37 }
0x1217   :  { %v6742_v47 = vadd.f32 %v10473_v16, %v6741_v5  ;;  %10482 = vpow2.f32 %v8634_v0  ;;  %v9402_v5 = vunpack.c.h.bf16 %v9142_v12 }
0x1218   :  { %v9147_v56 = vpack.c.bf16 %v1027_v37, %v1025_v27 }
0x1219   :  { %v6746_v49 = vsel %vm6745_vm9, %v10473_v16, %v6742_v47 }
0x121a   :  { %v10477_v39 = vpop.eup %10476  ;;  %v13865_v21 = vsel %vm6748_vm10, %v6750_v17, %v6746_v49  ;;  %v9405_v17 = vunpack.c.l.bf16 %v9147_v56 }
0x121b   :  { %v10479_v45 = vpop.eup %10478  ;;  %v6724_v48 = vmul.f32 %v10477_v39, %v13854_v20  ;;  %vm6729_vm11 = vweird.f32 %v10477_v39 }
0x121c   :  { %v13863_v26 = vadd.f32 1.0, %v10479_v45  ;;  %v10481_v31 = vpop.eup %10480  ;;  %vm6730_vm13 = vmor %vm6728_vm12, %vm6729_vm11 }
0x121d   :  { %v6725_v52 = vsub.f32 1.0, %v6724_v48  ;;  %v10483_v55 = vpop.eup %10482  ;;  %v13873_v3 = vadd.f32 1.0, %v10481_v31 }
0x121e   :  { %10484 = vrcp.f32 %v13863_v26  ;;  %v13877_v10 = vadd.f32 1.0, %v10483_v55  ;;  %vm6758_vm1 = vweird.f32 %v13863_v26  ;;  %v6762_v31 = vand.u32 2147483647, %v13863_v26 }
0x121f   :  { %v6726_v53 = vmul.f32 %v10477_v39, %v6725_v52  ;;  %vm6773_vm6 = vweird.f32 %v13873_v3 }
0x1220   :  { %vm6763_vm3 = vcmp.eq.f32.partialorder %v6762_v31, 8.507059e+37  ;;  %vm6803_vm7 = vweird.f32 %v13877_v10 }
0x1221   :  { %v6727_v44 = vadd.f32 %v10477_v39, %v6726_v53 }
0x1223   :  { %v6731_v16 = vsel %vm6730_vm13, %v10477_v39, %v6727_v44  ;;  %v9406_v44 = vunpack.c.h.bf16 %v9147_v56  ;;  %v6809_v56 = vand.u32 2147483648, %v13877_v10 }
0x1224   :  { %v13875_v19 = vpop.eup %10484  ;;  %v13896_v42 = vsel %vm6733_vm14, %v6735_v54, %v6731_v16  ;;  %v14565_v16 = vld [vmem:[#allocation42_spill] sm:$0xff] }
0x1225   :  { %v6754_v11 = vmul.f32 %v13875_v19, %v13863_v26  ;;  %vm6759_vm15 = vweird.f32 %v13875_v19  ;;  %v1032_v22 = vadd.f32 %v13799_v8, %v14565_v16 }
0x1226   :  { %vm13921_vm2 = vmor %vm6758_vm1, %vm6759_vm15 }
0x1227   :  { %v6755_v47 = vsub.f32 1.0, %v6754_v11 }
0x1229   :  { %v6756_v12 = vmul.f32 %v13875_v19, %v6755_v47  ;;  %v6779_v47 = vand.u32 2147483648, %v13873_v3 }
0x1241   :  { %v6988_v43 = vpop.permute.xlu2 %6987 }
0x1242   :  { %v7032_v63 = vmul.f32 %v6988_v43, %v13865_v21  ;;  %v6593_v57 = vpop.f32.mrf.mxu2  ;;  %v6757_v43 = vadd.f32 %v13875_v19, %v6756_v12 }
0x1243   :  { %v13868_v32 = vadd.f32 %v9401_v24, %v6593_v57  ;;  %v6764_v57 = vand.u32 2147483648, %v13863_v26 }
0x1244   :  { %7067 = vrot.lane.b32.xlu1 %v7032_v63, %s10624_s3 }
0x1245   :  { %10486 = vtanh.f32 %v13868_v32  ;;  %v6765_v26 = vor.u32 1.1754944e-38, %v6764_v57 }
0x1246   :  { %10488 = vpow2.f32 %v8633_v2 }
0x1247   :  { %10490 = vrcp.f32 %v13873_v3 }
0x1248   :  { %10492 = vrcp.f32 %v13877_v10 }
0x1249   :  { %v7062_v23 = vpop.permute.xlu2 %7061 }
0x124a   :  { %v6539_v14 = vpop.permute.xlu1 %6538  ;;  %v6595_v28 = vpop.f32.mrf.mxu2 }
0x124b   :  { %v10487_v60 = vpop.eup %10486  ;;  %8626 = vmatmul.msk.bf16.gmra.mxu2 %vm517_vm0, %v6539_v14  ;;  %v13894_v20 = vadd.f32 %v9402_v5, %v6595_v28  ;;  %v6761_v14 = vsel %vm13921_vm2, %v13875_v19, %v6757_v43 }
0x124c   :  { %6997 = vrot.lane.b32.xlu2 %v10487_v60, %s10624_s3  ;;  %v10489_v38 = vpop.eup %10488  ;;  %v13939_v29 = vsel %vm6763_vm3, %v6765_v26, %v6761_v14 }
0x124d   :  { %v13892_v40 = vadd.f32 1.0, %v10489_v38  ;;  %v13898_v51 = vpop.eup %10490  ;;  %v14564_v38 = vld [vmem:[#allocation41_spill] sm:$0xff] }
0x124e   :  { %v13901_v7 = vpop.eup %10492  ;;  %v6769_v0 = vmul.f32 %v13898_v51, %v13873_v3  ;;  %v1030_v11 = vadd.f32 %v13799_v8, %v14564_v38  ;;  %vm6774_vm4 = vweird.f32 %v13898_v51 }
0x124f   :  { %10494 = vrcp.f32 %v13892_v40  ;;  %v6799_v49 = vmul.f32 %v13901_v7, %v13877_v10  ;;  %vm6804_vm5 = vweird.f32 %v13901_v7  ;;  %vm6775_vm8 = vmor %vm6773_vm6, %vm6774_vm4  ;;  %vm6788_vm13 = vweird.f32 %v13892_v40 }
0x1250   :  { %10496 = vtanh.f32 %v13894_v20  ;;  %v6770_v24 = vsub.f32 1.0, %v6769_v0  ;;  %v9152_v12 = vpack.c.bf16 %v1032_v22, %v1030_v11  ;;  %v6807_v0 = vand.u32 2147483647, %v13877_v10  ;;  %vm6805_vm9 = vmor %vm6803_vm7, %vm6804_vm5 }
0x1251   :  { %v6800_v52 = vsub.f32 1.0, %v6799_v49  ;;  %v6949_v49 = vmul.f32 %v13840_v50, %v13552_v62  ;;  %v6792_v26 = vand.u32 2147483647, %v13892_v40 }
0x1252   :  { %v6986_v9 = vpop.permute.xlu1 %6985  ;;  %v6598_v45 = vpop.f32.mrf.mxu2  ;;  %v6771_v28 = vmul.f32 %v13898_v51, %v6770_v24  ;;  %v6780_v24 = vor.u32 1.1754944e-38, %v6779_v47  ;;  %vm6808_vm11 = vcmp.eq.f32.partialorder %v6807_v0, 8.507059e+37  ;;  %v9409_v55 = vunpack.c.l.bf16 %v9152_v12 }
0x1253   :  { %v7031_v39 = vmul.f32 %v6986_v9, %v13896_v42  ;;  %v13911_v48 = vadd.f32 %v9405_v17, %v6598_v45  ;;  %v6801_v15 = vmul.f32 %v13901_v7, %v6800_v52  ;;  %v6777_v45 = vand.u32 2147483647, %v13873_v3 }
0x1254   :  { %v6772_v5 = vadd.f32 %v13898_v51, %v6771_v28  ;;  %v7109_v57 = vadd.f32 %v7062_v23, %v6949_v49  ;;  %v6810_v52 = vor.u32 1.1754944e-38, %v6809_v56  ;;  %vm6793_vm15 = vcmp.eq.f32.partialorder %v6792_v26, 8.507059e+37 }
0x1255   :  { %7065 = vrot.lane.b32.xlu0 %v7031_v39, %s10624_s3  ;;  %v13915_v63 = vpop.eup %10494  ;;  %10498 = vtanh.f32 %v13911_v48  ;;  %v6802_v9 = vadd.f32 %v13901_v7, %v6801_v15  ;;  %vm6778_vm10 = vcmp.eq.f32.partialorder %v6777_v45, 8.507059e+37  ;;  %v6950_v15 = vmul.f32 %v13846_v34, %v13535_v30 }
0x1256   :  { %v10497_v2 = vpop.eup %10496  ;;  %v6784_v60 = vmul.f32 %v13915_v63, %v13892_v40  ;;  %v6776_v17 = vsel %vm6775_vm8, %v13898_v51, %v6772_v5  ;;  %vm6789_vm12 = vweird.f32 %v13915_v63  ;;  %v8635_v30 = vmul.f32 -1.442695, %v13868_v32 }
0x1257   :  { %v6806_v43 = vsel %vm6805_vm9, %v13901_v7, %v6802_v9  ;;  %v13962_v31 = vsel %vm6778_vm10, %v6780_v24, %v6776_v17  ;;  %vm6790_vm14 = vmor %vm6788_vm13, %vm6789_vm12  ;;  %v8636_v32 = vmul.f32 -1.442695, %v13894_v20 }
0x1258   :  { %v6785_v54 = vsub.f32 1.0, %v6784_v60 }
0x125a   :  { %v6600_v53 = vpop.f32.mrf.mxu2  ;;  %v6786_v3 = vmul.f32 %v13915_v63, %v6785_v54 }
0x125b   :  { %v13937_v27 = vadd.f32 %v9406_v44, %v6600_v53  ;;  %v10499_v39 = vpop.eup %10498  ;;  %v13964_v53 = vsel %vm6808_vm11, %v6810_v52, %v6806_v43  ;;  %v6794_v44 = vand.u32 2147483648, %v13892_v40 }
0x125c   :  { %v6787_v51 = vadd.f32 %v13915_v63, %v6786_v3 }
0x125d   :  { %6999 = vrot.lane.b32.xlu0 %v10497_v2, %s10624_s3  ;;  %10500 = vtanh.f32 %v13937_v27  ;;  %v6795_v11 = vor.u32 1.1754944e-38, %v6794_v44 }
0x125e   :  { %10502 = vtanh.f32 %v7109_v57  ;;  %v6791_v23 = vsel %vm6790_vm14, %v13915_v63, %v6787_v51 }
0x1261   :  { %v6990_v19 = vpop.permute.xlu0 %6989  ;;  %v6996_v2 = vpop.permute.xlu2 %6995 }
0x1262   :  { %v7033_v37 = vmul.f32 %v6990_v19, %v13939_v29  ;;  %v7036_v28 = vmul.f32 %v6996_v2, %v13964_v53  ;;  %v13982_v19 = vsel %vm6793_vm15, %v6795_v11, %v6791_v23 }
0x1263   :  { %v10501_v7 = vpop.eup %10500 }
0x1264   :  { %7069 = vrot.lane.b32.xlu1 %v7033_v37, %s10624_s3  ;;  %v9410_v37 = vunpack.c.h.bf16 %v9152_v12  ;;  %v10503_v5 = vpop.eup %10502 }
0x1265   :  { %7001 = vrot.lane.b32.xlu0 %v10499_v39, %s10624_s3 }
0x1269   :  { %v6992_v10 = vpop.permute.xlu1 %6991 }
0x126a   :  { %v7034_v62 = vmul.f32 %v6992_v10, %v13962_v31  ;;  %v6603_v14 = vpop.f32.mrf.mxu2 }
0x126b   :  { %v13970_v60 = vadd.f32 %v9409_v55, %v6603_v14 }
0x126c   :  { %7071 = vrot.lane.b32.xlu2 %v7034_v62, %s10624_s3  ;;  %7003 = vrot.lane.b32.xlu1 %v10501_v7, %s10624_s3  ;;  %v8637_v62 = vmul.f32 -1.442695, %v13911_v48  ;;  %v8638_v7 = vmul.f32 -1.442695, %v13937_v27 }
0x126d   :  { %10504 = vtanh.f32 %v13970_v60  ;;  %7075 = vrot.lane.b32.xlu0 %v7036_v28, %s10624_s3  ;;  %v6952_v28 = vmul.f32 %v13865_v21, %v13618_v46  ;;  %v8639_v27 = vmul.f32 -1.442695, %v13970_v60  ;;  %v6951_v60 = vmul.f32 %v13896_v42, %v13580_v25 }
0x126f   :  { %v7064_v38 = vpop.permute.xlu0 %7063 }
0x1270   :  { %v7110_v16 = vadd.f32 %v7064_v38, %v6950_v15 }
0x1271   :  { %v6994_v22 = vpop.permute.xlu1 %6993 }
0x1272   :  { %v7035_v40 = vmul.f32 %v6994_v22, %v13982_v19  ;;  %v6605_v54 = vpop.f32.mrf.mxu2  ;;  %10506 = vtanh.f32 %v7110_v16 }
0x1273   :  { %v10505_v9 = vpop.eup %10504  ;;  %v6626_v47 = vadd.f32 %v9410_v37, %v6605_v54  ;;  %v14566_v54 = vld [vmem:[#allocation43_spill] sm:$0xff] }
0x1274   :  { %7073 = vrot.lane.b32.xlu2 %v7035_v40, %s10624_s3  ;;  %7157 = vrot.lane.b32.xlu1 %v10503_v5, %s10624_s3 }
0x1275   :  { %10508 = vtanh.f32 %v6626_v47  ;;  %7005 = vrot.lane.b32.xlu0 %v10505_v9, %s10624_s3  ;;  %v8640_v46 = vmul.f32 -1.442695, %v6626_v47  ;;  %v1035_v9 = vadd.f32 %v13799_v8, %v14566_v54 }
0x1276   :  { %10510 = vpow2.f32 %v8635_v30  ;;  %v14567_v30 = vld [vmem:[#allocation44_spill] sm:$0xff] }
0x1278   :  { %v10507_v63 = vpop.eup %10506 }
0x127b   :  { %v10509_v39 = vpop.eup %10508 }
0x127c   :  { %7159 = vrot.lane.b32.xlu2 %v10507_v63, %s10624_s3  ;;  %7007 = vrot.lane.b32.xlu1 %v10509_v39, %s10624_s3  ;;  %v10511_v56 = vpop.eup %10510  ;;  %v1037_v63 = vadd.f32 %v13799_v8, %v14567_v30 }
0x127d   :  { %v6685_v45 = vadd.f32 1.0, %v10511_v56 }
0x127f   :  { %10512 = vrcp.f32 %v6685_v45  ;;  %v6824_v43 = vand.u32 2147483648, %v6685_v45  ;;  %vm6818_vm2 = vweird.f32 %v6685_v45  ;;  %v6822_v24 = vand.u32 2147483647, %v6685_v45 }
0x1280   :  { %10514 = vpow2.f32 %v8636_v32 }
0x1281   :  { %v6825_v52 = vor.u32 1.1754944e-38, %v6824_v43  ;;  %vm6823_vm4 = vcmp.eq.f32.partialorder %v6822_v24, 8.507059e+37  ;;  %10516 = vpow2.f32 %v8637_v62 }
0x1285   :  { %v10513_v12 = vpop.eup %10512 }
0x1286   :  { %v6814_v0 = vmul.f32 %v10513_v12, %v6685_v45  ;;  %vm6819_vm1 = vweird.f32 %v10513_v12  ;;  %v10515_v14 = vpop.eup %10514 }
0x1287   :  { %vm6820_vm3 = vmor %vm6818_vm2, %vm6819_vm1  ;;  %v6686_v51 = vadd.f32 1.0, %v10515_v14  ;;  %v10517_v20 = vpop.eup %10516 }
0x1288   :  { %v6815_v49 = vsub.f32 1.0, %v6814_v0  ;;  %v14000_v26 = vadd.f32 1.0, %v10517_v20  ;;  %v9157_v0 = vpack.c.bf16 %v1037_v63, %v1035_v9 }
0x1289   :  { %10518 = vrcp.f32 %v6686_v51  ;;  %vm6833_vm6 = vweird.f32 %v6686_v51 }
0x128a   :  { %v6816_v17 = vmul.f32 %v10513_v12, %v6815_v49  ;;  %10520 = vpow2.f32 %v8638_v7  ;;  %v6839_v49 = vand.u32 2147483648, %v6686_v51  ;;  %vm6848_vm10 = vweird.f32 %v14000_v26 }
0x128c   :  { %v6817_v3 = vadd.f32 %v10513_v12, %v6816_v17 }
0x128e   :  { %v6821_v57 = vsel %vm6820_vm3, %v10513_v12, %v6817_v3  ;;  %v6837_v3 = vand.u32 2147483647, %v6686_v51 }
0x128f   :  { %v13992_v2 = vsel %vm6823_vm4, %v6825_v52, %v6821_v57  ;;  %v10519_v23 = vpop.eup %10518  ;;  %v9413_v57 = vunpack.c.l.bf16 %v9157_v0  ;;  %v6840_v52 = vor.u32 1.1754944e-38, %v6839_v49  ;;  %v6953_v49 = vmul.f32 %v13939_v29, %v13597_v61 }
0x1290   :  { %v10521_v38 = vpop.eup %10520  ;;  %v6829_v48 = vmul.f32 %v10519_v23, %v6686_v51  ;;  %vm6834_vm5 = vweird.f32 %v10519_v23  ;;  %vm6838_vm8 = vcmp.eq.f32.partialorder %v6837_v3, 8.507059e+37 }
0x1291   :  { %v14003_v11 = vadd.f32 1.0, %v10521_v38  ;;  %vm6835_vm7 = vmor %vm6833_vm6, %vm6834_vm5  ;;  %v6852_v38 = vand.u32 2147483647, %v14000_v26 }
0x1292   :  { %v6830_v22 = vsub.f32 1.0, %v6829_v48 }
0x1293   :  { %vm6853_vm12 = vcmp.eq.f32.partialorder %v6852_v38, 8.507059e+37  ;;  %vm6863_vm14 = vweird.f32 %v14003_v11 }
0x1294   :  { %v6831_v5 = vmul.f32 %v10519_v23, %v6830_v22  ;;  %v9414_v22 = vunpack.c.h.bf16 %v9157_v0 }
0x1296   :  { %v6832_v45 = vadd.f32 %v10519_v23, %v6831_v5 }
0x1298   :  { %v6836_v24 = vsel %vm6835_vm7, %v10519_v23, %v6832_v45  ;;  %v6854_v23 = vand.u32 2147483648, %v14000_v26  ;;  %v6867_v45 = vand.u32 2147483647, %v14003_v11 }
0x1299   :  { %v14029_v51 = vsel %vm6838_vm8, %v6840_v52, %v6836_v24 }
0x129a   :  { %vm6868_vm1 = vcmp.eq.f32.partialorder %v6867_v45, 8.507059e+37 }
0x12a6   :  { %v6998_v10 = vpop.permute.xlu2 %6997 }
0x12a7   :  { %v7037_v55 = vmul.f32 %v6998_v10, %v13992_v2 }
0x12a9   :  { %7077 = vrot.lane.b32.xlu2 %v7037_v55, %s10624_s3 }
0x12b6   :  { %v7068_v44 = vpop.permute.xlu1 %7067 }
0x12b7   :  { %v7112_v15 = vadd.f32 %v7068_v44, %v6952_v28 }
0x12b9   :  { %10522 = vtanh.f32 %v7112_v15 }
0x12ba   :  { %10524 = vrcp.f32 %v14000_v26 }
0x12bb   :  { %10526 = vrcp.f32 %v14003_v11 }
0x12bc   :  { %10528 = vpow2.f32 %v8639_v27  ;;  %v6954_v27 = vmul.f32 %v13962_v31, %v13662_v33 }
0x12bd   :  { %10530 = vpow2.f32 %v8640_v46  ;;  %v6855_v46 = vor.u32 1.1754944e-38, %v6854_v23 }
0x12bf   :  { %v10523_v16 = vpop.eup %10522 }
0x12c0   :  { %7163 = vrot.lane.b32.xlu2 %v10523_v16, %s10624_s3  ;;  %v14007_v37 = vpop.eup %10524 }
0x12c1   :  { %v6844_v40 = vmul.f32 %v14007_v37, %v14000_v26  ;;  %v14018_v56 = vpop.eup %10526  ;;  %vm6849_vm9 = vweird.f32 %v14007_v37 }
0x12c2   :  { %v10529_v17 = vpop.eup %10528  ;;  %v6859_v8 = vmul.f32 %v14018_v56, %v14003_v11  ;;  %vm6850_vm11 = vmor %vm6848_vm10, %vm6849_vm9  ;;  %vm6864_vm13 = vweird.f32 %v14018_v56 }
0x12c3   :  { %v6845_v12 = vsub.f32 1.0, %v6844_v40  ;;  %v10531_v43 = vpop.eup %10530  ;;  %v14023_v32 = vadd.f32 1.0, %v10529_v17  ;;  %vm6865_vm15 = vmor %vm6863_vm14, %vm6864_vm13 }
0x12c4   :  { %v14025_v10 = vadd.f32 1.0, %v10531_v43  ;;  %v6860_v7 = vsub.f32 1.0, %v6859_v8 }
0x12c5   :  { %v6846_v25 = vmul.f32 %v14007_v37, %v6845_v12  ;;  %v6884_v23 = vand.u32 2147483648, %v14023_v32  ;;  %vm6878_vm4 = vweird.f32 %v14023_v32 }
0x12c6   :  { %v7072_v28 = vpop.permute.xlu2 %7071  ;;  %v6861_v48 = vmul.f32 %v14018_v56, %v6860_v7  ;;  %vm6893_vm6 = vweird.f32 %v14025_v10 }
0x12c7   :  { %v7066_v39 = vpop.permute.xlu0 %7065  ;;  %v6847_v15 = vadd.f32 %v14007_v37, %v6846_v25  ;;  %v7114_v26 = vadd.f32 %v7072_v28, %v6954_v27  ;;  %v6955_v28 = vmul.f32 %v13982_v19, %v13698_v4  ;;  %v6882_v4 = vand.u32 2147483647, %v14023_v32 }
0x12c8   :  { %v7111_v47 = vadd.f32 %v7066_v39, %v6951_v60  ;;  %v6869_v39 = vand.u32 2147483648, %v14003_v11 }
0x12c9   :  { %v6851_v16 = vsel %vm6850_vm11, %v14007_v37, %v6847_v15  ;;  %v6862_v37 = vadd.f32 %v14018_v56, %v6861_v48  ;;  %vm6883_vm8 = vcmp.eq.f32.partialorder %v6882_v4, 8.507059e+37  ;;  %vm7430_vm11 = vcmask 523264  }
0x12ca   :  { %10532 = vtanh.f32 %v7111_v47  ;;  %v14051_v63 = vsel %vm6853_vm12, %v6855_v46, %v6851_v16  ;;  %v6870_v3 = vor.u32 1.1754944e-38, %v6869_v39  ;;  %v6899_v46 = vand.u32 2147483648, %v14025_v10 }
0x12cb   :  { %10534 = vrcp.f32 %v14023_v32  ;;  %v6866_v17 = vsel %vm6865_vm15, %v14018_v56, %v6862_v37 }
0x12cc   :  { %10536 = vrcp.f32 %v14025_v10  ;;  %v14072_v8 = vsel %vm6868_vm1, %v6870_v3, %v6866_v17  ;;  %v6900_v37 = vor.u32 1.1754944e-38, %v6899_v46 }
0x12ce   :  { %v6608_v55 = vpop.f32.mrf.mxu2  ;;  %v7074_v12 = vpop.permute.xlu2 %7073 }
0x12cf   :  { %v14027_v62 = vadd.f32 %v9413_v57, %v6608_v55  ;;  %v7000_v14 = vpop.permute.xlu0 %6999 }
0x12d0   :  { %v10533_v20 = vpop.eup %10532  ;;  %v7038_v44 = vmul.f32 %v7000_v14, %v14029_v51 }
0x12d1   :  { %7161 = vrot.lane.b32.xlu1 %v10533_v20, %s10624_s3  ;;  %10538 = vtanh.f32 %v14027_v62  ;;  %v14047_v54 = vpop.eup %10534 }
0x12d2   :  { %7079 = vrot.lane.b32.xlu0 %v7038_v44, %s10624_s3  ;;  %v14054_v60 = vpop.eup %10536  ;;  %v6874_v0 = vmul.f32 %v14047_v54, %v14023_v32  ;;  %vm6879_vm2 = vweird.f32 %v14047_v54 }
0x12d3   :  { %v6889_v11 = vmul.f32 %v14054_v60, %v14025_v10  ;;  %vm6894_vm3 = vweird.f32 %v14054_v60  ;;  %vm6880_vm5 = vmor %vm6878_vm4, %vm6879_vm2  ;;  %vm7628_vm4 = vcmask 1042434  }
0x12d4   :  { %v6875_v25 = vsub.f32 1.0, %v6874_v0  ;;  %vm6895_vm7 = vmor %vm6893_vm6, %vm6894_vm3  ;;  %vm7632_vm6 = vcmask 1044484  }
0x12d5   :  { %v6890_v55 = vsub.f32 1.0, %v6889_v11 }
0x12d6   :  { %v6610_v5 = vpop.f32.mrf.mxu2  ;;  %v7070_v40 = vpop.permute.xlu1 %7069  ;;  %v6876_v56 = vmul.f32 %v14047_v54, %v6875_v25 }
0x12d7   :  { %v14049_v9 = vadd.f32 %v9414_v22, %v6610_v5  ;;  %v7002_v30 = vpop.permute.xlu0 %7001  ;;  %v10539_v47 = vpop.eup %10538  ;;  %v7113_v43 = vadd.f32 %v7070_v40, %v6953_v49  ;;  %v6891_v7 = vmul.f32 %v14054_v60, %v6890_v55  ;;  %v7115_v22 = vadd.f32 %v7074_v12, %v6955_v28 }
0x12d8   :  { %v7039_v33 = vmul.f32 %v7002_v30, %v14051_v63  ;;  %v7160_v20 = vpop.permute.xlu2 %7159  ;;  %v6877_v15 = vadd.f32 %v14047_v54, %v6876_v56  ;;  %v6956_v40 = vmul.f32 %v13964_v53, %v13712_v1  ;;  %v8641_v12 = vmul.f32 -1.442695, %v14027_v62  ;;  %v8830_v62 = vld [vmem:[%s14439_s7 + $0x8] sm:$0xff] }
0x12d9   :  { %10540 = vtanh.f32 %v14049_v9  ;;  %v7206_v48 = vmul.f32 %v7160_v20, %v13846_v34  ;;  %v6892_v27 = vadd.f32 %v14054_v60, %v6891_v7  ;;  %v6897_v34 = vand.u32 2147483647, %v14025_v10  ;;  %7323 = vmatpush.bf16.msrb.mxu3 %v8830_v62  ;;  %v8825_v20 = vld [vmem:[%s14438_s6] sm:$0xff] }
0x12da   :  { %7009 = vrot.lane.b32.xlu0 %v10539_v47, %s10624_s3  ;;  %7081 = vrot.lane.b32.xlu2 %v7039_v33, %s10624_s3  ;;  %10542 = vtanh.f32 %v7114_v26  ;;  %v6885_v26 = vor.u32 1.1754944e-38, %v6884_v23  ;;  %v8642_v0 = vmul.f32 -1.442695, %v14049_v9  ;;  %v8827_v9 = vld [vmem:[%s14438_s6 + $0x10] sm:$0xff] }
0x12db   :  { %10544 = vtanh.f32 %v7113_v43  ;;  %v6896_v32 = vsel %vm6895_vm7, %v14054_v60, %v6892_v27  ;;  %vm6898_vm9 = vcmp.eq.f32.partialorder %v6897_v34, 8.507059e+37  ;;  %v8828_v43 = vld [vmem:[%s14438_s6 + $0x18] sm:$0xff]  ;;  %v8817_v27 = vld [vmem:[%s14440_s0] sm:$0xff]  ;;  %vm7634_vm7 = vcmask 1045509  }
0x12dc   :  { %10546 = vtanh.f32 %v7115_v22  ;;  %7459 = vmatpush.bf16.msra.mxu1 %v8828_v43 }
0x12de   :  { %v7004_v24 = vpop.permute.xlu1 %7003 }
0x12df   :  { %v10541_v57 = vpop.eup %10540  ;;  %v7040_v52 = vmul.f32 %v7004_v24, %v14072_v8  ;;  %v7076_v61 = vpop.permute.xlu0 %7075 }
0x12e0   :  { %7011 = vrot.lane.b32.xlu1 %v10541_v57, %s10624_s3  ;;  %v10543_v14 = vpop.eup %10542  ;;  %v7116_v33 = vadd.f32 %v7076_v61, %v6956_v40  ;;  %7460 = vmatpush.bf16.msra.mxu1 %v8827_v9  ;;  %v8826_v61 = vld [vmem:[%s14438_s6 + $0x8] sm:$0xff] }
0x12e1   :  { %v10545_v38 = vpop.eup %10544 }
0x12e2   :  { %7083 = vrot.lane.b32.xlu0 %v7040_v52, %s10624_s3  ;;  %7167 = vrot.lane.b32.xlu2 %v10543_v14, %s10624_s3  ;;  %10548 = vtanh.f32 %v7116_v33  ;;  %v10547_v60 = vpop.eup %10546  ;;  %v8829_v52 = vld [vmem:[%s14439_s7] sm:$0xff] }
0x12e3   :  { %10550 = vpow2.f32 %v8641_v12  ;;  %7324 = vmatpush.bf16.msrb.mxu3 %v8829_v52 }
0x12e4   :  { %10552 = vpow2.f32 %v8642_v0  ;;  %7461 = vmatpush.bf16.msra.mxu1 %v8826_v61 }
0x12e6   :  { %v7158_v44 = vpop.permute.xlu1 %7157 }
0x12e7   :  { %v7205_v16 = vmul.f32 %v7158_v44, %v13840_v50  ;;  %v6881_v50 = vsel %vm6880_vm5, %v14047_v54, %v6877_v15  ;;  %v7006_v30 = vpop.permute.xlu0 %7005  ;;  %v14103_v54 = vsel %vm6898_vm9, %v6900_v37, %v6896_v32  ;;  %v6957_v44 = vmul.f32 %v13992_v2, %v13730_v41 }
0x12e8   :  { %7165 = vrot.lane.b32.xlu1 %v10545_v38, %s10624_s3  ;;  %v14100_v39 = vsel %vm6883_vm8, %v6885_v26, %v6881_v50  ;;  %v10549_v45 = vpop.eup %10548  ;;  %7462 = vmatpush.bf16.msra.mxu1 %v8825_v20  ;;  %v6959_v26 = vmul.f32 %v14051_v63, %v13743_v36  ;;  %v6962_v9 = vmul.f32 %v14103_v54, %v13766_v6  ;;  %vm7630_vm5 = vcmask 1043459  }
0x12e9   :  { %v7245_v5 = vpack.c.bf16 %v7206_v48, %v7205_v16  ;;  %v7041_v10 = vmul.f32 %v7006_v30, %v14100_v39  ;;  %v10551_v49 = vpop.eup %10550  ;;  %vm7636_vm8 = vcmask 1046534   ;;  %vm7638_vm9 = vcmask 1047559  }
0x12ea   :  { %v6691_v17 = vadd.f32 1.0, %v10551_v49  ;;  %v10553_v11 = vpop.eup %10552 }
0x12eb   :  { %7265 = vrot.lane.b32.xlu0 %v7245_v5, %s10625_s21  ;;  %v14112_v3 = vadd.f32 1.0, %v10553_v11  ;;  %8707 = vmatmul.msk.bf16.vlgmr.msra.gmra.mxu1 %vm7430_vm11, %v8817_v27  ;;  %v6960_v11 = vmul.f32 %v14072_v8, %v13755_v59 }
0x12ec   :  { %10554 = vrcp.f32 %v6691_v17  ;;  %v6914_v5 = vand.u32 2147483648, %v6691_v17  ;;  %vm6908_vm12 = vweird.f32 %v6691_v17  ;;  %v6912_v34 = vand.u32 2147483647, %v6691_v17 }
0x12ed   :  { %10556 = vrcp.f32 %v14112_v3  ;;  %vm6923_vm1 = vweird.f32 %v14112_v3 }
0x12ee   :  { %v7008_v47 = vpop.permute.xlu1 %7007  ;;  %v6915_v40 = vor.u32 1.1754944e-38, %v6914_v5  ;;  %vm6913_vm14 = vcmp.eq.f32.partialorder %v6912_v34, 8.507059e+37 }
0x12ef   :  { %v7042_v1 = vmul.f32 %v7008_v47, %v14103_v54 }
0x12f0   :  { %7085 = vrot.lane.b32.xlu1 %v7041_v10, %s10624_s3  ;;  %v6929_v10 = vand.u32 2147483648, %v14112_v3 }
0x12f1   :  { %7087 = vrot.lane.b32.xlu2 %v7042_v1, %s10624_s3 }
0x12f2   :  { %v10555_v24 = vpop.eup %10554 }
0x12f3   :  { %7169 = vrot.lane.b32.xlu0 %v10547_v60, %s10624_s3  ;;  %v6904_v57 = vmul.f32 %v10555_v24, %v6691_v17  ;;  %v10557_v55 = vpop.eup %10556  ;;  %vm6909_vm10 = vweird.f32 %v10555_v24 }
0x12f4   :  { %v6919_v7 = vmul.f32 %v10557_v55, %v14112_v3  ;;  %vm6910_vm13 = vmor %vm6908_vm12, %vm6909_vm10  ;;  %vm6924_vm15 = vweird.f32 %v10557_v55  ;;  %vm7651_vm12 = vcmask 64512  }
0x12f5   :  { %v6905_v14 = vsub.f32 1.0, %v6904_v57  ;;  %vm6925_vm2 = vmor %vm6923_vm1, %vm6924_vm15 }
0x12f6   :  { %v6920_v23 = vsub.f32 1.0, %v6919_v7  ;;  %v6961_v7 = vmul.f32 %v14100_v39, %v13757_v35  ;;  %v8818_v35 = vld [vmem:[%s14440_s0 + $0x8] sm:$0xff] }
0x12f7   :  { %v6906_v28 = vmul.f32 %v10555_v24, %v6905_v14 }
0x12f8   :  { %7171 = vrot.lane.b32.xlu1 %v10549_v45, %s10624_s3  ;;  %v6921_v50 = vmul.f32 %v10557_v55, %v6920_v23  ;;  %v6930_v45 = vor.u32 1.1754944e-38, %v6929_v10 }
0x12f9   :  { %v6907_v4 = vadd.f32 %v10555_v24, %v6906_v28 }
0x12fa   :  { %v6922_v30 = vadd.f32 %v10557_v55, %v6921_v50 }
0x12fb   :  { %8708 = vmatmul.msk.bf16.gmra.mxu1 %vm7430_vm11, %v8818_v35 }
0x12fc   :  { %v6926_v36 = vsel %vm6925_vm2, %v10557_v55, %v6922_v30 }
0x1303   :  { %v7078_v25 = vpop.permute.xlu2 %7077 }
0x1304   :  { %v7117_v22 = vadd.f32 %v7078_v25, %v6957_v44 }
0x1306   :  { %10558 = vtanh.f32 %v7117_v22  ;;  %v8820_v22 = vld [vmem:[%s14440_s0 + $0x18] sm:$0xff] }
0x130c   :  { %v10559_v60 = vpop.eup %10558 }
0x131a   :  { %v7164_v56 = vpop.permute.xlu2 %7163 }
0x131b   :  { %v7208_v38 = vmul.f32 %v7164_v56, %v13865_v21  ;;  %v6911_v21 = vsel %vm6910_vm13, %v10555_v24, %v6907_v4 }
0x131c   :  { %v14147_v37 = vsel %vm6913_vm14, %v6915_v40, %v6911_v21 }
0x1334   :  { %v7082_v41 = vpop.permute.xlu2 %7081 }
0x1335   :  { %v7119_v47 = vadd.f32 %v7082_v41, %v6959_v26 }
0x133c   :  { %v7168_v12 = vpop.permute.xlu2 %7167 }
0x133d   :  { %v7210_v52 = vmul.f32 %v7168_v12, %v13962_v31 }
0x1343   :  { %v7162_v15 = vpop.permute.xlu1 %7161 }
0x1344   :  { %v7207_v48 = vmul.f32 %v7162_v15, %v13896_v42  ;;  %v7080_v16 = vpop.permute.xlu0 %7079  ;;  %v6958_v42 = vmul.f32 %v14029_v51, %v13736_v18  ;;  %v6927_v18 = vand.u32 2147483647, %v14112_v3 }
0x1346   :  { %v7246_v46 = vpack.c.bf16 %v7208_v38, %v7207_v48  ;;  %v7118_v32 = vadd.f32 %v7080_v16, %v6958_v42  ;;  %vm6928_vm3 = vcmp.eq.f32.partialorder %v6927_v18, 8.507059e+37 }
0x1347   :  { %v14155_v0 = vsel %vm6928_vm3, %v6930_v45, %v6926_v36 }
0x1348   :  { %7267 = vrot.lane.b32.xlu2 %v7246_v46, %s10625_s21  ;;  %10560 = vtanh.f32 %v7118_v32  ;;  %v6964_v46 = vmul.f32 %v14155_v0, %v13778_v58 }
0x1349   :  { %10562 = vtanh.f32 %v7119_v47 }
0x134b   :  { %v7088_v62 = vpop.permute.xlu2 %7087 }
0x134c   :  { %v7010_v33 = vpop.permute.xlu0 %7009  ;;  %v7122_v55 = vadd.f32 %v7088_v62, %v6962_v9  ;;  %v8821_v9 = vld [vmem:[%s14440_s0 + $0x20] sm:$0xff] }
0x134d   :  { %v7043_v1 = vmul.f32 %v7010_v33, %v14147_v37 }
0x134e   :  { %v10561_v24 = vpop.eup %10560 }
0x134f   :  { %7089 = vrot.lane.b32.xlu0 %v7043_v1, %s10624_s3  ;;  %v10563_v25 = vpop.eup %10562 }
0x1350   :  { %7173 = vrot.lane.b32.xlu2 %v10559_v60, %s10624_s3 }
0x1352   :  { %v7012_v49 = vpop.permute.xlu1 %7011 }
0x1353   :  { %v7044_v17 = vmul.f32 %v7012_v49, %v14155_v0 }
0x1354   :  { %v7084_v3 = vpop.permute.xlu0 %7083 }
0x1355   :  { %v7120_v43 = vadd.f32 %v7084_v3, %v6960_v11  ;;  %7091 = vrot.lane.b32.xlu1 %v7044_v17, %s10624_s3  ;;  %v14210_v17 = vld [vmem:[%s14441_s8] ss:$0 sm:$0xff] }
0x1357   :  { %10564 = vtanh.f32 %v7120_v43  ;;  %7175 = vrot.lane.b32.xlu0 %v10561_v24, %s10624_s3 }
0x1358   :  { %7177 = vrot.lane.b32.xlu2 %v10563_v25, %s10624_s3  ;;  %10566 = vtanh.f32 %v7122_v55 }
0x135a   :  { %v7166_v57 = vpop.permute.xlu1 %7165 }
0x135b   :  { %v7209_v59 = vmul.f32 %v7166_v57, %v13939_v29 }
0x135d   :  { %v10565_v14 = vpop.eup %10564  ;;  %v7247_v61 = vpack.c.bf16 %v7210_v52, %v7209_v59  ;;  %v7266_v56 = vpop.permute.xlu0 %7265 }
0x135e   :  { %8651 = vmatmul.msk.bf16.vlgmr.msrb.gmra.mxu3 %vm517_vm0, %v7266_v56  ;;  %v10567_v31 = vpop.eup %10566 }
0x135f   :  { %7179 = vrot.lane.b32.xlu0 %v10565_v14, %s10624_s3  ;;  %7269 = vrot.lane.b32.xlu1 %v7247_v61, %s10625_s21  ;;  %v8822_v14 = vld [vmem:[%s14440_s0 + $0x28] sm:$0xff] }
0x1362   :  { %v7086_v6 = vpop.permute.xlu1 %7085 }
0x1363   :  { %v7121_v20 = vadd.f32 %v7086_v6, %v6961_v7 }
0x1365   :  { %10568 = vtanh.f32 %v7121_v20  ;;  %v7170_v29 = vpop.permute.xlu0 %7169 }
0x1366   :  { %v7211_v15 = vmul.f32 %v7170_v29, %v13982_v19  ;;  %v8819_v19 = vld [vmem:[%s14440_s0 + $0x10] sm:$0xff] }
0x1367   :  { %7183 = vrot.lane.b32.xlu0 %v10567_v31, %s10624_s3  ;;  %8709 = vmatmul.msk.bf16.gmra.mxu1 %vm7430_vm11, %v8819_v19  ;;  %v8823_v29 = vld [vmem:[%s14440_s0 + $0x30] sm:$0xff] }
0x1368   :  { %v7464_v36 = vpop.f32.mrf.mxu1 }
0x136a   :  { %v7172_v28 = vpop.permute.xlu1 %7171 }
0x136b   :  { %v10569_v44 = vpop.eup %10568  ;;  %v7212_v23 = vmul.f32 %v7172_v28, %v13964_v53  ;;  %v6963_v53 = vmul.f32 %v14147_v37, %v13785_v13 }
0x136c   :  { %7181 = vrot.lane.b32.xlu2 %v10569_v44, %s10624_s3 }
0x136d   :  { %v7248_v38 = vpack.c.bf16 %v7212_v23, %v7211_v15 }
0x136f   :  { %7271 = vrot.lane.b32.xlu1 %v7248_v38, %s10625_s21 }
0x1370   :  { %v7466_v12 = vpop.f32.mrf.mxu1 }
0x1377   :  { %8710 = vmatmul.msk.bf16.gmra.mxu1 %vm7430_vm11, %v8820_v22 }
0x1378   :  { %v7469_v25 = vpop.f32.mrf.mxu1 }
0x1380   :  { %v7471_v28 = vpop.f32.mrf.mxu1 }
0x1387   :  { %8711 = vmatmul.msk.bf16.gmra.mxu1 %vm7430_vm11, %v8821_v9 }
0x1397   :  { %8712 = vmatmul.msk.bf16.gmra.mxu1 %vm7430_vm11, %v8822_v14 }
0x13a2   :  { %v7268_v48 = vpop.permute.xlu2 %7267 }
0x13a3   :  { %8652 = vmatmul.msk.bf16.gmra.mxu3 %vm517_vm0, %v7268_v48 }
0x13a7   :  { %8713 = vmatmul.msk.bf16.gmra.mxu1 %vm7430_vm11, %v8823_v29 }
0x13aa   :  { %v7174_v4 = vpop.permute.xlu2 %7173 }
0x13ab   :  { %v7213_v21 = vmul.f32 %v7174_v4, %v13992_v2 }
0x13b2   :  { %v7178_v40 = vpop.permute.xlu2 %7177 }
0x13b3   :  { %v7215_v32 = vmul.f32 %v7178_v40, %v14051_v63 }
0x13c1   :  { %v7090_v16 = vpop.permute.xlu0 %7089 }
0x13c2   :  { %v7123_v27 = vadd.f32 %v7090_v16, %v6963_v53 }
0x13c4   :  { %10570 = vtanh.f32 %v7123_v27 }
0x13c7   :  { %v7092_v5 = vpop.permute.xlu1 %7091 }
0x13c8   :  { %v7124_v41 = vadd.f32 %v7092_v5, %v6964_v46 }
0x13c9   :  { %v7176_v34 = vpop.permute.xlu0 %7175 }
0x13ca   :  { %v10571_v50 = vpop.eup %10570  ;;  %10572 = vtanh.f32 %v7124_v41  ;;  %v7214_v13 = vmul.f32 %v7176_v34, %v14029_v51  ;;  %v7182_v51 = vpop.permute.xlu2 %7181 }
0x13cb   :  { %7185 = vrot.lane.b32.xlu2 %v10571_v50, %s10624_s3  ;;  %v7217_v47 = vmul.f32 %v7182_v51, %v14100_v39 }
0x13cc   :  { %v7249_v42 = vpack.c.bf16 %v7214_v13, %v7213_v21 }
0x13ce   :  { %7273 = vrot.lane.b32.xlu1 %v7249_v42, %s10625_s21 }
0x13d0   :  { %v10573_v26 = vpop.eup %10572 }
0x13d1   :  { %v7180_v30 = vpop.permute.xlu0 %7179  ;;  %v7270_v58 = vpop.permute.xlu1 %7269  ;;  %7187 = vrot.lane.b32.xlu0 %v10573_v26, %s10624_s3 }
0x13d2   :  { %v7216_v33 = vmul.f32 %v7180_v30, %v14072_v8  ;;  %8653 = vmatmul.msk.bf16.gmra.mxu3 %vm517_vm0, %v7270_v58  ;;  %v8824_v58 = vld [vmem:[%s14440_s0 + $0x38] sm:$0xff] }
0x13d3   :  { %8714 = vmatmul.msk.bf16.gmra.mxu1 %vm7430_vm11, %v8824_v58 }
0x13d4   :  { %v7250_v2 = vpack.c.bf16 %v7216_v33, %v7215_v32 }
0x13d6   :  { %7275 = vrot.lane.b32.xlu1 %v7250_v2, %s10625_s21 }
0x13d9   :  { %v7184_v10 = vpop.permute.xlu0 %7183 }
0x13da   :  { %v7218_v1 = vmul.f32 %v7184_v10, %v14103_v54 }
0x13dc   :  { %v7251_v18 = vpack.c.bf16 %v7218_v1, %v7217_v47 }
0x13de   :  { %7277 = vrot.lane.b32.xlu2 %v7251_v18, %s10625_s21 }
0x13e1   :  { %v7272_v60 = vpop.permute.xlu1 %7271  ;;  %v7326_v63 = vpop.f32.mrf.mxu3 }
0x13e2   :  { %8654 = vmatmul.msk.bf16.gmra.mxu3 %vm517_vm0, %v7272_v60  ;;  %v7465_v8 = vadd.f32 %v7464_v36, %v7326_v63 }
0x13e4   :  { %10574 = vtanh.f32 %v7465_v8  ;;  %v7474_v23 = vpop.f32.mrf.mxu1 }
0x13e9   :  { %v7328_v45 = vpop.f32.mrf.mxu3 }
0x13ea   :  { %v7467_v49 = vadd.f32 %v7466_v12, %v7328_v45  ;;  %v14212_v39 = vpop.eup %10574 }
0x13eb   :  { %v7526_v54 = vmul.f32 %v14212_v39, %v14210_v17 }
0x13ec   :  { %10576 = vtanh.f32 %v7467_v49 }
0x13ed   :  { %v7542_v3 = vsel %vm7430_vm11, %v7526_v54, 0.0 }
0x13f2   :  { %v14216_v11 = vpop.eup %10576 }
0x13f3   :  { %v7527_v43 = vmul.f32 %v14216_v11, %v14210_v17 }
0x13f5   :  { %v7545_v24 = vsel %vm7430_vm11, %v7527_v43, 0.0 }
0x1400   :  { %7543 = vadd.xlane.f32.xlu1 %v7542_v3 }
0x1407   :  { %7546 = vadd.xlane.f32.xlu2 %v7545_v24 }
0x1425   :  { %v7186_v56 = vpop.permute.xlu2 %7185 }
0x1426   :  { %v7331_v62 = vpop.f32.mrf.mxu3  ;;  %v7219_v6 = vmul.f32 %v7186_v56, %v14147_v37  ;;  %v7476_v37 = vpop.f32.mrf.mxu1 }
0x1427   :  { %v7470_v57 = vadd.f32 %v7469_v25, %v7331_v62 }
0x1429   :  { %10578 = vtanh.f32 %v7470_v57 }
0x142e   :  { %v7333_v44 = vpop.f32.mrf.mxu3  ;;  %v7479_v46 = vpop.f32.mrf.mxu1 }
0x142f   :  { %v14226_v52 = vpop.eup %10578  ;;  %v7472_v16 = vadd.f32 %v7471_v28, %v7333_v44 }
0x1430   :  { %v7528_v59 = vmul.f32 %v14226_v52, %v14210_v17 }
0x1432   :  { %v7548_v55 = vsel %vm7430_vm11, %v7528_v59, 0.0 }
0x1433   :  { %7549 = vadd.xlane.f32.xlu1 %v7548_v55 }
0x1436   :  { %v7481_v32 = vpop.f32.mrf.mxu1 }
0x1438   :  { %v7278_v27 = vpop.permute.xlu2 %7277 }
0x143e   :  { %v7484_v33 = vpop.f32.mrf.mxu1 }
0x1440   :  { %v7274_v61 = vpop.permute.xlu1 %7273 }
0x1441   :  { %8655 = vmatmul.msk.bf16.gmra.mxu3 %vm517_vm0, %v7274_v61 }
0x1443   :  { %v7188_v7 = vpop.permute.xlu0 %7187 }
0x1444   :  { %v7220_v20 = vmul.f32 %v7188_v7, %v14155_v0 }
0x1446   :  { %v7252_v31 = vpack.c.bf16 %v7220_v20, %v7219_v6  ;;  %v7486_v10 = vpop.f32.mrf.mxu1 }
0x1448   :  { %7279 = vrot.lane.b32.xlu0 %v7252_v31, %s10625_s21  ;;  %v7276_v15 = vpop.permute.xlu1 %7275 }
0x144e   :  { %v7489_v60 = vpop.f32.mrf.mxu1 }
0x1451   :  { %8656 = vmatmul.msk.bf16.gmra.mxu3 %vm517_vm0, %v7276_v15 }
0x1455   :  { %v7336_v38 = vpop.f32.mrf.mxu3 }
0x1456   :  { %v7475_v35 = vadd.f32 %v7474_v23, %v7336_v38  ;;  %v7491_v43 = vpop.f32.mrf.mxu1 }
0x1458   :  { %10580 = vtanh.f32 %v7475_v35 }
0x145d   :  { %v7338_v0 = vpop.f32.mrf.mxu3 }
0x145e   :  { %v14244_v48 = vpop.eup %10580  ;;  %v7477_v19 = vadd.f32 %v7476_v37, %v7338_v0  ;;  %v7494_v55 = vpop.f32.mrf.mxu1 }
0x145f   :  { %v7530_v53 = vmul.f32 %v14244_v48, %v14210_v17 }
0x1460   :  { %10582 = vtanh.f32 %v7477_v19 }
0x1461   :  { %8657 = vmatmul.msk.bf16.gmra.mxu3 %vm517_vm0, %v7278_v27  ;;  %v7554_v22 = vsel %vm7430_vm11, %v7530_v53, 0.0  ;;  %10584 = vtanh.f32 %v7472_v16 }
0x1462   :  { %7555 = vadd.xlane.f32.xlu2 %v7554_v22 }
0x1465   :  { %v7341_v4 = vpop.f32.mrf.mxu3 }
0x1466   :  { %v14250_v5 = vpop.eup %10582  ;;  %v7480_v34 = vadd.f32 %v7479_v46, %v7341_v4  ;;  %v7496_v20 = vpop.f32.mrf.mxu1 }
0x1467   :  { %v7531_v41 = vmul.f32 %v14250_v5, %v14210_v17  ;;  %v14255_v21 = vpop.eup %10584 }
0x1468   :  { %10586 = vtanh.f32 %v7480_v34  ;;  %v7529_v13 = vmul.f32 %v14255_v21, %v14210_v17 }
0x1469   :  { %v7557_v50 = vsel %vm7430_vm11, %v7531_v41, 0.0 }
0x146a   :  { %7558 = vadd.xlane.f32.xlu1 %v7557_v50  ;;  %v7551_v42 = vsel %vm7430_vm11, %v7529_v13, 0.0 }
0x146d   :  { %v7343_v51 = vpop.f32.mrf.mxu3 }
0x146e   :  { %v14260_v40 = vpop.eup %10586  ;;  %v7482_v15 = vadd.f32 %v7481_v32, %v7343_v51  ;;  %v7499_v27 = vpop.f32.mrf.mxu1  ;;  %v7608_v32 = vlaneseq }
0x146f   :  { %v7532_v26 = vmul.f32 %v14260_v40, %v14210_v17 }
0x1471   :  { %v7560_v30 = vsel %vm7430_vm11, %v7532_v26, 0.0 }
0x1472   :  { %7552 = vadd.xlane.f32.xlu0 %v7551_v42 }
0x1476   :  { %v7501_v34 = vpop.f32.mrf.mxu1 }
0x147a   :  { %7561 = vadd.xlane.f32.xlu0 %v7560_v30  ;;  %v7547_v16 = vpop.xlane.xlu2 %7546 }
0x14ba   :  { %v7280_v2 = vpop.permute.xlu0 %7279 }
0x14bb   :  { %8658 = vmatmul.msk.bf16.gmra.mxu3 %vm517_vm0, %v7280_v2  ;;  %v7544_v2 = vpop.xlane.xlu1 %7543  ;;  %vm7626_vm0 = vcmask 1041409  }
0x14c4   :  { %v7346_v47 = vpop.f32.mrf.mxu3 }
0x14c5   :  { %v7485_v1 = vadd.f32 %v7484_v33, %v7346_v47 }
0x14c7   :  { %10588 = vtanh.f32 %v7485_v1 }
0x14cc   :  { %v7348_v18 = vpop.f32.mrf.mxu3 }
0x14cd   :  { %v14270_v63 = vpop.eup %10588  ;;  %v7487_v36 = vadd.f32 %v7486_v10, %v7348_v18  ;;  %v7609_v10 = vand.u32 127, %v7608_v32 }
0x14ce   :  { %v7534_v8 = vmul.f32 %v14270_v63, %v14210_v17 }
0x14cf   :  { %10590 = vtanh.f32 %v7487_v36 }
0x14d0   :  { %v7566_v45 = vsel %vm7430_vm11, %v7534_v8, 0.0 }
0x14d1   :  { %7567 = vadd.xlane.f32.xlu0 %v7566_v45 }
0x14d4   :  { %v7351_v12 = vpop.f32.mrf.mxu3 }
0x14d5   :  { %v14275_v49 = vpop.eup %10590  ;;  %v7490_v54 = vadd.f32 %v7489_v60, %v7351_v12  ;;  %v7556_v41 = vpop.xlane.xlu2 %7555 }
0x14d6   :  { %v7535_v3 = vmul.f32 %v14275_v49, %v14210_v17  ;;  %v7550_v12 = vpop.xlane.xlu1 %7549 }
0x14d7   :  { %10592 = vtanh.f32 %v7490_v54 }
0x14d8   :  { %v7569_v24 = vsel %vm7430_vm11, %v7535_v3, 0.0 }
0x14d9   :  { %7570 = vadd.xlane.f32.xlu2 %v7569_v24 }
0x14dc   :  { %v7353_v25 = vpop.f32.mrf.mxu3 }
0x14dd   :  { %v14280_v62 = vpop.eup %10592  ;;  %v7492_v9 = vadd.f32 %v7491_v43, %v7353_v25 }
0x14de   :  { %v7536_v57 = vmul.f32 %v14280_v62, %v14210_v17  ;;  %v7559_v43 = vpop.xlane.xlu1 %7558 }
0x14df   :  { %10594 = vtanh.f32 %v7492_v9  ;;  %v7611_v9 = vperm.slane %v7547_v16, %v7609_v10 }
0x14e0   :  { %v7572_v59 = vsel %vm7430_vm11, %v7536_v57, 0.0  ;;  %v7612_v57 = vperm.slane %v7550_v12, %v7609_v10 }
0x14e1   :  { %7573 = vadd.xlane.f32.xlu2 %v7572_v59 }
0x14e4   :  { %v7356_v14 = vpop.f32.mrf.mxu3 }
0x14e5   :  { %v14285_v61 = vpop.eup %10594  ;;  %v7495_v56 = vadd.f32 %v7494_v55, %v7356_v14  ;;  %v7553_v4 = vpop.xlane.xlu0 %7552  ;;  %v7610_v55 = vperm.slane %v7544_v2, %v7609_v10 }
0x14e6   :  { %v7537_v7 = vmul.f32 %v14285_v61, %v14210_v17  ;;  %v7613_v14 = vperm.slane %v7553_v4, %v7609_v10 }
0x14e7   :  { %10596 = vtanh.f32 %v7495_v56 }
0x14e8   :  { %v7575_v6 = vsel %vm7430_vm11, %v7537_v7, 0.0  ;;  %v7627_v7 = vsel %vm7626_vm0, %v7611_v9, %v7610_v55  ;;  %v7706_v9 = vshrl.u32 %v7608_v32, 7 }
0x14e9   :  { %7576 = vadd.xlane.f32.xlu1 %v7575_v6 }
0x14ea   :  { %9545 = vset.pattern.permute.xlu1 %v7706_v9  ;;  %9544 = vset.pattern.permute.xlu0 %v7706_v9 }
0x14eb   :  { %9543 = vset.pattern.permute.xlu2 %v7706_v9 }
0x14ec   :  { %v7358_v31 = vpop.f32.mrf.mxu3 }
0x14ed   :  { %v14290_v29 = vpop.eup %10596  ;;  %v7497_v28 = vadd.f32 %v7496_v20, %v7358_v31  ;;  %v7562_v30 = vpop.xlane.xlu0 %7561  ;;  %v7629_v31 = vsel %vm7628_vm4, %v7612_v57, %v7627_v7 }
0x14ee   :  { %v7538_v44 = vmul.f32 %v14290_v29, %v14210_v17 }
0x14ef   :  { %10598 = vtanh.f32 %v7497_v28 }
0x14f0   :  { %v7578_v23 = vsel %vm7430_vm11, %v7538_v44, 0.0  ;;  %10600 = vtanh.f32 %v7482_v15  ;;  %v7631_v44 = vsel %vm7630_vm5, %v7613_v14, %v7629_v31 }
0x14f1   :  { %7579 = vadd.xlane.f32.xlu0 %v7578_v23  ;;  %v7614_v23 = vperm.slane %v7556_v41, %v7609_v10 }
0x14f5   :  { %v14295_v38 = vpop.eup %10598 }
0x14f6   :  { %v7539_v35 = vmul.f32 %v14295_v38, %v14210_v17  ;;  %v14300_v0 = vpop.eup %10600 }
0x14f7   :  { %v7533_v19 = vmul.f32 %v14300_v0, %v14210_v17 }
0x14f8   :  { %v7581_v37 = vsel %vm7430_vm11, %v7539_v35, 0.0  ;;  %v7633_v35 = vsel %vm7632_vm6, %v7614_v23, %v7631_v44 }
0x14f9   :  { %7582 = vadd.xlane.f32.xlu2 %v7581_v37  ;;  %v7563_v53 = vsel %vm7430_vm11, %v7533_v19, 0.0  ;;  %v7616_v37 = vperm.slane %v7562_v30, %v7609_v10  ;;  %v7520_v19 = vld [vmem:[%s14442_s2] sm:$0xff] }
0x14fa   :  { %vm7590_vm10 = vcmp.gt.f32.partialorder %v7520_v19, 0.0 }
0x1501   :  { %7564 = vadd.xlane.f32.xlu2 %v7563_v53  ;;  %v7615_v53 = vperm.slane %v7559_v43, %v7609_v10 }
0x153e   :  { %v7361_v22 = vpop.f32.mrf.mxu3 }
0x153f   :  { %v7500_v46 = vadd.f32 %v7499_v27, %v7361_v22  ;;  %v7635_v27 = vsel %vm7634_vm7, %v7615_v53, %v7633_v35 }
0x1540   :  { %v7637_v4 = vsel %vm7636_vm8, %v7616_v37, %v7635_v27 }
0x1541   :  { %10602 = vtanh.f32 %v7500_v46 }
0x1544   :  { %v7568_v1 = vpop.xlane.xlu0 %7567 }
0x1545   :  { %v7618_v36 = vperm.slane %v7568_v1, %v7609_v10 }
0x1546   :  { %v7363_v50 = vpop.f32.mrf.mxu3 }
0x1547   :  { %v14305_v13 = vpop.eup %10602  ;;  %v7502_v42 = vadd.f32 %v7501_v34, %v7363_v50 }
0x1548   :  { %v7540_v26 = vmul.f32 %v14305_v13, %v14210_v17 }
0x1549   :  { %10604 = vtanh.f32 %v7502_v42 }
0x154a   :  { %v7584_v58 = vsel %vm7430_vm11, %v7540_v26, 0.0  ;;  %v7521_v26 = vld [vmem:[%s14442_s2 + $0x8] sm:$0xff] }
0x154b   :  { %7585 = vadd.xlane.f32.xlu1 %v7584_v58  ;;  %vm7591_vm13 = vcmp.gt.f32.partialorder %v7521_v26, 0.0 }
0x154c   :  { %v7571_v33 = vpop.xlane.xlu2 %7570 }
0x154d   :  { %v7619_v18 = vperm.slane %v7571_v33, %v7609_v10 }
0x154f   :  { %v14310_v51 = vpop.eup %10604  ;;  %v7640_v54 = vsel %vm7626_vm0, %v7619_v18, %v7618_v36 }
0x1550   :  { %v7541_v47 = vmul.f32 %v14310_v51, %v14210_v17 }
0x1552   :  { %v7587_v60 = vsel %vm7430_vm11, %v7541_v47, 0.0 }
0x1553   :  { %7588 = vadd.xlane.f32.xlu0 %v7587_v60 }
0x1554   :  { %v7574_v8 = vpop.xlane.xlu2 %7573 }
0x1555   :  { %v7620_v45 = vperm.slane %v7574_v8, %v7609_v10 }
0x1557   :  { %v7641_v3 = vsel %vm7628_vm4, %v7620_v45, %v7640_v54 }
0x155c   :  { %v7577_v24 = vpop.xlane.xlu1 %7576 }
0x155d   :  { %v7621_v17 = vperm.slane %v7577_v24, %v7609_v10 }
0x155f   :  { %v7642_v6 = vsel %vm7630_vm5, %v7621_v17, %v7641_v3 }
0x1564   :  { %v7580_v25 = vpop.xlane.xlu0 %7579 }
0x1565   :  { %v7622_v59 = vperm.slane %v7580_v25, %v7609_v10 }
0x1567   :  { %v7643_v28 = vsel %vm7632_vm6, %v7622_v59, %v7642_v6 }
0x156c   :  { %v7583_v56 = vpop.xlane.xlu2 %7582 }
0x156d   :  { %v7623_v20 = vperm.slane %v7583_v56, %v7609_v10 }
0x156f   :  { %v7644_v15 = vsel %vm7634_vm7, %v7623_v20, %v7643_v28 }
0x1574   :  { %v7565_v16 = vpop.xlane.xlu2 %7564 }
0x1575   :  { %v7617_v22 = vperm.slane %v7565_v16, %v7609_v10 }
0x1577   :  { %v7639_v46 = vsel %vm7638_vm9, %v7617_v22, %v7637_v4 }
0x1578   :  { %v7649_v41 = vsel %vm7590_vm10, %v7639_v46, -1e+30 }
0x1579   :  { %v7652_v34 = vsel %vm7651_vm12, %v7649_v41, -inf }
0x157a   :  { %7653 = vmax.xlane.f32.xlu1 %v7652_v34 }
0x15be   :  { %v7586_v50 = vpop.xlane.xlu1 %7585 }
0x15bf   :  { %v7624_v42 = vperm.slane %v7586_v50, %v7609_v10 }
0x15c1   :  { %v7645_v33 = vsel %vm7636_vm8, %v7624_v42, %v7644_v15 }
0x15c6   :  { %v7589_v30 = vpop.xlane.xlu0 %7588 }
0x15c7   :  { %v7625_v58 = vperm.slane %v7589_v30, %v7609_v10 }
0x15c9   :  { %v7646_v2 = vsel %vm7638_vm9, %v7625_v58, %v7645_v33 }
0x15ca   :  { %v7650_v47 = vsel %vm7591_vm13, %v7646_v2, -1e+30 }
0x15cb   :  { %v7655_v1 = vsel %vm7651_vm12, %v7650_v47, -inf }
0x15cc   :  { %7656 = vmax.xlane.f32.xlu2 %v7655_v1 }
0x15ed   :  { %v7654_v18 = vpop.xlane.xlu1 %7653 }
0x15ee   :  { %v7658_v60 = vsub.f32 %v7649_v41, %v7654_v18 }
0x15f0   :  { %v7660_v36 = vmul.f32 1.442695, %v7658_v60  ;;  %v8834_v60 = vld [vmem:[%s14443_s9 + $0x18] sm:$0xff] }
0x15f1   :  { %8050 = vmatpush.bf16.msra.mxu2 %v8834_v60 }
0x15f2   :  { %10606 = vpow2.f32 %v7660_v36 }
0x15f8   :  { %v10607_v8 = vpop.eup %10606 }
0x15f9   :  { %v7664_v45 = vmul.f32 %v10607_v8, %v7520_v19 }
0x15fb   :  { %v7666_v12 = vsel %vm7651_vm12, %v7664_v45, 0.0 }
0x15fc   :  { %7667 = vadd.xlane.f32.xlu0 %v7666_v12 }
0x163f   :  { %v7657_v54 = vpop.xlane.xlu2 %7656 }
0x1640   :  { %v7659_v10 = vsub.f32 %v7650_v47, %v7657_v54 }
0x1642   :  { %v7662_v3 = vmul.f32 1.442695, %v7659_v10 }
0x1644   :  { %10608 = vpow2.f32 %v7662_v3  ;;  %v8833_v3 = vld [vmem:[%s14443_s9 + $0x10] sm:$0xff] }
0x1645   :  { %8051 = vmatpush.bf16.msra.mxu2 %v8833_v3 }
0x164a   :  { %v10609_v43 = vpop.eup %10608 }
0x164b   :  { %v7665_v24 = vmul.f32 %v10609_v43, %v7521_v26  ;;  %v8832_v43 = vld [vmem:[%s14443_s9 + $0x8] sm:$0xff] }
0x164c   :  { %8052 = vmatpush.bf16.msra.mxu2 %v8832_v43 }
0x164d   :  { %v7669_v25 = vsel %vm7651_vm12, %v7665_v24, 0.0 }
0x164e   :  { %7670 = vadd.xlane.f32.xlu1 %v7669_v25 }
0x166f   :  { %v7668_v17 = vpop.xlane.xlu0 %7667 }
0x1670   :  { %v7672_v57 = vmax.f32 %v7668_v17, 1e-09 }
0x1672   :  { %10610 = vrcp.f32 %v7672_v57  ;;  %v7685_v56 = vand.u32 2147483648, %v7672_v57  ;;  %v7683_v6 = vand.u32 2147483647, %v7672_v57  ;;  %vm7679_vm15 = vweird.f32 %v7672_v57 }
0x1674   :  { %v7686_v31 = vor.u32 1.1754944e-38, %v7685_v56  ;;  %vm7684_vm2 = vcmp.eq.f32.partialorder %v7683_v6, 8.507059e+37 }
0x1678   :  { %v10611_v59 = vpop.eup %10610 }
0x1679   :  { %v7675_v55 = vmul.f32 %v10611_v59, %v7672_v57  ;;  %vm7680_vm14 = vweird.f32 %v10611_v59 }
0x167a   :  { %vm7681_vm1 = vmor %vm7679_vm15, %vm7680_vm14 }
0x167b   :  { %v7676_v14 = vsub.f32 1.0, %v7675_v55 }
0x167d   :  { %v7677_v7 = vmul.f32 %v10611_v59, %v7676_v14 }
0x167f   :  { %v7678_v20 = vadd.f32 %v10611_v59, %v7677_v7 }
0x1681   :  { %v7682_v28 = vsel %vm7681_vm1, %v10611_v59, %v7678_v20 }
0x1682   :  { %v7687_v32 = vsel %vm7684_vm2, %v7686_v31, %v7682_v28 }
0x1683   :  { %v7688_v44 = vmul.f32 %v7687_v32, %v7664_v45 }
0x1685   :  { %v7718_v15 = vperm.slane %v7688_v44, 2  ;;  %v7711_v23 = vperm.slane %v7688_v44, 1  ;;  %v7704_v35 = vperm.slane %v7688_v44, 0  ;;  %v7725_v37 = vperm.slane %v7688_v44, 3 }
0x1686   :  { %v7732_v19 = vperm.slane %v7688_v44, 4  ;;  %v7739_v53 = vperm.slane %v7688_v44, 5  ;;  %v7746_v16 = vperm.slane %v7688_v44, 6  ;;  %v7753_v36 = vperm.slane %v7688_v44, 7 }
0x1687   :  { %7723 = vperm.xlu1 %9545, %v7718_v15   ;;  %7716 = vperm.xlu0 %9544, %v7711_v23  }
0x1688   :  { %7709 = vperm.xlu2 %9543, %v7704_v35  }
0x168f   :  { %7730 = vperm.xlu1 %9545, %v7725_v37   ;;  %7737 = vperm.xlu0 %9544, %v7732_v19  }
0x1690   :  { %7744 = vperm.xlu2 %9543, %v7739_v53  }
0x1697   :  { %7751 = vperm.xlu1 %9545, %v7746_v16  }
0x16c1   :  { %v7671_v27 = vpop.xlane.xlu1 %7670 }
0x16c2   :  { %v7673_v22 = vmax.f32 %v7671_v27, 1e-09  ;;  %v8831_v27 = vld [vmem:[%s14443_s9] sm:$0xff] }
0x16c3   :  { %8053 = vmatpush.bf16.msra.mxu2 %v8831_v27 }
0x16c4   :  { %10612 = vrcp.f32 %v7673_v22  ;;  %v7700_v34 = vand.u32 2147483648, %v7673_v22  ;;  %v7698_v42 = vand.u32 2147483647, %v7673_v22  ;;  %vm7694_vm10 = vweird.f32 %v7673_v22 }
0x16c6   :  { %v7701_v30 = vor.u32 1.1754944e-38, %v7700_v34  ;;  %vm7699_vm13 = vcmp.eq.f32.partialorder %v7698_v42, 8.507059e+37 }
0x16ca   :  { %v10613_v4 = vpop.eup %10612 }
0x16cb   :  { %v7690_v46 = vmul.f32 %v10613_v4, %v7673_v22  ;;  %vm7695_vm3 = vweird.f32 %v10613_v4 }
0x16cc   :  { %vm7696_vm12 = vmor %vm7694_vm10, %vm7695_vm3 }
0x16cd   :  { %v7691_v41 = vsub.f32 1.0, %v7690_v46 }
0x16cf   :  { %v7692_v50 = vmul.f32 %v10613_v4, %v7691_v41 }
0x16d1   :  { %v7693_v26 = vadd.f32 %v10613_v4, %v7692_v50 }
0x16d3   :  { %v7697_v58 = vsel %vm7696_vm12, %v10613_v4, %v7693_v26 }
0x16d4   :  { %v7702_v33 = vsel %vm7699_vm13, %v7701_v30, %v7697_v58 }
0x16d5   :  { %v7703_v2 = vmul.f32 %v7702_v33, %v7665_v24 }
0x16d7   :  { %v7795_v47 = vperm.slane %v7703_v2, 5  ;;  %v7767_v1 = vperm.slane %v7703_v2, 1  ;;  %v7760_v18 = vperm.slane %v7703_v2, 0  ;;  %v7774_v8 = vperm.slane %v7703_v2, 2 }
0x16d8   :  { %v7788_v45 = vperm.slane %v7703_v2, 4  ;;  %v7781_v12 = vperm.slane %v7703_v2, 3  ;;  %v7809_v54 = vperm.slane %v7703_v2, 7  ;;  %v7802_v10 = vperm.slane %v7703_v2, 6 }
0x16d9   :  { %7800 = vperm.xlu0 %9544, %v7795_v47   ;;  %7772 = vperm.xlu2 %9543, %v7767_v1  }
0x16da   :  { %7765 = vperm.xlu1 %9545, %v7760_v18  }
0x16e1   :  { %7758 = vperm.xlu0 %9544, %v7753_v36   ;;  %7779 = vperm.xlu2 %9543, %v7774_v8  }
0x16e2   :  { %7793 = vperm.xlu1 %9545, %v7788_v45   ;;  %v7710_v24 = vpop.permute.xlu2 %7709 }
0x16e3   :  { %v7816_v9 = vmul.f32 %v14212_v39, %v7710_v24 }
0x16e5   :  { %v7832_v17 = vsel %vm7430_vm11, %v7816_v9, 0.0 }
0x16e6   :  { %v7833_v59 = vrot.slane %v7832_v17, 4 }
0x16e8   :  { %v7834_v56 = vadd.f32 %v7833_v59, %v7832_v17 }
0x16e9   :  { %7786 = vperm.xlu2 %9543, %v7781_v12  }
0x16ea   :  { %7814 = vperm.xlu1 %9545, %v7809_v54   ;;  %v7745_v25 = vpop.permute.xlu2 %7744  ;;  %v7835_v28 = vrot.slane %v7834_v56, 2 }
0x16eb   :  { %v7821_v20 = vmul.f32 %v14250_v5, %v7745_v25 }
0x16ec   :  { %v7836_v37 = vadd.f32 %v7835_v28, %v7834_v56 }
0x16ed   :  { %v7867_v23 = vsel %vm7430_vm11, %v7821_v20, 0.0 }
0x16ee   :  { %v7868_v5 = vrot.slane %v7867_v23, 4  ;;  %v7837_v4 = vrot.slane %v7836_v37, 1 }
0x16f0   :  { %v7869_v26 = vadd.f32 %v7868_v5, %v7867_v23 }
0x16f1   :  { %7807 = vperm.xlu2 %9543, %v7802_v10  }
0x16f2   :  { %v7870_v36 = vrot.slane %v7869_v26, 2 }
0x16f9   :  { %v7724_v57 = vpop.permute.xlu1 %7723  ;;  %v7717_v14 = vpop.permute.xlu0 %7716 }
0x16fa   :  { %v7817_v7 = vmul.f32 %v14216_v11, %v7717_v14  ;;  %v7818_v6 = vmul.f32 %v14226_v52, %v7724_v57 }
0x16fc   :  { %v7839_v32 = vsel %vm7430_vm11, %v7817_v7, 0.0  ;;  %v7846_v39 = vsel %vm7430_vm11, %v7818_v6, 0.0 }
0x16fd   :  { %v7840_v35 = vrot.slane %v7839_v32, 4  ;;  %v7847_v19 = vrot.slane %v7846_v39, 4 }
0x16ff   :  { %v7841_v22 = vadd.f32 %v7840_v35, %v7839_v32  ;;  %v7848_v46 = vadd.f32 %v7847_v19, %v7846_v39 }
0x1701   :  { %v7731_v31 = vpop.permute.xlu1 %7730  ;;  %v7738_v53 = vpop.permute.xlu0 %7737  ;;  %v7842_v30 = vrot.slane %v7841_v22, 2  ;;  %v7849_v47 = vrot.slane %v7848_v46, 2 }
0x1702   :  { %v7819_v11 = vmul.f32 %v14255_v21, %v7731_v31 }
0x1703   :  { %v7843_v12 = vadd.f32 %v7842_v30, %v7841_v22  ;;  %v8837_v30 = vld [vmem:[%s14445_s11 + $0x10] sm:$0xff] }
0x1704   :  { %v7853_v41 = vsel %vm7430_vm11, %v7819_v11, 0.0 }
0x1705   :  { %v7854_v33 = vrot.slane %v7853_v41, 4  ;;  %v7844_v7 = vrot.slane %v7843_v12, 1 }
0x1707   :  { %v7855_v54 = vadd.f32 %v7854_v33, %v7853_v41  ;;  %v7845_v5 = vadd.f32 %v7844_v7, %v7843_v12 }
0x1709   :  { %v7752_v50 = vpop.permute.xlu1 %7751  ;;  %v7856_v6 = vrot.slane %v7855_v54, 2 }
0x170a   :  { %v7822_v18 = vmul.f32 %v14260_v40, %v7752_v50  ;;  %v14375_v40 = vadd.f32 %v7870_v36, %v7869_v26 }
0x170c   :  { %v7874_v25 = vsel %vm7430_vm11, %v7822_v18, 0.0 }
0x170d   :  { %v7875_v28 = vrot.slane %v7874_v25, 4 }
0x1733   :  { %v7773_v55 = vpop.permute.xlu2 %7772 }
0x1734   :  { %v7825_v15 = vmul.f32 %v14275_v49, %v7773_v55  ;;  %v7820_v49 = vmul.f32 %v14244_v48, %v7738_v53  ;;  %v7838_v48 = vadd.f32 %v7837_v4, %v7836_v37 }
0x1736   :  { %v7895_v16 = vsel %vm7430_vm11, %v7825_v15, 0.0  ;;  %v7860_v58 = vsel %vm7430_vm11, %v7820_v49, 0.0  ;;  %v7944_v10 = vpack.c.bf16 %v7838_v48, %v7838_v48  ;;  %v8838_v49 = vld [vmem:[%s14445_s11 + $0x18] sm:$0xff] }
0x1737   :  { %v7896_v21 = vrot.slane %v7895_v16, 4  ;;  %v7861_v8 = vrot.slane %v7860_v58, 4  ;;  %8106 = vmatpush.bf16.msra.mxu3 %v8838_v49 }
0x1738   :  { %v14381_v19 = vunpack.c.l.b16 %v7944_v10 }
0x1739   :  { %v7897_v60 = vadd.f32 %v7896_v21, %v7895_v16  ;;  %v7862_v55 = vadd.f32 %v7861_v8, %v7860_v58  ;;  %v7876_v16 = vadd.f32 %v7875_v28, %v7874_v25 }
0x173b   :  { %v7780_v44 = vpop.permute.xlu2 %7779  ;;  %v7898_v9 = vrot.slane %v7897_v60, 2  ;;  %v7863_v23 = vrot.slane %v7862_v55, 2  ;;  %8107 = vmatpush.bf16.msra.mxu3 %v8837_v30 }
0x173c   :  { %v7826_v52 = vmul.f32 %v14280_v62, %v7780_v44 }
0x173d   :  { %v7864_v21 = vadd.f32 %v7863_v23, %v7862_v55 }
0x173e   :  { %v7902_v62 = vsel %vm7430_vm11, %v7826_v52, 0.0  ;;  %v7872_v52 = vrot.slane %v14375_v40, 1 }
0x173f   :  { %v7903_v1 = vrot.slane %v7902_v62, 4 }
0x1741   :  { %v7904_v3 = vadd.f32 %v7903_v1, %v7902_v62 }
0x1743   :  { %v7787_v34 = vpop.permute.xlu2 %7786  ;;  %v7905_v32 = vrot.slane %v7904_v3, 2 }
0x1744   :  { %v7827_v42 = vmul.f32 %v14285_v61, %v7787_v34  ;;  %v7850_v61 = vadd.f32 %v7849_v47, %v7848_v46  ;;  %v7877_v47 = vrot.slane %v7876_v16, 2 }
0x1745   :  { %v7906_v27 = vadd.f32 %v7905_v32, %v7904_v3  ;;  %v7865_v3 = vrot.slane %v7864_v21, 1 }
0x1746   :  { %v7909_v2 = vsel %vm7430_vm11, %v7827_v42, 0.0  ;;  %v7851_v39 = vrot.slane %v7850_v61, 1 }
0x1747   :  { %v7910_v45 = vrot.slane %v7909_v2, 4  ;;  %v7907_v1 = vrot.slane %v7906_v27, 1 }
0x1748   :  { %v7852_v4 = vadd.f32 %v7851_v39, %v7850_v61  ;;  %v8836_v61 = vld [vmem:[%s14445_s11 + $0x8] sm:$0xff] }
0x1749   :  { %v7911_v14 = vadd.f32 %v7910_v45, %v7909_v2  ;;  %8108 = vmatpush.bf16.msra.mxu3 %v8836_v61 }
0x174b   :  { %v7801_v43 = vpop.permute.xlu0 %7800  ;;  %v7808_v24 = vpop.permute.xlu2 %7807  ;;  %v7912_v35 = vrot.slane %v7911_v14, 2 }
0x174c   :  { %v7829_v17 = vmul.f32 %v14295_v38, %v7801_v43  ;;  %v7830_v57 = vmul.f32 %v14305_v13, %v7808_v24  ;;  %v7766_v59 = vpop.permute.xlu1 %7765  ;;  %v7899_v13 = vadd.f32 %v7898_v9, %v7897_v60  ;;  %v7945_v60 = vpack.c.bf16 %v7845_v5, %v7845_v5 }
0x174d   :  { %v7824_v56 = vmul.f32 %v14270_v63, %v7766_v59  ;;  %v7857_v63 = vadd.f32 %v7856_v6, %v7855_v54  ;;  %v7913_v62 = vadd.f32 %v7912_v35, %v7911_v14 }
0x174e   :  { %v7923_v20 = vsel %vm7430_vm11, %v7829_v17, 0.0  ;;  %v7930_v31 = vsel %vm7430_vm11, %v7830_v57, 0.0  ;;  %v7900_v46 = vrot.slane %v7899_v13, 1  ;;  %v7878_v17 = vadd.f32 %v7877_v47, %v7876_v16 }
0x174f   :  { %v7924_v44 = vrot.slane %v7923_v20, 4  ;;  %v7888_v38 = vsel %vm7430_vm11, %v7824_v56, 0.0  ;;  %v7931_v37 = vrot.slane %v7930_v31, 4  ;;  %v7858_v58 = vrot.slane %v7857_v63, 1 }
0x1750   :  { %v7889_v15 = vrot.slane %v7888_v38, 4  ;;  %v7901_v36 = vadd.f32 %v7900_v46, %v7899_v13  ;;  %v7914_v12 = vrot.slane %v7913_v62, 1  ;;  %v7908_v57 = vadd.f32 %v7907_v1, %v7906_v27 }
0x1751   :  { %v7925_v53 = vadd.f32 %v7924_v44, %v7923_v20  ;;  %v7932_v42 = vadd.f32 %v7931_v37, %v7930_v31  ;;  %v7859_v9 = vadd.f32 %v7858_v58, %v7857_v63  ;;  %v7989_v55 = vunpack.c.l.b16 %v7945_v60  ;;  %v8835_v44 = vld [vmem:[%s14445_s11] sm:$0xff] }
0x1752   :  { %v7890_v11 = vadd.f32 %v7889_v15, %v7888_v38  ;;  %v7953_v14 = vpack.c.bf16 %v7901_v36, %v7901_v36  ;;  %v7915_v20 = vadd.f32 %v7914_v12, %v7913_v62  ;;  %v7866_v38 = vadd.f32 %v7865_v3, %v7864_v21  ;;  %8109 = vmatpush.bf16.msra.mxu3 %v8835_v44 }
0x1753   :  { %v7759_v22 = vpop.permute.xlu0 %7758  ;;  %v7926_v33 = vrot.slane %v7925_v53, 2  ;;  %v7933_v54 = vrot.slane %v7932_v42, 2  ;;  %v7947_v23 = vpack.c.bf16 %v7859_v9, %v7859_v9  ;;  %v7879_v35 = vrot.slane %v7878_v17, 1 }
0x1754   :  { %v7891_v41 = vrot.slane %v7890_v11, 2  ;;  %v7823_v34 = vmul.f32 %v14300_v0, %v7759_v22  ;;  %v7794_v50 = vpop.permute.xlu1 %7793  ;;  %v7954_v37 = vpack.c.bf16 %v7908_v57, %v7908_v57  ;;  %v7955_v22 = vpack.c.bf16 %v7915_v20, %v7915_v20 }
0x1755   :  { %v7828_v26 = vmul.f32 %v14290_v29, %v7794_v50  ;;  %v7946_v29 = vpack.c.bf16 %v7852_v4, %v7852_v4  ;;  %v7927_v43 = vadd.f32 %v7926_v33, %v7925_v53  ;;  %v7934_v31 = vadd.f32 %v7933_v54, %v7932_v42 }
0x1756   :  { %v7892_v2 = vadd.f32 %v7891_v41, %v7890_v11  ;;  %v7881_v48 = vsel %vm7430_vm11, %v7823_v34, 0.0  ;;  %v7997_v53 = vunpack.c.l.b16 %v7953_v14  ;;  %v8004_v50 = vsel %vm7626_vm0, %v7989_v55, %v14381_v19 }
0x1757   :  { %v7882_v18 = vrot.slane %v7881_v48, 4  ;;  %v7916_v0 = vsel %vm7430_vm11, %v7828_v26, 0.0  ;;  %v7928_v39 = vrot.slane %v7927_v43, 1  ;;  %v7990_v27 = vunpack.c.l.b16 %v7946_v29 }
0x1758   :  { %v7893_v8 = vrot.slane %v7892_v2, 1  ;;  %v7917_v45 = vrot.slane %v7916_v0, 4  ;;  %v7935_v49 = vrot.slane %v7934_v31, 1  ;;  %v7948_v21 = vpack.c.bf16 %v7866_v38, %v7866_v38 }
0x1759   :  { %v7883_v10 = vadd.f32 %v7882_v18, %v7881_v48  ;;  %v7929_v4 = vadd.f32 %v7928_v39, %v7927_v43  ;;  %v7880_v62 = vadd.f32 %v7879_v35, %v7878_v17  ;;  %v7998_v42 = vunpack.c.l.b16 %v7954_v37 }
0x175a   :  { %v7894_v24 = vadd.f32 %v7893_v8, %v7892_v2  ;;  %v7918_v25 = vadd.f32 %v7917_v45, %v7916_v0  ;;  %v7991_v26 = vunpack.c.l.b16 %v7947_v23  ;;  %v7999_v2 = vunpack.c.l.b16 %v7955_v22  ;;  %v9549_v23 = vld [vmem:[%s14446_s12] ss:$0 sm:$0xff] }
0x175b   :  { %v7884_v59 = vrot.slane %v7883_v10, 2  ;;  %v7957_v48 = vpack.c.bf16 %v7929_v4, %v7929_v4  ;;  %v8005_v0 = vsel %vm7628_vm4, %v7990_v27, %v8004_v50  ;;  %v7992_v60 = vunpack.c.l.b16 %v7948_v21 }
0x175c   :  { %v7952_v56 = vpack.c.bf16 %v7894_v24, %v7894_v24  ;;  %v7919_v7 = vrot.slane %v7918_v25, 2  ;;  %v7815_v6 = vpop.permute.xlu1 %7814  ;;  %v7950_v36 = vpack.c.bf16 %v7880_v62, %v7880_v62  ;;  %v8006_v19 = vsel %vm7630_vm5, %v7991_v26, %v8005_v0 }
0x175d   :  { %v7885_v28 = vadd.f32 %v7884_v59, %v7883_v10  ;;  %v7831_v32 = vmul.f32 %v14310_v51, %v7815_v6  ;;  %v7873_v51 = vadd.f32 %v7872_v52, %v14375_v40  ;;  %v7936_v40 = vadd.f32 %v7935_v49, %v7934_v31 }
0x175e   :  { %v7996_v13 = vunpack.c.l.b16 %v7952_v56  ;;  %v7920_v15 = vadd.f32 %v7919_v7, %v7918_v25  ;;  %v8001_v10 = vunpack.c.l.b16 %v7957_v48  ;;  %v8007_v3 = vsel %vm7632_vm6, %v7992_v60, %v8006_v19 }
0x175f   :  { %v7937_v63 = vsel %vm7430_vm11, %v7831_v32, 0.0  ;;  %v7886_v11 = vrot.slane %v7885_v28, 1  ;;  %v7949_v18 = vpack.c.bf16 %v7873_v51, %v7873_v51  ;;  %v7958_v12 = vpack.c.bf16 %v7936_v40, %v7936_v40 }
0x1760   :  { %v7921_v5 = vrot.slane %v7920_v15, 1  ;;  %v7938_v16 = vrot.slane %v7937_v63, 4  ;;  %v8011_v46 = vsel %vm7626_vm0, %v7997_v53, %v7996_v13  ;;  %v7994_v43 = vunpack.c.l.b16 %v7950_v36 }
0x1761   :  { %v7887_v30 = vadd.f32 %v7886_v11, %v7885_v28  ;;  %v8012_v52 = vsel %vm7628_vm4, %v7998_v42, %v8011_v46  ;;  %v7993_v24 = vunpack.c.l.b16 %v7949_v18  ;;  %v8002_v57 = vunpack.c.l.b16 %v7958_v12  ;;  %v9548_v28 = vld [vmem:[%s14444_s10] ss:$0 sm:$0xff] }
0x1762   :  { %v7922_v41 = vadd.f32 %v7921_v5, %v7920_v15  ;;  %v7939_v34 = vadd.f32 %v7938_v16, %v7937_v63  ;;  %v8013_v45 = vsel %vm7630_vm5, %v7999_v2, %v8012_v52  ;;  %vm8116_vm0 = vcmask 15360  }
0x1763   :  { %v7951_v8 = vpack.c.bf16 %v7887_v30, %v7887_v30  ;;  %v8008_v59 = vsel %vm7634_vm7, %v7993_v24, %v8007_v3 }
0x1764   :  { %v7956_v58 = vpack.c.bf16 %v7922_v41, %v7922_v41  ;;  %v7940_v33 = vrot.slane %v7939_v34, 2  ;;  %v8009_v14 = vsel %vm7636_vm8, %v7994_v43, %v8008_v59 }
0x1765   :  { %v7995_v25 = vunpack.c.l.b16 %v7951_v8 }
0x1766   :  { %v8000_v47 = vunpack.c.l.b16 %v7956_v58  ;;  %v7941_v1 = vadd.f32 %v7940_v33, %v7939_v34 }
0x1767   :  { %v8010_v7 = vsel %vm7638_vm9, %v7995_v25, %v8009_v14 }
0x1768   :  { %v7942_v29 = vrot.slane %v7941_v1, 1  ;;  %v8014_v54 = vsel %vm7632_vm6, %v8000_v47, %v8013_v45 }
0x1769   :  { %v8015_v9 = vsel %vm7634_vm7, %v8001_v10, %v8014_v54 }
0x176a   :  { %v7943_v61 = vadd.f32 %v7942_v29, %v7941_v1  ;;  %v8016_v56 = vsel %vm7636_vm8, %v8002_v57, %v8015_v9 }
0x176c   :  { %v7959_v17 = vpack.c.bf16 %v7943_v61, %v7943_v61 }
0x176e   :  { %v8003_v55 = vunpack.c.l.b16 %v7959_v17 }
0x1770   :  { %v8017_v6 = vsel %vm7638_vm9, %v8003_v55, %v8016_v56 }
0x1771   :  { %v8018_v20 = vpack.c.b16 %v8017_v6, %v8010_v7 }
0x1773   :  { %8731 = vmatmul.msk.bf16.vlgmr.msra.gmra.mxu2 %vm7430_vm11, %v8018_v20 }
0x17f6   :  { %v8055_v31 = vpop.f32.mrf.mxu2 }
0x17f7   :  { %v8056_v32 = vadd.f32 %v9548_v28, %v8055_v31 }
0x17f9   :  { %v8060_v39 = vmax.f32 %v8056_v32, 0.0 }
0x17fe   :  { %v8057_v44 = vpop.f32.mrf.mxu2 }
0x17ff   :  { %v8058_v38 = vadd.f32 %v9548_v28, %v8057_v44 }
0x1801   :  { %v8061_v13 = vmax.f32 %v8058_v38, 0.0 }
0x1803   :  { %v8062_v15 = vpack.c.bf16 %v8061_v13, %v8060_v39 }
0x1805   :  { %8748 = vmatmul.msk.bf16.vlgmr.msra.gmra.mxu3 %vm7430_vm11, %v8062_v15 }
0x1888   :  { %v8111_v35 = vpop.f32.mrf.mxu3 }
0x1889   :  { %v8112_v37 = vadd.f32 %v9549_v23, %v8111_v35 }
0x188b   :  { %8117 = vst.msk [vmem:[%s14447_s13] sm:$0xff] %vm8116_vm0, %v8112_v37 }
0x1890   :  { %v8113_v63 = vpop.f32.mrf.mxu3 }
0x1891   :  { %v8114_v53 = vadd.f32 %v9549_v23, %v8113_v63 }
0x1893   :  { %8118 = vst.msk [vmem:[%s14447_s13 + $0x8] sm:$0xff] %vm8116_vm0, %v8114_v53 }

</bundles_post_ra>
